<compile_context>
chip_gen: v5e
topology: v5e:2x2
jax: 0.10.0
libtpu: 0.0.40
codegen_flags: <defaults>
</compile_context>

<pallas_src>
import math

import jax
import jax.numpy as jnp
from jax.experimental import pallas as pl
from jax.experimental.pallas import tpu as pltpu

N_WIN = 430
WIN_IN = 25
WIN_OUT = 4
FEAT = N_WIN * WIN_OUT        # 1720
K_IN = N_WIN * WIN_IN         # 10750  (flat X feature width)
K_PAD = 10752                 # 84 * 128
N_OUT = 2
N_PAD = 128                   # lane-dense output slab
BN_EPS = 1e-5


def _round_up(x, m):
    return (x + m - 1) // m * m


# ----------------------------------------------------------------------------
# Kernel: one MXU matmul per batch tile.
# ----------------------------------------------------------------------------
def winbinvec_kernel(x_ref, w_ref, b_ref, out_ref):
    out_ref[...] = (
        jnp.dot(x_ref[...], w_ref[...], preferred_element_type=jnp.float32)
        + b_ref[...])


# ----------------------------------------------------------------------------
# Wrapper-side weight algebra (one-time, plain JAX at HIGHEST precision).
# ----------------------------------------------------------------------------
def _fold_bn(w, b, bn):
    """Fold eval-mode BatchNorm (gamma, beta, mean, var) into Linear (w, b)."""
    gamma, beta, mean, var = bn
    s = gamma * jax.lax.rsqrt(var + BN_EPS)
    return w * s[:, None], (b - mean) * s + beta


def _prepare_params(p):
    """Compose the whole affine eval-mode graph into (W_eff, b_eff)."""
    hp = jax.lax.Precision.HIGHEST
    mm = lambda a, b: jnp.dot(a, b, precision=hp)

    def rm(w, b):
        # PyTorch Linear (out,in) -> right-multiplication form A (in,out), c.
        return w.T, b

    A3, c3 = rm(*_fold_bn(p["w3"], p["b3"], p["bn3"]))
    A4, c4 = rm(*_fold_bn(p["w4"], p["b4"], p["bn4"]))
    A5, c5 = rm(*_fold_bn(p["w5"], p["b5"], p["bn5"]))
    A6, c6 = rm(p["w6"], p["b6"])
    A7, c7 = rm(p["w7"], p["b7"])
    A8, c8 = rm(p["w8"], p["b8"])

    # fc3..fc8 composed right-to-left (every intermediate stays tiny).
    M = mm(A3, mm(A4, mm(A5, mm(A6, mm(A7, A8)))))                    # (1720, 2)
    c = (mm(mm(mm(mm(mm(c3, A4) + c4, A5) + c5, A6) + c6, A7) + c7, A8)
         + c8)                                                        # (2,)

    # Fold the 430x Linear(25,4) window stage (block-diagonal) into M.
    Mr = M.reshape(N_WIN, WIN_OUT, N_OUT)                             # [i, o, j]
    w_eff = jnp.einsum("iod,ioj->idj", p["ww"], Mr, precision=hp)
    w_eff = w_eff.reshape(K_IN, N_OUT)                                # (10750, 2)
    b_eff = jnp.einsum("io,ioj->j", p["bw"], Mr, precision=hp) + c    # (2,)

    w_pad = jnp.pad(w_eff, ((0, K_PAD - K_IN), (0, N_PAD - N_OUT)))
    b_pad = jnp.pad(b_eff, (0, N_PAD - N_OUT)).reshape(1, N_PAD)
    return w_pad.astype(jnp.bfloat16), b_pad.astype(jnp.float32)


# ----------------------------------------------------------------------------
# Public forward.
# ----------------------------------------------------------------------------
def winbinvec_fc(X, p, *, tb=256, x_dtype=jnp.bfloat16):
    """X: (B, 430, 25) float32 -> (B, 2) float32 (eval-mode forward)."""
    B = X.shape[0]
    assert X.shape[1:] == (N_WIN, WIN_IN), X.shape

    # Batch tile: clamp to the (8-padded) batch; for big batches make sure the
    # grid has >= 2 steps so both v7x TensorCores get work (tiles stay >= 128).
    tb = max(8, min(tb, _round_up(B, 8)))
    if B > 128:
        tb = min(tb, max(128, _round_up(pl.cdiv(B, 2), 8)))

    # Free reshape + bf16 cast + tiny (+2 lane) pad. No transpose, no 430->512.
    xr = X.reshape(B, K_IN).astype(x_dtype)
    xp = jnp.pad(xr, ((0, 0), (0, K_PAD - K_IN)))

    w_pad, b_pad = _prepare_params(p)

    # VMEM budget from the actual footprint (double-buffered X/out, weights
    # counted twice to also cover the no-single-buffer fallback) + headroom.
    x_bytes = tb * K_PAD * jnp.dtype(x_dtype).itemsize
    w_bytes = K_PAD * N_PAD * 2
    o_bytes = tb * N_PAD * 4
    footprint = 2 * x_bytes + 2 * w_bytes + 2 * o_bytes + 2 * N_PAD * 4
    vmem_limit = min(int(footprint + (8 << 20)), 100 << 20)

    def run(single_buffer):
        if single_buffer:
            w_spec = pl.BlockSpec((K_PAD, N_PAD), lambda b: (0, 0),
                                  pipeline_mode=pl.Buffered(1))
            b_spec = pl.BlockSpec((1, N_PAD), lambda b: (0, 0),
                                  pipeline_mode=pl.Buffered(1))
        else:
            w_spec = pl.BlockSpec((K_PAD, N_PAD), lambda b: (0, 0))
            b_spec = pl.BlockSpec((1, N_PAD), lambda b: (0, 0))
        return pl.pallas_call(
            winbinvec_kernel,
            out_shape=jax.ShapeDtypeStruct((B, N_PAD), jnp.float32),
            grid=(pl.cdiv(B, tb),),
            in_specs=[pl.BlockSpec((tb, K_PAD), lambda b: (b, 0)),
                      w_spec, b_spec],
            out_specs=pl.BlockSpec((tb, N_PAD), lambda b: (b, 0)),
            compiler_params=pltpu.CompilerParams(
                dimension_semantics=("parallel",),
                vmem_limit_bytes=vmem_limit),
        )(xp, w_pad, b_pad)

    try:
        out = run(single_buffer=True)
    except Exception:
        # Fallback for Pallas builds that reject single-buffered (Buffered(1))
        # inputs; only costs ~2.6 MiB of extra weight VMEM.
        out = run(single_buffer=False)
    return out[:, :N_OUT]


# ----------------------------------------------------------------------------
# Deterministic parameter init (PyTorch-style shapes) and pure-JAX reference.
# ----------------------------------------------------------------------------
def init_params(key):
    ks = iter(jax.random.split(key, 40))
    p = {}

    def lin(fan_in, fan_out):
        bound = 1.0 / math.sqrt(fan_in)
        w = jax.random.uniform(next(ks), (fan_out, fan_in), jnp.float32, -bound, bound)
        b = jax.random.uniform(next(ks), (fan_out,), jnp.float32, -bound, bound)
        return w, b

    bound = 1.0 / math.sqrt(WIN_IN)
    p["ww"] = jax.random.uniform(next(ks), (N_WIN, WIN_OUT, WIN_IN), jnp.float32, -bound, bound)
    p["bw"] = jax.random.uniform(next(ks), (N_WIN, WIN_OUT), jnp.float32, -bound, bound)
    p["w3"], p["b3"] = lin(1720, 1024)
    p["w4"], p["b4"] = lin(1024, 512)
    p["w5"], p["b5"] = lin(512, 256)
    p["w6"], p["b6"] = lin(256, 64)
    p["w7"], p["b7"] = lin(64, 32)
    p["w8"], p["b8"] = lin(32, 2)

    def bn(c):
        g = jax.random.uniform(next(ks), (c,), jnp.float32, 0.8, 1.2)
        be = 0.1 * jax.random.normal(next(ks), (c,), jnp.float32)
        m = 0.1 * jax.random.normal(next(ks), (c,), jnp.float32)
        v = jax.random.uniform(next(ks), (c,), jnp.float32, 0.5, 1.5)
        return g, be, m, v

    p["bn3"] = bn(1024)
    p["bn4"] = bn(512)
    p["bn5"] = bn(256)
    return p


def reference_forward(X, p):
    """Pure-JAX f32 staged reference matching the PyTorch forward (eval mode)."""
    B = X.shape[0]
    hp = jax.lax.Precision.HIGHEST
    h = (jnp.einsum("bid,iod->bio", X, p["ww"], precision=hp)
         + p["bw"][None]).reshape(B, FEAT)

    def lin(x, w, b):
        return jnp.dot(x, w.T, precision=hp) + b

    def bn(x, t):
        g, be, m, v = t
        return (x - m) / jnp.sqrt(v + BN_EPS) * g + be

    h = bn(lin(h, p["w3"], p["b3"]), p["bn3"])
    h = bn(lin(h, p["w4"], p["b4"]), p["bn4"])
    h = bn(lin(h, p["w5"], p["b5"]), p["bn5"])
    h = lin(h, p["w6"], p["b6"])
    h = lin(h, p["w7"], p["b7"])
    return lin(h, p["w8"], p["b8"])


if __name__ == "__main__":
    key = jax.random.PRNGKey(0)
    kx, kp = jax.random.split(key)

    B = 16
    X = jax.random.normal(kx, (B, N_WIN, WIN_IN), jnp.float32)
    params = init_params(kp)

    out = jax.block_until_ready(winbinvec_fc(X, params))
    ref = reference_forward(X, params)

    assert out.shape == (B, N_OUT), out.shape
    assert bool(jnp.all(jnp.isfinite(out)))
    max_err = float(jnp.max(jnp.abs(out - ref)))
    if not jnp.allclose(out, ref, atol=5e-3, rtol=5e-3):
        raise AssertionError(f"kernel vs reference mismatch, max abs diff = {max_err}")
    print("KERNEL_OK")
</pallas_src>

<mosaic_0001>
module attributes {stable_mosaic.version = 11 : i64} {
  func.func @winbinvec_kernel(%arg0: i32, %arg1: memref<16x10752xbf16, #tpu.memory_space<vmem>>, %arg2: memref<10752x128xbf16, #tpu.memory_space<vmem>>, %arg3: memref<1x128xf32, #tpu.memory_space<vmem>>, %arg4: memref<16x128xf32, #tpu.memory_space<vmem>>) attributes {dimension_semantics = [#tpu.dimension_semantics<parallel>], iteration_bounds = array<i64: 1>, scalar_prefetch = 0 : i64, scratch_operands = 0 : i64, tpu.core_type = #tpu.core_type<tc>, window_params = [{transform_indices = @transform_0, window_bounds = array<i64: 16, 10752>}, {pipeline_mode = #tpu.pipeline_mode<synchronous>, transform_indices = @transform_1, window_bounds = array<i64: 10752, 128>}, {pipeline_mode = #tpu.pipeline_mode<synchronous>, transform_indices = @transform_2, window_bounds = array<i64: 1, 128>}, {transform_indices = @transform_3, window_bounds = array<i64: 16, 128>}]} {
    %c0 = arith.constant 0 : index
    %c0_0 = arith.constant 0 : index
    %0 = vector.load %arg1[%c0, %c0_0] : memref<16x10752xbf16, #tpu.memory_space<vmem>>, vector<16x10752xbf16>
    %c0_1 = arith.constant 0 : index
    %c0_2 = arith.constant 0 : index
    %1 = vector.load %arg2[%c0_1, %c0_2] : memref<10752x128xbf16, #tpu.memory_space<vmem>>, vector<10752x128xbf16>
    %cst = arith.constant dense<0.000000e+00> : vector<16x128xf32>
    %2 = tpu.matmul %0, %1, %cst {dimension_numbers = #tpu.dot_dimension_numbers<[1], [0], [0], [1], [0, 0, 1, 1], [], []>} : vector<16x10752xbf16>, vector<10752x128xbf16>, vector<16x128xf32> -> vector<16x128xf32>
    %c0_3 = arith.constant 0 : index
    %c0_4 = arith.constant 0 : index
    %3 = vector.load %arg3[%c0_3, %c0_4] : memref<1x128xf32, #tpu.memory_space<vmem>>, vector<1x128xf32>
    %4 = vector.broadcast %3 : vector<1x128xf32> to vector<16x128xf32>
    %5 = arith.addf %2, %4 : vector<16x128xf32>
    %c0_5 = arith.constant 0 : index
    %c0_6 = arith.constant 0 : index
    %6 = vector.load %arg4[%c0_5, %c0_6] : memref<16x128xf32, #tpu.memory_space<vmem>>, vector<16x128xf32>
    tpu.vector_store %arg4[%c0_5, %c0_6], %5 {strides = array<i32>} : memref<16x128xf32, #tpu.memory_space<vmem>>, vector<16x128xf32>,
    return
  }
  func.func @transform_0(%arg0: i32) -> (i32, i32) {
    %c0_i32 = arith.constant 0 : i32
    %c0_i32_0 = arith.constant 0 : i32
    return %arg0, %c0_i32 : i32, i32
  }
  func.func @transform_1(%arg0: i32) -> (i32, i32) {
    %c0_i32 = arith.constant 0 : i32
    %c0_i32_0 = arith.constant 0 : i32
    %c0_i32_1 = arith.constant 0 : i32
    return %c0_i32, %c0_i32_0 : i32, i32
  }
  func.func @transform_2(%arg0: i32) -> (i32, i32) {
    %c0_i32 = arith.constant 0 : i32
    %c0_i32_0 = arith.constant 0 : i32
    %c0_i32_1 = arith.constant 0 : i32
    return %c0_i32, %c0_i32_0 : i32, i32
  }
  func.func @transform_3(%arg0: i32) -> (i32, i32) {
    %c0_i32 = arith.constant 0 : i32
    %c0_i32_0 = arith.constant 0 : i32
    return %arg0, %c0_i32 : i32, i32
  }
}

module attributes {stable_mosaic.version = 11 : i64} {
  func.func @winbinvec_kernel(%arg0: i32, %arg1: memref<16x10752xbf16, #tpu.memory_space<vmem>>, %arg2: memref<10752x128xbf16, #tpu.memory_space<vmem>>, %arg3: memref<1x128xf32, #tpu.memory_space<vmem>>, %arg4: memref<16x128xf32, #tpu.memory_space<vmem>>) attributes {dimension_semantics = [#tpu.dimension_semantics<parallel>], iteration_bounds = array<i64: 1>, scalar_prefetch = 0 : i64, scratch_operands = 0 : i64, tpu.core_type = #tpu.core_type<tc>, window_params = [{transform_indices = @transform_0, window_bounds = array<i64: 16, 10752>}, {pipeline_mode = #tpu.pipeline_mode<synchronous>, transform_indices = @transform_1, window_bounds = array<i64: 10752, 128>}, {pipeline_mode = #tpu.pipeline_mode<synchronous>, transform_indices = @transform_2, window_bounds = array<i64: 1, 128>}, {transform_indices = @transform_3, window_bounds = array<i64: 16, 128>}]} {
    %c0 = arith.constant 0 : index
    %c0_0 = arith.constant 0 : index
    %0 = vector.load %arg1[%c0, %c0_0] : memref<16x10752xbf16, #tpu.memory_space<vmem>>, vector<16x10752xbf16>
    %c0_1 = arith.constant 0 : index
    %c0_2 = arith.constant 0 : index
    %1 = vector.load %arg2[%c0_1, %c0_2] : memref<10752x128xbf16, #tpu.memory_space<vmem>>, vector<10752x128xbf16>
    %cst = arith.constant dense<0.000000e+00> : vector<16x128xf32>
    %2 = tpu.matmul %0, %1, %cst {dimension_numbers = #tpu.dot_dimension_numbers<[1], [0], [0], [1], [0, 0, 1, 1], [], []>} : vector<16x10752xbf16>, vector<10752x128xbf16>, vector<16x128xf32> -> vector<16x128xf32>
    %c0_3 = arith.constant 0 : index
    %c0_4 = arith.constant 0 : index
    %3 = vector.load %arg3[%c0_3, %c0_4] : memref<1x128xf32, #tpu.memory_space<vmem>>, vector<1x128xf32>
    %4 = vector.broadcast %3 : vector<1x128xf32> to vector<16x128xf32>
    %5 = arith.addf %2, %4 : vector<16x128xf32>
    %c0_5 = arith.constant 0 : index
    %c0_6 = arith.constant 0 : index
    %6 = vector.load %arg4[%c0_5, %c0_6] : memref<16x128xf32, #tpu.memory_space<vmem>>, vector<16x128xf32>
    tpu.vector_store %arg4[%c0_5, %c0_6], %5 {strides = array<i32>} : memref<16x128xf32, #tpu.memory_space<vmem>>, vector<16x128xf32>,
    return
  }
  func.func @transform_0(%arg0: i32) -> (i32, i32) {
    %c0_i32 = arith.constant 0 : i32
    %c0_i32_0 = arith.constant 0 : i32
    return %arg0, %c0_i32 : i32, i32
  }
  func.func @transform_1(%arg0: i32) -> (i32, i32) {
    %c0_i32 = arith.constant 0 : i32
    %c0_i32_0 = arith.constant 0 : i32
    %c0_i32_1 = arith.constant 0 : i32
    return %c0_i32, %c0_i32_0 : i32, i32
  }
  func.func @transform_2(%arg0: i32) -> (i32, i32) {
    %c0_i32 = arith.constant 0 : i32
    %c0_i32_0 = arith.constant 0 : i32
    %c0_i32_1 = arith.constant 0 : i32
    return %c0_i32, %c0_i32_0 : i32, i32
  }
  func.func @transform_3(%arg0: i32) -> (i32, i32) {
    %c0_i32 = arith.constant 0 : i32
    %c0_i32_0 = arith.constant 0 : i32
    return %arg0, %c0_i32 : i32, i32
  }
}

</mosaic_0001>

<bundles_post_ra>
// kernel: tpu_custom_call.1
= control target key start
LH: loop header
LB: loop body
LE: loop exit
PB: predicated region body
PF: predicated region fallthrough
CT: control target
= control target key end

     0   :  { %8 = vsyncpa [#allocation3], 0  ;;  %s11228_s0 = inlined_call_operand.hbm [shape: bf16[16,10752], index: 0, kind: input, shape index: {}]   ;;  %s11229_s1 = inlined_call_operand.hbm [shape: bf16[10752,128], index: 1, kind: input, shape index: {}]   ;;  %s11230_s2 = inlined_call_operand.hbm [shape: f32[1,128], index: 2, kind: input, shape index: {}]   ;;  %s11231_s3 = inlined_call_operand.hbm [shape: f32[16,128], index: 3, kind: output, shape index: {}]  }
   0x1   :  { %9 = vsyncpa [#allocation6], 0  ;;  %s28_s14 = sshll.u32 %s11229_s1, 4  ;;  %s29_s14 = int_to_ptr.hbm [resolvable:$true] %s28_s14 }
   0x2   :  { %10 = vsyncpa [#allocation4], 0  ;;  %s11035_s15 = smov [#allocation5]   ;;  %s15_s19 = sshll.u32 %s11228_s0, 4  ;;  %s16_s19 = int_to_ptr.hbm [resolvable:$true] %s15_s19 }
   0x3   :  { %s30_s16 = sshll.u32 %s11035_s15, 4  ;;  %s11036_s20 = smov 64   ;;  %s31_s16 = int_to_ptr.vmem [resolvable:$true] %s30_s16 }
   0x4   :  { %s11037_s21 = smov 4   ;;  %s11038_s22 = smov [#allocation2]  }
   0x5   :  { %36 = dma.hbm_to_vmem [thread:$0]  %s29_s14, 86016, %s31_s16, [#allocation6], %s11036_s20, %s11036_s20, %s11037_s21  }
   0x6   :  { %s17_s23 = sshll.u32 %s11038_s22, 4  ;;  %s11039_s24 = smov 5376   ;;  %s18_s23 = int_to_ptr.vmem [resolvable:$true] %s17_s23 }
   0x7   :  { %s11040_s25 = smov 336   ;;  %s42_s27 = sshll.u32 %s11230_s2, 4  ;;  %s43_s27 = int_to_ptr.hbm [resolvable:$true] %s42_s27 }
   0x8   :  { %23 = dma.hbm_to_vmem [thread:$0]  %s16_s19, 10752, %s18_s23, [#allocation3], %s11039_s24, %s11039_s24, %s11040_s25  }
   0x9   :  { %s11041_s28 = smov [#allocation7]  }
   0xa   :  { %s44_s29 = sshll.u32 %s11041_s28, 4  ;;  %s45_s29 = int_to_ptr.vmem [resolvable:$true] %s44_s29 }
   0xb   :  { %47 = dma.hbm_to_vmem [thread:$0]  %s43_s27, 16, %s45_s29, [#allocation6]  }
   0xc   :  { %11029 = dma.done.wait [#allocation3], 10752  }
   0xd   :  { %11030 = vsyncadd [#allocation3], 4294956544 }
   0xe   :  { %11031 = dma.done.wait [#allocation6], 86032  }
   0xf   :  { %11032 = vsyncadd [#allocation6], 4294881264  ;;  %v10257_v0 = vld [vmem:[#allocation5 + $0x38] sm:$0xff]  ;;  %v10256_v4 = vld [vmem:[#allocation5 + $0x30] sm:$0xff]  ;;  %s11042_s0 = smov [#allocation8]   ;;  %s7128_s5 = sshll.u32 %s11231_s3, 4  ;;  %s7129_s5 = int_to_ptr.hbm [resolvable:$true] %s7128_s5 }
  0x10   :  { %v10265_v1 = vld [vmem:[#allocation5 + $0x78] sm:$0xff]  ;;  %5944 = vmatpush.bf16.msra.mxu0 %v10257_v0  ;;  %v10264_v5 = vld [vmem:[#allocation5 + $0x70] sm:$0xff]  ;;  %v10255_v8 = vld [vmem:[#allocation5 + $0x28] sm:$0xff]  ;;  %s7126_s2 = sshll.u32 %s11042_s0, 4  ;;  %s11043_s6 = smov 128   ;;  %s7127_s2 = int_to_ptr.vmem [resolvable:$true] %s7126_s2 }
  0x11   :  { %v10273_v2 = vld [vmem:[#allocation5 + $0xb8] sm:$0xff]  ;;  %5958 = vmatpush.bf16.msra.mxu1 %v10265_v1  ;;  %v10272_v6 = vld [vmem:[#allocation5 + $0xb0] sm:$0xff]  ;;  %v10263_v9 = vld [vmem:[#allocation5 + $0x68] sm:$0xff]  ;;  %s11044_s7 = smov 8  }
  0x12   :  { %v10281_v3 = vld [vmem:[#allocation5 + $0xf8] sm:$0xff]  ;;  %5972 = vmatpush.bf16.msra.mxu2 %v10273_v2  ;;  %v10280_v7 = vld [vmem:[#allocation5 + $0xf0] sm:$0xff]  ;;  %v10271_v10 = vld [vmem:[#allocation5 + $0xa8] sm:$0xff] }
  0x13   :  { %5986 = vmatpush.bf16.msra.mxu3 %v10281_v3  ;;  %v10279_v11 = vld [vmem:[#allocation5 + $0xe8] sm:$0xff]  ;;  %v10254_v12 = vld [vmem:[#allocation5 + $0x20] sm:$0xff]  ;;  %v10253_v16 = vld [vmem:[#allocation5 + $0x18] sm:$0xff] }
  0x14   :  { %5945 = vmatpush.bf16.msra.mxu0 %v10256_v4  ;;  %v10262_v13 = vld [vmem:[#allocation5 + $0x60] sm:$0xff]  ;;  %v10261_v17 = vld [vmem:[#allocation5 + $0x58] sm:$0xff]  ;;  %v10252_v20 = vld [vmem:[#allocation5 + $0x10] sm:$0xff] }
  0x15   :  { %5959 = vmatpush.bf16.msra.mxu1 %v10264_v5  ;;  %v10270_v14 = vld [vmem:[#allocation5 + $0xa0] sm:$0xff]  ;;  %v10269_v18 = vld [vmem:[#allocation5 + $0x98] sm:$0xff]  ;;  %v10260_v21 = vld [vmem:[#allocation5 + $0x50] sm:$0xff] }
  0x16   :  { %5973 = vmatpush.bf16.msra.mxu2 %v10272_v6  ;;  %v10278_v15 = vld [vmem:[#allocation5 + $0xe0] sm:$0xff]  ;;  %v10277_v19 = vld [vmem:[#allocation5 + $0xd8] sm:$0xff]  ;;  %v10268_v22 = vld [vmem:[#allocation5 + $0x90] sm:$0xff] }
  0x17   :  { %5987 = vmatpush.bf16.msra.mxu3 %v10280_v7  ;;  %v10276_v23 = vld [vmem:[#allocation5 + $0xd0] sm:$0xff]  ;;  %v10251_v24 = vld [vmem:[#allocation5 + $0x8] sm:$0xff]  ;;  %v10250_v28 = vld [vmem:[#allocation5] sm:$0xff] }
  0x18   :  { %5946 = vmatpush.bf16.msra.mxu0 %v10255_v8  ;;  %v10259_v25 = vld [vmem:[#allocation5 + $0x48] sm:$0xff]  ;;  %v10258_v29 = vld [vmem:[#allocation5 + $0x40] sm:$0xff]  ;;  %v10289_v32 = vld [vmem:[#allocation5 + $0x138] sm:$0xff] }
  0x19   :  { %5960 = vmatpush.bf16.msra.mxu1 %v10263_v9  ;;  %v10267_v26 = vld [vmem:[#allocation5 + $0x88] sm:$0xff]  ;;  %v10266_v30 = vld [vmem:[#allocation5 + $0x80] sm:$0xff]  ;;  %v10297_v33 = vld [vmem:[#allocation5 + $0x178] sm:$0xff] }
  0x1a   :  { %5974 = vmatpush.bf16.msra.mxu2 %v10271_v10  ;;  %v10275_v27 = vld [vmem:[#allocation5 + $0xc8] sm:$0xff]  ;;  %v10274_v31 = vld [vmem:[#allocation5 + $0xc0] sm:$0xff]  ;;  %v10208_v35 = vld [vmem:[#allocation2 + $0x14c] sm:$0xf0] }
  0x1b   :  { %5988 = vmatpush.bf16.msra.mxu3 %v10279_v11  ;;  %v7144_v34 = vld [vmem:[#allocation2] sm:$0xf]  ;;  %v7152_v36 = vld [vmem:[#allocation2 + $0x8] sm:$0xf]  ;;  %v10209_v37 = vld [vmem:[#allocation2 + $0x154] sm:$0xf0] }
  0x1c   :  { %5947 = vmatpush.bf16.msra.mxu0 %v10254_v12  ;;  %v10166_v38 = vld [vmem:[#allocation2 + $0x4] sm:$0xf]  ;;  %v7146_v39 = vld [vmem:[#allocation2 + $0x150] sm:$0xf0]  ;;  %v10167_v40 = vld [vmem:[#allocation2 + $0xc] sm:$0xf]  ;;  %v7145_v44 = vor.u32 %v10208_v35, %v7144_v34  ;;  %v7153_v45 = vor.u32 %v10209_v37, %v7152_v36 }
  0x1d   :  { %5961 = vmatpush.bf16.msra.mxu1 %v10262_v13  ;;  %v7154_v41 = vld [vmem:[#allocation2 + $0x158] sm:$0xf0]  ;;  %v7149_v46 = vor.u32 %v10166_v38, %v7146_v39  ;;  %v10288_v48 = vld [vmem:[#allocation5 + $0x130] sm:$0xff]  ;;  %v10287_v52 = vld [vmem:[#allocation5 + $0x128] sm:$0xff] }
  0x1e   :  { %5975 = vmatpush.bf16.msra.mxu2 %v10270_v14  ;;  %v10305_v42 = vld [vmem:[#allocation5 + $0x1b8] sm:$0xff]  ;;  %v7157_v47 = vor.u32 %v10167_v40, %v7154_v41  ;;  %v10296_v49 = vld [vmem:[#allocation5 + $0x170] sm:$0xff]  ;;  %v10295_v53 = vld [vmem:[#allocation5 + $0x168] sm:$0xff] }
  0x1f   :  { %5989 = vmatpush.bf16.msra.mxu3 %v10278_v15  ;;  %v10313_v43 = vld [vmem:[#allocation5 + $0x1f8] sm:$0xff]  ;;  %v10304_v50 = vld [vmem:[#allocation5 + $0x1b0] sm:$0xff]  ;;  %v10303_v54 = vld [vmem:[#allocation5 + $0x1a8] sm:$0xff] }
  0x20   :  { %5948 = vmatpush.bf16.msra.mxu0 %v10253_v16  ;;  %v10312_v51 = vld [vmem:[#allocation5 + $0x1f0] sm:$0xff]  ;;  %v10311_v55 = vld [vmem:[#allocation5 + $0x1e8] sm:$0xff]  ;;  %v10286_v56 = vld [vmem:[#allocation5 + $0x120] sm:$0xff] }
  0x21   :  { %5962 = vmatpush.bf16.msra.mxu1 %v10261_v17  ;;  %v10294_v57 = vld [vmem:[#allocation5 + $0x160] sm:$0xff]  ;;  %v10285_v60 = vld [vmem:[#allocation5 + $0x118] sm:$0xff]  ;;  %v10284_v0 = vld [vmem:[#allocation5 + $0x110] sm:$0xff] }
  0x22   :  { %5976 = vmatpush.bf16.msra.mxu2 %v10269_v18  ;;  %v10302_v58 = vld [vmem:[#allocation5 + $0x1a0] sm:$0xff]  ;;  %v10293_v61 = vld [vmem:[#allocation5 + $0x158] sm:$0xff]  ;;  %v10292_v1 = vld [vmem:[#allocation5 + $0x150] sm:$0xff] }
  0x23   :  { %5990 = vmatpush.bf16.msra.mxu3 %v10277_v19  ;;  %v10310_v59 = vld [vmem:[#allocation5 + $0x1e0] sm:$0xff]  ;;  %v10301_v62 = vld [vmem:[#allocation5 + $0x198] sm:$0xff]  ;;  %v10300_v2 = vld [vmem:[#allocation5 + $0x190] sm:$0xff] }
  0x24   :  { %5949 = vmatpush.bf16.msra.mxu0 %v10252_v20  ;;  %v10309_v63 = vld [vmem:[#allocation5 + $0x1d8] sm:$0xff]  ;;  %v10308_v3 = vld [vmem:[#allocation5 + $0x1d0] sm:$0xff]  ;;  %v10283_v4 = vld [vmem:[#allocation5 + $0x108] sm:$0xff] }
  0x25   :  { %5963 = vmatpush.bf16.msra.mxu1 %v10260_v21  ;;  %v10291_v5 = vld [vmem:[#allocation5 + $0x148] sm:$0xff]  ;;  %v10282_v8 = vld [vmem:[#allocation5 + $0x100] sm:$0xff]  ;;  %v10321_v12 = vld [vmem:[#allocation5 + $0x238] sm:$0xff] }
  0x26   :  { %5977 = vmatpush.bf16.msra.mxu2 %v10268_v22  ;;  %v10299_v6 = vld [vmem:[#allocation5 + $0x188] sm:$0xff]  ;;  %v10290_v9 = vld [vmem:[#allocation5 + $0x140] sm:$0xff]  ;;  %v10329_v13 = vld [vmem:[#allocation5 + $0x278] sm:$0xff] }
  0x27   :  { %5991 = vmatpush.bf16.msra.mxu3 %v10276_v23  ;;  %v10307_v7 = vld [vmem:[#allocation5 + $0x1c8] sm:$0xff]  ;;  %v10298_v10 = vld [vmem:[#allocation5 + $0x180] sm:$0xff]  ;;  %v7160_v14 = vld [vmem:[#allocation2 + $0x10] sm:$0xf] }
  0x28   :  { %5950 = vmatpush.bf16.msra.mxu0 %v10251_v24  ;;  %v10306_v11 = vld [vmem:[#allocation5 + $0x1c0] sm:$0xff]  ;;  %v7168_v16 = vld [vmem:[#allocation2 + $0x18] sm:$0xf]  ;;  %v10211_v17 = vld [vmem:[#allocation2 + $0x164] sm:$0xf0] }
  0x29   :  { %5964 = vmatpush.bf16.msra.mxu1 %v10259_v25  ;;  %v10210_v15 = vld [vmem:[#allocation2 + $0x15c] sm:$0xf0]  ;;  %v10168_v18 = vld [vmem:[#allocation2 + $0x14] sm:$0xf]  ;;  %v7162_v19 = vld [vmem:[#allocation2 + $0x160] sm:$0xf0]  ;;  %v7169_v25 = vor.u32 %v10211_v17, %v7168_v16 }
  0x2a   :  { %5978 = vmatpush.bf16.msra.mxu2 %v10267_v26  ;;  %v10169_v20 = vld [vmem:[#allocation2 + $0x1c] sm:$0xf]  ;;  %v7170_v21 = vld [vmem:[#allocation2 + $0x168] sm:$0xf0]  ;;  %v7161_v24 = vor.u32 %v10210_v15, %v7160_v14  ;;  %v7165_v26 = vor.u32 %v10168_v18, %v7162_v19  ;;  %v10318_v36 = vld [vmem:[#allocation5 + $0x220] sm:$0xff] }
  0x2b   :  { %5992 = vmatpush.bf16.msra.mxu3 %v10275_v27  ;;  %v10337_v22 = vld [vmem:[#allocation5 + $0x2b8] sm:$0xff]  ;;  %v7173_v27 = vor.u32 %v10169_v20, %v7170_v21  ;;  %v10335_v34 = vld [vmem:[#allocation5 + $0x2a8] sm:$0xff]  ;;  %v10326_v37 = vld [vmem:[#allocation5 + $0x260] sm:$0xff] }
  0x2c   :  { %5951 = vmatpush.bf16.msra.mxu0 %v10250_v28  ;;  %v10345_v23 = vld [vmem:[#allocation5 + $0x2f8] sm:$0xff]  ;;  %v10320_v28 = vld [vmem:[#allocation5 + $0x230] sm:$0xff]  ;;  %v10343_v35 = vld [vmem:[#allocation5 + $0x2e8] sm:$0xff] }
  0x2d   :  { %5965 = vmatpush.bf16.msra.mxu1 %v10258_v29  ;;  %v10328_v29 = vld [vmem:[#allocation5 + $0x270] sm:$0xff]  ;;  %v10334_v38 = vld [vmem:[#allocation5 + $0x2a0] sm:$0xff]  ;;  %v10317_v40 = vld [vmem:[#allocation5 + $0x218] sm:$0xff] }
  0x2e   :  { %5979 = vmatpush.bf16.msra.mxu2 %v10266_v30  ;;  %v10336_v30 = vld [vmem:[#allocation5 + $0x2b0] sm:$0xff]  ;;  %v10342_v39 = vld [vmem:[#allocation5 + $0x2e0] sm:$0xff]  ;;  %v10325_v41 = vld [vmem:[#allocation5 + $0x258] sm:$0xff] }
  0x2f   :  { %5993 = vmatpush.bf16.msra.mxu3 %v10274_v31  ;;  %5952 = vmatmul.bf16.vlgmr.msra.gmra.mxu0 %v7145_v44  ;;  %v10344_v31 = vld [vmem:[#allocation5 + $0x2f0] sm:$0xff]  ;;  %v10367_v14 = vld [vmem:[#allocation5 + $0x3a8] sm:$0xff]  ;;  %v10350_v16 = vld [vmem:[#allocation5 + $0x320] sm:$0xff] }
  0x30   :  { %6000 = vmatpush.bf16.msrb.mxu0 %v10289_v32  ;;  %5966 = vmatmul.bf16.vlgmr.msra.gmra.mxu1 %v7149_v46  ;;  %v10319_v32 = vld [vmem:[#allocation5 + $0x228] sm:$0xff]  ;;  %v10316_v44 = vld [vmem:[#allocation5 + $0x210] sm:$0xff]  ;;  %v10358_v17 = vld [vmem:[#allocation5 + $0x360] sm:$0xff] }
  0x31   :  { %6014 = vmatpush.bf16.msrb.mxu1 %v10297_v33  ;;  %5980 = vmatmul.bf16.vlgmr.msra.gmra.mxu2 %v7153_v45  ;;  %v10327_v33 = vld [vmem:[#allocation5 + $0x268] sm:$0xff]  ;;  %v10324_v45 = vld [vmem:[#allocation5 + $0x250] sm:$0xff]  ;;  %v10366_v18 = vld [vmem:[#allocation5 + $0x3a0] sm:$0xff] }
  0x32   :  { %6028 = vmatpush.bf16.msrb.mxu2 %v10305_v42  ;;  %5994 = vmatmul.bf16.vlgmr.msra.gmra.mxu3 %v7157_v47  ;;  %v10333_v42 = vld [vmem:[#allocation5 + $0x298] sm:$0xff]  ;;  %v10332_v46 = vld [vmem:[#allocation5 + $0x290] sm:$0xff]  ;;  %v10375_v15 = vld [vmem:[#allocation5 + $0x3e8] sm:$0xff] }
  0x33   :  { %6042 = vmatpush.bf16.msrb.mxu3 %v10313_v43  ;;  %v10341_v43 = vld [vmem:[#allocation5 + $0x2d8] sm:$0xff]  ;;  %v10340_v47 = vld [vmem:[#allocation5 + $0x2d0] sm:$0xff]  ;;  %v10374_v19 = vld [vmem:[#allocation5 + $0x3e0] sm:$0xff] }
  0x34   :  { %6001 = vmatpush.bf16.msrb.mxu0 %v10288_v48  ;;  %v10315_v48 = vld [vmem:[#allocation5 + $0x208] sm:$0xff]  ;;  %v10349_v20 = vld [vmem:[#allocation5 + $0x318] sm:$0xff] }
  0x35   :  { %6015 = vmatpush.bf16.msrb.mxu1 %v10296_v49  ;;  %v10323_v49 = vld [vmem:[#allocation5 + $0x248] sm:$0xff]  ;;  %v10357_v21 = vld [vmem:[#allocation5 + $0x358] sm:$0xff] }
  0x36   :  { %6029 = vmatpush.bf16.msrb.mxu2 %v10304_v50  ;;  %v10331_v50 = vld [vmem:[#allocation5 + $0x288] sm:$0xff] }
  0x37   :  { %6043 = vmatpush.bf16.msrb.mxu3 %v10312_v51  ;;  %v10339_v51 = vld [vmem:[#allocation5 + $0x2c8] sm:$0xff] }
  0x38   :  { %6002 = vmatpush.bf16.msrb.mxu0 %v10287_v52  ;;  %v10314_v52 = vld [vmem:[#allocation5 + $0x200] sm:$0xff] }
  0x39   :  { %6016 = vmatpush.bf16.msrb.mxu1 %v10295_v53  ;;  %v10322_v53 = vld [vmem:[#allocation5 + $0x240] sm:$0xff] }
  0x3a   :  { %6030 = vmatpush.bf16.msrb.mxu2 %v10303_v54  ;;  %v10330_v54 = vld [vmem:[#allocation5 + $0x280] sm:$0xff] }
  0x3b   :  { %6044 = vmatpush.bf16.msrb.mxu3 %v10311_v55  ;;  %v10338_v55 = vld [vmem:[#allocation5 + $0x2c0] sm:$0xff] }
  0x3c   :  { %6003 = vmatpush.bf16.msrb.mxu0 %v10286_v56  ;;  %v10353_v56 = vld [vmem:[#allocation5 + $0x338] sm:$0xff] }
  0x3d   :  { %6017 = vmatpush.bf16.msrb.mxu1 %v10294_v57  ;;  %v10361_v57 = vld [vmem:[#allocation5 + $0x378] sm:$0xff] }
  0x3e   :  { %6031 = vmatpush.bf16.msrb.mxu2 %v10302_v58  ;;  %v7176_v58 = vld [vmem:[#allocation2 + $0x20] sm:$0xf] }
  0x3f   :  { %6045 = vmatpush.bf16.msrb.mxu3 %v10310_v59  ;;  %v10212_v59 = vld [vmem:[#allocation2 + $0x16c] sm:$0xf0] }
  0x40   :  { %6004 = vmatpush.bf16.msrb.mxu0 %v10285_v60  ;;  %v7184_v60 = vld [vmem:[#allocation2 + $0x28] sm:$0xf] }
  0x41   :  { %6018 = vmatpush.bf16.msrb.mxu1 %v10293_v61  ;;  %v10213_v61 = vld [vmem:[#allocation2 + $0x174] sm:$0xf0] }
  0x42   :  { %6032 = vmatpush.bf16.msrb.mxu2 %v10301_v62  ;;  %v10170_v62 = vld [vmem:[#allocation2 + $0x24] sm:$0xf] }
  0x43   :  { %6046 = vmatpush.bf16.msrb.mxu3 %v10309_v63  ;;  %v7178_v63 = vld [vmem:[#allocation2 + $0x170] sm:$0xf0] }
  0x44   :  { %6005 = vmatpush.bf16.msrb.mxu0 %v10284_v0  ;;  %v10171_v0 = vld [vmem:[#allocation2 + $0x2c] sm:$0xf] }
  0x45   :  { %6019 = vmatpush.bf16.msrb.mxu1 %v10292_v1  ;;  %v7186_v1 = vld [vmem:[#allocation2 + $0x178] sm:$0xf0] }
  0x46   :  { %6033 = vmatpush.bf16.msrb.mxu2 %v10300_v2  ;;  %v10369_v2 = vld [vmem:[#allocation5 + $0x3b8] sm:$0xff] }
  0x47   :  { %6047 = vmatpush.bf16.msrb.mxu3 %v10308_v3  ;;  %v10377_v3 = vld [vmem:[#allocation5 + $0x3f8] sm:$0xff] }
  0x48   :  { %6006 = vmatpush.bf16.msrb.mxu0 %v10283_v4  ;;  %v7177_v4 = vor.u32 %v10212_v59, %v7176_v58  ;;  %v10399_v58 = vld [vmem:[#allocation5 + $0x4a8] sm:$0xff] }
  0x49   :  { %6020 = vmatpush.bf16.msrb.mxu1 %v10291_v5  ;;  %v7185_v5 = vor.u32 %v10213_v61, %v7184_v60  ;;  %v10407_v59 = vld [vmem:[#allocation5 + $0x4e8] sm:$0xff]  ;;  %v10382_v60 = vld [vmem:[#allocation5 + $0x420] sm:$0xff] }
  0x4a   :  { %6034 = vmatpush.bf16.msrb.mxu2 %v10299_v6  ;;  %v7181_v6 = vor.u32 %v10170_v62, %v7178_v63  ;;  %v10390_v61 = vld [vmem:[#allocation5 + $0x460] sm:$0xff] }
  0x4b   :  { %6048 = vmatpush.bf16.msrb.mxu3 %v10307_v7  ;;  %v7189_v7 = vor.u32 %v10171_v0, %v7186_v1  ;;  %v10398_v62 = vld [vmem:[#allocation5 + $0x4a0] sm:$0xff]  ;;  %v10381_v0 = vld [vmem:[#allocation5 + $0x418] sm:$0xff] }
  0x4c   :  { %6007 = vmatpush.bf16.msrb.mxu0 %v10282_v8  ;;  %v10352_v8 = vld [vmem:[#allocation5 + $0x330] sm:$0xff]  ;;  %v10406_v63 = vld [vmem:[#allocation5 + $0x4e0] sm:$0xff]  ;;  %v10389_v1 = vld [vmem:[#allocation5 + $0x458] sm:$0xff] }
  0x4d   :  { %6021 = vmatpush.bf16.msrb.mxu1 %v10290_v9  ;;  %v10360_v9 = vld [vmem:[#allocation5 + $0x370] sm:$0xff] }
  0x4e   :  { %6035 = vmatpush.bf16.msrb.mxu2 %v10298_v10  ;;  %v10368_v10 = vld [vmem:[#allocation5 + $0x3b0] sm:$0xff] }
  0x4f   :  { %6049 = vmatpush.bf16.msrb.mxu3 %v10306_v11  ;;  %6008 = vmatmul.bf16.vlgmr.msrb.gmra.mxu0 %v7161_v24  ;;  %v10376_v11 = vld [vmem:[#allocation5 + $0x3f0] sm:$0xff] }
  0x50   :  { %6056 = vmatpush.bf16.msra.mxu0 %v10321_v12  ;;  %6022 = vmatmul.bf16.vlgmr.msrb.gmra.mxu1 %v7165_v26  ;;  %v10351_v12 = vld [vmem:[#allocation5 + $0x328] sm:$0xff]  ;;  %v10348_v24 = vld [vmem:[#allocation5 + $0x310] sm:$0xff] }
  0x51   :  { %6070 = vmatpush.bf16.msra.mxu1 %v10329_v13  ;;  %6036 = vmatmul.bf16.vlgmr.msrb.gmra.mxu2 %v7169_v25  ;;  %v10359_v13 = vld [vmem:[#allocation5 + $0x368] sm:$0xff]  ;;  %v10356_v25 = vld [vmem:[#allocation5 + $0x350] sm:$0xff] }
  0x52   :  { %6084 = vmatpush.bf16.msra.mxu2 %v10337_v22  ;;  %6050 = vmatmul.bf16.vlgmr.msrb.gmra.mxu3 %v7173_v27  ;;  %v10365_v22 = vld [vmem:[#allocation5 + $0x398] sm:$0xff]  ;;  %v10364_v26 = vld [vmem:[#allocation5 + $0x390] sm:$0xff] }
  0x53   :  { %6098 = vmatpush.bf16.msra.mxu3 %v10345_v23  ;;  %v10373_v23 = vld [vmem:[#allocation5 + $0x3d8] sm:$0xff]  ;;  %v10372_v27 = vld [vmem:[#allocation5 + $0x3d0] sm:$0xff] }
  0x54   :  { %6057 = vmatpush.bf16.msra.mxu0 %v10320_v28  ;;  %v10347_v28 = vld [vmem:[#allocation5 + $0x308] sm:$0xff] }
  0x55   :  { %6071 = vmatpush.bf16.msra.mxu1 %v10328_v29  ;;  %v10355_v29 = vld [vmem:[#allocation5 + $0x348] sm:$0xff] }
  0x56   :  { %6085 = vmatpush.bf16.msra.mxu2 %v10336_v30  ;;  %v10363_v30 = vld [vmem:[#allocation5 + $0x388] sm:$0xff] }
  0x57   :  { %6099 = vmatpush.bf16.msra.mxu3 %v10344_v31  ;;  %v10371_v31 = vld [vmem:[#allocation5 + $0x3c8] sm:$0xff] }
  0x58   :  { %6058 = vmatpush.bf16.msra.mxu0 %v10319_v32  ;;  %v10346_v32 = vld [vmem:[#allocation5 + $0x300] sm:$0xff] }
  0x59   :  { %6072 = vmatpush.bf16.msra.mxu1 %v10327_v33  ;;  %v10354_v33 = vld [vmem:[#allocation5 + $0x340] sm:$0xff] }
  0x5a   :  { %6086 = vmatpush.bf16.msra.mxu2 %v10335_v34  ;;  %v10362_v34 = vld [vmem:[#allocation5 + $0x380] sm:$0xff] }
  0x5b   :  { %6100 = vmatpush.bf16.msra.mxu3 %v10343_v35  ;;  %v10370_v35 = vld [vmem:[#allocation5 + $0x3c0] sm:$0xff] }
  0x5c   :  { %6059 = vmatpush.bf16.msra.mxu0 %v10318_v36  ;;  %v10385_v36 = vld [vmem:[#allocation5 + $0x438] sm:$0xff] }
  0x5d   :  { %6073 = vmatpush.bf16.msra.mxu1 %v10326_v37  ;;  %v10393_v37 = vld [vmem:[#allocation5 + $0x478] sm:$0xff] }
  0x5e   :  { %6087 = vmatpush.bf16.msra.mxu2 %v10334_v38  ;;  %v7192_v38 = vld [vmem:[#allocation2 + $0x30] sm:$0xf] }
  0x5f   :  { %6101 = vmatpush.bf16.msra.mxu3 %v10342_v39  ;;  %v10214_v39 = vld [vmem:[#allocation2 + $0x17c] sm:$0xf0] }
  0x60   :  { %6060 = vmatpush.bf16.msra.mxu0 %v10317_v40  ;;  %v7200_v40 = vld [vmem:[#allocation2 + $0x38] sm:$0xf] }
  0x61   :  { %6074 = vmatpush.bf16.msra.mxu1 %v10325_v41  ;;  %v10215_v41 = vld [vmem:[#allocation2 + $0x184] sm:$0xf0] }
  0x62   :  { %6088 = vmatpush.bf16.msra.mxu2 %v10333_v42  ;;  %v10172_v42 = vld [vmem:[#allocation2 + $0x34] sm:$0xf] }
  0x63   :  { %6102 = vmatpush.bf16.msra.mxu3 %v10341_v43  ;;  %v7194_v43 = vld [vmem:[#allocation2 + $0x180] sm:$0xf0] }
  0x64   :  { %6061 = vmatpush.bf16.msra.mxu0 %v10316_v44  ;;  %v10173_v44 = vld [vmem:[#allocation2 + $0x3c] sm:$0xf] }
  0x65   :  { %6075 = vmatpush.bf16.msra.mxu1 %v10324_v45  ;;  %v7202_v45 = vld [vmem:[#allocation2 + $0x188] sm:$0xf0] }
  0x66   :  { %6089 = vmatpush.bf16.msra.mxu2 %v10332_v46  ;;  %v10401_v46 = vld [vmem:[#allocation5 + $0x4b8] sm:$0xff] }
  0x67   :  { %6103 = vmatpush.bf16.msra.mxu3 %v10340_v47  ;;  %v10409_v47 = vld [vmem:[#allocation5 + $0x4f8] sm:$0xff] }
  0x68   :  { %6062 = vmatpush.bf16.msra.mxu0 %v10315_v48  ;;  %v7193_v48 = vor.u32 %v10214_v39, %v7192_v38  ;;  %v11074_v38 = vld [vmem:[#allocation7] ss:$0 sm:$0xff]  ;;  %v10431_v39 = vld [vmem:[#allocation5 + $0x5a8] sm:$0xff] }
  0x69   :  { %6076 = vmatpush.bf16.msra.mxu1 %v10323_v49  ;;  %v7201_v49 = vor.u32 %v10215_v41, %v7200_v40  ;;  %v10439_v40 = vld [vmem:[#allocation5 + $0x5e8] sm:$0xff] }
  0x6a   :  { %6090 = vmatpush.bf16.msra.mxu2 %v10331_v50  ;;  %v7197_v50 = vor.u32 %v10172_v42, %v7194_v43  ;;  %v10414_v42 = vld [vmem:[#allocation5 + $0x520] sm:$0xff] }
  0x6b   :  { %6104 = vmatpush.bf16.msra.mxu3 %v10339_v51  ;;  %v7205_v51 = vor.u32 %v10173_v44, %v7202_v45  ;;  %v10422_v43 = vld [vmem:[#allocation5 + $0x560] sm:$0xff] }
  0x6c   :  { %6063 = vmatpush.bf16.msra.mxu0 %v10314_v52  ;;  %v10384_v52 = vld [vmem:[#allocation5 + $0x430] sm:$0xff]  ;;  %v10430_v45 = vld [vmem:[#allocation5 + $0x5a0] sm:$0xff] }
  0x6d   :  { %6077 = vmatpush.bf16.msra.mxu1 %v10322_v53  ;;  %v10392_v53 = vld [vmem:[#allocation5 + $0x470] sm:$0xff] }
  0x6e   :  { %6091 = vmatpush.bf16.msra.mxu2 %v10330_v54  ;;  %v10400_v54 = vld [vmem:[#allocation5 + $0x4b0] sm:$0xff] }
  0x6f   :  { %6105 = vmatpush.bf16.msra.mxu3 %v10338_v55  ;;  %6064 = vmatmul.bf16.vlgmr.msra.gmra.mxu0 %v7177_v4  ;;  %v10408_v55 = vld [vmem:[#allocation5 + $0x4f0] sm:$0xff] }
  0x70   :  { %6112 = vmatpush.bf16.msrb.mxu0 %v10353_v56  ;;  %6078 = vmatmul.bf16.vlgmr.msra.gmra.mxu1 %v7181_v6  ;;  %v10383_v56 = vld [vmem:[#allocation5 + $0x428] sm:$0xff]  ;;  %v10380_v4 = vld [vmem:[#allocation5 + $0x410] sm:$0xff] }
  0x71   :  { %6126 = vmatpush.bf16.msrb.mxu1 %v10361_v57  ;;  %6092 = vmatmul.bf16.vlgmr.msra.gmra.mxu2 %v7185_v5  ;;  %v10391_v57 = vld [vmem:[#allocation5 + $0x468] sm:$0xff]  ;;  %v10388_v5 = vld [vmem:[#allocation5 + $0x450] sm:$0xff] }
  0x72   :  { %6140 = vmatpush.bf16.msrb.mxu2 %v10369_v2  ;;  %6106 = vmatmul.bf16.vlgmr.msra.gmra.mxu3 %v7189_v7  ;;  %v10397_v2 = vld [vmem:[#allocation5 + $0x498] sm:$0xff]  ;;  %v10396_v6 = vld [vmem:[#allocation5 + $0x490] sm:$0xff] }
  0x73   :  { %6154 = vmatpush.bf16.msrb.mxu3 %v10377_v3  ;;  %v10405_v3 = vld [vmem:[#allocation5 + $0x4d8] sm:$0xff]  ;;  %v10404_v7 = vld [vmem:[#allocation5 + $0x4d0] sm:$0xff] }
  0x74   :  { %6113 = vmatpush.bf16.msrb.mxu0 %v10352_v8  ;;  %v10379_v8 = vld [vmem:[#allocation5 + $0x408] sm:$0xff] }
  0x75   :  { %6127 = vmatpush.bf16.msrb.mxu1 %v10360_v9  ;;  %v10387_v9 = vld [vmem:[#allocation5 + $0x448] sm:$0xff] }
  0x76   :  { %6141 = vmatpush.bf16.msrb.mxu2 %v10368_v10  ;;  %v10395_v10 = vld [vmem:[#allocation5 + $0x488] sm:$0xff] }
  0x77   :  { %6155 = vmatpush.bf16.msrb.mxu3 %v10376_v11  ;;  %v10403_v11 = vld [vmem:[#allocation5 + $0x4c8] sm:$0xff] }
  0x78   :  { %6114 = vmatpush.bf16.msrb.mxu0 %v10351_v12  ;;  %v10378_v12 = vld [vmem:[#allocation5 + $0x400] sm:$0xff] }
  0x79   :  { %6128 = vmatpush.bf16.msrb.mxu1 %v10359_v13  ;;  %v10386_v13 = vld [vmem:[#allocation5 + $0x440] sm:$0xff] }
  0x7a   :  { %6142 = vmatpush.bf16.msrb.mxu2 %v10367_v14  ;;  %v10394_v14 = vld [vmem:[#allocation5 + $0x480] sm:$0xff] }
  0x7b   :  { %6156 = vmatpush.bf16.msrb.mxu3 %v10375_v15  ;;  %v10402_v15 = vld [vmem:[#allocation5 + $0x4c0] sm:$0xff] }
  0x7c   :  { %6115 = vmatpush.bf16.msrb.mxu0 %v10350_v16  ;;  %v10417_v16 = vld [vmem:[#allocation5 + $0x538] sm:$0xff] }
  0x7d   :  { %6129 = vmatpush.bf16.msrb.mxu1 %v10358_v17  ;;  %v10425_v17 = vld [vmem:[#allocation5 + $0x578] sm:$0xff] }
  0x7e   :  { %6143 = vmatpush.bf16.msrb.mxu2 %v10366_v18  ;;  %v7208_v18 = vld [vmem:[#allocation2 + $0x40] sm:$0xf] }
  0x7f   :  { %6157 = vmatpush.bf16.msrb.mxu3 %v10374_v19  ;;  %v10216_v19 = vld [vmem:[#allocation2 + $0x18c] sm:$0xf0] }
  0x80   :  { %6116 = vmatpush.bf16.msrb.mxu0 %v10349_v20  ;;  %v7216_v20 = vld [vmem:[#allocation2 + $0x48] sm:$0xf] }
  0x81   :  { %6130 = vmatpush.bf16.msrb.mxu1 %v10357_v21  ;;  %v10217_v21 = vld [vmem:[#allocation2 + $0x194] sm:$0xf0] }
  0x82   :  { %6144 = vmatpush.bf16.msrb.mxu2 %v10365_v22  ;;  %v10174_v22 = vld [vmem:[#allocation2 + $0x44] sm:$0xf] }
  0x83   :  { %6158 = vmatpush.bf16.msrb.mxu3 %v10373_v23  ;;  %v7210_v23 = vld [vmem:[#allocation2 + $0x190] sm:$0xf0] }
  0x84   :  { %6117 = vmatpush.bf16.msrb.mxu0 %v10348_v24  ;;  %v10175_v24 = vld [vmem:[#allocation2 + $0x4c] sm:$0xf] }
  0x85   :  { %6131 = vmatpush.bf16.msrb.mxu1 %v10356_v25  ;;  %v7218_v25 = vld [vmem:[#allocation2 + $0x198] sm:$0xf0] }
  0x86   :  { %6145 = vmatpush.bf16.msrb.mxu2 %v10364_v26  ;;  %v10433_v26 = vld [vmem:[#allocation5 + $0x5b8] sm:$0xff] }
  0x87   :  { %6159 = vmatpush.bf16.msrb.mxu3 %v10372_v27  ;;  %v10441_v27 = vld [vmem:[#allocation5 + $0x5f8] sm:$0xff] }
  0x88   :  { %6118 = vmatpush.bf16.msrb.mxu0 %v10347_v28  ;;  %v7209_v28 = vor.u32 %v10216_v19, %v7208_v18 }
  0x89   :  { %6132 = vmatpush.bf16.msrb.mxu1 %v10355_v29  ;;  %v7217_v29 = vor.u32 %v10217_v21, %v7216_v20 }
  0x8a   :  { %6146 = vmatpush.bf16.msrb.mxu2 %v10363_v30  ;;  %v7213_v30 = vor.u32 %v10174_v22, %v7210_v23  ;;  %v10448_v23 = vld [vmem:[#allocation5 + $0x630] sm:$0xff] }
  0x8b   :  { %6160 = vmatpush.bf16.msrb.mxu3 %v10371_v31  ;;  %v7221_v31 = vor.u32 %v10175_v24, %v7218_v25  ;;  %v10456_v24 = vld [vmem:[#allocation5 + $0x670] sm:$0xff] }
  0x8c   :  { %6119 = vmatpush.bf16.msrb.mxu0 %v10346_v32  ;;  %v10416_v32 = vld [vmem:[#allocation5 + $0x530] sm:$0xff] }
  0x8d   :  { %6133 = vmatpush.bf16.msrb.mxu1 %v10354_v33  ;;  %v10424_v33 = vld [vmem:[#allocation5 + $0x570] sm:$0xff] }
  0x8e   :  { %6147 = vmatpush.bf16.msrb.mxu2 %v10362_v34  ;;  %v10432_v34 = vld [vmem:[#allocation5 + $0x5b0] sm:$0xff] }
  0x8f   :  { %6161 = vmatpush.bf16.msrb.mxu3 %v10370_v35  ;;  %6120 = vmatmul.bf16.vlgmr.msrb.gmra.mxu0 %v7193_v48  ;;  %v10440_v35 = vld [vmem:[#allocation5 + $0x5f0] sm:$0xff] }
  0x90   :  { %6168 = vmatpush.bf16.msra.mxu0 %v10385_v36  ;;  %6134 = vmatmul.bf16.vlgmr.msrb.gmra.mxu1 %v7197_v50  ;;  %v10415_v36 = vld [vmem:[#allocation5 + $0x528] sm:$0xff]  ;;  %v10421_v50 = vld [vmem:[#allocation5 + $0x558] sm:$0xff]  ;;  %v10464_v25 = vld [vmem:[#allocation5 + $0x6b0] sm:$0xff] }
  0x91   :  { %6182 = vmatpush.bf16.msra.mxu1 %v10393_v37  ;;  %6148 = vmatmul.bf16.vlgmr.msrb.gmra.mxu2 %v7201_v49  ;;  %v10423_v37 = vld [vmem:[#allocation5 + $0x568] sm:$0xff]  ;;  %v10413_v49 = vld [vmem:[#allocation5 + $0x518] sm:$0xff] }
  0x92   :  { %6196 = vmatpush.bf16.msra.mxu2 %v10401_v46  ;;  %6162 = vmatmul.bf16.vlgmr.msrb.gmra.mxu3 %v7205_v51  ;;  %v10438_v46 = vld [vmem:[#allocation5 + $0x5e0] sm:$0xff]  ;;  %v10429_v51 = vld [vmem:[#allocation5 + $0x598] sm:$0xff] }
  0x93   :  { %6210 = vmatpush.bf16.msra.mxu3 %v10409_v47 }
  0x94   :  { %6169 = vmatpush.bf16.msra.mxu0 %v10384_v52  ;;  %v10437_v52 = vld [vmem:[#allocation5 + $0x5d8] sm:$0xff] }
  0x95   :  { %6183 = vmatpush.bf16.msra.mxu1 %v10392_v53 }
  0x96   :  { %6197 = vmatpush.bf16.msra.mxu2 %v10400_v54 }
  0x97   :  { %6211 = vmatpush.bf16.msra.mxu3 %v10408_v55 }
  0x98   :  { %6170 = vmatpush.bf16.msra.mxu0 %v10383_v56  ;;  %v10412_v56 = vld [vmem:[#allocation5 + $0x510] sm:$0xff] }
  0x99   :  { %6184 = vmatpush.bf16.msra.mxu1 %v10391_v57  ;;  %v10420_v57 = vld [vmem:[#allocation5 + $0x550] sm:$0xff] }
  0x9a   :  { %6198 = vmatpush.bf16.msra.mxu2 %v10399_v58 }
  0x9b   :  { %6212 = vmatpush.bf16.msra.mxu3 %v10407_v59  ;;  %v10428_v59 = vld [vmem:[#allocation5 + $0x590] sm:$0xff] }
  0x9c   :  { %6171 = vmatpush.bf16.msra.mxu0 %v10382_v60  ;;  %v10436_v60 = vld [vmem:[#allocation5 + $0x5d0] sm:$0xff] }
  0x9d   :  { %6185 = vmatpush.bf16.msra.mxu1 %v10390_v61  ;;  %v10411_v61 = vld [vmem:[#allocation5 + $0x508] sm:$0xff] }
  0x9e   :  { %6199 = vmatpush.bf16.msra.mxu2 %v10398_v62  ;;  %v10419_v62 = vld [vmem:[#allocation5 + $0x548] sm:$0xff] }
  0x9f   :  { %6213 = vmatpush.bf16.msra.mxu3 %v10406_v63  ;;  %v10427_v63 = vld [vmem:[#allocation5 + $0x588] sm:$0xff] }
  0xa0   :  { %6172 = vmatpush.bf16.msra.mxu0 %v10381_v0  ;;  %v10435_v0 = vld [vmem:[#allocation5 + $0x5c8] sm:$0xff] }
  0xa1   :  { %6186 = vmatpush.bf16.msra.mxu1 %v10389_v1  ;;  %v10410_v1 = vld [vmem:[#allocation5 + $0x500] sm:$0xff] }
  0xa2   :  { %6200 = vmatpush.bf16.msra.mxu2 %v10397_v2  ;;  %v10418_v2 = vld [vmem:[#allocation5 + $0x540] sm:$0xff] }
  0xa3   :  { %6214 = vmatpush.bf16.msra.mxu3 %v10405_v3  ;;  %v10426_v3 = vld [vmem:[#allocation5 + $0x580] sm:$0xff] }
  0xa4   :  { %6173 = vmatpush.bf16.msra.mxu0 %v10380_v4  ;;  %v10434_v4 = vld [vmem:[#allocation5 + $0x5c0] sm:$0xff] }
  0xa5   :  { %6187 = vmatpush.bf16.msra.mxu1 %v10388_v5  ;;  %v10449_v5 = vld [vmem:[#allocation5 + $0x638] sm:$0xff] }
  0xa6   :  { %6201 = vmatpush.bf16.msra.mxu2 %v10396_v6  ;;  %v10457_v6 = vld [vmem:[#allocation5 + $0x678] sm:$0xff] }
  0xa7   :  { %6215 = vmatpush.bf16.msra.mxu3 %v10404_v7  ;;  %v7224_v7 = vld [vmem:[#allocation2 + $0x50] sm:$0xf] }
  0xa8   :  { %6174 = vmatpush.bf16.msra.mxu0 %v10379_v8  ;;  %v10218_v8 = vld [vmem:[#allocation2 + $0x19c] sm:$0xf0] }
  0xa9   :  { %6188 = vmatpush.bf16.msra.mxu1 %v10387_v9  ;;  %v7232_v9 = vld [vmem:[#allocation2 + $0x58] sm:$0xf]  ;;  %v7225_v18 = vor.u32 %v10218_v8, %v7224_v7  ;;  %v7250_v7 = vld [vmem:[#allocation2 + $0x1b8] sm:$0xf0] }
  0xaa   :  { %6202 = vmatpush.bf16.msra.mxu2 %v10395_v10  ;;  %v10219_v10 = vld [vmem:[#allocation2 + $0x1a4] sm:$0xf0]  ;;  %v10497_v8 = vld [vmem:[#allocation5 + $0x7b8] sm:$0xff] }
  0xab   :  { %6216 = vmatpush.bf16.msra.mxu3 %v10403_v11  ;;  %v10176_v11 = vld [vmem:[#allocation2 + $0x54] sm:$0xf]  ;;  %v7233_v19 = vor.u32 %v10219_v10, %v7232_v9  ;;  %v10505_v9 = vld [vmem:[#allocation5 + $0x7f8] sm:$0xff] }
  0xac   :  { %6175 = vmatpush.bf16.msra.mxu0 %v10378_v12  ;;  %v5953_v41 = vpop.f32.mrf.mxu0  ;;  %v7226_v12 = vld [vmem:[#allocation2 + $0x1a0] sm:$0xf0] }
  0xad   :  { %6189 = vmatpush.bf16.msra.mxu1 %v10386_v13  ;;  %v5954_v44 = vadd.f32 %v11074_v38, %v5953_v41  ;;  %v5967_v47 = vpop.f32.mrf.mxu1  ;;  %v10177_v13 = vld [vmem:[#allocation2 + $0x5c] sm:$0xf]  ;;  %v7229_v20 = vor.u32 %v10176_v11, %v7226_v12 }
  0xae   :  { %6203 = vmatpush.bf16.msra.mxu2 %v10394_v14  ;;  %v7234_v14 = vld [vmem:[#allocation2 + $0x1a8] sm:$0xf0] }
  0xaf   :  { %6217 = vmatpush.bf16.msra.mxu3 %v10402_v15  ;;  %6176 = vmatmul.bf16.vlgmr.msra.gmra.mxu0 %v7209_v28  ;;  %v5968_v48 = vadd.f32 %v5967_v47, %v5954_v44  ;;  %v10465_v15 = vld [vmem:[#allocation5 + $0x6b8] sm:$0xff]  ;;  %v7237_v21 = vor.u32 %v10177_v13, %v7234_v14  ;;  %v10447_v28 = vld [vmem:[#allocation5 + $0x628] sm:$0xff] }
  0xb0   :  { %6224 = vmatpush.bf16.msrb.mxu0 %v10417_v16  ;;  %6190 = vmatmul.bf16.vlgmr.msra.gmra.mxu1 %v7213_v30  ;;  %v10473_v16 = vld [vmem:[#allocation5 + $0x6f8] sm:$0xff]  ;;  %v10463_v30 = vld [vmem:[#allocation5 + $0x6a8] sm:$0xff] }
  0xb1   :  { %6238 = vmatpush.bf16.msrb.mxu1 %v10425_v17  ;;  %6204 = vmatmul.bf16.vlgmr.msra.gmra.mxu2 %v7217_v29  ;;  %v10455_v29 = vld [vmem:[#allocation5 + $0x668] sm:$0xff]  ;;  %v10461_v44 = vld [vmem:[#allocation5 + $0x698] sm:$0xff] }
  0xb2   :  { %6252 = vmatpush.bf16.msrb.mxu2 %v10433_v26  ;;  %6218 = vmatmul.bf16.vlgmr.msra.gmra.mxu3 %v7221_v31  ;;  %v10472_v26 = vld [vmem:[#allocation5 + $0x6f0] sm:$0xff]  ;;  %v10471_v31 = vld [vmem:[#allocation5 + $0x6e8] sm:$0xff] }
  0xb3   :  { %6266 = vmatpush.bf16.msrb.mxu3 %v10441_v27 }
  0xb4   :  { %6225 = vmatpush.bf16.msrb.mxu0 %v10416_v32  ;;  %v5981_v53 = vpop.f32.mrf.mxu2  ;;  %v11079_v17 = vpop.f32.mrf.mxu0 }
  0xb5   :  { %6239 = vmatpush.bf16.msrb.mxu1 %v10424_v33  ;;  %v5982_v54 = vadd.f32 %v5981_v53, %v5968_v48  ;;  %v5995_v55 = vpop.f32.mrf.mxu3  ;;  %v11081_v22 = vpop.f32.mrf.mxu1  ;;  %v10468_v53 = vld [vmem:[#allocation5 + $0x6d0] sm:$0xff] }
  0xb6   :  { %6253 = vmatpush.bf16.msrb.mxu2 %v10432_v34 }
  0xb7   :  { %6267 = vmatpush.bf16.msrb.mxu3 %v10440_v35  ;;  %v11077_v58 = vadd.f32 %v5995_v55, %v5982_v54  ;;  %v10446_v35 = vld [vmem:[#allocation5 + $0x620] sm:$0xff]  ;;  %v10443_v54 = vld [vmem:[#allocation5 + $0x608] sm:$0xff] }
  0xb8   :  { %6226 = vmatpush.bf16.msrb.mxu0 %v10415_v36  ;;  %v10454_v36 = vld [vmem:[#allocation5 + $0x660] sm:$0xff]  ;;  %v10451_v55 = vld [vmem:[#allocation5 + $0x648] sm:$0xff] }
  0xb9   :  { %6240 = vmatpush.bf16.msrb.mxu1 %v10423_v37  ;;  %v10462_v37 = vld [vmem:[#allocation5 + $0x6a0] sm:$0xff] }
  0xba   :  { %6254 = vmatpush.bf16.msrb.mxu2 %v10431_v39  ;;  %v10470_v39 = vld [vmem:[#allocation5 + $0x6e0] sm:$0xff] }
  0xbb   :  { %6268 = vmatpush.bf16.msrb.mxu3 %v10439_v40 }
  0xbc   :  { %6227 = vmatpush.bf16.msrb.mxu0 %v10414_v42  ;;  %v11083_v27 = vpop.f32.mrf.mxu2  ;;  %v10445_v42 = vld [vmem:[#allocation5 + $0x618] sm:$0xff] }
  0xbd   :  { %6241 = vmatpush.bf16.msrb.mxu1 %v10422_v43  ;;  %v11085_v32 = vpop.f32.mrf.mxu3  ;;  %v10453_v43 = vld [vmem:[#allocation5 + $0x658] sm:$0xff] }
  0xbe   :  { %6255 = vmatpush.bf16.msrb.mxu2 %v10430_v45  ;;  %v10469_v45 = vld [vmem:[#allocation5 + $0x6d8] sm:$0xff] }
  0xbf   :  { %6269 = vmatpush.bf16.msrb.mxu3 %v10438_v46 }
  0xc0   :  { %6228 = vmatpush.bf16.msrb.mxu0 %v10413_v49 }
  0xc1   :  { %6242 = vmatpush.bf16.msrb.mxu1 %v10421_v50  ;;  %v10444_v50 = vld [vmem:[#allocation5 + $0x610] sm:$0xff] }
  0xc2   :  { %6256 = vmatpush.bf16.msrb.mxu2 %v10429_v51  ;;  %v10452_v51 = vld [vmem:[#allocation5 + $0x650] sm:$0xff] }
  0xc3   :  { %6270 = vmatpush.bf16.msrb.mxu3 %v10437_v52  ;;  %v10460_v52 = vld [vmem:[#allocation5 + $0x690] sm:$0xff] }
  0xc4   :  { %6229 = vmatpush.bf16.msrb.mxu0 %v10412_v56  ;;  %v10459_v56 = vld [vmem:[#allocation5 + $0x688] sm:$0xff] }
  0xc5   :  { %6243 = vmatpush.bf16.msrb.mxu1 %v10420_v57  ;;  %v10467_v57 = vld [vmem:[#allocation5 + $0x6c8] sm:$0xff] }
  0xc6   :  { %6257 = vmatpush.bf16.msrb.mxu2 %v10428_v59  ;;  %v10450_v59 = vld [vmem:[#allocation5 + $0x640] sm:$0xff] }
  0xc7   :  { %6271 = vmatpush.bf16.msrb.mxu3 %v10436_v60  ;;  %v10458_v60 = vld [vmem:[#allocation5 + $0x680] sm:$0xff] }
  0xc8   :  { %6230 = vmatpush.bf16.msrb.mxu0 %v10411_v61  ;;  %v10466_v61 = vld [vmem:[#allocation5 + $0x6c0] sm:$0xff] }
  0xc9   :  { %6244 = vmatpush.bf16.msrb.mxu1 %v10419_v62  ;;  %v10481_v62 = vld [vmem:[#allocation5 + $0x738] sm:$0xff] }
  0xca   :  { %6258 = vmatpush.bf16.msrb.mxu2 %v10427_v63  ;;  %v10489_v63 = vld [vmem:[#allocation5 + $0x778] sm:$0xff] }
  0xcb   :  { %6272 = vmatpush.bf16.msrb.mxu3 %v10435_v0  ;;  %v7240_v0 = vld [vmem:[#allocation2 + $0x60] sm:$0xf] }
  0xcc   :  { %6231 = vmatpush.bf16.msrb.mxu0 %v10410_v1  ;;  %v6009_v33 = vpop.f32.mrf.mxu0  ;;  %v10220_v1 = vld [vmem:[#allocation2 + $0x1ac] sm:$0xf0] }
  0xcd   :  { %6245 = vmatpush.bf16.msrb.mxu1 %v10418_v2  ;;  %v6010_v34 = vadd.f32 %v6009_v33, %v11077_v58  ;;  %v6023_v40 = vpop.f32.mrf.mxu1  ;;  %v10442_v58 = vld [vmem:[#allocation5 + $0x600] sm:$0xff]  ;;  %v7248_v2 = vld [vmem:[#allocation2 + $0x68] sm:$0xf]  ;;  %v7241_v10 = vor.u32 %v10220_v1, %v7240_v0  ;;  %v10180_v1 = vld [vmem:[#allocation2 + $0x74] sm:$0xf] }
  0xce   :  { %6259 = vmatpush.bf16.msrb.mxu2 %v10426_v3  ;;  %v10221_v3 = vld [vmem:[#allocation2 + $0x1b4] sm:$0xf0]  ;;  %v10486_v33 = vld [vmem:[#allocation5 + $0x760] sm:$0xff]  ;;  %v10223_v0 = vld [vmem:[#allocation2 + $0x1c4] sm:$0xf0] }
  0xcf   :  { %6273 = vmatpush.bf16.msrb.mxu3 %v10434_v4  ;;  %6232 = vmatmul.bf16.vlgmr.msrb.gmra.mxu0 %v7225_v18  ;;  %v6024_v41 = vadd.f32 %v6023_v40, %v6010_v34  ;;  %v10178_v4 = vld [vmem:[#allocation2 + $0x64] sm:$0xf]  ;;  %v7249_v11 = vor.u32 %v10221_v3, %v7248_v2  ;;  %v10488_v18 = vld [vmem:[#allocation5 + $0x770] sm:$0xff]  ;;  %v10485_v40 = vld [vmem:[#allocation5 + $0x758] sm:$0xff] }
  0xd0   :  { %6280 = vmatpush.bf16.msra.mxu0 %v10449_v5  ;;  %6246 = vmatmul.bf16.vlgmr.msrb.gmra.mxu1 %v7229_v20  ;;  %v7242_v5 = vld [vmem:[#allocation2 + $0x1b0] sm:$0xf0]  ;;  %v7258_v2 = vld [vmem:[#allocation2 + $0x1c0] sm:$0xf0]  ;;  %v10181_v3 = vld [vmem:[#allocation2 + $0x7c] sm:$0xf] }
  0xd1   :  { %6294 = vmatpush.bf16.msra.mxu1 %v10457_v6  ;;  %6260 = vmatmul.bf16.vlgmr.msrb.gmra.mxu2 %v7233_v19  ;;  %v10179_v6 = vld [vmem:[#allocation2 + $0x6c] sm:$0xf]  ;;  %v7245_v13 = vor.u32 %v10178_v4, %v7242_v5  ;;  %v10496_v19 = vld [vmem:[#allocation5 + $0x7b0] sm:$0xff]  ;;  %v10529_v5 = vld [vmem:[#allocation5 + $0x8b8] sm:$0xff] }
  0xd2   :  { %6308 = vmatpush.bf16.msra.mxu2 %v10465_v15  ;;  %6274 = vmatmul.bf16.vlgmr.msrb.gmra.mxu3 %v7237_v21  ;;  %v7253_v14 = vor.u32 %v10179_v6, %v7250_v7  ;;  %v10504_v20 = vld [vmem:[#allocation5 + $0x7f0] sm:$0xff]  ;;  %v10479_v21 = vld [vmem:[#allocation5 + $0x728] sm:$0xff]  ;;  %v10537_v6 = vld [vmem:[#allocation5 + $0x8f8] sm:$0xff] }
  0xd3   :  { %6322 = vmatpush.bf16.msra.mxu3 %v10473_v16  ;;  %v10480_v16 = vld [vmem:[#allocation5 + $0x730] sm:$0xff]  ;;  %v7266_v4 = vld [vmem:[#allocation2 + $0x1c8] sm:$0xf0] }
  0xd4   :  { %6281 = vmatpush.bf16.msra.mxu0 %v10448_v23  ;;  %v6037_v46 = vpop.f32.mrf.mxu2  ;;  %v11090_v12 = vpop.f32.mrf.mxu0  ;;  %v10487_v23 = vld [vmem:[#allocation5 + $0x768] sm:$0xff] }
  0xd5   :  { %6295 = vmatpush.bf16.msra.mxu1 %v10456_v24  ;;  %v6038_v47 = vadd.f32 %v6037_v46, %v6024_v41  ;;  %v6051_v48 = vpop.f32.mrf.mxu3  ;;  %v11092_v15 = vpop.f32.mrf.mxu1  ;;  %v10493_v41 = vld [vmem:[#allocation5 + $0x798] sm:$0xff] }
  0xd6   :  { %6309 = vmatpush.bf16.msra.mxu2 %v10464_v25  ;;  %v10495_v25 = vld [vmem:[#allocation5 + $0x7a8] sm:$0xff] }
  0xd7   :  { %6323 = vmatpush.bf16.msra.mxu3 %v10472_v26  ;;  %v11088_v49 = vadd.f32 %v6051_v48, %v6038_v47  ;;  %v10503_v26 = vld [vmem:[#allocation5 + $0x7e8] sm:$0xff]  ;;  %v10476_v47 = vld [vmem:[#allocation5 + $0x710] sm:$0xff] }
  0xd8   :  { %6282 = vmatpush.bf16.msra.mxu0 %v10447_v28  ;;  %v10484_v48 = vld [vmem:[#allocation5 + $0x750] sm:$0xff] }
  0xd9   :  { %6296 = vmatpush.bf16.msra.mxu1 %v10455_v29 }
  0xda   :  { %6310 = vmatpush.bf16.msra.mxu2 %v10463_v30 }
  0xdb   :  { %6324 = vmatpush.bf16.msra.mxu3 %v10471_v31  ;;  %v10478_v31 = vld [vmem:[#allocation5 + $0x720] sm:$0xff] }
  0xdc   :  { %6283 = vmatpush.bf16.msra.mxu0 %v10446_v35  ;;  %v11094_v24 = vpop.f32.mrf.mxu2  ;;  %v10494_v35 = vld [vmem:[#allocation5 + $0x7a0] sm:$0xff] }
  0xdd   :  { %6297 = vmatpush.bf16.msra.mxu1 %v10454_v36  ;;  %v11096_v28 = vpop.f32.mrf.mxu3  ;;  %v10502_v36 = vld [vmem:[#allocation5 + $0x7e0] sm:$0xff] }
  0xde   :  { %6311 = vmatpush.bf16.msra.mxu2 %v10462_v37 }
  0xdf   :  { %6325 = vmatpush.bf16.msra.mxu3 %v10470_v39  ;;  %v10477_v39 = vld [vmem:[#allocation5 + $0x718] sm:$0xff] }
  0xe0   :  { %6284 = vmatpush.bf16.msra.mxu0 %v10445_v42  ;;  %v10501_v42 = vld [vmem:[#allocation5 + $0x7d8] sm:$0xff] }
  0xe1   :  { %6298 = vmatpush.bf16.msra.mxu1 %v10453_v43 }
  0xe2   :  { %6312 = vmatpush.bf16.msra.mxu2 %v10461_v44 }
  0xe3   :  { %6326 = vmatpush.bf16.msra.mxu3 %v10469_v45 }
  0xe4   :  { %6285 = vmatpush.bf16.msra.mxu0 %v10444_v50  ;;  %v10500_v50 = vld [vmem:[#allocation5 + $0x7d0] sm:$0xff] }
  0xe5   :  { %6299 = vmatpush.bf16.msra.mxu1 %v10452_v51  ;;  %v10475_v51 = vld [vmem:[#allocation5 + $0x708] sm:$0xff] }
  0xe6   :  { %6313 = vmatpush.bf16.msra.mxu2 %v10460_v52  ;;  %v10483_v52 = vld [vmem:[#allocation5 + $0x748] sm:$0xff] }
  0xe7   :  { %6327 = vmatpush.bf16.msra.mxu3 %v10468_v53  ;;  %v10491_v53 = vld [vmem:[#allocation5 + $0x788] sm:$0xff] }
  0xe8   :  { %6286 = vmatpush.bf16.msra.mxu0 %v10443_v54  ;;  %v10499_v54 = vld [vmem:[#allocation5 + $0x7c8] sm:$0xff] }
  0xe9   :  { %6300 = vmatpush.bf16.msra.mxu1 %v10451_v55  ;;  %v10474_v55 = vld [vmem:[#allocation5 + $0x700] sm:$0xff] }
  0xea   :  { %6314 = vmatpush.bf16.msra.mxu2 %v10459_v56  ;;  %v10482_v56 = vld [vmem:[#allocation5 + $0x740] sm:$0xff] }
  0xeb   :  { %6328 = vmatpush.bf16.msra.mxu3 %v10467_v57  ;;  %v10490_v57 = vld [vmem:[#allocation5 + $0x780] sm:$0xff] }
  0xec   :  { %6287 = vmatpush.bf16.msra.mxu0 %v10442_v58  ;;  %v6065_v29 = vpop.f32.mrf.mxu0  ;;  %v10498_v58 = vld [vmem:[#allocation5 + $0x7c0] sm:$0xff] }
  0xed   :  { %6301 = vmatpush.bf16.msra.mxu1 %v10450_v59  ;;  %v6066_v30 = vadd.f32 %v6065_v29, %v11088_v49  ;;  %v6079_v34 = vpop.f32.mrf.mxu1  ;;  %v10492_v49 = vld [vmem:[#allocation5 + $0x790] sm:$0xff]  ;;  %v10513_v59 = vld [vmem:[#allocation5 + $0x838] sm:$0xff] }
  0xee   :  { %6315 = vmatpush.bf16.msra.mxu2 %v10458_v60  ;;  %v10521_v60 = vld [vmem:[#allocation5 + $0x878] sm:$0xff] }
  0xef   :  { %6329 = vmatpush.bf16.msra.mxu3 %v10466_v61  ;;  %6288 = vmatmul.bf16.vlgmr.msra.gmra.mxu0 %v7241_v10  ;;  %v6080_v37 = vadd.f32 %v6079_v34, %v6066_v30  ;;  %v7256_v61 = vld [vmem:[#allocation2 + $0x70] sm:$0xf]  ;;  %v7261_v10 = vor.u32 %v10180_v1, %v7258_v2  ;;  %v10518_v34 = vld [vmem:[#allocation5 + $0x860] sm:$0xff]  ;;  %v10225_v1 = vld [vmem:[#allocation2 + $0x1d4] sm:$0xf0] }
  0xf0   :  { %6336 = vmatpush.bf16.msrb.mxu0 %v10481_v62  ;;  %6302 = vmatmul.bf16.vlgmr.msra.gmra.mxu1 %v7245_v13  ;;  %v10222_v62 = vld [vmem:[#allocation2 + $0x1bc] sm:$0xf0]  ;;  %v10182_v2 = vld [vmem:[#allocation2 + $0x84] sm:$0xf] }
  0xf1   :  { %6350 = vmatpush.bf16.msrb.mxu1 %v10489_v63  ;;  %6316 = vmatmul.bf16.vlgmr.msra.gmra.mxu2 %v7249_v11  ;;  %v7264_v63 = vld [vmem:[#allocation2 + $0x78] sm:$0xf]  ;;  %v7257_v7 = vor.u32 %v10222_v62, %v7256_v61  ;;  %v7269_v11 = vor.u32 %v10181_v3, %v7266_v4  ;;  %v7272_v62 = vld [vmem:[#allocation2 + $0x80] sm:$0xf]  ;;  %v7274_v3 = vld [vmem:[#allocation2 + $0x1d0] sm:$0xf0] }
  0xf2   :  { %6364 = vmatpush.bf16.msrb.mxu2 %v10497_v8  ;;  %6330 = vmatmul.bf16.vlgmr.msra.gmra.mxu3 %v7253_v14  ;;  %v7265_v8 = vor.u32 %v10223_v0, %v7264_v63  ;;  %v10512_v14 = vld [vmem:[#allocation5 + $0x830] sm:$0xff]  ;;  %v10553_v61 = vld [vmem:[#allocation5 + $0x978] sm:$0xff]  ;;  %v7280_v0 = vld [vmem:[#allocation2 + $0x88] sm:$0xf] }
  0xf3   :  { %6378 = vmatpush.bf16.msrb.mxu3 %v10505_v9  ;;  %v10224_v63 = vld [vmem:[#allocation2 + $0x1cc] sm:$0xf0]  ;;  %v10183_v4 = vld [vmem:[#allocation2 + $0x8c] sm:$0xf] }
  0xf4   :  { %6337 = vmatpush.bf16.msrb.mxu0 %v10480_v16  ;;  %v6093_v43 = vpop.f32.mrf.mxu2  ;;  %v11101_v9 = vpop.f32.mrf.mxu0  ;;  %v10520_v16 = vld [vmem:[#allocation5 + $0x870] sm:$0xff] }
  0xf5   :  { %6351 = vmatpush.bf16.msrb.mxu1 %v10488_v18  ;;  %v6094_v44 = vadd.f32 %v6093_v43, %v6080_v37  ;;  %v6107_v45 = vpop.f32.mrf.mxu3  ;;  %v11103_v13 = vpop.f32.mrf.mxu1  ;;  %v10528_v18 = vld [vmem:[#allocation5 + $0x8b0] sm:$0xff]  ;;  %v10534_v37 = vld [vmem:[#allocation5 + $0x8e0] sm:$0xff]  ;;  %v10533_v43 = vld [vmem:[#allocation5 + $0x8d8] sm:$0xff] }
  0xf6   :  { %6365 = vmatpush.bf16.msrb.mxu2 %v10496_v19  ;;  %v10536_v19 = vld [vmem:[#allocation5 + $0x8f0] sm:$0xff] }
  0xf7   :  { %6379 = vmatpush.bf16.msrb.mxu3 %v10504_v20  ;;  %v11099_v46 = vadd.f32 %v6107_v45, %v6094_v44  ;;  %v10511_v20 = vld [vmem:[#allocation5 + $0x828] sm:$0xff] }
  0xf8   :  { %6338 = vmatpush.bf16.msrb.mxu0 %v10479_v21  ;;  %v10519_v21 = vld [vmem:[#allocation5 + $0x868] sm:$0xff] }
  0xf9   :  { %6352 = vmatpush.bf16.msrb.mxu1 %v10487_v23 }
  0xfa   :  { %6366 = vmatpush.bf16.msrb.mxu2 %v10495_v25  ;;  %v10527_v25 = vld [vmem:[#allocation5 + $0x8a8] sm:$0xff] }
  0xfb   :  { %6380 = vmatpush.bf16.msrb.mxu3 %v10503_v26  ;;  %v10535_v26 = vld [vmem:[#allocation5 + $0x8e8] sm:$0xff] }
  0xfc   :  { %6339 = vmatpush.bf16.msrb.mxu0 %v10478_v31  ;;  %v11105_v23 = vpop.f32.mrf.mxu2 }
  0xfd   :  { %6353 = vmatpush.bf16.msrb.mxu1 %v10486_v33  ;;  %v11107_v29 = vpop.f32.mrf.mxu3  ;;  %v10510_v33 = vld [vmem:[#allocation5 + $0x820] sm:$0xff] }
  0xfe   :  { %6367 = vmatpush.bf16.msrb.mxu2 %v10494_v35 }
  0xff   :  { %6381 = vmatpush.bf16.msrb.mxu3 %v10502_v36  ;;  %v10526_v36 = vld [vmem:[#allocation5 + $0x8a0] sm:$0xff] }
 0x100   :  { %6340 = vmatpush.bf16.msrb.mxu0 %v10477_v39 }
 0x101   :  { %6354 = vmatpush.bf16.msrb.mxu1 %v10485_v40  ;;  %v10509_v40 = vld [vmem:[#allocation5 + $0x818] sm:$0xff] }
 0x102   :  { %6368 = vmatpush.bf16.msrb.mxu2 %v10493_v41  ;;  %v10517_v41 = vld [vmem:[#allocation5 + $0x858] sm:$0xff] }
 0x103   :  { %6382 = vmatpush.bf16.msrb.mxu3 %v10501_v42  ;;  %v10525_v42 = vld [vmem:[#allocation5 + $0x898] sm:$0xff] }
 0x104   :  { %6341 = vmatpush.bf16.msrb.mxu0 %v10476_v47 }
 0x105   :  { %6355 = vmatpush.bf16.msrb.mxu1 %v10484_v48  ;;  %v10508_v48 = vld [vmem:[#allocation5 + $0x810] sm:$0xff] }
 0x106   :  { %6369 = vmatpush.bf16.msrb.mxu2 %v10492_v49  ;;  %v10516_v49 = vld [vmem:[#allocation5 + $0x850] sm:$0xff] }
 0x107   :  { %6383 = vmatpush.bf16.msrb.mxu3 %v10500_v50  ;;  %v10524_v50 = vld [vmem:[#allocation5 + $0x890] sm:$0xff] }
 0x108   :  { %6342 = vmatpush.bf16.msrb.mxu0 %v10475_v51  ;;  %v10532_v51 = vld [vmem:[#allocation5 + $0x8d0] sm:$0xff] }
 0x109   :  { %6356 = vmatpush.bf16.msrb.mxu1 %v10483_v52  ;;  %v10507_v52 = vld [vmem:[#allocation5 + $0x808] sm:$0xff] }
 0x10a   :  { %6370 = vmatpush.bf16.msrb.mxu2 %v10491_v53  ;;  %v10515_v53 = vld [vmem:[#allocation5 + $0x848] sm:$0xff] }
 0x10b   :  { %6384 = vmatpush.bf16.msrb.mxu3 %v10499_v54  ;;  %v10523_v54 = vld [vmem:[#allocation5 + $0x888] sm:$0xff] }
 0x10c   :  { %6343 = vmatpush.bf16.msrb.mxu0 %v10474_v55  ;;  %v6121_v30 = vpop.f32.mrf.mxu0  ;;  %v10531_v55 = vld [vmem:[#allocation5 + $0x8c8] sm:$0xff] }
 0x10d   :  { %6357 = vmatpush.bf16.msrb.mxu1 %v10482_v56  ;;  %v6122_v31 = vadd.f32 %v6121_v30, %v11099_v46  ;;  %v6135_v35 = vpop.f32.mrf.mxu1  ;;  %v10506_v56 = vld [vmem:[#allocation5 + $0x800] sm:$0xff]  ;;  %v10551_v30 = vld [vmem:[#allocation5 + $0x968] sm:$0xff] }
 0x10e   :  { %6371 = vmatpush.bf16.msrb.mxu2 %v10490_v57  ;;  %v10514_v57 = vld [vmem:[#allocation5 + $0x840] sm:$0xff] }
 0x10f   :  { %6385 = vmatpush.bf16.msrb.mxu3 %v10498_v58  ;;  %6344 = vmatmul.bf16.vlgmr.msrb.gmra.mxu0 %v7257_v7  ;;  %v6136_v39 = vadd.f32 %v6135_v35, %v6122_v31  ;;  %v10522_v58 = vld [vmem:[#allocation5 + $0x880] sm:$0xff]  ;;  %v10569_v7 = vld [vmem:[#allocation5 + $0x9f8] sm:$0xff] }
 0x110   :  { %6392 = vmatpush.bf16.msra.mxu0 %v10513_v59  ;;  %6358 = vmatmul.bf16.vlgmr.msrb.gmra.mxu1 %v7261_v10  ;;  %v10530_v59 = vld [vmem:[#allocation5 + $0x8c0] sm:$0xff]  ;;  %v7281_v10 = vor.u32 %v10225_v1, %v7280_v0  ;;  %v10577_v1 = vld [vmem:[#allocation5 + $0xa38] sm:$0xff] }
 0x111   :  { %6406 = vmatpush.bf16.msra.mxu1 %v10521_v60  ;;  %6372 = vmatmul.bf16.vlgmr.msrb.gmra.mxu2 %v7265_v8  ;;  %v10545_v60 = vld [vmem:[#allocation5 + $0x938] sm:$0xff]  ;;  %v7273_v8 = vor.u32 %v10224_v63, %v7272_v62  ;;  %v10546_v62 = vld [vmem:[#allocation5 + $0x940] sm:$0xff] }
 0x112   :  { %6420 = vmatpush.bf16.msra.mxu2 %v10529_v5  ;;  %6386 = vmatmul.bf16.vlgmr.msrb.gmra.mxu3 %v7269_v11  ;;  %v7282_v5 = vld [vmem:[#allocation2 + $0x1d8] sm:$0xf0]  ;;  %v10554_v63 = vld [vmem:[#allocation5 + $0x980] sm:$0xff] }
 0x113   :  { %6434 = vmatpush.bf16.msra.mxu3 %v10537_v6  ;;  %v10561_v6 = vld [vmem:[#allocation5 + $0x9b8] sm:$0xff]  ;;  %v10562_v0 = vld [vmem:[#allocation5 + $0x9c0] sm:$0xff] }
 0x114   :  { %6393 = vmatpush.bf16.msra.mxu0 %v10512_v14  ;;  %v6149_v44 = vpop.f32.mrf.mxu2  ;;  %v11112_v11 = vpop.f32.mrf.mxu0  ;;  %v7277_v14 = vor.u32 %v10182_v2, %v7274_v3  ;;  %v10585_v2 = vld [vmem:[#allocation5 + $0xa78] sm:$0xff]  ;;  %v7288_v3 = vld [vmem:[#allocation2 + $0x90] sm:$0xf] }
 0x115   :  { %6407 = vmatpush.bf16.msra.mxu1 %v10520_v16  ;;  %v6150_v45 = vadd.f32 %v6149_v44, %v6136_v39  ;;  %v6163_v47 = vpop.f32.mrf.mxu3  ;;  %v7285_v16 = vor.u32 %v10183_v4, %v7282_v5  ;;  %v10542_v39 = vld [vmem:[#allocation5 + $0x920] sm:$0xff]  ;;  %v7296_v5 = vld [vmem:[#allocation2 + $0x98] sm:$0xf] }
 0x116   :  { %6421 = vmatpush.bf16.msra.mxu2 %v10528_v18  ;;  %v11114_v18 = vpop.f32.mrf.mxu1  ;;  %v10226_v4 = vld [vmem:[#allocation2 + $0x1dc] sm:$0xf0] }
 0x117   :  { %6435 = vmatpush.bf16.msra.mxu3 %v10536_v19  ;;  %v11110_v46 = vadd.f32 %v6163_v47, %v6150_v45  ;;  %v10544_v19 = vld [vmem:[#allocation5 + $0x930] sm:$0xff]  ;;  %v10541_v45 = vld [vmem:[#allocation5 + $0x918] sm:$0xff] }
 0x118   :  { %6394 = vmatpush.bf16.msra.mxu0 %v10511_v20  ;;  %v10552_v20 = vld [vmem:[#allocation5 + $0x970] sm:$0xff]  ;;  %v10549_v47 = vld [vmem:[#allocation5 + $0x958] sm:$0xff] }
 0x119   :  { %6408 = vmatpush.bf16.msra.mxu1 %v10519_v21  ;;  %v10560_v21 = vld [vmem:[#allocation5 + $0x9b0] sm:$0xff] }
 0x11a   :  { %6422 = vmatpush.bf16.msra.mxu2 %v10527_v25  ;;  %v10568_v25 = vld [vmem:[#allocation5 + $0x9f0] sm:$0xff] }
 0x11b   :  { %6436 = vmatpush.bf16.msra.mxu3 %v10535_v26  ;;  %v10543_v26 = vld [vmem:[#allocation5 + $0x928] sm:$0xff] }
 0x11c   :  { %6395 = vmatpush.bf16.msra.mxu0 %v10510_v33  ;;  %v11116_v31 = vpop.f32.mrf.mxu2  ;;  %v10559_v33 = vld [vmem:[#allocation5 + $0x9a8] sm:$0xff] }
 0x11d   :  { %6409 = vmatpush.bf16.msra.mxu1 %v10518_v34  ;;  %v10567_v34 = vld [vmem:[#allocation5 + $0x9e8] sm:$0xff]  ;;  %v11118_v35 = vpop.f32.mrf.mxu3 }
 0x11e   :  { %6423 = vmatpush.bf16.msra.mxu2 %v10526_v36 }
 0x11f   :  { %6437 = vmatpush.bf16.msra.mxu3 %v10534_v37 }
 0x120   :  { %6396 = vmatpush.bf16.msra.mxu0 %v10509_v40  ;;  %v10550_v40 = vld [vmem:[#allocation5 + $0x960] sm:$0xff] }
 0x121   :  { %6410 = vmatpush.bf16.msra.mxu1 %v10517_v41 }
 0x122   :  { %6424 = vmatpush.bf16.msra.mxu2 %v10525_v42  ;;  %v10558_v42 = vld [vmem:[#allocation5 + $0x9a0] sm:$0xff] }
 0x123   :  { %6438 = vmatpush.bf16.msra.mxu3 %v10533_v43  ;;  %v10566_v43 = vld [vmem:[#allocation5 + $0x9e0] sm:$0xff] }
 0x124   :  { %6397 = vmatpush.bf16.msra.mxu0 %v10508_v48  ;;  %v10557_v48 = vld [vmem:[#allocation5 + $0x998] sm:$0xff] }
 0x125   :  { %6411 = vmatpush.bf16.msra.mxu1 %v10516_v49  ;;  %v10565_v49 = vld [vmem:[#allocation5 + $0x9d8] sm:$0xff] }
 0x126   :  { %6425 = vmatpush.bf16.msra.mxu2 %v10524_v50 }
 0x127   :  { %6439 = vmatpush.bf16.msra.mxu3 %v10532_v51 }
 0x128   :  { %6398 = vmatpush.bf16.msra.mxu0 %v10507_v52 }
 0x129   :  { %6412 = vmatpush.bf16.msra.mxu1 %v10515_v53  ;;  %v10540_v53 = vld [vmem:[#allocation5 + $0x910] sm:$0xff] }
 0x12a   :  { %6426 = vmatpush.bf16.msra.mxu2 %v10523_v54  ;;  %v10548_v54 = vld [vmem:[#allocation5 + $0x950] sm:$0xff] }
 0x12b   :  { %6440 = vmatpush.bf16.msra.mxu3 %v10531_v55  ;;  %v10556_v55 = vld [vmem:[#allocation5 + $0x990] sm:$0xff] }
 0x12c   :  { %6399 = vmatpush.bf16.msra.mxu0 %v10506_v56  ;;  %v6177_v36 = vpop.f32.mrf.mxu0  ;;  %v10564_v56 = vld [vmem:[#allocation5 + $0x9d0] sm:$0xff] }
 0x12d   :  { %6413 = vmatpush.bf16.msra.mxu1 %v10514_v57  ;;  %v6178_v37 = vadd.f32 %v6177_v36, %v11110_v46  ;;  %v6191_v41 = vpop.f32.mrf.mxu1  ;;  %v10539_v57 = vld [vmem:[#allocation5 + $0x908] sm:$0xff]  ;;  %v10584_v36 = vld [vmem:[#allocation5 + $0xa70] sm:$0xff] }
 0x12e   :  { %6427 = vmatpush.bf16.msra.mxu2 %v10522_v58  ;;  %v10547_v58 = vld [vmem:[#allocation5 + $0x948] sm:$0xff] }
 0x12f   :  { %6441 = vmatpush.bf16.msra.mxu3 %v10530_v59  ;;  %6400 = vmatmul.bf16.vlgmr.msra.gmra.mxu0 %v7273_v8  ;;  %v6192_v44 = vadd.f32 %v6191_v41, %v6178_v37  ;;  %v10555_v59 = vld [vmem:[#allocation5 + $0x988] sm:$0xff]  ;;  %v7290_v8 = vld [vmem:[#allocation2 + $0x1e0] sm:$0xf0]  ;;  %v10592_v37 = vld [vmem:[#allocation5 + $0xab0] sm:$0xff] }
 0x130   :  { %6448 = vmatpush.bf16.msrb.mxu0 %v10545_v60  ;;  %6414 = vmatmul.bf16.vlgmr.msra.gmra.mxu1 %v7277_v14  ;;  %v10563_v60 = vld [vmem:[#allocation5 + $0x9c8] sm:$0xff] }
 0x131   :  { %6462 = vmatpush.bf16.msrb.mxu1 %v10553_v61  ;;  %6428 = vmatmul.bf16.vlgmr.msra.gmra.mxu2 %v7281_v10  ;;  %v10538_v61 = vld [vmem:[#allocation5 + $0x900] sm:$0xff]  ;;  %v10185_v10 = vld [vmem:[#allocation2 + $0x9c] sm:$0xf]  ;;  %v7298_v14 = vld [vmem:[#allocation2 + $0x1e8] sm:$0xf0] }
 0x132   :  { %6476 = vmatpush.bf16.msrb.mxu2 %v10561_v6  ;;  %6442 = vmatmul.bf16.vlgmr.msra.gmra.mxu3 %v7285_v16  ;;  %v10227_v6 = vld [vmem:[#allocation2 + $0x1e4] sm:$0xf0]  ;;  %v10593_v16 = vld [vmem:[#allocation5 + $0xab8] sm:$0xff] }
 0x133   :  { %6490 = vmatpush.bf16.msrb.mxu3 %v10569_v7  ;;  %v10184_v7 = vld [vmem:[#allocation2 + $0x94] sm:$0xf]  ;;  %v10583_v41 = vld [vmem:[#allocation5 + $0xa68] sm:$0xff] }
 0x134   :  { %6449 = vmatpush.bf16.msrb.mxu0 %v10544_v19  ;;  %v6205_v50 = vpop.f32.mrf.mxu2  ;;  %v10601_v19 = vld [vmem:[#allocation5 + $0xaf8] sm:$0xff] }
 0x135   :  { %6463 = vmatpush.bf16.msrb.mxu1 %v10552_v20  ;;  %v6206_v51 = vadd.f32 %v6205_v50, %v6192_v44  ;;  %v6219_v52 = vpop.f32.mrf.mxu3  ;;  %v7289_v20 = vor.u32 %v10226_v4, %v7288_v3  ;;  %v10599_v44 = vld [vmem:[#allocation5 + $0xae8] sm:$0xff]  ;;  %v10582_v50 = vld [vmem:[#allocation5 + $0xa60] sm:$0xff] }
 0x136   :  { %6477 = vmatpush.bf16.msrb.mxu2 %v10560_v21  ;;  %v7297_v21 = vor.u32 %v10227_v6, %v7296_v5  ;;  %v10579_v3 = vld [vmem:[#allocation5 + $0xa48] sm:$0xff]  ;;  %v10570_v6 = vld [vmem:[#allocation5 + $0xa00] sm:$0xff] }
 0x137   :  { %6491 = vmatpush.bf16.msrb.mxu3 %v10568_v25  ;;  %v11121_v46 = vadd.f32 %v6219_v52, %v6206_v51  ;;  %v11123_v25 = vpop.f32.mrf.mxu0  ;;  %v10590_v52 = vld [vmem:[#allocation5 + $0xaa0] sm:$0xff]  ;;  %v10587_v4 = vld [vmem:[#allocation5 + $0xa88] sm:$0xff] }
 0x138   :  { %6450 = vmatpush.bf16.msrb.mxu0 %v10543_v26  ;;  %v7293_v26 = vor.u32 %v10184_v7, %v7290_v8  ;;  %v10595_v5 = vld [vmem:[#allocation5 + $0xac8] sm:$0xff]  ;;  %v10578_v7 = vld [vmem:[#allocation5 + $0xa40] sm:$0xff] }
 0x139   :  { %6464 = vmatpush.bf16.msrb.mxu1 %v10551_v30  ;;  %v7301_v30 = vor.u32 %v10185_v10, %v7298_v14  ;;  %v10586_v8 = vld [vmem:[#allocation5 + $0xa80] sm:$0xff]  ;;  %v5956_v14 = vadd.f32 %v11074_v38, %v11079_v17 }
 0x13a   :  { %6478 = vmatpush.bf16.msrb.mxu2 %v10559_v33  ;;  %v11125_v33 = vpop.f32.mrf.mxu1  ;;  %v10594_v10 = vld [vmem:[#allocation5 + $0xac0] sm:$0xff] }
 0x13b   :  { %6492 = vmatpush.bf16.msrb.mxu3 %v10567_v34  ;;  %v10576_v34 = vld [vmem:[#allocation5 + $0xa30] sm:$0xff] }
 0x13c   :  { %6451 = vmatpush.bf16.msrb.mxu0 %v10542_v39  ;;  %v10600_v39 = vld [vmem:[#allocation5 + $0xaf0] sm:$0xff] }
 0x13d   :  { %6465 = vmatpush.bf16.msrb.mxu1 %v10550_v40  ;;  %v10575_v40 = vld [vmem:[#allocation5 + $0xa28] sm:$0xff] }
 0x13e   :  { %6479 = vmatpush.bf16.msrb.mxu2 %v10558_v42  ;;  %v11127_v42 = vpop.f32.mrf.mxu2 }
 0x13f   :  { %6493 = vmatpush.bf16.msrb.mxu3 %v10566_v43  ;;  %v10591_v43 = vld [vmem:[#allocation5 + $0xaa8] sm:$0xff] }
 0x140   :  { %6452 = vmatpush.bf16.msrb.mxu0 %v10541_v45  ;;  %v11129_v45 = vpop.f32.mrf.mxu3 }
 0x141   :  { %6466 = vmatpush.bf16.msrb.mxu1 %v10549_v47 }
 0x142   :  { %6480 = vmatpush.bf16.msrb.mxu2 %v10557_v48 }
 0x143   :  { %6494 = vmatpush.bf16.msrb.mxu3 %v10565_v49  ;;  %v10574_v49 = vld [vmem:[#allocation5 + $0xa20] sm:$0xff] }
 0x144   :  { %6453 = vmatpush.bf16.msrb.mxu0 %v10540_v53  ;;  %v10598_v53 = vld [vmem:[#allocation5 + $0xae0] sm:$0xff] }
 0x145   :  { %6467 = vmatpush.bf16.msrb.mxu1 %v10548_v54 }
 0x146   :  { %6481 = vmatpush.bf16.msrb.mxu2 %v10556_v55  ;;  %v10573_v55 = vld [vmem:[#allocation5 + $0xa18] sm:$0xff] }
 0x147   :  { %6495 = vmatpush.bf16.msrb.mxu3 %v10564_v56  ;;  %v10581_v56 = vld [vmem:[#allocation5 + $0xa58] sm:$0xff] }
 0x148   :  { %6454 = vmatpush.bf16.msrb.mxu0 %v10539_v57  ;;  %v10589_v57 = vld [vmem:[#allocation5 + $0xa98] sm:$0xff] }
 0x149   :  { %6468 = vmatpush.bf16.msrb.mxu1 %v10547_v58  ;;  %v10597_v58 = vld [vmem:[#allocation5 + $0xad8] sm:$0xff] }
 0x14a   :  { %6482 = vmatpush.bf16.msrb.mxu2 %v10555_v59 }
 0x14b   :  { %6496 = vmatpush.bf16.msrb.mxu3 %v10563_v60 }
 0x14c   :  { %6455 = vmatpush.bf16.msrb.mxu0 %v10538_v61  ;;  %v6233_v47 = vpop.f32.mrf.mxu0 }
 0x14d   :  { %6469 = vmatpush.bf16.msrb.mxu1 %v10546_v62  ;;  %v6234_v48 = vadd.f32 %v6233_v47, %v11121_v46  ;;  %v6247_v51 = vpop.f32.mrf.mxu1  ;;  %v10572_v62 = vld [vmem:[#allocation5 + $0xa10] sm:$0xff] }
 0x14e   :  { %6483 = vmatpush.bf16.msrb.mxu2 %v10554_v63  ;;  %v10580_v63 = vld [vmem:[#allocation5 + $0xa50] sm:$0xff] }
 0x14f   :  { %6497 = vmatpush.bf16.msrb.mxu3 %v10562_v0  ;;  %6456 = vmatmul.bf16.vlgmr.msrb.gmra.mxu0 %v7289_v20  ;;  %v6248_v54 = vadd.f32 %v6247_v51, %v6234_v48  ;;  %v10588_v0 = vld [vmem:[#allocation5 + $0xa90] sm:$0xff]  ;;  %v7304_v20 = vld [vmem:[#allocation2 + $0xa0] sm:$0xf] }
 0x150   :  { %6504 = vmatpush.bf16.msra.mxu0 %v10577_v1  ;;  %6470 = vmatmul.bf16.vlgmr.msrb.gmra.mxu1 %v7293_v26  ;;  %v10596_v1 = vld [vmem:[#allocation5 + $0xad0] sm:$0xff]  ;;  %v7312_v26 = vld [vmem:[#allocation2 + $0xa8] sm:$0xf] }
 0x151   :  { %6518 = vmatpush.bf16.msra.mxu1 %v10585_v2  ;;  %6484 = vmatmul.bf16.vlgmr.msrb.gmra.mxu2 %v7297_v21  ;;  %v10571_v2 = vld [vmem:[#allocation5 + $0xa08] sm:$0xff]  ;;  %v10228_v21 = vld [vmem:[#allocation2 + $0x1ec] sm:$0xf0] }
 0x152   :  { %6532 = vmatpush.bf16.msra.mxu2 %v10593_v16  ;;  %6498 = vmatmul.bf16.vlgmr.msrb.gmra.mxu3 %v7301_v30  ;;  %v10609_v16 = vld [vmem:[#allocation5 + $0xb38] sm:$0xff]  ;;  %v7305_v38 = vor.u32 %v10228_v21, %v7304_v20  ;;  %v10616_v51 = vld [vmem:[#allocation5 + $0xb70] sm:$0xff] }
 0x153   :  { %6546 = vmatpush.bf16.msra.mxu3 %v10601_v19  ;;  %v10617_v19 = vld [vmem:[#allocation5 + $0xb78] sm:$0xff]  ;;  %v10612_v20 = vld [vmem:[#allocation5 + $0xb50] sm:$0xff] }
 0x154   :  { %6505 = vmatpush.bf16.msra.mxu0 %v10576_v34  ;;  %v6261_v59 = vpop.f32.mrf.mxu2  ;;  %v10229_v30 = vld [vmem:[#allocation2 + $0x1f4] sm:$0xf0]  ;;  %v10186_v34 = vld [vmem:[#allocation2 + $0xa4] sm:$0xf]  ;;  %v10620_v21 = vld [vmem:[#allocation5 + $0xb90] sm:$0xff] }
 0x155   :  { %6519 = vmatpush.bf16.msra.mxu1 %v10584_v36  ;;  %v6262_v60 = vadd.f32 %v6261_v59, %v6248_v54  ;;  %v6275_v61 = vpop.f32.mrf.mxu3  ;;  %v7306_v36 = vld [vmem:[#allocation2 + $0x1f0] sm:$0xf0]  ;;  %v7313_v17 = vor.u32 %v10229_v30, %v7312_v26  ;;  %v10607_v54 = vld [vmem:[#allocation5 + $0xb28] sm:$0xff] }
 0x156   :  { %6533 = vmatpush.bf16.msra.mxu2 %v10592_v37  ;;  %v10187_v37 = vld [vmem:[#allocation2 + $0xac] sm:$0xf]  ;;  %v7309_v47 = vor.u32 %v10186_v34, %v7306_v36  ;;  %v10628_v26 = vld [vmem:[#allocation5 + $0xbd0] sm:$0xff] }
 0x157   :  { %6547 = vmatpush.bf16.msra.mxu3 %v10600_v39  ;;  %v11132_v46 = vadd.f32 %v6275_v61, %v6262_v60  ;;  %v7314_v39 = vld [vmem:[#allocation2 + $0x1f8] sm:$0xf0]  ;;  %v10603_v34 = vld [vmem:[#allocation5 + $0xb08] sm:$0xff] }
 0x158   :  { %6506 = vmatpush.bf16.msra.mxu0 %v10575_v40  ;;  %v10625_v40 = vld [vmem:[#allocation5 + $0xbb8] sm:$0xff]  ;;  %v7317_v48 = vor.u32 %v10187_v37, %v7314_v39  ;;  %v10619_v36 = vld [vmem:[#allocation5 + $0xb88] sm:$0xff]  ;;  %v10602_v39 = vld [vmem:[#allocation5 + $0xb00] sm:$0xff] }
 0x159   :  { %6520 = vmatpush.bf16.msra.mxu1 %v10583_v41  ;;  %v10633_v41 = vld [vmem:[#allocation5 + $0xbf8] sm:$0xff] }
 0x15a   :  { %6534 = vmatpush.bf16.msra.mxu2 %v10591_v43  ;;  %v5970_v43 = vadd.f32 %v11081_v22, %v5956_v14  ;;  %v10632_v22 = vld [vmem:[#allocation5 + $0xbf0] sm:$0xff] }
 0x15b   :  { %6548 = vmatpush.bf16.msra.mxu3 %v10599_v44  ;;  %v11137_v44 = vpop.f32.mrf.mxu0 }
 0x15c   :  { %6507 = vmatpush.bf16.msra.mxu0 %v10574_v49  ;;  %v11139_v49 = vpop.f32.mrf.mxu1 }
 0x15d   :  { %6521 = vmatpush.bf16.msra.mxu1 %v10582_v50  ;;  %v10608_v50 = vld [vmem:[#allocation5 + $0xb30] sm:$0xff]  ;;  %v11145_v60 = vpop.f32.mrf.mxu3 }
 0x15e   :  { %6535 = vmatpush.bf16.msra.mxu2 %v10590_v52  ;;  %v10624_v52 = vld [vmem:[#allocation5 + $0xbb0] sm:$0xff] }
 0x15f   :  { %6549 = vmatpush.bf16.msra.mxu3 %v10598_v53  ;;  %v5984_v53 = vadd.f32 %v11083_v27, %v5970_v43  ;;  %v10626_v43 = vld [vmem:[#allocation5 + $0xbc0] sm:$0xff] }
 0x160   :  { %6508 = vmatpush.bf16.msra.mxu0 %v10573_v55  ;;  %v10615_v55 = vld [vmem:[#allocation5 + $0xb68] sm:$0xff] }
 0x161   :  { %6522 = vmatpush.bf16.msra.mxu1 %v10581_v56  ;;  %v11142_v56 = vpop.f32.mrf.mxu2  ;;  %v5998_v59 = vadd.f32 %v11085_v32, %v5984_v53  ;;  %v10605_v32 = vld [vmem:[#allocation5 + $0xb18] sm:$0xff] }
 0x162   :  { %6536 = vmatpush.bf16.msra.mxu2 %v10589_v57  ;;  %v10623_v57 = vld [vmem:[#allocation5 + $0xba8] sm:$0xff]  ;;  %v10189_v53 = vld [vmem:[#allocation2 + $0xbc] sm:$0xf] }
 0x163   :  { %6550 = vmatpush.bf16.msra.mxu3 %v10597_v58  ;;  %v10631_v58 = vld [vmem:[#allocation5 + $0xbe8] sm:$0xff] }
 0x164   :  { %6509 = vmatpush.bf16.msra.mxu0 %v10572_v62  ;;  %v10606_v62 = vld [vmem:[#allocation5 + $0xb20] sm:$0xff] }
 0x165   :  { %6523 = vmatpush.bf16.msra.mxu1 %v10580_v63  ;;  %v10614_v63 = vld [vmem:[#allocation5 + $0xb60] sm:$0xff] }
 0x166   :  { %6537 = vmatpush.bf16.msra.mxu2 %v10588_v0 }
 0x167   :  { %6551 = vmatpush.bf16.msra.mxu3 %v10596_v1  ;;  %v10622_v1 = vld [vmem:[#allocation5 + $0xba0] sm:$0xff] }
 0x168   :  { %6510 = vmatpush.bf16.msra.mxu0 %v10571_v2  ;;  %v10630_v2 = vld [vmem:[#allocation5 + $0xbe0] sm:$0xff] }
 0x169   :  { %6524 = vmatpush.bf16.msra.mxu1 %v10579_v3  ;;  %v6012_v3 = vadd.f32 %v11090_v12, %v5998_v59  ;;  %v10604_v12 = vld [vmem:[#allocation5 + $0xb10] sm:$0xff] }
 0x16a   :  { %6538 = vmatpush.bf16.msra.mxu2 %v10587_v4 }
 0x16b   :  { %6552 = vmatpush.bf16.msra.mxu3 %v10595_v5  ;;  %v10613_v5 = vld [vmem:[#allocation5 + $0xb58] sm:$0xff] }
 0x16c   :  { %6511 = vmatpush.bf16.msra.mxu0 %v10570_v6  ;;  %v6289_v61 = vpop.f32.mrf.mxu0  ;;  %v10621_v6 = vld [vmem:[#allocation5 + $0xb98] sm:$0xff] }
 0x16d   :  { %6525 = vmatpush.bf16.msra.mxu1 %v10578_v7  ;;  %v6290_v27 = vadd.f32 %v6289_v61, %v11132_v46  ;;  %v6303_v0 = vpop.f32.mrf.mxu1  ;;  %v10629_v7 = vld [vmem:[#allocation5 + $0xbd8] sm:$0xff]  ;;  %v6026_v46 = vadd.f32 %v11092_v15, %v6012_v3  ;;  %v10611_v15 = vld [vmem:[#allocation5 + $0xb48] sm:$0xff] }
 0x16e   :  { %6539 = vmatpush.bf16.msra.mxu2 %v10586_v8 }
 0x16f   :  { %6553 = vmatpush.bf16.msra.mxu3 %v10594_v10  ;;  %6512 = vmatmul.bf16.vlgmr.msra.gmra.mxu0 %v7305_v38  ;;  %v6304_v4 = vadd.f32 %v6303_v0, %v6290_v27  ;;  %v10641_v38 = vld [vmem:[#allocation5 + $0xc38] sm:$0xff]  ;;  %v10648_v0 = vld [vmem:[#allocation5 + $0xc70] sm:$0xff] }
 0x170   :  { %6560 = vmatpush.bf16.msrb.mxu0 %v10609_v16  ;;  %6526 = vmatmul.bf16.vlgmr.msra.gmra.mxu1 %v7309_v47  ;;  %v6040_v16 = vadd.f32 %v11094_v24, %v6026_v46  ;;  %v10627_v24 = vld [vmem:[#allocation5 + $0xbc8] sm:$0xff]  ;;  %v7320_v47 = vld [vmem:[#allocation2 + $0xb0] sm:$0xf] }
 0x171   :  { %6574 = vmatpush.bf16.msrb.mxu1 %v10617_v19  ;;  %6540 = vmatmul.bf16.vlgmr.msra.gmra.mxu2 %v7313_v17  ;;  %v10649_v17 = vld [vmem:[#allocation5 + $0xc78] sm:$0xff] }
 0x172   :  { %6588 = vmatpush.bf16.msrb.mxu2 %v10625_v40  ;;  %6554 = vmatmul.bf16.vlgmr.msra.gmra.mxu3 %v7317_v48  ;;  %v6054_v30 = vadd.f32 %v11096_v28, %v6040_v16  ;;  %v10610_v40 = vld [vmem:[#allocation5 + $0xb40] sm:$0xff]  ;;  %v7328_v48 = vld [vmem:[#allocation2 + $0xb8] sm:$0xf] }
 0x173   :  { %6602 = vmatpush.bf16.msrb.mxu3 %v10633_v41  ;;  %v10618_v41 = vld [vmem:[#allocation5 + $0xb80] sm:$0xff] }
 0x174   :  { %6561 = vmatpush.bf16.msrb.mxu0 %v10608_v50  ;;  %v6317_v8 = vpop.f32.mrf.mxu2  ;;  %v6068_v37 = vadd.f32 %v11101_v9, %v6054_v30  ;;  %v10230_v28 = vld [vmem:[#allocation2 + $0x1fc] sm:$0xf0]  ;;  %v10231_v50 = vld [vmem:[#allocation2 + $0x204] sm:$0xf0]  ;;  %v7330_v9 = vld [vmem:[#allocation2 + $0x208] sm:$0xf0]  ;;  %v11157_v61 = vpop.f32.mrf.mxu0 }
 0x175   :  { %6575 = vmatpush.bf16.msrb.mxu1 %v10616_v51  ;;  %v6318_v10 = vadd.f32 %v6317_v8, %v6304_v4  ;;  %v6331_v14 = vpop.f32.mrf.mxu3  ;;  %v10188_v51 = vld [vmem:[#allocation2 + $0xb4] sm:$0xf]  ;;  %v7329_v59 = vor.u32 %v10231_v50, %v7328_v48  ;;  %v10639_v4 = vld [vmem:[#allocation5 + $0xc28] sm:$0xff]  ;;  %v10637_v30 = vld [vmem:[#allocation5 + $0xc18] sm:$0xff] }
 0x176   :  { %6589 = vmatpush.bf16.msrb.mxu2 %v10624_v52  ;;  %v6082_v52 = vadd.f32 %v11103_v13, %v6068_v37  ;;  %v10640_v13 = vld [vmem:[#allocation5 + $0xc30] sm:$0xff]  ;;  %v10634_v50 = vld [vmem:[#allocation5 + $0xc00] sm:$0xff] }
 0x177   :  { %6603 = vmatpush.bf16.msrb.mxu3 %v10632_v22  ;;  %v11151_v19 = vadd.f32 %v6331_v14, %v6318_v10  ;;  %v7322_v22 = vld [vmem:[#allocation2 + $0x200] sm:$0xf0] }
 0x178   :  { %6562 = vmatpush.bf16.msrb.mxu0 %v10607_v54  ;;  %v10657_v54 = vld [vmem:[#allocation5 + $0xcb8] sm:$0xff]  ;;  %v7325_v27 = vor.u32 %v10188_v51, %v7322_v22  ;;  %v10646_v14 = vld [vmem:[#allocation5 + $0xc60] sm:$0xff] }
 0x179   :  { %6576 = vmatpush.bf16.msrb.mxu1 %v10615_v55  ;;  %v10665_v55 = vld [vmem:[#allocation5 + $0xcf8] sm:$0xff]  ;;  %v10642_v51 = vld [vmem:[#allocation5 + $0xc40] sm:$0xff] }
 0x17a   :  { %6590 = vmatpush.bf16.msrb.mxu2 %v10623_v57  ;;  %v6096_v57 = vadd.f32 %v11105_v23, %v6082_v52  ;;  %v10664_v23 = vld [vmem:[#allocation5 + $0xcf0] sm:$0xff]  ;;  %v10650_v52 = vld [vmem:[#allocation5 + $0xc80] sm:$0xff] }
 0x17b   :  { %6604 = vmatpush.bf16.msrb.mxu3 %v10631_v58  ;;  %v7321_v58 = vor.u32 %v10230_v28, %v7320_v47  ;;  %v10635_v47 = vld [vmem:[#allocation5 + $0xc08] sm:$0xff]  ;;  %v10658_v22 = vld [vmem:[#allocation5 + $0xcc0] sm:$0xff] }
 0x17c   :  { %6563 = vmatpush.bf16.msrb.mxu0 %v10606_v62  ;;  %v7333_v62 = vor.u32 %v10189_v53, %v7330_v9  ;;  %v10651_v28 = vld [vmem:[#allocation5 + $0xc88] sm:$0xff]  ;;  %v10673_v53 = vld [vmem:[#allocation5 + $0xd38] sm:$0xff] }
 0x17d   :  { %6577 = vmatpush.bf16.msrb.mxu1 %v10614_v63  ;;  %v11159_v63 = vpop.f32.mrf.mxu1  ;;  %v11165_v8 = vpop.f32.mrf.mxu3  ;;  %v10681_v9 = vld [vmem:[#allocation5 + $0xd78] sm:$0xff] }
 0x17e   :  { %6591 = vmatpush.bf16.msrb.mxu2 %v10622_v1  ;;  %v10656_v1 = vld [vmem:[#allocation5 + $0xcb0] sm:$0xff] }
 0x17f   :  { %6605 = vmatpush.bf16.msrb.mxu3 %v10630_v2  ;;  %v6110_v2 = vadd.f32 %v11107_v29, %v6096_v57  ;;  %v10233_v57 = vld [vmem:[#allocation2 + $0x214] sm:$0xf0] }
 0x180   :  { %6564 = vmatpush.bf16.msrb.mxu0 %v10605_v32  ;;  %v10647_v32 = vld [vmem:[#allocation5 + $0xc68] sm:$0xff] }
 0x181   :  { %6578 = vmatpush.bf16.msrb.mxu1 %v10613_v5  ;;  %v6124_v3 = vadd.f32 %v11112_v11, %v6110_v2  ;;  %v11163_v5 = vpop.f32.mrf.mxu2  ;;  %v10638_v11 = vld [vmem:[#allocation5 + $0xc20] sm:$0xff] }
 0x182   :  { %6592 = vmatpush.bf16.msrb.mxu2 %v10621_v6  ;;  %v10655_v6 = vld [vmem:[#allocation5 + $0xca8] sm:$0xff] }
 0x183   :  { %6606 = vmatpush.bf16.msrb.mxu3 %v10629_v7  ;;  %v10663_v7 = vld [vmem:[#allocation5 + $0xce8] sm:$0xff]  ;;  %v6138_v29 = vadd.f32 %v11114_v18, %v6124_v3  ;;  %v10653_v18 = vld [vmem:[#allocation5 + $0xc98] sm:$0xff] }
 0x184   :  { %6565 = vmatpush.bf16.msrb.mxu0 %v10604_v12  ;;  %v10654_v12 = vld [vmem:[#allocation5 + $0xca0] sm:$0xff] }
 0x185   :  { %6579 = vmatpush.bf16.msrb.mxu1 %v10612_v20  ;;  %v10662_v20 = vld [vmem:[#allocation5 + $0xce0] sm:$0xff] }
 0x186   :  { %6593 = vmatpush.bf16.msrb.mxu2 %v10620_v21  ;;  %v6152_v21 = vadd.f32 %v11116_v31, %v6138_v29  ;;  %v10636_v31 = vld [vmem:[#allocation5 + $0xc10] sm:$0xff] }
 0x187   :  { %6607 = vmatpush.bf16.msrb.mxu3 %v10628_v26 }
 0x188   :  { %6566 = vmatpush.bf16.msrb.mxu0 %v10603_v34  ;;  %v10645_v34 = vld [vmem:[#allocation5 + $0xc58] sm:$0xff] }
 0x189   :  { %6580 = vmatpush.bf16.msrb.mxu1 %v10611_v15  ;;  %v10661_v15 = vld [vmem:[#allocation5 + $0xcd8] sm:$0xff] }
 0x18a   :  { %6594 = vmatpush.bf16.msrb.mxu2 %v10619_v36 }
 0x18b   :  { %6608 = vmatpush.bf16.msrb.mxu3 %v10627_v24 }
 0x18c   :  { %6567 = vmatpush.bf16.msrb.mxu0 %v10602_v39  ;;  %v6345_v46 = vpop.f32.mrf.mxu0 }
 0x18d   :  { %6581 = vmatpush.bf16.msrb.mxu1 %v10610_v40  ;;  %v6346_v10 = vadd.f32 %v6345_v46, %v11151_v19  ;;  %v6359_v16 = vpop.f32.mrf.mxu1  ;;  %v6166_v19 = vadd.f32 %v11118_v35, %v6152_v21  ;;  %v10643_v35 = vld [vmem:[#allocation5 + $0xc48] sm:$0xff]  ;;  %v10688_v46 = vld [vmem:[#allocation5 + $0xdb0] sm:$0xff] }
 0x18e   :  { %6595 = vmatpush.bf16.msrb.mxu2 %v10618_v41  ;;  %v10644_v41 = vld [vmem:[#allocation5 + $0xc50] sm:$0xff] }
 0x18f   :  { %6609 = vmatpush.bf16.msrb.mxu3 %v10626_v43  ;;  %6568 = vmatmul.bf16.vlgmr.msrb.gmra.mxu0 %v7321_v58  ;;  %v6360_v26 = vadd.f32 %v6359_v16, %v6346_v10  ;;  %v6180_v39 = vadd.f32 %v11123_v25, %v6166_v19  ;;  %v10652_v43 = vld [vmem:[#allocation5 + $0xc90] sm:$0xff]  ;;  %v10659_v25 = vld [vmem:[#allocation5 + $0xcc8] sm:$0xff]  ;;  %v10190_v58 = vld [vmem:[#allocation2 + $0xc4] sm:$0xf] }
 0x190   :  { %6616 = vmatpush.bf16.msra.mxu0 %v10641_v38  ;;  %6582 = vmatmul.bf16.vlgmr.msrb.gmra.mxu1 %v7325_v27  ;;  %v10660_v38 = vld [vmem:[#allocation5 + $0xcd0] sm:$0xff] }
 0x191   :  { %6630 = vmatpush.bf16.msra.mxu1 %v10649_v17  ;;  %6596 = vmatmul.bf16.vlgmr.msrb.gmra.mxu2 %v7329_v59  ;;  %v6194_v17 = vadd.f32 %v11125_v33, %v6180_v39  ;;  %v10232_v33 = vld [vmem:[#allocation2 + $0x20c] sm:$0xf0]  ;;  %v7338_v27 = vld [vmem:[#allocation2 + $0x210] sm:$0xf0]  ;;  %v10677_v39 = vld [vmem:[#allocation5 + $0xd58] sm:$0xff] }
 0x192   :  { %6644 = vmatpush.bf16.msra.mxu2 %v10657_v54  ;;  %6610 = vmatmul.bf16.vlgmr.msrb.gmra.mxu3 %v7333_v62  ;;  %v7336_v54 = vld [vmem:[#allocation2 + $0xc0] sm:$0xf]  ;;  %v10191_v62 = vld [vmem:[#allocation2 + $0xcc] sm:$0xf] }
 0x193   :  { %6658 = vmatpush.bf16.msra.mxu3 %v10665_v55  ;;  %v6208_v48 = vadd.f32 %v11127_v42, %v6194_v17  ;;  %v7344_v55 = vld [vmem:[#allocation2 + $0xc8] sm:$0xf]  ;;  %v7346_v42 = vld [vmem:[#allocation2 + $0x218] sm:$0xf0] }
 0x194   :  { %6617 = vmatpush.bf16.msra.mxu0 %v10640_v13  ;;  %v6373_v36 = vpop.f32.mrf.mxu2  ;;  %v10689_v13 = vld [vmem:[#allocation5 + $0xdb8] sm:$0xff]  ;;  %v7345_v2 = vor.u32 %v10233_v57, %v7344_v55  ;;  %v11178_v3 = vpop.f32.mrf.mxu0  ;;  %v7352_v57 = vld [vmem:[#allocation2 + $0xd0] sm:$0xf] }
 0x195   :  { %6631 = vmatpush.bf16.msra.mxu1 %v10648_v0  ;;  %v6374_v24 = vadd.f32 %v6373_v36, %v6360_v26  ;;  %v6387_v37 = vpop.f32.mrf.mxu3  ;;  %v6222_v59 = vadd.f32 %v11129_v45, %v6208_v48  ;;  %v10697_v0 = vld [vmem:[#allocation5 + $0xdf8] sm:$0xff]  ;;  %v10672_v45 = vld [vmem:[#allocation5 + $0xd30] sm:$0xff]  ;;  %v10694_v36 = vld [vmem:[#allocation5 + $0xde0] sm:$0xff] }
 0x196   :  { %6645 = vmatpush.bf16.msra.mxu2 %v10656_v1  ;;  %v10713_v55 = vld [vmem:[#allocation5 + $0xe78] sm:$0xff] }
 0x197   :  { %6659 = vmatpush.bf16.msra.mxu3 %v10664_v23  ;;  %v11172_v40 = vadd.f32 %v6387_v37, %v6374_v24  ;;  %v6236_v1 = vadd.f32 %v11137_v44, %v6222_v59  ;;  %v7337_v23 = vor.u32 %v10232_v33, %v7336_v54  ;;  %v10696_v44 = vld [vmem:[#allocation5 + $0xdf0] sm:$0xff]  ;;  %v10669_v37 = vld [vmem:[#allocation5 + $0xd18] sm:$0xff]  ;;  %v10690_v54 = vld [vmem:[#allocation5 + $0xdc0] sm:$0xff] }
 0x198   :  { %6618 = vmatpush.bf16.msra.mxu0 %v10639_v4  ;;  %v7341_v4 = vor.u32 %v10190_v58, %v7338_v27  ;;  %v10705_v33 = vld [vmem:[#allocation5 + $0xe38] sm:$0xff]  ;;  %v10235_v59 = vld [vmem:[#allocation2 + $0x224] sm:$0xf0]  ;;  %v10192_v27 = vld [vmem:[#allocation2 + $0xd4] sm:$0xf] }
 0x199   :  { %6632 = vmatpush.bf16.msra.mxu1 %v10647_v32  ;;  %v7349_v32 = vor.u32 %v10191_v62, %v7346_v42  ;;  %v6250_v29 = vadd.f32 %v11139_v49, %v6236_v1  ;;  %v7360_v58 = vld [vmem:[#allocation2 + $0xd8] sm:$0xf]  ;;  %v7354_v42 = vld [vmem:[#allocation2 + $0x220] sm:$0xf0] }
 0x19a   :  { %6646 = vmatpush.bf16.msra.mxu2 %v10655_v6  ;;  %v11180_v6 = vpop.f32.mrf.mxu1  ;;  %v10721_v1 = vld [vmem:[#allocation5 + $0xeb8] sm:$0xff] }
 0x19b   :  { %6660 = vmatpush.bf16.msra.mxu3 %v10663_v7  ;;  %v10680_v7 = vld [vmem:[#allocation5 + $0xd70] sm:$0xff]  ;;  %v6264_v10 = vadd.f32 %v11142_v56, %v6250_v29  ;;  %v10670_v56 = vld [vmem:[#allocation5 + $0xd20] sm:$0xff] }
 0x19c   :  { %6619 = vmatpush.bf16.msra.mxu0 %v10638_v11  ;;  %v10671_v11 = vld [vmem:[#allocation5 + $0xd28] sm:$0xff]  ;;  %v11184_v16 = vpop.f32.mrf.mxu2  ;;  %v10720_v29 = vld [vmem:[#allocation5 + $0xeb0] sm:$0xff] }
 0x19d   :  { %6633 = vmatpush.bf16.msra.mxu1 %v10646_v14  ;;  %v10679_v14 = vld [vmem:[#allocation5 + $0xd68] sm:$0xff]  ;;  %v11186_v21 = vpop.f32.mrf.mxu3  ;;  %v6278_v49 = vadd.f32 %v11145_v60, %v6264_v10  ;;  %v10685_v60 = vld [vmem:[#allocation5 + $0xd98] sm:$0xff]  ;;  %v10728_v10 = vld [vmem:[#allocation5 + $0xef0] sm:$0xff] }
 0x19e   :  { %6647 = vmatpush.bf16.msra.mxu2 %v10654_v12  ;;  %v10687_v12 = vld [vmem:[#allocation5 + $0xda8] sm:$0xff] }
 0x19f   :  { %6661 = vmatpush.bf16.msra.mxu3 %v10662_v20  ;;  %v10695_v20 = vld [vmem:[#allocation5 + $0xde8] sm:$0xff]  ;;  %v6292_v19 = vadd.f32 %v11157_v61, %v6278_v49  ;;  %v10668_v61 = vld [vmem:[#allocation5 + $0xd10] sm:$0xff] }
 0x1a0   :  { %6620 = vmatpush.bf16.msra.mxu0 %v10637_v30  ;;  %v10727_v49 = vld [vmem:[#allocation5 + $0xee8] sm:$0xff] }
 0x1a1   :  { %6634 = vmatpush.bf16.msra.mxu1 %v10645_v34  ;;  %v10678_v34 = vld [vmem:[#allocation5 + $0xd60] sm:$0xff] }
 0x1a2   :  { %6648 = vmatpush.bf16.msra.mxu2 %v10653_v18 }
 0x1a3   :  { %6662 = vmatpush.bf16.msra.mxu3 %v10661_v15  ;;  %v10686_v15 = vld [vmem:[#allocation5 + $0xda0] sm:$0xff] }
 0x1a4   :  { %6621 = vmatpush.bf16.msra.mxu0 %v10636_v31  ;;  %v10693_v31 = vld [vmem:[#allocation5 + $0xdd8] sm:$0xff] }
 0x1a5   :  { %6635 = vmatpush.bf16.msra.mxu1 %v10644_v41 }
 0x1a6   :  { %6649 = vmatpush.bf16.msra.mxu2 %v10652_v43 }
 0x1a7   :  { %6663 = vmatpush.bf16.msra.mxu3 %v10660_v38 }
 0x1a8   :  { %6622 = vmatpush.bf16.msra.mxu0 %v10635_v47 }
 0x1a9   :  { %6636 = vmatpush.bf16.msra.mxu1 %v10643_v35  ;;  %v10676_v35 = vld [vmem:[#allocation5 + $0xd50] sm:$0xff] }
 0x1aa   :  { %6650 = vmatpush.bf16.msra.mxu2 %v10651_v28  ;;  %v10684_v28 = vld [vmem:[#allocation5 + $0xd90] sm:$0xff] }
 0x1ab   :  { %6664 = vmatpush.bf16.msra.mxu3 %v10659_v25  ;;  %v10692_v25 = vld [vmem:[#allocation5 + $0xdd0] sm:$0xff] }
 0x1ac   :  { %6623 = vmatpush.bf16.msra.mxu0 %v10634_v50  ;;  %v6401_v26 = vpop.f32.mrf.mxu0  ;;  %v10667_v50 = vld [vmem:[#allocation5 + $0xd08] sm:$0xff] }
 0x1ad   :  { %6637 = vmatpush.bf16.msra.mxu1 %v10642_v51  ;;  %v6402_v30 = vadd.f32 %v6401_v26, %v11172_v40  ;;  %v6415_v18 = vpop.f32.mrf.mxu1  ;;  %v6306_v40 = vadd.f32 %v11159_v63, %v6292_v19  ;;  %v10675_v63 = vld [vmem:[#allocation5 + $0xd48] sm:$0xff]  ;;  %v10718_v19 = vld [vmem:[#allocation5 + $0xea0] sm:$0xff] }
 0x1ae   :  { %6651 = vmatpush.bf16.msra.mxu2 %v10650_v52  ;;  %v10683_v51 = vld [vmem:[#allocation5 + $0xd88] sm:$0xff] }
 0x1af   :  { %6665 = vmatpush.bf16.msra.mxu3 %v10658_v22  ;;  %6624 = vmatmul.bf16.vlgmr.msra.gmra.mxu0 %v7337_v23  ;;  %v6416_v24 = vadd.f32 %v6415_v18, %v6402_v30  ;;  %v6320_v17 = vadd.f32 %v11163_v5, %v6306_v40  ;;  %v10691_v5 = vld [vmem:[#allocation5 + $0xdc8] sm:$0xff]  ;;  %v10666_v22 = vld [vmem:[#allocation5 + $0xd00] sm:$0xff]  ;;  %v10729_v23 = vld [vmem:[#allocation5 + $0xef8] sm:$0xff] }
 0x1b0   :  { %6672 = vmatpush.bf16.msrb.mxu0 %v10673_v53  ;;  %6638 = vmatmul.bf16.vlgmr.msra.gmra.mxu1 %v7341_v4  ;;  %v10674_v53 = vld [vmem:[#allocation5 + $0xd40] sm:$0xff]  ;;  %v7361_v4 = vor.u32 %v10235_v59, %v7360_v58  ;;  %v10719_v26 = vld [vmem:[#allocation5 + $0xea8] sm:$0xff]  ;;  %v10725_v40 = vld [vmem:[#allocation5 + $0xed8] sm:$0xff] }
 0x1b1   :  { %6686 = vmatpush.bf16.msrb.mxu1 %v10681_v9  ;;  %6652 = vmatmul.bf16.vlgmr.msra.gmra.mxu2 %v7345_v2  ;;  %v6334_v48 = vadd.f32 %v11165_v8, %v6320_v17  ;;  %v10682_v9 = vld [vmem:[#allocation5 + $0xd80] sm:$0xff] }
 0x1b2   :  { %6700 = vmatpush.bf16.msrb.mxu2 %v10689_v13  ;;  %6666 = vmatmul.bf16.vlgmr.msra.gmra.mxu3 %v7349_v32  ;;  %v10234_v8 = vld [vmem:[#allocation2 + $0x21c] sm:$0xf0]  ;;  %v10193_v13 = vld [vmem:[#allocation2 + $0xdc] sm:$0xf] }
 0x1b3   :  { %6714 = vmatpush.bf16.msrb.mxu3 %v10697_v0  ;;  %v6348_v52 = vadd.f32 %v11178_v3, %v6334_v48  ;;  %v7362_v0 = vld [vmem:[#allocation2 + $0x228] sm:$0xf0]  ;;  %v7353_v3 = vor.u32 %v10234_v8, %v7352_v57  ;;  %v10702_v18 = vld [vmem:[#allocation5 + $0xe20] sm:$0xff]  ;;  %v10708_v48 = vld [vmem:[#allocation5 + $0xe50] sm:$0xff] }
 0x1b4   :  { %6673 = vmatpush.bf16.msrb.mxu0 %v10672_v45  ;;  %v6429_v41 = vpop.f32.mrf.mxu2  ;;  %v6403_v32 = vpop.f32.mrf.mxu0  ;;  %v7357_v45 = vor.u32 %v10192_v27, %v7354_v42  ;;  %v10698_v57 = vld [vmem:[#allocation5 + $0xe00] sm:$0xff]  ;;  %v10745_v42 = vld [vmem:[#allocation5 + $0xf78] sm:$0xff] }
 0x1b5   :  { %6687 = vmatpush.bf16.msrb.mxu1 %v10680_v7  ;;  %v6430_v43 = vadd.f32 %v6429_v41, %v6416_v24  ;;  %v6443_v38 = vpop.f32.mrf.mxu3  ;;  %v6362_v62 = vadd.f32 %v11180_v6, %v6348_v52  ;;  %v7365_v7 = vor.u32 %v10193_v13, %v7362_v0  ;;  %v10704_v6 = vld [vmem:[#allocation5 + $0xe30] sm:$0xff]  ;;  %v10726_v24 = vld [vmem:[#allocation5 + $0xee0] sm:$0xff]  ;;  %v10717_v41 = vld [vmem:[#allocation5 + $0xe98] sm:$0xff] }
 0x1b6   :  { %6701 = vmatpush.bf16.msrb.mxu2 %v10688_v46  ;;  %v6417_v46 = vpop.f32.mrf.mxu1  ;;  %v10699_v52 = vld [vmem:[#allocation5 + $0xe08] sm:$0xff]  ;;  %v10706_v8 = vld [vmem:[#allocation5 + $0xe40] sm:$0xff]  ;;  %v10236_v0 = vld [vmem:[#allocation2 + $0x22c] sm:$0xf0] }
 0x1b7   :  { %6715 = vmatpush.bf16.msrb.mxu3 %v10696_v44  ;;  %v11193_v47 = vadd.f32 %v6443_v38, %v6430_v43  ;;  %v6376_v2 = vadd.f32 %v11184_v16, %v6362_v62  ;;  %v10712_v44 = vld [vmem:[#allocation5 + $0xe70] sm:$0xff]  ;;  %v10703_v16 = vld [vmem:[#allocation5 + $0xe28] sm:$0xff]  ;;  %v10714_v58 = vld [vmem:[#allocation5 + $0xe80] sm:$0xff] }
 0x1b8   :  { %6674 = vmatpush.bf16.msrb.mxu0 %v10671_v11  ;;  %v10722_v59 = vld [vmem:[#allocation5 + $0xec0] sm:$0xff]  ;;  %v10737_v62 = vld [vmem:[#allocation5 + $0xf38] sm:$0xff] }
 0x1b9   :  { %6688 = vmatpush.bf16.msrb.mxu1 %v10679_v14  ;;  %v6390_v11 = vadd.f32 %v11186_v21, %v6376_v2  ;;  %v7368_v13 = vld [vmem:[#allocation2 + $0xe0] sm:$0xf]  ;;  %v10194_v2 = vld [vmem:[#allocation2 + $0xe4] sm:$0xf] }
 0x1ba   :  { %6702 = vmatpush.bf16.msrb.mxu2 %v10687_v12  ;;  %v10711_v12 = vld [vmem:[#allocation5 + $0xe68] sm:$0xff] }
 0x1bb   :  { %6716 = vmatpush.bf16.msrb.mxu3 %v10695_v20  ;;  %v6404_v14 = vadd.f32 %v6403_v32, %v6390_v11  ;;  %v7378_v32 = vld [vmem:[#allocation2 + $0x238] sm:$0xf0]  ;;  %v10744_v11 = vld [vmem:[#allocation5 + $0xf70] sm:$0xff] }
 0x1bc   :  { %6675 = vmatpush.bf16.msrb.mxu0 %v10670_v56  ;;  %v6431_v20 = vpop.f32.mrf.mxu2 }
 0x1bd   :  { %6689 = vmatpush.bf16.msrb.mxu1 %v10678_v34  ;;  %v6445_v30 = vpop.f32.mrf.mxu3  ;;  %v6418_v34 = vadd.f32 %v6417_v46, %v6404_v14  ;;  %v7369_v46 = vor.u32 %v10236_v0, %v7368_v13  ;;  %v10752_v14 = vld [vmem:[#allocation5 + $0xfb0] sm:$0xff]  ;;  %v7386_v0 = vld [vmem:[#allocation2 + $0x240] sm:$0xf0] }
 0x1be   :  { %6703 = vmatpush.bf16.msrb.mxu2 %v10686_v15  ;;  %v10710_v15 = vld [vmem:[#allocation5 + $0xe60] sm:$0xff]  ;;  %v10196_v13 = vld [vmem:[#allocation2 + $0xf4] sm:$0xf] }
 0x1bf   :  { %6717 = vmatpush.bf16.msrb.mxu3 %v10694_v36 }
 0x1c0   :  { %6676 = vmatpush.bf16.msrb.mxu0 %v10669_v37  ;;  %v6432_v37 = vadd.f32 %v6431_v20, %v6418_v34  ;;  %v10743_v20 = vld [vmem:[#allocation5 + $0xf68] sm:$0xff]  ;;  %v10734_v34 = vld [vmem:[#allocation5 + $0xf20] sm:$0xff] }
 0x1c1   :  { %6690 = vmatpush.bf16.msrb.mxu1 %v10677_v39 }
 0x1c2   :  { %6704 = vmatpush.bf16.msrb.mxu2 %v10685_v60  ;;  %v10701_v60 = vld [vmem:[#allocation5 + $0xe18] sm:$0xff]  ;;  %v6446_v38 = vadd.f32 %v6445_v30, %v6432_v37 }
 0x1c3   :  { %6718 = vmatpush.bf16.msrb.mxu3 %v10693_v31  ;;  %v10709_v31 = vld [vmem:[#allocation5 + $0xe58] sm:$0xff] }
 0x1c4   :  { %6677 = vmatpush.bf16.msrb.mxu0 %v10668_v61  ;;  %v10741_v37 = vld [vmem:[#allocation5 + $0xf58] sm:$0xff] }
 0x1c5   :  { %6691 = vmatpush.bf16.msrb.mxu1 %v10676_v35 }
 0x1c6   :  { %6705 = vmatpush.bf16.msrb.mxu2 %v10684_v28 }
 0x1c7   :  { %6719 = vmatpush.bf16.msrb.mxu3 %v10692_v25  ;;  %v10700_v25 = vld [vmem:[#allocation5 + $0xe10] sm:$0xff] }
 0x1c8   :  { %6678 = vmatpush.bf16.msrb.mxu0 %v10667_v50 }
 0x1c9   :  { %6692 = vmatpush.bf16.msrb.mxu1 %v10675_v63  ;;  %v10716_v63 = vld [vmem:[#allocation5 + $0xe90] sm:$0xff] }
 0x1ca   :  { %6706 = vmatpush.bf16.msrb.mxu2 %v10683_v51  ;;  %v10724_v51 = vld [vmem:[#allocation5 + $0xed0] sm:$0xff] }
 0x1cb   :  { %6720 = vmatpush.bf16.msrb.mxu3 %v10691_v5 }
 0x1cc   :  { %6679 = vmatpush.bf16.msrb.mxu0 %v10666_v22  ;;  %v6457_v56 = vpop.f32.mrf.mxu0  ;;  %v10707_v22 = vld [vmem:[#allocation5 + $0xe48] sm:$0xff] }
 0x1cd   :  { %6693 = vmatpush.bf16.msrb.mxu1 %v10674_v53  ;;  %v6458_v21 = vadd.f32 %v6457_v56, %v11193_v47  ;;  %v6471_v36 = vpop.f32.mrf.mxu1  ;;  %v10715_v53 = vld [vmem:[#allocation5 + $0xe88] sm:$0xff] }
 0x1ce   :  { %6707 = vmatpush.bf16.msrb.mxu2 %v10682_v9  ;;  %v10723_v9 = vld [vmem:[#allocation5 + $0xec8] sm:$0xff] }
 0x1cf   :  { %6721 = vmatpush.bf16.msrb.mxu3 %v10690_v54  ;;  %6680 = vmatmul.bf16.vlgmr.msrb.gmra.mxu0 %v7353_v3  ;;  %v6472_v39 = vadd.f32 %v6471_v36, %v6458_v21  ;;  %v7370_v3 = vld [vmem:[#allocation2 + $0x230] sm:$0xf0]  ;;  %v10742_v21 = vld [vmem:[#allocation5 + $0xf60] sm:$0xff] }
 0x1d0   :  { %6728 = vmatpush.bf16.msra.mxu0 %v10705_v33  ;;  %6694 = vmatmul.bf16.vlgmr.msrb.gmra.mxu1 %v7357_v45  ;;  %v10753_v45 = vld [vmem:[#allocation5 + $0xfb8] sm:$0xff]  ;;  %v10758_v36 = vld [vmem:[#allocation5 + $0xfe0] sm:$0xff] }
 0x1d1   :  { %6742 = vmatpush.bf16.msra.mxu1 %v10713_v55  ;;  %6708 = vmatmul.bf16.vlgmr.msrb.gmra.mxu2 %v7361_v4  ;;  %v10195_v4 = vld [vmem:[#allocation2 + $0xec] sm:$0xf] }
 0x1d2   :  { %6756 = vmatpush.bf16.msra.mxu2 %v10721_v1  ;;  %6722 = vmatmul.bf16.vlgmr.msrb.gmra.mxu3 %v7365_v7  ;;  %v7376_v1 = vld [vmem:[#allocation2 + $0xe8] sm:$0xf]  ;;  %v10761_v7 = vld [vmem:[#allocation5 + $0xff8] sm:$0xff] }
 0x1d3   :  { %6770 = vmatpush.bf16.msra.mxu3 %v10729_v23  ;;  %v10237_v23 = vld [vmem:[#allocation2 + $0x234] sm:$0xf0] }
 0x1d4   :  { %6729 = vmatpush.bf16.msra.mxu0 %v10704_v6  ;;  %v6485_v43 = vpop.f32.mrf.mxu2  ;;  %v6459_v61 = vpop.f32.mrf.mxu0  ;;  %v7377_v6 = vor.u32 %v10237_v23, %v7376_v1  ;;  %v10197_v1 = vld [vmem:[#allocation2 + $0xfc] sm:$0xf]  ;;  %v7394_v23 = vld [vmem:[#allocation2 + $0x248] sm:$0xf0] }
 0x1d5   :  { %6743 = vmatpush.bf16.msra.mxu1 %v10712_v44  ;;  %v6486_v17 = vadd.f32 %v6485_v43, %v6472_v39  ;;  %v6499_v47 = vpop.f32.mrf.mxu3  ;;  %v6460_v35 = vadd.f32 %v6459_v61, %v6446_v38  ;;  %v6473_v50 = vpop.f32.mrf.mxu1  ;;  %v7373_v44 = vor.u32 %v10194_v2, %v7370_v3  ;;  %v10749_v39 = vld [vmem:[#allocation5 + $0xf98] sm:$0xff]  ;;  %v10740_v61 = vld [vmem:[#allocation5 + $0xf50] sm:$0xff] }
 0x1d6   :  { %6757 = vmatpush.bf16.msra.mxu2 %v10720_v29  ;;  %v7381_v29 = vor.u32 %v10195_v4, %v7378_v32  ;;  %v10785_v2 = vld [vmem:[#allocation5 + $0x10b8] sm:$0xff] }
 0x1d7   :  { %6771 = vmatpush.bf16.msra.mxu3 %v10728_v10  ;;  %v11201_v28 = vadd.f32 %v6499_v47, %v6486_v17  ;;  %v6474_v5 = vadd.f32 %v6473_v50, %v6460_v35  ;;  %v10736_v10 = vld [vmem:[#allocation5 + $0xf30] sm:$0xff]  ;;  %v10731_v50 = vld [vmem:[#allocation5 + $0xf08] sm:$0xff]  ;;  %v10793_v3 = vld [vmem:[#allocation5 + $0x10f8] sm:$0xff] }
 0x1d8   :  { %6730 = vmatpush.bf16.msra.mxu0 %v10703_v16  ;;  %v10760_v16 = vld [vmem:[#allocation5 + $0xff0] sm:$0xff] }
 0x1d9   :  { %6744 = vmatpush.bf16.msra.mxu1 %v10711_v12  ;;  %v10735_v12 = vld [vmem:[#allocation5 + $0xf28] sm:$0xff]  ;;  %v10732_v47 = vld [vmem:[#allocation5 + $0xf10] sm:$0xff] }
 0x1da   :  { %6758 = vmatpush.bf16.msra.mxu2 %v10719_v26  ;;  %v10751_v26 = vld [vmem:[#allocation5 + $0xfa8] sm:$0xff] }
 0x1db   :  { %6772 = vmatpush.bf16.msra.mxu3 %v10727_v49  ;;  %v10759_v49 = vld [vmem:[#allocation5 + $0xfe8] sm:$0xff] }
 0x1dc   :  { %6731 = vmatpush.bf16.msra.mxu0 %v10702_v18  ;;  %v6487_v54 = vpop.f32.mrf.mxu2 }
 0x1dd   :  { %6745 = vmatpush.bf16.msra.mxu1 %v10710_v15  ;;  %v6488_v33 = vadd.f32 %v6487_v54, %v6474_v5  ;;  %v6501_v55 = vpop.f32.mrf.mxu3  ;;  %v10750_v15 = vld [vmem:[#allocation5 + $0xfa0] sm:$0xff]  ;;  %v10755_v5 = vld [vmem:[#allocation5 + $0xfc8] sm:$0xff] }
 0x1de   :  { %6759 = vmatpush.bf16.msra.mxu2 %v10718_v19  ;;  %v10738_v54 = vld [vmem:[#allocation5 + $0xf40] sm:$0xff] }
 0x1df   :  { %6773 = vmatpush.bf16.msra.mxu3 %v10726_v24  ;;  %v11203_v27 = vadd.f32 %v6501_v55, %v6488_v33  ;;  %v10733_v24 = vld [vmem:[#allocation5 + $0xf18] sm:$0xff]  ;;  %v10746_v33 = vld [vmem:[#allocation5 + $0xf80] sm:$0xff] }
 0x1e0   :  { %6732 = vmatpush.bf16.msra.mxu0 %v10701_v60  ;;  %v10757_v60 = vld [vmem:[#allocation5 + $0xfd8] sm:$0xff]  ;;  %v10754_v55 = vld [vmem:[#allocation5 + $0xfc0] sm:$0xff] }
 0x1e1   :  { %6746 = vmatpush.bf16.msra.mxu1 %v10709_v31 }
 0x1e2   :  { %6760 = vmatpush.bf16.msra.mxu2 %v10717_v41 }
 0x1e3   :  { %6774 = vmatpush.bf16.msra.mxu3 %v10725_v40 }
 0x1e4   :  { %6733 = vmatpush.bf16.msra.mxu0 %v10700_v25  ;;  %v10756_v25 = vld [vmem:[#allocation5 + $0xfd0] sm:$0xff] }
 0x1e5   :  { %6747 = vmatpush.bf16.msra.mxu1 %v10708_v48 }
 0x1e6   :  { %6761 = vmatpush.bf16.msra.mxu2 %v10716_v63  ;;  %v10739_v63 = vld [vmem:[#allocation5 + $0xf48] sm:$0xff] }
 0x1e7   :  { %6775 = vmatpush.bf16.msra.mxu3 %v10724_v51  ;;  %v10747_v51 = vld [vmem:[#allocation5 + $0xf88] sm:$0xff] }
 0x1e8   :  { %6734 = vmatpush.bf16.msra.mxu0 %v10699_v52 }
 0x1e9   :  { %6748 = vmatpush.bf16.msra.mxu1 %v10707_v22 }
 0x1ea   :  { %6762 = vmatpush.bf16.msra.mxu2 %v10715_v53 }
 0x1eb   :  { %6776 = vmatpush.bf16.msra.mxu3 %v10723_v9  ;;  %v10730_v9 = vld [vmem:[#allocation5 + $0xf00] sm:$0xff] }
 0x1ec   :  { %6735 = vmatpush.bf16.msra.mxu0 %v10698_v57  ;;  %v6513_v30 = vpop.f32.mrf.mxu0 }
 0x1ed   :  { %6749 = vmatpush.bf16.msra.mxu1 %v10706_v8  ;;  %v6514_v56 = vadd.f32 %v6513_v30, %v11201_v28  ;;  %v6527_v18 = vpop.f32.mrf.mxu1  ;;  %v10748_v28 = vld [vmem:[#allocation5 + $0xf90] sm:$0xff]  ;;  %v10769_v8 = vld [vmem:[#allocation5 + $0x1038] sm:$0xff] }
 0x1ee   :  { %6763 = vmatpush.bf16.msra.mxu2 %v10714_v58  ;;  %v10777_v58 = vld [vmem:[#allocation5 + $0x1078] sm:$0xff] }
 0x1ef   :  { %6777 = vmatpush.bf16.msra.mxu3 %v10722_v59  ;;  %6736 = vmatmul.bf16.vlgmr.msra.gmra.mxu0 %v7369_v46  ;;  %v6528_v19 = vadd.f32 %v6527_v18, %v6514_v56  ;;  %v7384_v59 = vld [vmem:[#allocation2 + $0xf0] sm:$0xf]  ;;  %v10782_v56 = vld [vmem:[#allocation5 + $0x10a0] sm:$0xff]  ;;  %v10765_v18 = vld [vmem:[#allocation5 + $0x1018] sm:$0xff] }
 0x1f0   :  { %6784 = vmatpush.bf16.msrb.mxu0 %v10737_v62  ;;  %6750 = vmatmul.bf16.vlgmr.msra.gmra.mxu1 %v7373_v44  ;;  %v7392_v62 = vld [vmem:[#allocation2 + $0xf8] sm:$0xf]  ;;  %v10768_v46 = vld [vmem:[#allocation5 + $0x1030] sm:$0xff] }
 0x1f1   :  { %6798 = vmatpush.bf16.msrb.mxu1 %v10745_v42  ;;  %6764 = vmatmul.bf16.vlgmr.msra.gmra.mxu2 %v7377_v6  ;;  %v10239_v42 = vld [vmem:[#allocation2 + $0x244] sm:$0xf0]  ;;  %v10776_v6 = vld [vmem:[#allocation5 + $0x1070] sm:$0xff] }
 0x1f2   :  { %6812 = vmatpush.bf16.msrb.mxu2 %v10753_v45  ;;  %6778 = vmatmul.bf16.vlgmr.msra.gmra.mxu3 %v7381_v29  ;;  %v7393_v32 = vor.u32 %v10239_v42, %v7392_v62  ;;  %v7389_v45 = vor.u32 %v10196_v13, %v7386_v0  ;;  %v10784_v44 = vld [vmem:[#allocation5 + $0x10b0] sm:$0xff]  ;;  %v10199_v62 = vld [vmem:[#allocation2 + $0x10c] sm:$0xf]  ;;  %v7410_v42 = vld [vmem:[#allocation2 + $0x258] sm:$0xf0] }
 0x1f3   :  { %6826 = vmatpush.bf16.msrb.mxu3 %v10761_v7  ;;  %v7397_v7 = vor.u32 %v10197_v1, %v7394_v23  ;;  %v10792_v29 = vld [vmem:[#allocation5 + $0x10f0] sm:$0xff]  ;;  %v10817_v13 = vld [vmem:[#allocation5 + $0x11b8] sm:$0xff] }
 0x1f4   :  { %6785 = vmatpush.bf16.msrb.mxu0 %v10736_v10  ;;  %v6541_v31 = vpop.f32.mrf.mxu2  ;;  %v6515_v43 = vpop.f32.mrf.mxu0  ;;  %v10767_v10 = vld [vmem:[#allocation5 + $0x1028] sm:$0xff]  ;;  %v10825_v0 = vld [vmem:[#allocation5 + $0x11f8] sm:$0xff] }
 0x1f5   :  { %6799 = vmatpush.bf16.msrb.mxu1 %v10744_v11  ;;  %v6542_v41 = vadd.f32 %v6541_v31, %v6528_v19  ;;  %v6555_v40 = vpop.f32.mrf.mxu3  ;;  %v6516_v38 = vadd.f32 %v6515_v43, %v11203_v27  ;;  %v6529_v35 = vpop.f32.mrf.mxu1  ;;  %v10238_v27 = vld [vmem:[#allocation2 + $0x23c] sm:$0xf0]  ;;  %v10775_v11 = vld [vmem:[#allocation5 + $0x1068] sm:$0xff]  ;;  %v10789_v19 = vld [vmem:[#allocation5 + $0x10d8] sm:$0xff] }
 0x1f6   :  { %6813 = vmatpush.bf16.msrb.mxu2 %v10752_v14  ;;  %v7385_v4 = vor.u32 %v10238_v27, %v7384_v59  ;;  %v10783_v14 = vld [vmem:[#allocation5 + $0x10a8] sm:$0xff]  ;;  %v10772_v43 = vld [vmem:[#allocation5 + $0x1050] sm:$0xff]  ;;  %v10198_v59 = vld [vmem:[#allocation2 + $0x104] sm:$0xf] }
 0x1f7   :  { %6827 = vmatpush.bf16.msrb.mxu3 %v10760_v16  ;;  %v11207_v17 = vadd.f32 %v6555_v40, %v6542_v41  ;;  %v6530_v48 = vadd.f32 %v6529_v35, %v6516_v38  ;;  %v10791_v16 = vld [vmem:[#allocation5 + $0x10e8] sm:$0xff]  ;;  %v10764_v40 = vld [vmem:[#allocation5 + $0x1010] sm:$0xff] }
 0x1f8   :  { %6786 = vmatpush.bf16.msrb.mxu0 %v10735_v12  ;;  %v10763_v35 = vld [vmem:[#allocation5 + $0x1008] sm:$0xff]  ;;  %v7402_v27 = vld [vmem:[#allocation2 + $0x250] sm:$0xf0] }
 0x1f9   :  { %6800 = vmatpush.bf16.msrb.mxu1 %v10743_v20 }
 0x1fa   :  { %6814 = vmatpush.bf16.msrb.mxu2 %v10751_v26  ;;  %v10766_v26 = vld [vmem:[#allocation5 + $0x1020] sm:$0xff] }
 0x1fb   :  { %6828 = vmatpush.bf16.msrb.mxu3 %v10759_v49  ;;  %v10774_v49 = vld [vmem:[#allocation5 + $0x1060] sm:$0xff] }
 0x1fc   :  { %6787 = vmatpush.bf16.msrb.mxu0 %v10734_v34  ;;  %v6543_v52 = vpop.f32.mrf.mxu2  ;;  %v10790_v34 = vld [vmem:[#allocation5 + $0x10e0] sm:$0xff] }
 0x1fd   :  { %6801 = vmatpush.bf16.msrb.mxu1 %v10742_v21  ;;  %v6544_v22 = vadd.f32 %v6543_v52, %v6530_v48  ;;  %v6557_v53 = vpop.f32.mrf.mxu3  ;;  %v10787_v48 = vld [vmem:[#allocation5 + $0x10c8] sm:$0xff]  ;;  %v10770_v52 = vld [vmem:[#allocation5 + $0x1040] sm:$0xff] }
 0x1fe   :  { %6815 = vmatpush.bf16.msrb.mxu2 %v10750_v15  ;;  %v10773_v15 = vld [vmem:[#allocation5 + $0x1058] sm:$0xff] }
 0x1ff   :  { %6829 = vmatpush.bf16.msrb.mxu3 %v10758_v36  ;;  %v11209_v57 = vadd.f32 %v6557_v53, %v6544_v22  ;;  %v10781_v36 = vld [vmem:[#allocation5 + $0x1098] sm:$0xff]  ;;  %v10778_v22 = vld [vmem:[#allocation5 + $0x1080] sm:$0xff] }
 0x200   :  { %6788 = vmatpush.bf16.msrb.mxu0 %v10733_v24  ;;  %v10786_v53 = vld [vmem:[#allocation5 + $0x10c0] sm:$0xff] }
 0x201   :  { %6802 = vmatpush.bf16.msrb.mxu1 %v10741_v37 }
 0x202   :  { %6816 = vmatpush.bf16.msrb.mxu2 %v10749_v39 }
 0x203   :  { %6830 = vmatpush.bf16.msrb.mxu3 %v10757_v60 }
 0x204   :  { %6789 = vmatpush.bf16.msrb.mxu0 %v10732_v47  ;;  %v10788_v47 = vld [vmem:[#allocation5 + $0x10d0] sm:$0xff] }
 0x205   :  { %6803 = vmatpush.bf16.msrb.mxu1 %v10740_v61 }
 0x206   :  { %6817 = vmatpush.bf16.msrb.mxu2 %v10748_v28  ;;  %v10771_v28 = vld [vmem:[#allocation5 + $0x1048] sm:$0xff] }
 0x207   :  { %6831 = vmatpush.bf16.msrb.mxu3 %v10756_v25  ;;  %v10779_v25 = vld [vmem:[#allocation5 + $0x1088] sm:$0xff] }
 0x208   :  { %6790 = vmatpush.bf16.msrb.mxu0 %v10731_v50 }
 0x209   :  { %6804 = vmatpush.bf16.msrb.mxu1 %v10739_v63 }
 0x20a   :  { %6818 = vmatpush.bf16.msrb.mxu2 %v10747_v51 }
 0x20b   :  { %6832 = vmatpush.bf16.msrb.mxu3 %v10755_v5  ;;  %v10762_v5 = vld [vmem:[#allocation5 + $0x1000] sm:$0xff] }
 0x20c   :  { %6791 = vmatpush.bf16.msrb.mxu0 %v10730_v9  ;;  %v6569_v12 = vpop.f32.mrf.mxu0 }
 0x20d   :  { %6805 = vmatpush.bf16.msrb.mxu1 %v10738_v54  ;;  %v6570_v20 = vadd.f32 %v6569_v12, %v11207_v17  ;;  %v6583_v30 = vpop.f32.mrf.mxu1  ;;  %v10780_v17 = vld [vmem:[#allocation5 + $0x1090] sm:$0xff]  ;;  %v10801_v54 = vld [vmem:[#allocation5 + $0x1138] sm:$0xff] }
 0x20e   :  { %6819 = vmatpush.bf16.msrb.mxu2 %v10746_v33  ;;  %v10809_v33 = vld [vmem:[#allocation5 + $0x1178] sm:$0xff] }
 0x20f   :  { %6833 = vmatpush.bf16.msrb.mxu3 %v10754_v55  ;;  %6792 = vmatmul.bf16.vlgmr.msrb.gmra.mxu0 %v7385_v4  ;;  %v6584_v21 = vadd.f32 %v6583_v30, %v6570_v20  ;;  %v7400_v55 = vld [vmem:[#allocation2 + $0x100] sm:$0xf]  ;;  %v10800_v4 = vld [vmem:[#allocation5 + $0x1130] sm:$0xff]  ;;  %v10797_v30 = vld [vmem:[#allocation5 + $0x1118] sm:$0xff] }
 0x210   :  { %6840 = vmatpush.bf16.msra.mxu0 %v10769_v8  ;;  %6806 = vmatmul.bf16.vlgmr.msrb.gmra.mxu1 %v7389_v45  ;;  %v7408_v8 = vld [vmem:[#allocation2 + $0x108] sm:$0xf]  ;;  %v10816_v45 = vld [vmem:[#allocation5 + $0x11b0] sm:$0xff]  ;;  %v10814_v20 = vld [vmem:[#allocation5 + $0x11a0] sm:$0xff] }
 0x211   :  { %6854 = vmatpush.bf16.msra.mxu1 %v10777_v58  ;;  %6820 = vmatmul.bf16.vlgmr.msrb.gmra.mxu2 %v7393_v32  ;;  %v10241_v58 = vld [vmem:[#allocation2 + $0x254] sm:$0xf0]  ;;  %v10808_v32 = vld [vmem:[#allocation5 + $0x1170] sm:$0xff] }
 0x212   :  { %6868 = vmatpush.bf16.msra.mxu2 %v10785_v2  ;;  %6834 = vmatmul.bf16.vlgmr.msrb.gmra.mxu3 %v7397_v7  ;;  %v7409_v23 = vor.u32 %v10241_v58, %v7408_v8  ;;  %v7405_v2 = vor.u32 %v10198_v59, %v7402_v27  ;;  %v10824_v7 = vld [vmem:[#allocation5 + $0x11f0] sm:$0xff]  ;;  %v10201_v8 = vld [vmem:[#allocation2 + $0x11c] sm:$0xf]  ;;  %v7426_v58 = vld [vmem:[#allocation2 + $0x268] sm:$0xf0] }
 0x213   :  { %6882 = vmatpush.bf16.msra.mxu3 %v10793_v3  ;;  %v7413_v3 = vor.u32 %v10199_v62, %v7410_v42  ;;  %v10849_v59 = vld [vmem:[#allocation5 + $0x12b8] sm:$0xff] }
 0x214   :  { %6841 = vmatpush.bf16.msra.mxu0 %v10768_v46  ;;  %v6597_v24 = vpop.f32.mrf.mxu2  ;;  %v6571_v60 = vpop.f32.mrf.mxu0  ;;  %v10799_v46 = vld [vmem:[#allocation5 + $0x1128] sm:$0xff]  ;;  %v10857_v27 = vld [vmem:[#allocation5 + $0x12f8] sm:$0xff] }
 0x215   :  { %6855 = vmatpush.bf16.msra.mxu1 %v10776_v6  ;;  %v6598_v37 = vadd.f32 %v6597_v24, %v6584_v21  ;;  %v6611_v39 = vpop.f32.mrf.mxu3  ;;  %v6572_v31 = vadd.f32 %v6571_v60, %v11209_v57  ;;  %v6585_v38 = vpop.f32.mrf.mxu1  ;;  %v10240_v57 = vld [vmem:[#allocation2 + $0x24c] sm:$0xf0]  ;;  %v10807_v6 = vld [vmem:[#allocation5 + $0x1168] sm:$0xff]  ;;  %v10821_v21 = vld [vmem:[#allocation5 + $0x11d8] sm:$0xff] }
 0x216   :  { %6869 = vmatpush.bf16.msra.mxu2 %v10784_v44  ;;  %v7401_v1 = vor.u32 %v10240_v57, %v7400_v55  ;;  %v10815_v44 = vld [vmem:[#allocation5 + $0x11a8] sm:$0xff]  ;;  %v10804_v60 = vld [vmem:[#allocation5 + $0x1150] sm:$0xff]  ;;  %v7418_v57 = vld [vmem:[#allocation2 + $0x260] sm:$0xf0] }
 0x217   :  { %6883 = vmatpush.bf16.msra.mxu3 %v10792_v29  ;;  %v11213_v41 = vadd.f32 %v6611_v39, %v6598_v37  ;;  %v6586_v61 = vadd.f32 %v6585_v38, %v6572_v31  ;;  %v10823_v29 = vld [vmem:[#allocation5 + $0x11e8] sm:$0xff]  ;;  %v10796_v39 = vld [vmem:[#allocation5 + $0x1110] sm:$0xff] }
 0x218   :  { %6842 = vmatpush.bf16.msra.mxu0 %v10767_v10  ;;  %v10795_v38 = vld [vmem:[#allocation5 + $0x1108] sm:$0xff]  ;;  %v10200_v55 = vld [vmem:[#allocation2 + $0x114] sm:$0xf] }
 0x219   :  { %6856 = vmatpush.bf16.msra.mxu1 %v10775_v11 }
 0x21a   :  { %6870 = vmatpush.bf16.msra.mxu2 %v10783_v14  ;;  %v10798_v14 = vld [vmem:[#allocation5 + $0x1120] sm:$0xff] }
 0x21b   :  { %6884 = vmatpush.bf16.msra.mxu3 %v10791_v16  ;;  %v10806_v16 = vld [vmem:[#allocation5 + $0x1160] sm:$0xff] }
 0x21c   :  { %6843 = vmatpush.bf16.msra.mxu0 %v10766_v26  ;;  %v6599_v50 = vpop.f32.mrf.mxu2  ;;  %v10822_v26 = vld [vmem:[#allocation5 + $0x11e0] sm:$0xff] }
 0x21d   :  { %6857 = vmatpush.bf16.msra.mxu1 %v10774_v49  ;;  %v6600_v63 = vadd.f32 %v6599_v50, %v6586_v61  ;;  %v6613_v51 = vpop.f32.mrf.mxu3  ;;  %v10819_v61 = vld [vmem:[#allocation5 + $0x11c8] sm:$0xff]  ;;  %v10802_v50 = vld [vmem:[#allocation5 + $0x1140] sm:$0xff] }
 0x21e   :  { %6871 = vmatpush.bf16.msra.mxu2 %v10782_v56  ;;  %v10805_v56 = vld [vmem:[#allocation5 + $0x1158] sm:$0xff] }
 0x21f   :  { %6885 = vmatpush.bf16.msra.mxu3 %v10790_v34  ;;  %v11215_v9 = vadd.f32 %v6613_v51, %v6600_v63  ;;  %v10813_v34 = vld [vmem:[#allocation5 + $0x1198] sm:$0xff]  ;;  %v10810_v63 = vld [vmem:[#allocation5 + $0x1180] sm:$0xff] }
 0x220   :  { %6844 = vmatpush.bf16.msra.mxu0 %v10765_v18  ;;  %v10818_v51 = vld [vmem:[#allocation5 + $0x11c0] sm:$0xff] }
 0x221   :  { %6858 = vmatpush.bf16.msra.mxu1 %v10773_v15 }
 0x222   :  { %6872 = vmatpush.bf16.msra.mxu2 %v10781_v36 }
 0x223   :  { %6886 = vmatpush.bf16.msra.mxu3 %v10789_v19 }
 0x224   :  { %6845 = vmatpush.bf16.msra.mxu0 %v10764_v40  ;;  %v10820_v40 = vld [vmem:[#allocation5 + $0x11d0] sm:$0xff] }
 0x225   :  { %6859 = vmatpush.bf16.msra.mxu1 %v10772_v43 }
 0x226   :  { %6873 = vmatpush.bf16.msra.mxu2 %v10780_v17  ;;  %v10803_v17 = vld [vmem:[#allocation5 + $0x1148] sm:$0xff] }
 0x227   :  { %6887 = vmatpush.bf16.msra.mxu3 %v10788_v47  ;;  %v10811_v47 = vld [vmem:[#allocation5 + $0x1188] sm:$0xff] }
 0x228   :  { %6846 = vmatpush.bf16.msra.mxu0 %v10763_v35 }
 0x229   :  { %6860 = vmatpush.bf16.msra.mxu1 %v10771_v28 }
 0x22a   :  { %6874 = vmatpush.bf16.msra.mxu2 %v10779_v25 }
 0x22b   :  { %6888 = vmatpush.bf16.msra.mxu3 %v10787_v48  ;;  %v10794_v48 = vld [vmem:[#allocation5 + $0x1100] sm:$0xff] }
 0x22c   :  { %6847 = vmatpush.bf16.msra.mxu0 %v10762_v5  ;;  %v6625_v10 = vpop.f32.mrf.mxu0 }
 0x22d   :  { %6861 = vmatpush.bf16.msra.mxu1 %v10770_v52  ;;  %v6626_v11 = vadd.f32 %v6625_v10, %v11213_v41  ;;  %v6639_v12 = vpop.f32.mrf.mxu1  ;;  %v10812_v41 = vld [vmem:[#allocation5 + $0x1190] sm:$0xff]  ;;  %v10833_v52 = vld [vmem:[#allocation5 + $0x1238] sm:$0xff] }
 0x22e   :  { %6875 = vmatpush.bf16.msra.mxu2 %v10778_v22  ;;  %v10841_v22 = vld [vmem:[#allocation5 + $0x1278] sm:$0xff] }
 0x22f   :  { %6889 = vmatpush.bf16.msra.mxu3 %v10786_v53  ;;  %6848 = vmatmul.bf16.vlgmr.msra.gmra.mxu0 %v7401_v1  ;;  %v6640_v49 = vadd.f32 %v6639_v12, %v6626_v11  ;;  %v7416_v53 = vld [vmem:[#allocation2 + $0x110] sm:$0xf]  ;;  %v10829_v10 = vld [vmem:[#allocation5 + $0x1218] sm:$0xff] }
 0x230   :  { %6896 = vmatpush.bf16.msrb.mxu0 %v10801_v54  ;;  %6862 = vmatmul.bf16.vlgmr.msra.gmra.mxu1 %v7405_v2  ;;  %v7424_v54 = vld [vmem:[#allocation2 + $0x118] sm:$0xf]  ;;  %v10832_v1 = vld [vmem:[#allocation5 + $0x1230] sm:$0xff] }
 0x231   :  { %6910 = vmatpush.bf16.msrb.mxu1 %v10809_v33  ;;  %6876 = vmatmul.bf16.vlgmr.msra.gmra.mxu2 %v7409_v23  ;;  %v10243_v33 = vld [vmem:[#allocation2 + $0x264] sm:$0xf0]  ;;  %v10840_v23 = vld [vmem:[#allocation5 + $0x1270] sm:$0xff]  ;;  %v10837_v11 = vld [vmem:[#allocation5 + $0x1258] sm:$0xff] }
 0x232   :  { %6924 = vmatpush.bf16.msrb.mxu2 %v10817_v13  ;;  %6890 = vmatmul.bf16.vlgmr.msra.gmra.mxu3 %v7413_v3  ;;  %v7425_v42 = vor.u32 %v10243_v33, %v7424_v54  ;;  %v7421_v13 = vor.u32 %v10200_v55, %v7418_v57  ;;  %v10848_v2 = vld [vmem:[#allocation5 + $0x12b0] sm:$0xff]  ;;  %v10879_v54 = vld [vmem:[#allocation5 + $0x13a8] sm:$0xff]  ;;  %v10862_v55 = vld [vmem:[#allocation5 + $0x1320] sm:$0xff] }
 0x233   :  { %6938 = vmatpush.bf16.msrb.mxu3 %v10825_v0  ;;  %v7429_v0 = vor.u32 %v10201_v8, %v7426_v58  ;;  %v10856_v3 = vld [vmem:[#allocation5 + $0x12f0] sm:$0xff]  ;;  %v10887_v33 = vld [vmem:[#allocation5 + $0x13e8] sm:$0xff]  ;;  %v10870_v57 = vld [vmem:[#allocation5 + $0x1360] sm:$0xff] }
 0x234   :  { %6897 = vmatpush.bf16.msrb.mxu0 %v10800_v4  ;;  %v6653_v18 = vpop.f32.mrf.mxu2  ;;  %v6627_v19 = vpop.f32.mrf.mxu0  ;;  %v10831_v4 = vld [vmem:[#allocation5 + $0x1228] sm:$0xff]  ;;  %v10828_v12 = vld [vmem:[#allocation5 + $0x1210] sm:$0xff]  ;;  %v10878_v8 = vld [vmem:[#allocation5 + $0x13a0] sm:$0xff] }
 0x235   :  { %6911 = vmatpush.bf16.msrb.mxu1 %v10808_v32  ;;  %v6654_v15 = vadd.f32 %v6653_v18, %v6640_v49  ;;  %v6667_v36 = vpop.f32.mrf.mxu3  ;;  %v6628_v24 = vadd.f32 %v6627_v19, %v11215_v9  ;;  %v6641_v31 = vpop.f32.mrf.mxu1  ;;  %v10242_v9 = vld [vmem:[#allocation2 + $0x25c] sm:$0xf0]  ;;  %v10839_v32 = vld [vmem:[#allocation5 + $0x1268] sm:$0xff]  ;;  %v10852_v49 = vld [vmem:[#allocation5 + $0x12d0] sm:$0xff] }
 0x236   :  { %6925 = vmatpush.bf16.msrb.mxu2 %v10816_v45  ;;  %v7417_v62 = vor.u32 %v10242_v9, %v7416_v53  ;;  %v10847_v45 = vld [vmem:[#allocation5 + $0x12a8] sm:$0xff]  ;;  %v10826_v18 = vld [vmem:[#allocation5 + $0x1200] sm:$0xff] }
 0x237   :  { %6939 = vmatpush.bf16.msrb.mxu3 %v10824_v7  ;;  %v11219_v37 = vadd.f32 %v6667_v36, %v6654_v15  ;;  %v6642_v43 = vadd.f32 %v6641_v31, %v6628_v24  ;;  %v10855_v7 = vld [vmem:[#allocation5 + $0x12e8] sm:$0xff]  ;;  %v10834_v15 = vld [vmem:[#allocation5 + $0x1240] sm:$0xff]  ;;  %v10865_v24 = vld [vmem:[#allocation5 + $0x1338] sm:$0xff] }
 0x238   :  { %6898 = vmatpush.bf16.msrb.mxu0 %v10799_v46  ;;  %v10830_v46 = vld [vmem:[#allocation5 + $0x1220] sm:$0xff]  ;;  %v10244_v31 = vld [vmem:[#allocation2 + $0x26c] sm:$0xf0]  ;;  %v10863_v53 = vld [vmem:[#allocation5 + $0x1328] sm:$0xff] }
 0x239   :  { %6912 = vmatpush.bf16.msrb.mxu1 %v10807_v6  ;;  %v10838_v6 = vld [vmem:[#allocation5 + $0x1260] sm:$0xff]  ;;  %v10871_v9 = vld [vmem:[#allocation5 + $0x1368] sm:$0xff] }
 0x23a   :  { %6926 = vmatpush.bf16.msrb.mxu2 %v10815_v44  ;;  %v10846_v44 = vld [vmem:[#allocation5 + $0x12a0] sm:$0xff] }
 0x23b   :  { %6940 = vmatpush.bf16.msrb.mxu3 %v10823_v29  ;;  %v10854_v29 = vld [vmem:[#allocation5 + $0x12e0] sm:$0xff] }
 0x23c   :  { %6899 = vmatpush.bf16.msrb.mxu0 %v10798_v14  ;;  %v6655_v35 = vpop.f32.mrf.mxu2  ;;  %v10845_v14 = vld [vmem:[#allocation5 + $0x1298] sm:$0xff]  ;;  %v10842_v36 = vld [vmem:[#allocation5 + $0x1280] sm:$0xff] }
 0x23d   :  { %6913 = vmatpush.bf16.msrb.mxu1 %v10806_v16  ;;  %v6656_v28 = vadd.f32 %v6655_v35, %v6642_v43  ;;  %v6669_v25 = vpop.f32.mrf.mxu3  ;;  %v10853_v16 = vld [vmem:[#allocation5 + $0x12d8] sm:$0xff]  ;;  %v10850_v19 = vld [vmem:[#allocation5 + $0x12c0] sm:$0xff] }
 0x23e   :  { %6927 = vmatpush.bf16.msrb.mxu2 %v10814_v20  ;;  %v10836_v20 = vld [vmem:[#allocation5 + $0x1250] sm:$0xff]  ;;  %v10202_v43 = vld [vmem:[#allocation2 + $0x124] sm:$0xf]  ;;  %v10889_v35 = vld [vmem:[#allocation5 + $0x13f8] sm:$0xff] }
 0x23f   :  { %6941 = vmatpush.bf16.msrb.mxu3 %v10822_v26  ;;  %v11221_v5 = vadd.f32 %v6669_v25, %v6656_v28  ;;  %v10844_v26 = vld [vmem:[#allocation5 + $0x1290] sm:$0xff]  ;;  %v10886_v58 = vld [vmem:[#allocation5 + $0x13e0] sm:$0xff] }
 0x240   :  { %6900 = vmatpush.bf16.msrb.mxu0 %v10797_v30  ;;  %v10827_v30 = vld [vmem:[#allocation5 + $0x1208] sm:$0xff] }
 0x241   :  { %6914 = vmatpush.bf16.msrb.mxu1 %v10805_v56  ;;  %v10835_v56 = vld [vmem:[#allocation5 + $0x1248] sm:$0xff] }
 0x242   :  { %6928 = vmatpush.bf16.msrb.mxu2 %v10813_v34  ;;  %v10843_v34 = vld [vmem:[#allocation5 + $0x1288] sm:$0xff] }
 0x243   :  { %6942 = vmatpush.bf16.msrb.mxu3 %v10821_v21  ;;  %v10851_v21 = vld [vmem:[#allocation5 + $0x12c8] sm:$0xff] }
 0x244   :  { %6901 = vmatpush.bf16.msrb.mxu0 %v10796_v39  ;;  %v10873_v39 = vld [vmem:[#allocation5 + $0x1378] sm:$0xff] }
 0x245   :  { %6915 = vmatpush.bf16.msrb.mxu1 %v10804_v60  ;;  %v7432_v60 = vld [vmem:[#allocation2 + $0x120] sm:$0xf] }
 0x246   :  { %6929 = vmatpush.bf16.msrb.mxu2 %v10812_v41  ;;  %v7440_v41 = vld [vmem:[#allocation2 + $0x128] sm:$0xf]  ;;  %v7433_v28 = vor.u32 %v10244_v31, %v7432_v60 }
 0x247   :  { %6943 = vmatpush.bf16.msrb.mxu3 %v10820_v40  ;;  %v10245_v40 = vld [vmem:[#allocation2 + $0x274] sm:$0xf0]  ;;  %v10895_v60 = vld [vmem:[#allocation5 + $0x1428] sm:$0xff] }
 0x248   :  { %6902 = vmatpush.bf16.msrb.mxu0 %v10795_v38  ;;  %v7434_v38 = vld [vmem:[#allocation2 + $0x270] sm:$0xf0]  ;;  %v7441_v25 = vor.u32 %v10245_v40, %v7440_v41  ;;  %v10903_v31 = vld [vmem:[#allocation5 + $0x1468] sm:$0xff] }
 0x249   :  { %6916 = vmatpush.bf16.msrb.mxu1 %v10803_v17  ;;  %v10203_v17 = vld [vmem:[#allocation2 + $0x12c] sm:$0xf] }
 0x24a   :  { %6930 = vmatpush.bf16.msrb.mxu2 %v10811_v47  ;;  %v7442_v47 = vld [vmem:[#allocation2 + $0x278] sm:$0xf0]  ;;  %v10911_v41 = vld [vmem:[#allocation5 + $0x14a8] sm:$0xff] }
 0x24b   :  { %6944 = vmatpush.bf16.msrb.mxu3 %v10819_v61  ;;  %v10881_v61 = vld [vmem:[#allocation5 + $0x13b8] sm:$0xff]  ;;  %v10919_v40 = vld [vmem:[#allocation5 + $0x14e8] sm:$0xff] }
 0x24c   :  { %6903 = vmatpush.bf16.msrb.mxu0 %v10794_v48  ;;  %v7437_v48 = vor.u32 %v10202_v43, %v7434_v38  ;;  %v10894_v43 = vld [vmem:[#allocation5 + $0x1420] sm:$0xff] }
 0x24d   :  { %6917 = vmatpush.bf16.msrb.mxu1 %v10802_v50  ;;  %v7445_v50 = vor.u32 %v10203_v17, %v7442_v47  ;;  %v10902_v38 = vld [vmem:[#allocation5 + $0x1460] sm:$0xff] }
 0x24e   :  { %6931 = vmatpush.bf16.msrb.mxu2 %v10810_v63  ;;  %v10864_v63 = vld [vmem:[#allocation5 + $0x1330] sm:$0xff]  ;;  %v10910_v17 = vld [vmem:[#allocation5 + $0x14a0] sm:$0xff] }
 0x24f   :  { %6945 = vmatpush.bf16.msrb.mxu3 %v10818_v51  ;;  %6904 = vmatmul.bf16.vlgmr.msrb.gmra.mxu0 %v7417_v62  ;;  %v10872_v51 = vld [vmem:[#allocation5 + $0x1370] sm:$0xff]  ;;  %v10877_v62 = vld [vmem:[#allocation5 + $0x1398] sm:$0xff]  ;;  %v10918_v47 = vld [vmem:[#allocation5 + $0x14e0] sm:$0xff] }
 0x250   :  { %6952 = vmatpush.bf16.msra.mxu0 %v10833_v52  ;;  %6918 = vmatmul.bf16.vlgmr.msrb.gmra.mxu1 %v7421_v13  ;;  %v10880_v52 = vld [vmem:[#allocation5 + $0x13b0] sm:$0xff] }
 0x251   :  { %6966 = vmatpush.bf16.msra.mxu1 %v10841_v22  ;;  %6932 = vmatmul.bf16.vlgmr.msrb.gmra.mxu2 %v7425_v42  ;;  %v10888_v22 = vld [vmem:[#allocation5 + $0x13f0] sm:$0xff]  ;;  %v10885_v42 = vld [vmem:[#allocation5 + $0x13d8] sm:$0xff] }
 0x252   :  { %6980 = vmatpush.bf16.msra.mxu2 %v10849_v59  ;;  %6946 = vmatmul.bf16.vlgmr.msrb.gmra.mxu3 %v7429_v0  ;;  %v10861_v59 = vld [vmem:[#allocation5 + $0x1318] sm:$0xff]  ;;  %v10860_v13 = vld [vmem:[#allocation5 + $0x1310] sm:$0xff] }
 0x253   :  { %6994 = vmatpush.bf16.msra.mxu3 %v10857_v27  ;;  %v10869_v27 = vld [vmem:[#allocation5 + $0x1358] sm:$0xff]  ;;  %v10868_v0 = vld [vmem:[#allocation5 + $0x1350] sm:$0xff] }
 0x254   :  { %6953 = vmatpush.bf16.msra.mxu0 %v10832_v1  ;;  %v10876_v1 = vld [vmem:[#allocation5 + $0x1390] sm:$0xff] }
 0x255   :  { %6967 = vmatpush.bf16.msra.mxu1 %v10840_v23  ;;  %v10884_v23 = vld [vmem:[#allocation5 + $0x13d0] sm:$0xff] }
 0x256   :  { %6981 = vmatpush.bf16.msra.mxu2 %v10848_v2  ;;  %v10859_v2 = vld [vmem:[#allocation5 + $0x1308] sm:$0xff] }
 0x257   :  { %6995 = vmatpush.bf16.msra.mxu3 %v10856_v3  ;;  %v10867_v3 = vld [vmem:[#allocation5 + $0x1348] sm:$0xff] }
 0x258   :  { %6954 = vmatpush.bf16.msra.mxu0 %v10831_v4  ;;  %v10875_v4 = vld [vmem:[#allocation5 + $0x1388] sm:$0xff] }
 0x259   :  { %6968 = vmatpush.bf16.msra.mxu1 %v10839_v32  ;;  %v10883_v32 = vld [vmem:[#allocation5 + $0x13c8] sm:$0xff] }
 0x25a   :  { %6982 = vmatpush.bf16.msra.mxu2 %v10847_v45  ;;  %v10858_v45 = vld [vmem:[#allocation5 + $0x1300] sm:$0xff] }
 0x25b   :  { %6996 = vmatpush.bf16.msra.mxu3 %v10855_v7  ;;  %v10866_v7 = vld [vmem:[#allocation5 + $0x1340] sm:$0xff] }
 0x25c   :  { %6955 = vmatpush.bf16.msra.mxu0 %v10830_v46  ;;  %v10874_v46 = vld [vmem:[#allocation5 + $0x1380] sm:$0xff] }
 0x25d   :  { %6969 = vmatpush.bf16.msra.mxu1 %v10838_v6  ;;  %v10882_v6 = vld [vmem:[#allocation5 + $0x13c0] sm:$0xff] }
 0x25e   :  { %6983 = vmatpush.bf16.msra.mxu2 %v10846_v44  ;;  %v10897_v44 = vld [vmem:[#allocation5 + $0x1438] sm:$0xff] }
 0x25f   :  { %6997 = vmatpush.bf16.msra.mxu3 %v10854_v29  ;;  %v10905_v29 = vld [vmem:[#allocation5 + $0x1478] sm:$0xff] }
 0x260   :  { %6956 = vmatpush.bf16.msra.mxu0 %v10829_v10  ;;  %v7448_v10 = vld [vmem:[#allocation2 + $0x130] sm:$0xf] }
 0x261   :  { %6970 = vmatpush.bf16.msra.mxu1 %v10837_v11  ;;  %v10246_v11 = vld [vmem:[#allocation2 + $0x27c] sm:$0xf0] }
 0x262   :  { %6984 = vmatpush.bf16.msra.mxu2 %v10845_v14  ;;  %v7456_v14 = vld [vmem:[#allocation2 + $0x138] sm:$0xf] }
 0x263   :  { %6998 = vmatpush.bf16.msra.mxu3 %v10853_v16  ;;  %v10247_v16 = vld [vmem:[#allocation2 + $0x284] sm:$0xf0] }
 0x264   :  { %6957 = vmatpush.bf16.msra.mxu0 %v10828_v12  ;;  %v10204_v12 = vld [vmem:[#allocation2 + $0x134] sm:$0xf] }
 0x265   :  { %6971 = vmatpush.bf16.msra.mxu1 %v10836_v20  ;;  %v7450_v20 = vld [vmem:[#allocation2 + $0x280] sm:$0xf0] }
 0x266   :  { %6985 = vmatpush.bf16.msra.mxu2 %v10844_v26  ;;  %v10205_v26 = vld [vmem:[#allocation2 + $0x13c] sm:$0xf] }
 0x267   :  { %6999 = vmatpush.bf16.msra.mxu3 %v10852_v49  ;;  %v7458_v49 = vld [vmem:[#allocation2 + $0x288] sm:$0xf0] }
 0x268   :  { %6958 = vmatpush.bf16.msra.mxu0 %v10827_v30  ;;  %v10913_v30 = vld [vmem:[#allocation5 + $0x14b8] sm:$0xff] }
 0x269   :  { %6972 = vmatpush.bf16.msra.mxu1 %v10835_v56  ;;  %v10921_v56 = vld [vmem:[#allocation5 + $0x14f8] sm:$0xff] }
 0x26a   :  { %6986 = vmatpush.bf16.msra.mxu2 %v10843_v34  ;;  %v7449_v34 = vor.u32 %v10246_v11, %v7448_v10 }
 0x26b   :  { %7000 = vmatpush.bf16.msra.mxu3 %v10851_v21  ;;  %v7457_v21 = vor.u32 %v10247_v16, %v7456_v14 }
 0x26c   :  { %6959 = vmatpush.bf16.msra.mxu0 %v10826_v18  ;;  %v7453_v18 = vor.u32 %v10204_v12, %v7450_v20 }
 0x26d   :  { %6973 = vmatpush.bf16.msra.mxu1 %v10834_v15  ;;  %v7461_v15 = vor.u32 %v10205_v26, %v7458_v49 }
 0x26e   :  { %6987 = vmatpush.bf16.msra.mxu2 %v10842_v36  ;;  %v10896_v36 = vld [vmem:[#allocation5 + $0x1430] sm:$0xff] }
 0x26f   :  { %7001 = vmatpush.bf16.msra.mxu3 %v10850_v19  ;;  %6960 = vmatmul.bf16.vlgmr.msra.gmra.mxu0 %v7433_v28  ;;  %v10904_v19 = vld [vmem:[#allocation5 + $0x1470] sm:$0xff]  ;;  %v10909_v28 = vld [vmem:[#allocation5 + $0x1498] sm:$0xff] }
 0x270   :  { %7008 = vmatpush.bf16.msrb.mxu0 %v10865_v24  ;;  %6974 = vmatmul.bf16.vlgmr.msra.gmra.mxu1 %v7437_v48  ;;  %v10912_v24 = vld [vmem:[#allocation5 + $0x14b0] sm:$0xff] }
 0x271   :  { %7022 = vmatpush.bf16.msrb.mxu1 %v10873_v39  ;;  %6988 = vmatmul.bf16.vlgmr.msra.gmra.mxu2 %v7441_v25  ;;  %v10920_v39 = vld [vmem:[#allocation5 + $0x14f0] sm:$0xff]  ;;  %v10917_v25 = vld [vmem:[#allocation5 + $0x14d8] sm:$0xff] }
 0x272   :  { %7036 = vmatpush.bf16.msrb.mxu2 %v10881_v61  ;;  %7002 = vmatmul.bf16.vlgmr.msra.gmra.mxu3 %v7445_v50  ;;  %v10893_v61 = vld [vmem:[#allocation5 + $0x1418] sm:$0xff]  ;;  %v10892_v48 = vld [vmem:[#allocation5 + $0x1410] sm:$0xff] }
 0x273   :  { %7050 = vmatpush.bf16.msrb.mxu3 %v10889_v35  ;;  %v10901_v35 = vld [vmem:[#allocation5 + $0x1458] sm:$0xff]  ;;  %v10900_v50 = vld [vmem:[#allocation5 + $0x1450] sm:$0xff] }
 0x274   :  { %7009 = vmatpush.bf16.msrb.mxu0 %v10864_v63  ;;  %v10908_v63 = vld [vmem:[#allocation5 + $0x1490] sm:$0xff] }
 0x275   :  { %7023 = vmatpush.bf16.msrb.mxu1 %v10872_v51  ;;  %v10916_v51 = vld [vmem:[#allocation5 + $0x14d0] sm:$0xff] }
 0x276   :  { %7037 = vmatpush.bf16.msrb.mxu2 %v10880_v52  ;;  %v10891_v52 = vld [vmem:[#allocation5 + $0x1408] sm:$0xff] }
 0x277   :  { %7051 = vmatpush.bf16.msrb.mxu3 %v10888_v22  ;;  %v10899_v22 = vld [vmem:[#allocation5 + $0x1448] sm:$0xff] }
 0x278   :  { %7010 = vmatpush.bf16.msrb.mxu0 %v10863_v53  ;;  %v10907_v53 = vld [vmem:[#allocation5 + $0x1488] sm:$0xff] }
 0x279   :  { %7024 = vmatpush.bf16.msrb.mxu1 %v10871_v9  ;;  %v10915_v9 = vld [vmem:[#allocation5 + $0x14c8] sm:$0xff] }
 0x27a   :  { %7038 = vmatpush.bf16.msrb.mxu2 %v10879_v54  ;;  %v10890_v54 = vld [vmem:[#allocation5 + $0x1400] sm:$0xff] }
 0x27b   :  { %7052 = vmatpush.bf16.msrb.mxu3 %v10887_v33  ;;  %v10898_v33 = vld [vmem:[#allocation5 + $0x1440] sm:$0xff] }
 0x27c   :  { %7011 = vmatpush.bf16.msrb.mxu0 %v10862_v55  ;;  %v10906_v55 = vld [vmem:[#allocation5 + $0x1480] sm:$0xff] }
 0x27d   :  { %7025 = vmatpush.bf16.msrb.mxu1 %v10870_v57  ;;  %v10914_v57 = vld [vmem:[#allocation5 + $0x14c0] sm:$0xff] }
 0x27e   :  { %7039 = vmatpush.bf16.msrb.mxu2 %v10878_v8  ;;  %v7464_v8 = vld [vmem:[#allocation2 + $0x140] sm:$0xf] }
 0x27f   :  { %7053 = vmatpush.bf16.msrb.mxu3 %v10886_v58  ;;  %v10248_v58 = vld [vmem:[#allocation2 + $0x28c] sm:$0xf0] }
 0x280   :  { %7012 = vmatpush.bf16.msrb.mxu0 %v10861_v59  ;;  %v10206_v59 = vld [vmem:[#allocation2 + $0x144] sm:$0xf] }
 0x281   :  { %7026 = vmatpush.bf16.msrb.mxu1 %v10869_v27  ;;  %v7466_v27 = vld [vmem:[#allocation2 + $0x290] sm:$0xf0] }
 0x282   :  { %7040 = vmatpush.bf16.msrb.mxu2 %v10877_v62  ;;  %v7472_v62 = vld [vmem:[#allocation2 + $0x148] sm:$0xf] }
 0x283   :  { %7054 = vmatpush.bf16.msrb.mxu3 %v10885_v42  ;;  %v10249_v42 = vld [vmem:[#allocation2 + $0x294] sm:$0xf0] }
 0x284   :  { %7013 = vmatpush.bf16.msrb.mxu0 %v10860_v13  ;;  %v10207_v13 = vld [vmem:[#allocation2 + $0x14c] sm:$0xf] }
 0x285   :  { %7027 = vmatpush.bf16.msrb.mxu1 %v10868_v0  ;;  %v7474_v0 = vld [vmem:[#allocation2 + $0x298] sm:$0xf0] }
 0x286   :  { %7041 = vmatpush.bf16.msrb.mxu2 %v10876_v1  ;;  %v7465_v1 = vor.u32 %v10248_v58, %v7464_v8 }
 0x287   :  { %7055 = vmatpush.bf16.msrb.mxu3 %v10884_v23  ;;  %v7469_v23 = vor.u32 %v10206_v59, %v7466_v27 }
 0x288   :  { %7014 = vmatpush.bf16.msrb.mxu0 %v10859_v2  ;;  %v7473_v2 = vor.u32 %v10249_v42, %v7472_v62 }
 0x289   :  { %7028 = vmatpush.bf16.msrb.mxu1 %v10867_v3  ;;  %v7477_v3 = vor.u32 %v10207_v13, %v7474_v0 }
 0x28a   :  { %7042 = vmatpush.bf16.msrb.mxu2 %v10875_v4  ;;  %v6681_v4 = vpop.f32.mrf.mxu0 }
 0x28b   :  { %7056 = vmatpush.bf16.msrb.mxu3 %v10883_v32  ;;  %v6695_v32 = vpop.f32.mrf.mxu1 }
 0x28c   :  { %7015 = vmatpush.bf16.msrb.mxu0 %v10858_v45  ;;  %v6709_v45 = vpop.f32.mrf.mxu2 }
 0x28d   :  { %7029 = vmatpush.bf16.msrb.mxu1 %v10866_v7  ;;  %v6723_v7 = vpop.f32.mrf.mxu3 }
 0x28e   :  { %7043 = vmatpush.bf16.msrb.mxu2 %v10874_v46 }
 0x28f   :  { %7057 = vmatpush.bf16.msrb.mxu3 %v10882_v6  ;;  %7016 = vmatmul.bf16.vlgmr.msrb.gmra.mxu0 %v7449_v34 }
 0x290   :  { %7064 = vmatpush.bf16.msra.mxu0 %v10897_v44  ;;  %7030 = vmatmul.bf16.vlgmr.msrb.gmra.mxu1 %v7453_v18  ;;  %v6682_v18 = vadd.f32 %v6681_v4, %v11219_v37 }
 0x291   :  { %7078 = vmatpush.bf16.msra.mxu1 %v10905_v29  ;;  %7044 = vmatmul.bf16.vlgmr.msrb.gmra.mxu2 %v7457_v21 }
 0x292   :  { %7092 = vmatpush.bf16.msra.mxu2 %v10913_v30  ;;  %7058 = vmatmul.bf16.vlgmr.msrb.gmra.mxu3 %v7461_v15  ;;  %v6683_v46 = vpop.f32.mrf.mxu0 }
 0x293   :  { %7106 = vmatpush.bf16.msra.mxu3 %v10921_v56  ;;  %v6697_v6 = vpop.f32.mrf.mxu1 }
 0x294   :  { %7065 = vmatpush.bf16.msra.mxu0 %v10896_v36  ;;  %v6711_v44 = vpop.f32.mrf.mxu2  ;;  %v6696_v36 = vadd.f32 %v6695_v32, %v6682_v18 }
 0x295   :  { %7079 = vmatpush.bf16.msra.mxu1 %v10904_v19  ;;  %v6725_v29 = vpop.f32.mrf.mxu3 }
 0x296   :  { %7093 = vmatpush.bf16.msra.mxu2 %v10912_v24  ;;  %v6710_v24 = vadd.f32 %v6709_v45, %v6696_v36 }
 0x297   :  { %7107 = vmatpush.bf16.msra.mxu3 %v10920_v39  ;;  %v6684_v39 = vadd.f32 %v6683_v46, %v11221_v5 }
 0x298   :  { %7066 = vmatpush.bf16.msra.mxu0 %v10895_v60 }
 0x299   :  { %7080 = vmatpush.bf16.msra.mxu1 %v10903_v31 }
 0x29a   :  { %7094 = vmatpush.bf16.msra.mxu2 %v10911_v41  ;;  %v6737_v10 = vpop.f32.mrf.mxu0  ;;  %v6724_v41 = vadd.f32 %v6723_v7, %v6710_v24 }
 0x29b   :  { %7108 = vmatpush.bf16.msra.mxu3 %v10919_v40  ;;  %v6751_v11 = vpop.f32.mrf.mxu1 }
 0x29c   :  { %7067 = vmatpush.bf16.msra.mxu0 %v10894_v43  ;;  %v6765_v14 = vpop.f32.mrf.mxu2  ;;  %v6698_v43 = vadd.f32 %v6697_v6, %v6684_v39 }
 0x29d   :  { %7081 = vmatpush.bf16.msra.mxu1 %v10902_v38  ;;  %v6779_v16 = vpop.f32.mrf.mxu3  ;;  %v6738_v38 = vadd.f32 %v6737_v10, %v6724_v41 }
 0x29e   :  { %7095 = vmatpush.bf16.msra.mxu2 %v10910_v17 }
 0x29f   :  { %7109 = vmatpush.bf16.msra.mxu3 %v10918_v47  ;;  %v6712_v47 = vadd.f32 %v6711_v44, %v6698_v43 }
 0x2a0   :  { %7068 = vmatpush.bf16.msra.mxu0 %v10893_v61  ;;  %v6752_v61 = vadd.f32 %v6751_v11, %v6738_v38 }
 0x2a1   :  { %7082 = vmatpush.bf16.msra.mxu1 %v10901_v35 }
 0x2a2   :  { %7096 = vmatpush.bf16.msra.mxu2 %v10909_v28  ;;  %v6739_v12 = vpop.f32.mrf.mxu0 }
 0x2a3   :  { %7110 = vmatpush.bf16.msra.mxu3 %v10917_v25  ;;  %v6753_v20 = vpop.f32.mrf.mxu1  ;;  %v6726_v25 = vadd.f32 %v6725_v29, %v6712_v47 }
 0x2a4   :  { %7069 = vmatpush.bf16.msra.mxu0 %v10892_v48  ;;  %v6767_v26 = vpop.f32.mrf.mxu2  ;;  %v6766_v48 = vadd.f32 %v6765_v14, %v6752_v61 }
 0x2a5   :  { %7083 = vmatpush.bf16.msra.mxu1 %v10900_v50  ;;  %v6781_v49 = vpop.f32.mrf.mxu3  ;;  %v6740_v37 = vadd.f32 %v6739_v12, %v6726_v25 }
 0x2a6   :  { %7097 = vmatpush.bf16.msra.mxu2 %v10908_v63  ;;  %v6780_v63 = vadd.f32 %v6779_v16, %v6766_v48 }
 0x2a7   :  { %7111 = vmatpush.bf16.msra.mxu3 %v10916_v51 }
 0x2a8   :  { %7070 = vmatpush.bf16.msra.mxu0 %v10891_v52  ;;  %v6754_v52 = vadd.f32 %v6753_v20, %v6740_v37 }
 0x2a9   :  { %7084 = vmatpush.bf16.msra.mxu1 %v10899_v22 }
 0x2aa   :  { %7098 = vmatpush.bf16.msra.mxu2 %v10907_v53  ;;  %v6793_v30 = vpop.f32.mrf.mxu0  ;;  %v6768_v5 = vadd.f32 %v6767_v26, %v6754_v52 }
 0x2ab   :  { %7112 = vmatpush.bf16.msra.mxu3 %v10915_v9  ;;  %v6807_v56 = vpop.f32.mrf.mxu1  ;;  %v6794_v22 = vadd.f32 %v6793_v30, %v6780_v63 }
 0x2ac   :  { %7071 = vmatpush.bf16.msra.mxu0 %v10890_v54  ;;  %v6821_v34 = vpop.f32.mrf.mxu2 }
 0x2ad   :  { %7085 = vmatpush.bf16.msra.mxu1 %v10898_v33  ;;  %v6835_v21 = vpop.f32.mrf.mxu3  ;;  %v6808_v54 = vadd.f32 %v6807_v56, %v6794_v22 }
 0x2ae   :  { %7099 = vmatpush.bf16.msra.mxu2 %v10906_v55  ;;  %v6782_v55 = vadd.f32 %v6781_v49, %v6768_v5 }
 0x2af   :  { %7113 = vmatpush.bf16.msra.mxu3 %v10914_v57  ;;  %7072 = vmatmul.bf16.vlgmr.msra.gmra.mxu0 %v7465_v1  ;;  %v6822_v57 = vadd.f32 %v6821_v34, %v6808_v54 }
 0x2b0   :  { %7086 = vmatmul.bf16.vlgmr.msra.gmra.mxu1 %v7469_v23 }
 0x2b1   :  { %7100 = vmatmul.bf16.vlgmr.msra.gmra.mxu2 %v7473_v2  ;;  %v6836_v59 = vadd.f32 %v6835_v21, %v6822_v57 }
 0x2b2   :  { %7114 = vmatmul.bf16.vlgmr.msra.gmra.mxu3 %v7477_v3  ;;  %v6795_v15 = vpop.f32.mrf.mxu0 }
 0x2b3   :  { %v6809_v19 = vpop.f32.mrf.mxu1  ;;  %v6796_v58 = vadd.f32 %v6795_v15, %v6782_v55 }
 0x2b4   :  { %v6823_v60 = vpop.f32.mrf.mxu2 }
 0x2b5   :  { %v6837_v31 = vpop.f32.mrf.mxu3  ;;  %v6810_v42 = vadd.f32 %v6809_v19, %v6796_v58 }
 0x2b7   :  { %v6824_v0 = vadd.f32 %v6823_v60, %v6810_v42 }
 0x2b9   :  { %v6838_v3 = vadd.f32 %v6837_v31, %v6824_v0 }
 0x2ba   :  { %v6849_v40 = vpop.f32.mrf.mxu0 }
 0x2bb   :  { %v6863_v17 = vpop.f32.mrf.mxu1  ;;  %v6850_v13 = vadd.f32 %v6849_v40, %v6836_v59 }
 0x2bc   :  { %v6877_v35 = vpop.f32.mrf.mxu2 }
 0x2bd   :  { %v6891_v28 = vpop.f32.mrf.mxu3  ;;  %v6864_v23 = vadd.f32 %v6863_v17, %v6850_v13 }
 0x2bf   :  { %v6878_v4 = vadd.f32 %v6877_v35, %v6864_v23 }
 0x2c1   :  { %v6892_v46 = vadd.f32 %v6891_v28, %v6878_v4 }
 0x2c2   :  { %v6851_v50 = vpop.f32.mrf.mxu0 }
 0x2c3   :  { %v6865_v51 = vpop.f32.mrf.mxu1  ;;  %v6852_v32 = vadd.f32 %v6851_v50, %v6838_v3 }
 0x2c4   :  { %v6879_v53 = vpop.f32.mrf.mxu2 }
 0x2c5   :  { %v6893_v9 = vpop.f32.mrf.mxu3  ;;  %v6866_v44 = vadd.f32 %v6865_v51, %v6852_v32 }
 0x2c7   :  { %v6880_v11 = vadd.f32 %v6879_v53, %v6866_v44 }
 0x2c9   :  { %v6894_v20 = vadd.f32 %v6893_v9, %v6880_v11 }
 0x2cc   :  { %v6905_v33 = vpop.f32.mrf.mxu0 }
 0x2cd   :  { %v6919_v8 = vpop.f32.mrf.mxu1  ;;  %v6906_v29 = vadd.f32 %v6905_v33, %v6892_v46 }
 0x2cf   :  { %v6920_v14 = vadd.f32 %v6919_v8, %v6906_v29 }
 0x2d4   :  { %v6933_v27 = vpop.f32.mrf.mxu2  ;;  %v6907_v1 = vpop.f32.mrf.mxu0 }
 0x2d5   :  { %v6947_v62 = vpop.f32.mrf.mxu3  ;;  %v6921_v2 = vpop.f32.mrf.mxu1  ;;  %v6934_v26 = vadd.f32 %v6933_v27, %v6920_v14  ;;  %v6908_v49 = vadd.f32 %v6907_v1, %v6894_v20 }
 0x2d7   :  { %v6948_v56 = vadd.f32 %v6947_v62, %v6934_v26  ;;  %v6922_v21 = vadd.f32 %v6921_v2, %v6908_v49 }
 0x2dc   :  { %v6935_v45 = vpop.f32.mrf.mxu2 }
 0x2dd   :  { %v6949_v7 = vpop.f32.mrf.mxu3  ;;  %v6936_v15 = vadd.f32 %v6935_v45, %v6922_v21 }
 0x2df   :  { %v6950_v60 = vadd.f32 %v6949_v7, %v6936_v15 }
 0x2ec   :  { %v6961_v6 = vpop.f32.mrf.mxu0 }
 0x2ed   :  { %v6975_v10 = vpop.f32.mrf.mxu1  ;;  %v6962_v18 = vadd.f32 %v6961_v6, %v6948_v56 }
 0x2ef   :  { %v6976_v24 = vadd.f32 %v6975_v10, %v6962_v18 }
 0x2f4   :  { %v6989_v16 = vpop.f32.mrf.mxu2  ;;  %v6963_v30 = vpop.f32.mrf.mxu0 }
 0x2f5   :  { %v7003_v12 = vpop.f32.mrf.mxu3  ;;  %v6977_v34 = vpop.f32.mrf.mxu1  ;;  %v6990_v31 = vadd.f32 %v6989_v16, %v6976_v24  ;;  %v6964_v40 = vadd.f32 %v6963_v30, %v6950_v60 }
 0x2f7   :  { %v7004_v43 = vadd.f32 %v7003_v12, %v6990_v31  ;;  %v6978_v47 = vadd.f32 %v6977_v34, %v6964_v40 }
 0x2fc   :  { %v6991_v36 = vpop.f32.mrf.mxu2 }
 0x2fd   :  { %v7005_v19 = vpop.f32.mrf.mxu3  ;;  %v6992_v35 = vadd.f32 %v6991_v36, %v6978_v47 }
 0x2ff   :  { %v7006_v37 = vadd.f32 %v7005_v19, %v6992_v35 }
 0x30c   :  { %v7017_v39 = vpop.f32.mrf.mxu0 }
 0x30d   :  { %v7031_v41 = vpop.f32.mrf.mxu1  ;;  %v7018_v61 = vadd.f32 %v7017_v39, %v7004_v43 }
 0x30f   :  { %v7032_v25 = vadd.f32 %v7031_v41, %v7018_v61 }
 0x314   :  { %v7045_v38 = vpop.f32.mrf.mxu2  ;;  %v7019_v28 = vpop.f32.mrf.mxu0 }
 0x315   :  { %v7059_v17 = vpop.f32.mrf.mxu3  ;;  %v7033_v48 = vpop.f32.mrf.mxu1  ;;  %v7046_v50 = vadd.f32 %v7045_v38, %v7032_v25  ;;  %v7020_v63 = vadd.f32 %v7019_v28, %v7006_v37 }
 0x317   :  { %v7060_v22 = vadd.f32 %v7059_v17, %v7046_v50  ;;  %v7034_v53 = vadd.f32 %v7033_v48, %v7020_v63 }
 0x31c   :  { %v7047_v51 = vpop.f32.mrf.mxu2 }
 0x31d   :  { %v7061_v52 = vpop.f32.mrf.mxu3  ;;  %v7048_v33 = vadd.f32 %v7047_v51, %v7034_v53 }
 0x31f   :  { %v7062_v58 = vadd.f32 %v7061_v52, %v7048_v33 }
 0x32c   :  { %v7073_v5 = vpop.f32.mrf.mxu0 }
 0x32d   :  { %v7074_v9 = vadd.f32 %v7073_v5, %v7060_v22  ;;  %v7087_v54 = vpop.f32.mrf.mxu1 }
 0x32f   :  { %v7088_v55 = vadd.f32 %v7087_v54, %v7074_v9 }
 0x334   :  { %v7101_v57 = vpop.f32.mrf.mxu2  ;;  %v7075_v27 = vpop.f32.mrf.mxu0 }
 0x335   :  { %v7115_v8 = vpop.f32.mrf.mxu3  ;;  %v7102_v59 = vadd.f32 %v7101_v57, %v7088_v55  ;;  %v7076_v42 = vadd.f32 %v7075_v27, %v7062_v58  ;;  %v7089_v13 = vpop.f32.mrf.mxu1 }
 0x337   :  { %v7116_v62 = vadd.f32 %v7115_v8, %v7102_v59  ;;  %v7090_v0 = vadd.f32 %v7089_v13, %v7076_v42 }
 0x339   :  { %7120 = vst [vmem:[#allocation8] sm:$0xff] %v7116_v62 }
 0x33c   :  { %v7103_v1 = vpop.f32.mrf.mxu2 }
 0x33d   :  { %v7104_v23 = vadd.f32 %v7103_v1, %v7090_v0  ;;  %v7117_v2 = vpop.f32.mrf.mxu3 }
 0x33f   :  { %v7118_v3 = vadd.f32 %v7117_v2, %v7104_v23 }
 0x341   :  { %7121 = vst [vmem:[#allocation8 + $0x8] sm:$0xff] %v7118_v3 }
 0x342   :  { %7134 = dma.vmem_to_hbm [thread:$0]  %s7127_s2, 256, %s7129_s5, [#allocation4], %s11043_s6, %s11043_s6, %s11044_s7  }
 0x343   :  { %11033 = dma.done.wait [#allocation4], 256  }
 0x344   :  { %11034 = vsyncadd [#allocation4], 4294967040 }
 0x345   :  { %7139 = vsyncpa [#allocation3], 1 }
 0x346   :  { %7140 = vsyncpa [#allocation6], 1 }
 0x347   :  { %7141 = vsyncpa [#allocation4], 1 }

// kernel: tpu_custom_call.1
= control target key start
LH: loop header
LB: loop body
LE: loop exit
PB: predicated region body
PF: predicated region fallthrough
CT: control target
= control target key end

     0   :  { %8 = vsyncpa [#allocation3], 0  ;;  %s11228_s0 = inlined_call_operand.hbm [shape: bf16[16,10752], index: 0, kind: input, shape index: {}]   ;;  %s11229_s1 = inlined_call_operand.hbm [shape: bf16[10752,128], index: 1, kind: input, shape index: {}]   ;;  %s11230_s2 = inlined_call_operand.hbm [shape: f32[1,128], index: 2, kind: input, shape index: {}]   ;;  %s11231_s3 = inlined_call_operand.hbm [shape: f32[16,128], index: 3, kind: output, shape index: {}]  }
   0x1   :  { %9 = vsyncpa [#allocation6], 0  ;;  %s28_s14 = sshll.u32 %s11229_s1, 4  ;;  %s29_s14 = int_to_ptr.hbm [resolvable:$true] %s28_s14 }
   0x2   :  { %10 = vsyncpa [#allocation4], 0  ;;  %s11035_s15 = smov [#allocation5]   ;;  %s15_s19 = sshll.u32 %s11228_s0, 4  ;;  %s16_s19 = int_to_ptr.hbm [resolvable:$true] %s15_s19 }
   0x3   :  { %s30_s16 = sshll.u32 %s11035_s15, 4  ;;  %s11036_s20 = smov 64   ;;  %s31_s16 = int_to_ptr.vmem [resolvable:$true] %s30_s16 }
   0x4   :  { %s11037_s21 = smov 4   ;;  %s11038_s22 = smov [#allocation2]  }
   0x5   :  { %36 = dma.hbm_to_vmem [thread:$0]  %s29_s14, 86016, %s31_s16, [#allocation6], %s11036_s20, %s11036_s20, %s11037_s21  }
   0x6   :  { %s17_s23 = sshll.u32 %s11038_s22, 4  ;;  %s11039_s24 = smov 5376   ;;  %s18_s23 = int_to_ptr.vmem [resolvable:$true] %s17_s23 }
   0x7   :  { %s11040_s25 = smov 336   ;;  %s42_s27 = sshll.u32 %s11230_s2, 4  ;;  %s43_s27 = int_to_ptr.hbm [resolvable:$true] %s42_s27 }
   0x8   :  { %23 = dma.hbm_to_vmem [thread:$0]  %s16_s19, 10752, %s18_s23, [#allocation3], %s11039_s24, %s11039_s24, %s11040_s25  }
   0x9   :  { %s11041_s28 = smov [#allocation7]  }
   0xa   :  { %s44_s29 = sshll.u32 %s11041_s28, 4  ;;  %s45_s29 = int_to_ptr.vmem [resolvable:$true] %s44_s29 }
   0xb   :  { %47 = dma.hbm_to_vmem [thread:$0]  %s43_s27, 16, %s45_s29, [#allocation6]  }
   0xc   :  { %11029 = dma.done.wait [#allocation3], 10752  }
   0xd   :  { %11030 = vsyncadd [#allocation3], 4294956544 }
   0xe   :  { %11031 = dma.done.wait [#allocation6], 86032  }
   0xf   :  { %11032 = vsyncadd [#allocation6], 4294881264  ;;  %v10257_v0 = vld [vmem:[#allocation5 + $0x38] sm:$0xff]  ;;  %v10256_v4 = vld [vmem:[#allocation5 + $0x30] sm:$0xff]  ;;  %s11042_s0 = smov [#allocation8]   ;;  %s7128_s5 = sshll.u32 %s11231_s3, 4  ;;  %s7129_s5 = int_to_ptr.hbm [resolvable:$true] %s7128_s5 }
  0x10   :  { %v10265_v1 = vld [vmem:[#allocation5 + $0x78] sm:$0xff]  ;;  %5944 = vmatpush.bf16.msra.mxu0 %v10257_v0  ;;  %v10264_v5 = vld [vmem:[#allocation5 + $0x70] sm:$0xff]  ;;  %v10255_v8 = vld [vmem:[#allocation5 + $0x28] sm:$0xff]  ;;  %s7126_s2 = sshll.u32 %s11042_s0, 4  ;;  %s11043_s6 = smov 128   ;;  %s7127_s2 = int_to_ptr.vmem [resolvable:$true] %s7126_s2 }
  0x11   :  { %v10273_v2 = vld [vmem:[#allocation5 + $0xb8] sm:$0xff]  ;;  %5958 = vmatpush.bf16.msra.mxu1 %v10265_v1  ;;  %v10272_v6 = vld [vmem:[#allocation5 + $0xb0] sm:$0xff]  ;;  %v10263_v9 = vld [vmem:[#allocation5 + $0x68] sm:$0xff]  ;;  %s11044_s7 = smov 8  }
  0x12   :  { %v10281_v3 = vld [vmem:[#allocation5 + $0xf8] sm:$0xff]  ;;  %5972 = vmatpush.bf16.msra.mxu2 %v10273_v2  ;;  %v10280_v7 = vld [vmem:[#allocation5 + $0xf0] sm:$0xff]  ;;  %v10271_v10 = vld [vmem:[#allocation5 + $0xa8] sm:$0xff] }
  0x13   :  { %5986 = vmatpush.bf16.msra.mxu3 %v10281_v3  ;;  %v10279_v11 = vld [vmem:[#allocation5 + $0xe8] sm:$0xff]  ;;  %v10254_v12 = vld [vmem:[#allocation5 + $0x20] sm:$0xff]  ;;  %v10253_v16 = vld [vmem:[#allocation5 + $0x18] sm:$0xff] }
  0x14   :  { %5945 = vmatpush.bf16.msra.mxu0 %v10256_v4  ;;  %v10262_v13 = vld [vmem:[#allocation5 + $0x60] sm:$0xff]  ;;  %v10261_v17 = vld [vmem:[#allocation5 + $0x58] sm:$0xff]  ;;  %v10252_v20 = vld [vmem:[#allocation5 + $0x10] sm:$0xff] }
  0x15   :  { %5959 = vmatpush.bf16.msra.mxu1 %v10264_v5  ;;  %v10270_v14 = vld [vmem:[#allocation5 + $0xa0] sm:$0xff]  ;;  %v10269_v18 = vld [vmem:[#allocation5 + $0x98] sm:$0xff]  ;;  %v10260_v21 = vld [vmem:[#allocation5 + $0x50] sm:$0xff] }
  0x16   :  { %5973 = vmatpush.bf16.msra.mxu2 %v10272_v6  ;;  %v10278_v15 = vld [vmem:[#allocation5 + $0xe0] sm:$0xff]  ;;  %v10277_v19 = vld [vmem:[#allocation5 + $0xd8] sm:$0xff]  ;;  %v10268_v22 = vld [vmem:[#allocation5 + $0x90] sm:$0xff] }
  0x17   :  { %5987 = vmatpush.bf16.msra.mxu3 %v10280_v7  ;;  %v10276_v23 = vld [vmem:[#allocation5 + $0xd0] sm:$0xff]  ;;  %v10251_v24 = vld [vmem:[#allocation5 + $0x8] sm:$0xff]  ;;  %v10250_v28 = vld [vmem:[#allocation5] sm:$0xff] }
  0x18   :  { %5946 = vmatpush.bf16.msra.mxu0 %v10255_v8  ;;  %v10259_v25 = vld [vmem:[#allocation5 + $0x48] sm:$0xff]  ;;  %v10258_v29 = vld [vmem:[#allocation5 + $0x40] sm:$0xff]  ;;  %v10289_v32 = vld [vmem:[#allocation5 + $0x138] sm:$0xff] }
  0x19   :  { %5960 = vmatpush.bf16.msra.mxu1 %v10263_v9  ;;  %v10267_v26 = vld [vmem:[#allocation5 + $0x88] sm:$0xff]  ;;  %v10266_v30 = vld [vmem:[#allocation5 + $0x80] sm:$0xff]  ;;  %v10297_v33 = vld [vmem:[#allocation5 + $0x178] sm:$0xff] }
  0x1a   :  { %5974 = vmatpush.bf16.msra.mxu2 %v10271_v10  ;;  %v10275_v27 = vld [vmem:[#allocation5 + $0xc8] sm:$0xff]  ;;  %v10274_v31 = vld [vmem:[#allocation5 + $0xc0] sm:$0xff]  ;;  %v10208_v35 = vld [vmem:[#allocation2 + $0x14c] sm:$0xf0] }
  0x1b   :  { %5988 = vmatpush.bf16.msra.mxu3 %v10279_v11  ;;  %v7144_v34 = vld [vmem:[#allocation2] sm:$0xf]  ;;  %v7152_v36 = vld [vmem:[#allocation2 + $0x8] sm:$0xf]  ;;  %v10209_v37 = vld [vmem:[#allocation2 + $0x154] sm:$0xf0] }
  0x1c   :  { %5947 = vmatpush.bf16.msra.mxu0 %v10254_v12  ;;  %v10166_v38 = vld [vmem:[#allocation2 + $0x4] sm:$0xf]  ;;  %v7146_v39 = vld [vmem:[#allocation2 + $0x150] sm:$0xf0]  ;;  %v10167_v40 = vld [vmem:[#allocation2 + $0xc] sm:$0xf]  ;;  %v7145_v44 = vor.u32 %v10208_v35, %v7144_v34  ;;  %v7153_v45 = vor.u32 %v10209_v37, %v7152_v36 }
  0x1d   :  { %5961 = vmatpush.bf16.msra.mxu1 %v10262_v13  ;;  %v7154_v41 = vld [vmem:[#allocation2 + $0x158] sm:$0xf0]  ;;  %v7149_v46 = vor.u32 %v10166_v38, %v7146_v39  ;;  %v10288_v48 = vld [vmem:[#allocation5 + $0x130] sm:$0xff]  ;;  %v10287_v52 = vld [vmem:[#allocation5 + $0x128] sm:$0xff] }
  0x1e   :  { %5975 = vmatpush.bf16.msra.mxu2 %v10270_v14  ;;  %v10305_v42 = vld [vmem:[#allocation5 + $0x1b8] sm:$0xff]  ;;  %v7157_v47 = vor.u32 %v10167_v40, %v7154_v41  ;;  %v10296_v49 = vld [vmem:[#allocation5 + $0x170] sm:$0xff]  ;;  %v10295_v53 = vld [vmem:[#allocation5 + $0x168] sm:$0xff] }
  0x1f   :  { %5989 = vmatpush.bf16.msra.mxu3 %v10278_v15  ;;  %v10313_v43 = vld [vmem:[#allocation5 + $0x1f8] sm:$0xff]  ;;  %v10304_v50 = vld [vmem:[#allocation5 + $0x1b0] sm:$0xff]  ;;  %v10303_v54 = vld [vmem:[#allocation5 + $0x1a8] sm:$0xff] }
  0x20   :  { %5948 = vmatpush.bf16.msra.mxu0 %v10253_v16  ;;  %v10312_v51 = vld [vmem:[#allocation5 + $0x1f0] sm:$0xff]  ;;  %v10311_v55 = vld [vmem:[#allocation5 + $0x1e8] sm:$0xff]  ;;  %v10286_v56 = vld [vmem:[#allocation5 + $0x120] sm:$0xff] }
  0x21   :  { %5962 = vmatpush.bf16.msra.mxu1 %v10261_v17  ;;  %v10294_v57 = vld [vmem:[#allocation5 + $0x160] sm:$0xff]  ;;  %v10285_v60 = vld [vmem:[#allocation5 + $0x118] sm:$0xff]  ;;  %v10284_v0 = vld [vmem:[#allocation5 + $0x110] sm:$0xff] }
  0x22   :  { %5976 = vmatpush.bf16.msra.mxu2 %v10269_v18  ;;  %v10302_v58 = vld [vmem:[#allocation5 + $0x1a0] sm:$0xff]  ;;  %v10293_v61 = vld [vmem:[#allocation5 + $0x158] sm:$0xff]  ;;  %v10292_v1 = vld [vmem:[#allocation5 + $0x150] sm:$0xff] }
  0x23   :  { %5990 = vmatpush.bf16.msra.mxu3 %v10277_v19  ;;  %v10310_v59 = vld [vmem:[#allocation5 + $0x1e0] sm:$0xff]  ;;  %v10301_v62 = vld [vmem:[#allocation5 + $0x198] sm:$0xff]  ;;  %v10300_v2 = vld [vmem:[#allocation5 + $0x190] sm:$0xff] }
  0x24   :  { %5949 = vmatpush.bf16.msra.mxu0 %v10252_v20  ;;  %v10309_v63 = vld [vmem:[#allocation5 + $0x1d8] sm:$0xff]  ;;  %v10308_v3 = vld [vmem:[#allocation5 + $0x1d0] sm:$0xff]  ;;  %v10283_v4 = vld [vmem:[#allocation5 + $0x108] sm:$0xff] }
  0x25   :  { %5963 = vmatpush.bf16.msra.mxu1 %v10260_v21  ;;  %v10291_v5 = vld [vmem:[#allocation5 + $0x148] sm:$0xff]  ;;  %v10282_v8 = vld [vmem:[#allocation5 + $0x100] sm:$0xff]  ;;  %v10321_v12 = vld [vmem:[#allocation5 + $0x238] sm:$0xff] }
  0x26   :  { %5977 = vmatpush.bf16.msra.mxu2 %v10268_v22  ;;  %v10299_v6 = vld [vmem:[#allocation5 + $0x188] sm:$0xff]  ;;  %v10290_v9 = vld [vmem:[#allocation5 + $0x140] sm:$0xff]  ;;  %v10329_v13 = vld [vmem:[#allocation5 + $0x278] sm:$0xff] }
  0x27   :  { %5991 = vmatpush.bf16.msra.mxu3 %v10276_v23  ;;  %v10307_v7 = vld [vmem:[#allocation5 + $0x1c8] sm:$0xff]  ;;  %v10298_v10 = vld [vmem:[#allocation5 + $0x180] sm:$0xff]  ;;  %v7160_v14 = vld [vmem:[#allocation2 + $0x10] sm:$0xf] }
  0x28   :  { %5950 = vmatpush.bf16.msra.mxu0 %v10251_v24  ;;  %v10306_v11 = vld [vmem:[#allocation5 + $0x1c0] sm:$0xff]  ;;  %v7168_v16 = vld [vmem:[#allocation2 + $0x18] sm:$0xf]  ;;  %v10211_v17 = vld [vmem:[#allocation2 + $0x164] sm:$0xf0] }
  0x29   :  { %5964 = vmatpush.bf16.msra.mxu1 %v10259_v25  ;;  %v10210_v15 = vld [vmem:[#allocation2 + $0x15c] sm:$0xf0]  ;;  %v10168_v18 = vld [vmem:[#allocation2 + $0x14] sm:$0xf]  ;;  %v7162_v19 = vld [vmem:[#allocation2 + $0x160] sm:$0xf0]  ;;  %v7169_v25 = vor.u32 %v10211_v17, %v7168_v16 }
  0x2a   :  { %5978 = vmatpush.bf16.msra.mxu2 %v10267_v26  ;;  %v10169_v20 = vld [vmem:[#allocation2 + $0x1c] sm:$0xf]  ;;  %v7170_v21 = vld [vmem:[#allocation2 + $0x168] sm:$0xf0]  ;;  %v7161_v24 = vor.u32 %v10210_v15, %v7160_v14  ;;  %v7165_v26 = vor.u32 %v10168_v18, %v7162_v19  ;;  %v10318_v36 = vld [vmem:[#allocation5 + $0x220] sm:$0xff] }
  0x2b   :  { %5992 = vmatpush.bf16.msra.mxu3 %v10275_v27  ;;  %v10337_v22 = vld [vmem:[#allocation5 + $0x2b8] sm:$0xff]  ;;  %v7173_v27 = vor.u32 %v10169_v20, %v7170_v21  ;;  %v10335_v34 = vld [vmem:[#allocation5 + $0x2a8] sm:$0xff]  ;;  %v10326_v37 = vld [vmem:[#allocation5 + $0x260] sm:$0xff] }
  0x2c   :  { %5951 = vmatpush.bf16.msra.mxu0 %v10250_v28  ;;  %v10345_v23 = vld [vmem:[#allocation5 + $0x2f8] sm:$0xff]  ;;  %v10320_v28 = vld [vmem:[#allocation5 + $0x230] sm:$0xff]  ;;  %v10343_v35 = vld [vmem:[#allocation5 + $0x2e8] sm:$0xff] }
  0x2d   :  { %5965 = vmatpush.bf16.msra.mxu1 %v10258_v29  ;;  %v10328_v29 = vld [vmem:[#allocation5 + $0x270] sm:$0xff]  ;;  %v10334_v38 = vld [vmem:[#allocation5 + $0x2a0] sm:$0xff]  ;;  %v10317_v40 = vld [vmem:[#allocation5 + $0x218] sm:$0xff] }
  0x2e   :  { %5979 = vmatpush.bf16.msra.mxu2 %v10266_v30  ;;  %v10336_v30 = vld [vmem:[#allocation5 + $0x2b0] sm:$0xff]  ;;  %v10342_v39 = vld [vmem:[#allocation5 + $0x2e0] sm:$0xff]  ;;  %v10325_v41 = vld [vmem:[#allocation5 + $0x258] sm:$0xff] }
  0x2f   :  { %5993 = vmatpush.bf16.msra.mxu3 %v10274_v31  ;;  %5952 = vmatmul.bf16.vlgmr.msra.gmra.mxu0 %v7145_v44  ;;  %v10344_v31 = vld [vmem:[#allocation5 + $0x2f0] sm:$0xff]  ;;  %v10367_v14 = vld [vmem:[#allocation5 + $0x3a8] sm:$0xff]  ;;  %v10350_v16 = vld [vmem:[#allocation5 + $0x320] sm:$0xff] }
  0x30   :  { %6000 = vmatpush.bf16.msrb.mxu0 %v10289_v32  ;;  %5966 = vmatmul.bf16.vlgmr.msra.gmra.mxu1 %v7149_v46  ;;  %v10319_v32 = vld [vmem:[#allocation5 + $0x228] sm:$0xff]  ;;  %v10316_v44 = vld [vmem:[#allocation5 + $0x210] sm:$0xff]  ;;  %v10358_v17 = vld [vmem:[#allocation5 + $0x360] sm:$0xff] }
  0x31   :  { %6014 = vmatpush.bf16.msrb.mxu1 %v10297_v33  ;;  %5980 = vmatmul.bf16.vlgmr.msra.gmra.mxu2 %v7153_v45  ;;  %v10327_v33 = vld [vmem:[#allocation5 + $0x268] sm:$0xff]  ;;  %v10324_v45 = vld [vmem:[#allocation5 + $0x250] sm:$0xff]  ;;  %v10366_v18 = vld [vmem:[#allocation5 + $0x3a0] sm:$0xff] }
  0x32   :  { %6028 = vmatpush.bf16.msrb.mxu2 %v10305_v42  ;;  %5994 = vmatmul.bf16.vlgmr.msra.gmra.mxu3 %v7157_v47  ;;  %v10333_v42 = vld [vmem:[#allocation5 + $0x298] sm:$0xff]  ;;  %v10332_v46 = vld [vmem:[#allocation5 + $0x290] sm:$0xff]  ;;  %v10375_v15 = vld [vmem:[#allocation5 + $0x3e8] sm:$0xff] }
  0x33   :  { %6042 = vmatpush.bf16.msrb.mxu3 %v10313_v43  ;;  %v10341_v43 = vld [vmem:[#allocation5 + $0x2d8] sm:$0xff]  ;;  %v10340_v47 = vld [vmem:[#allocation5 + $0x2d0] sm:$0xff]  ;;  %v10374_v19 = vld [vmem:[#allocation5 + $0x3e0] sm:$0xff] }
  0x34   :  { %6001 = vmatpush.bf16.msrb.mxu0 %v10288_v48  ;;  %v10315_v48 = vld [vmem:[#allocation5 + $0x208] sm:$0xff]  ;;  %v10349_v20 = vld [vmem:[#allocation5 + $0x318] sm:$0xff] }
  0x35   :  { %6015 = vmatpush.bf16.msrb.mxu1 %v10296_v49  ;;  %v10323_v49 = vld [vmem:[#allocation5 + $0x248] sm:$0xff]  ;;  %v10357_v21 = vld [vmem:[#allocation5 + $0x358] sm:$0xff] }
  0x36   :  { %6029 = vmatpush.bf16.msrb.mxu2 %v10304_v50  ;;  %v10331_v50 = vld [vmem:[#allocation5 + $0x288] sm:$0xff] }
  0x37   :  { %6043 = vmatpush.bf16.msrb.mxu3 %v10312_v51  ;;  %v10339_v51 = vld [vmem:[#allocation5 + $0x2c8] sm:$0xff] }
  0x38   :  { %6002 = vmatpush.bf16.msrb.mxu0 %v10287_v52  ;;  %v10314_v52 = vld [vmem:[#allocation5 + $0x200] sm:$0xff] }
  0x39   :  { %6016 = vmatpush.bf16.msrb.mxu1 %v10295_v53  ;;  %v10322_v53 = vld [vmem:[#allocation5 + $0x240] sm:$0xff] }
  0x3a   :  { %6030 = vmatpush.bf16.msrb.mxu2 %v10303_v54  ;;  %v10330_v54 = vld [vmem:[#allocation5 + $0x280] sm:$0xff] }
  0x3b   :  { %6044 = vmatpush.bf16.msrb.mxu3 %v10311_v55  ;;  %v10338_v55 = vld [vmem:[#allocation5 + $0x2c0] sm:$0xff] }
  0x3c   :  { %6003 = vmatpush.bf16.msrb.mxu0 %v10286_v56  ;;  %v10353_v56 = vld [vmem:[#allocation5 + $0x338] sm:$0xff] }
  0x3d   :  { %6017 = vmatpush.bf16.msrb.mxu1 %v10294_v57  ;;  %v10361_v57 = vld [vmem:[#allocation5 + $0x378] sm:$0xff] }
  0x3e   :  { %6031 = vmatpush.bf16.msrb.mxu2 %v10302_v58  ;;  %v7176_v58 = vld [vmem:[#allocation2 + $0x20] sm:$0xf] }
  0x3f   :  { %6045 = vmatpush.bf16.msrb.mxu3 %v10310_v59  ;;  %v10212_v59 = vld [vmem:[#allocation2 + $0x16c] sm:$0xf0] }
  0x40   :  { %6004 = vmatpush.bf16.msrb.mxu0 %v10285_v60  ;;  %v7184_v60 = vld [vmem:[#allocation2 + $0x28] sm:$0xf] }
  0x41   :  { %6018 = vmatpush.bf16.msrb.mxu1 %v10293_v61  ;;  %v10213_v61 = vld [vmem:[#allocation2 + $0x174] sm:$0xf0] }
  0x42   :  { %6032 = vmatpush.bf16.msrb.mxu2 %v10301_v62  ;;  %v10170_v62 = vld [vmem:[#allocation2 + $0x24] sm:$0xf] }
  0x43   :  { %6046 = vmatpush.bf16.msrb.mxu3 %v10309_v63  ;;  %v7178_v63 = vld [vmem:[#allocation2 + $0x170] sm:$0xf0] }
  0x44   :  { %6005 = vmatpush.bf16.msrb.mxu0 %v10284_v0  ;;  %v10171_v0 = vld [vmem:[#allocation2 + $0x2c] sm:$0xf] }
  0x45   :  { %6019 = vmatpush.bf16.msrb.mxu1 %v10292_v1  ;;  %v7186_v1 = vld [vmem:[#allocation2 + $0x178] sm:$0xf0] }
  0x46   :  { %6033 = vmatpush.bf16.msrb.mxu2 %v10300_v2  ;;  %v10369_v2 = vld [vmem:[#allocation5 + $0x3b8] sm:$0xff] }
  0x47   :  { %6047 = vmatpush.bf16.msrb.mxu3 %v10308_v3  ;;  %v10377_v3 = vld [vmem:[#allocation5 + $0x3f8] sm:$0xff] }
  0x48   :  { %6006 = vmatpush.bf16.msrb.mxu0 %v10283_v4  ;;  %v7177_v4 = vor.u32 %v10212_v59, %v7176_v58  ;;  %v10399_v58 = vld [vmem:[#allocation5 + $0x4a8] sm:$0xff] }
  0x49   :  { %6020 = vmatpush.bf16.msrb.mxu1 %v10291_v5  ;;  %v7185_v5 = vor.u32 %v10213_v61, %v7184_v60  ;;  %v10407_v59 = vld [vmem:[#allocation5 + $0x4e8] sm:$0xff]  ;;  %v10382_v60 = vld [vmem:[#allocation5 + $0x420] sm:$0xff] }
  0x4a   :  { %6034 = vmatpush.bf16.msrb.mxu2 %v10299_v6  ;;  %v7181_v6 = vor.u32 %v10170_v62, %v7178_v63  ;;  %v10390_v61 = vld [vmem:[#allocation5 + $0x460] sm:$0xff] }
  0x4b   :  { %6048 = vmatpush.bf16.msrb.mxu3 %v10307_v7  ;;  %v7189_v7 = vor.u32 %v10171_v0, %v7186_v1  ;;  %v10398_v62 = vld [vmem:[#allocation5 + $0x4a0] sm:$0xff]  ;;  %v10381_v0 = vld [vmem:[#allocation5 + $0x418] sm:$0xff] }
  0x4c   :  { %6007 = vmatpush.bf16.msrb.mxu0 %v10282_v8  ;;  %v10352_v8 = vld [vmem:[#allocation5 + $0x330] sm:$0xff]  ;;  %v10406_v63 = vld [vmem:[#allocation5 + $0x4e0] sm:$0xff]  ;;  %v10389_v1 = vld [vmem:[#allocation5 + $0x458] sm:$0xff] }
  0x4d   :  { %6021 = vmatpush.bf16.msrb.mxu1 %v10290_v9  ;;  %v10360_v9 = vld [vmem:[#allocation5 + $0x370] sm:$0xff] }
  0x4e   :  { %6035 = vmatpush.bf16.msrb.mxu2 %v10298_v10  ;;  %v10368_v10 = vld [vmem:[#allocation5 + $0x3b0] sm:$0xff] }
  0x4f   :  { %6049 = vmatpush.bf16.msrb.mxu3 %v10306_v11  ;;  %6008 = vmatmul.bf16.vlgmr.msrb.gmra.mxu0 %v7161_v24  ;;  %v10376_v11 = vld [vmem:[#allocation5 + $0x3f0] sm:$0xff] }
  0x50   :  { %6056 = vmatpush.bf16.msra.mxu0 %v10321_v12  ;;  %6022 = vmatmul.bf16.vlgmr.msrb.gmra.mxu1 %v7165_v26  ;;  %v10351_v12 = vld [vmem:[#allocation5 + $0x328] sm:$0xff]  ;;  %v10348_v24 = vld [vmem:[#allocation5 + $0x310] sm:$0xff] }
  0x51   :  { %6070 = vmatpush.bf16.msra.mxu1 %v10329_v13  ;;  %6036 = vmatmul.bf16.vlgmr.msrb.gmra.mxu2 %v7169_v25  ;;  %v10359_v13 = vld [vmem:[#allocation5 + $0x368] sm:$0xff]  ;;  %v10356_v25 = vld [vmem:[#allocation5 + $0x350] sm:$0xff] }
  0x52   :  { %6084 = vmatpush.bf16.msra.mxu2 %v10337_v22  ;;  %6050 = vmatmul.bf16.vlgmr.msrb.gmra.mxu3 %v7173_v27  ;;  %v10365_v22 = vld [vmem:[#allocation5 + $0x398] sm:$0xff]  ;;  %v10364_v26 = vld [vmem:[#allocation5 + $0x390] sm:$0xff] }
  0x53   :  { %6098 = vmatpush.bf16.msra.mxu3 %v10345_v23  ;;  %v10373_v23 = vld [vmem:[#allocation5 + $0x3d8] sm:$0xff]  ;;  %v10372_v27 = vld [vmem:[#allocation5 + $0x3d0] sm:$0xff] }
  0x54   :  { %6057 = vmatpush.bf16.msra.mxu0 %v10320_v28  ;;  %v10347_v28 = vld [vmem:[#allocation5 + $0x308] sm:$0xff] }
  0x55   :  { %6071 = vmatpush.bf16.msra.mxu1 %v10328_v29  ;;  %v10355_v29 = vld [vmem:[#allocation5 + $0x348] sm:$0xff] }
  0x56   :  { %6085 = vmatpush.bf16.msra.mxu2 %v10336_v30  ;;  %v10363_v30 = vld [vmem:[#allocation5 + $0x388] sm:$0xff] }
  0x57   :  { %6099 = vmatpush.bf16.msra.mxu3 %v10344_v31  ;;  %v10371_v31 = vld [vmem:[#allocation5 + $0x3c8] sm:$0xff] }
  0x58   :  { %6058 = vmatpush.bf16.msra.mxu0 %v10319_v32  ;;  %v10346_v32 = vld [vmem:[#allocation5 + $0x300] sm:$0xff] }
  0x59   :  { %6072 = vmatpush.bf16.msra.mxu1 %v10327_v33  ;;  %v10354_v33 = vld [vmem:[#allocation5 + $0x340] sm:$0xff] }
  0x5a   :  { %6086 = vmatpush.bf16.msra.mxu2 %v10335_v34  ;;  %v10362_v34 = vld [vmem:[#allocation5 + $0x380] sm:$0xff] }
  0x5b   :  { %6100 = vmatpush.bf16.msra.mxu3 %v10343_v35  ;;  %v10370_v35 = vld [vmem:[#allocation5 + $0x3c0] sm:$0xff] }
  0x5c   :  { %6059 = vmatpush.bf16.msra.mxu0 %v10318_v36  ;;  %v10385_v36 = vld [vmem:[#allocation5 + $0x438] sm:$0xff] }
  0x5d   :  { %6073 = vmatpush.bf16.msra.mxu1 %v10326_v37  ;;  %v10393_v37 = vld [vmem:[#allocation5 + $0x478] sm:$0xff] }
  0x5e   :  { %6087 = vmatpush.bf16.msra.mxu2 %v10334_v38  ;;  %v7192_v38 = vld [vmem:[#allocation2 + $0x30] sm:$0xf] }
  0x5f   :  { %6101 = vmatpush.bf16.msra.mxu3 %v10342_v39  ;;  %v10214_v39 = vld [vmem:[#allocation2 + $0x17c] sm:$0xf0] }
  0x60   :  { %6060 = vmatpush.bf16.msra.mxu0 %v10317_v40  ;;  %v7200_v40 = vld [vmem:[#allocation2 + $0x38] sm:$0xf] }
  0x61   :  { %6074 = vmatpush.bf16.msra.mxu1 %v10325_v41  ;;  %v10215_v41 = vld [vmem:[#allocation2 + $0x184] sm:$0xf0] }
  0x62   :  { %6088 = vmatpush.bf16.msra.mxu2 %v10333_v42  ;;  %v10172_v42 = vld [vmem:[#allocation2 + $0x34] sm:$0xf] }
  0x63   :  { %6102 = vmatpush.bf16.msra.mxu3 %v10341_v43  ;;  %v7194_v43 = vld [vmem:[#allocation2 + $0x180] sm:$0xf0] }
  0x64   :  { %6061 = vmatpush.bf16.msra.mxu0 %v10316_v44  ;;  %v10173_v44 = vld [vmem:[#allocation2 + $0x3c] sm:$0xf] }
  0x65   :  { %6075 = vmatpush.bf16.msra.mxu1 %v10324_v45  ;;  %v7202_v45 = vld [vmem:[#allocation2 + $0x188] sm:$0xf0] }
  0x66   :  { %6089 = vmatpush.bf16.msra.mxu2 %v10332_v46  ;;  %v10401_v46 = vld [vmem:[#allocation5 + $0x4b8] sm:$0xff] }
  0x67   :  { %6103 = vmatpush.bf16.msra.mxu3 %v10340_v47  ;;  %v10409_v47 = vld [vmem:[#allocation5 + $0x4f8] sm:$0xff] }
  0x68   :  { %6062 = vmatpush.bf16.msra.mxu0 %v10315_v48  ;;  %v7193_v48 = vor.u32 %v10214_v39, %v7192_v38  ;;  %v11074_v38 = vld [vmem:[#allocation7] ss:$0 sm:$0xff]  ;;  %v10431_v39 = vld [vmem:[#allocation5 + $0x5a8] sm:$0xff] }
  0x69   :  { %6076 = vmatpush.bf16.msra.mxu1 %v10323_v49  ;;  %v7201_v49 = vor.u32 %v10215_v41, %v7200_v40  ;;  %v10439_v40 = vld [vmem:[#allocation5 + $0x5e8] sm:$0xff] }
  0x6a   :  { %6090 = vmatpush.bf16.msra.mxu2 %v10331_v50  ;;  %v7197_v50 = vor.u32 %v10172_v42, %v7194_v43  ;;  %v10414_v42 = vld [vmem:[#allocation5 + $0x520] sm:$0xff] }
  0x6b   :  { %6104 = vmatpush.bf16.msra.mxu3 %v10339_v51  ;;  %v7205_v51 = vor.u32 %v10173_v44, %v7202_v45  ;;  %v10422_v43 = vld [vmem:[#allocation5 + $0x560] sm:$0xff] }
  0x6c   :  { %6063 = vmatpush.bf16.msra.mxu0 %v10314_v52  ;;  %v10384_v52 = vld [vmem:[#allocation5 + $0x430] sm:$0xff]  ;;  %v10430_v45 = vld [vmem:[#allocation5 + $0x5a0] sm:$0xff] }
  0x6d   :  { %6077 = vmatpush.bf16.msra.mxu1 %v10322_v53  ;;  %v10392_v53 = vld [vmem:[#allocation5 + $0x470] sm:$0xff] }
  0x6e   :  { %6091 = vmatpush.bf16.msra.mxu2 %v10330_v54  ;;  %v10400_v54 = vld [vmem:[#allocation5 + $0x4b0] sm:$0xff] }
  0x6f   :  { %6105 = vmatpush.bf16.msra.mxu3 %v10338_v55  ;;  %6064 = vmatmul.bf16.vlgmr.msra.gmra.mxu0 %v7177_v4  ;;  %v10408_v55 = vld [vmem:[#allocation5 + $0x4f0] sm:$0xff] }
  0x70   :  { %6112 = vmatpush.bf16.msrb.mxu0 %v10353_v56  ;;  %6078 = vmatmul.bf16.vlgmr.msra.gmra.mxu1 %v7181_v6  ;;  %v10383_v56 = vld [vmem:[#allocation5 + $0x428] sm:$0xff]  ;;  %v10380_v4 = vld [vmem:[#allocation5 + $0x410] sm:$0xff] }
  0x71   :  { %6126 = vmatpush.bf16.msrb.mxu1 %v10361_v57  ;;  %6092 = vmatmul.bf16.vlgmr.msra.gmra.mxu2 %v7185_v5  ;;  %v10391_v57 = vld [vmem:[#allocation5 + $0x468] sm:$0xff]  ;;  %v10388_v5 = vld [vmem:[#allocation5 + $0x450] sm:$0xff] }
  0x72   :  { %6140 = vmatpush.bf16.msrb.mxu2 %v10369_v2  ;;  %6106 = vmatmul.bf16.vlgmr.msra.gmra.mxu3 %v7189_v7  ;;  %v10397_v2 = vld [vmem:[#allocation5 + $0x498] sm:$0xff]  ;;  %v10396_v6 = vld [vmem:[#allocation5 + $0x490] sm:$0xff] }
  0x73   :  { %6154 = vmatpush.bf16.msrb.mxu3 %v10377_v3  ;;  %v10405_v3 = vld [vmem:[#allocation5 + $0x4d8] sm:$0xff]  ;;  %v10404_v7 = vld [vmem:[#allocation5 + $0x4d0] sm:$0xff] }
  0x74   :  { %6113 = vmatpush.bf16.msrb.mxu0 %v10352_v8  ;;  %v10379_v8 = vld [vmem:[#allocation5 + $0x408] sm:$0xff] }
  0x75   :  { %6127 = vmatpush.bf16.msrb.mxu1 %v10360_v9  ;;  %v10387_v9 = vld [vmem:[#allocation5 + $0x448] sm:$0xff] }
  0x76   :  { %6141 = vmatpush.bf16.msrb.mxu2 %v10368_v10  ;;  %v10395_v10 = vld [vmem:[#allocation5 + $0x488] sm:$0xff] }
  0x77   :  { %6155 = vmatpush.bf16.msrb.mxu3 %v10376_v11  ;;  %v10403_v11 = vld [vmem:[#allocation5 + $0x4c8] sm:$0xff] }
  0x78   :  { %6114 = vmatpush.bf16.msrb.mxu0 %v10351_v12  ;;  %v10378_v12 = vld [vmem:[#allocation5 + $0x400] sm:$0xff] }
  0x79   :  { %6128 = vmatpush.bf16.msrb.mxu1 %v10359_v13  ;;  %v10386_v13 = vld [vmem:[#allocation5 + $0x440] sm:$0xff] }
  0x7a   :  { %6142 = vmatpush.bf16.msrb.mxu2 %v10367_v14  ;;  %v10394_v14 = vld [vmem:[#allocation5 + $0x480] sm:$0xff] }
  0x7b   :  { %6156 = vmatpush.bf16.msrb.mxu3 %v10375_v15  ;;  %v10402_v15 = vld [vmem:[#allocation5 + $0x4c0] sm:$0xff] }
  0x7c   :  { %6115 = vmatpush.bf16.msrb.mxu0 %v10350_v16  ;;  %v10417_v16 = vld [vmem:[#allocation5 + $0x538] sm:$0xff] }
  0x7d   :  { %6129 = vmatpush.bf16.msrb.mxu1 %v10358_v17  ;;  %v10425_v17 = vld [vmem:[#allocation5 + $0x578] sm:$0xff] }
  0x7e   :  { %6143 = vmatpush.bf16.msrb.mxu2 %v10366_v18  ;;  %v7208_v18 = vld [vmem:[#allocation2 + $0x40] sm:$0xf] }
  0x7f   :  { %6157 = vmatpush.bf16.msrb.mxu3 %v10374_v19  ;;  %v10216_v19 = vld [vmem:[#allocation2 + $0x18c] sm:$0xf0] }
  0x80   :  { %6116 = vmatpush.bf16.msrb.mxu0 %v10349_v20  ;;  %v7216_v20 = vld [vmem:[#allocation2 + $0x48] sm:$0xf] }
  0x81   :  { %6130 = vmatpush.bf16.msrb.mxu1 %v10357_v21  ;;  %v10217_v21 = vld [vmem:[#allocation2 + $0x194] sm:$0xf0] }
  0x82   :  { %6144 = vmatpush.bf16.msrb.mxu2 %v10365_v22  ;;  %v10174_v22 = vld [vmem:[#allocation2 + $0x44] sm:$0xf] }
  0x83   :  { %6158 = vmatpush.bf16.msrb.mxu3 %v10373_v23  ;;  %v7210_v23 = vld [vmem:[#allocation2 + $0x190] sm:$0xf0] }
  0x84   :  { %6117 = vmatpush.bf16.msrb.mxu0 %v10348_v24  ;;  %v10175_v24 = vld [vmem:[#allocation2 + $0x4c] sm:$0xf] }
  0x85   :  { %6131 = vmatpush.bf16.msrb.mxu1 %v10356_v25  ;;  %v7218_v25 = vld [vmem:[#allocation2 + $0x198] sm:$0xf0] }
  0x86   :  { %6145 = vmatpush.bf16.msrb.mxu2 %v10364_v26  ;;  %v10433_v26 = vld [vmem:[#allocation5 + $0x5b8] sm:$0xff] }
  0x87   :  { %6159 = vmatpush.bf16.msrb.mxu3 %v10372_v27  ;;  %v10441_v27 = vld [vmem:[#allocation5 + $0x5f8] sm:$0xff] }
  0x88   :  { %6118 = vmatpush.bf16.msrb.mxu0 %v10347_v28  ;;  %v7209_v28 = vor.u32 %v10216_v19, %v7208_v18 }
  0x89   :  { %6132 = vmatpush.bf16.msrb.mxu1 %v10355_v29  ;;  %v7217_v29 = vor.u32 %v10217_v21, %v7216_v20 }
  0x8a   :  { %6146 = vmatpush.bf16.msrb.mxu2 %v10363_v30  ;;  %v7213_v30 = vor.u32 %v10174_v22, %v7210_v23  ;;  %v10448_v23 = vld [vmem:[#allocation5 + $0x630] sm:$0xff] }
  0x8b   :  { %6160 = vmatpush.bf16.msrb.mxu3 %v10371_v31  ;;  %v7221_v31 = vor.u32 %v10175_v24, %v7218_v25  ;;  %v10456_v24 = vld [vmem:[#allocation5 + $0x670] sm:$0xff] }
  0x8c   :  { %6119 = vmatpush.bf16.msrb.mxu0 %v10346_v32  ;;  %v10416_v32 = vld [vmem:[#allocation5 + $0x530] sm:$0xff] }
  0x8d   :  { %6133 = vmatpush.bf16.msrb.mxu1 %v10354_v33  ;;  %v10424_v33 = vld [vmem:[#allocation5 + $0x570] sm:$0xff] }
  0x8e   :  { %6147 = vmatpush.bf16.msrb.mxu2 %v10362_v34  ;;  %v10432_v34 = vld [vmem:[#allocation5 + $0x5b0] sm:$0xff] }
  0x8f   :  { %6161 = vmatpush.bf16.msrb.mxu3 %v10370_v35  ;;  %6120 = vmatmul.bf16.vlgmr.msrb.gmra.mxu0 %v7193_v48  ;;  %v10440_v35 = vld [vmem:[#allocation5 + $0x5f0] sm:$0xff] }
  0x90   :  { %6168 = vmatpush.bf16.msra.mxu0 %v10385_v36  ;;  %6134 = vmatmul.bf16.vlgmr.msrb.gmra.mxu1 %v7197_v50  ;;  %v10415_v36 = vld [vmem:[#allocation5 + $0x528] sm:$0xff]  ;;  %v10421_v50 = vld [vmem:[#allocation5 + $0x558] sm:$0xff]  ;;  %v10464_v25 = vld [vmem:[#allocation5 + $0x6b0] sm:$0xff] }
  0x91   :  { %6182 = vmatpush.bf16.msra.mxu1 %v10393_v37  ;;  %6148 = vmatmul.bf16.vlgmr.msrb.gmra.mxu2 %v7201_v49  ;;  %v10423_v37 = vld [vmem:[#allocation5 + $0x568] sm:$0xff]  ;;  %v10413_v49 = vld [vmem:[#allocation5 + $0x518] sm:$0xff] }
  0x92   :  { %6196 = vmatpush.bf16.msra.mxu2 %v10401_v46  ;;  %6162 = vmatmul.bf16.vlgmr.msrb.gmra.mxu3 %v7205_v51  ;;  %v10438_v46 = vld [vmem:[#allocation5 + $0x5e0] sm:$0xff]  ;;  %v10429_v51 = vld [vmem:[#allocation5 + $0x598] sm:$0xff] }
  0x93   :  { %6210 = vmatpush.bf16.msra.mxu3 %v10409_v47 }
  0x94   :  { %6169 = vmatpush.bf16.msra.mxu0 %v10384_v52  ;;  %v10437_v52 = vld [vmem:[#allocation5 + $0x5d8] sm:$0xff] }
  0x95   :  { %6183 = vmatpush.bf16.msra.mxu1 %v10392_v53 }
  0x96   :  { %6197 = vmatpush.bf16.msra.mxu2 %v10400_v54 }
  0x97   :  { %6211 = vmatpush.bf16.msra.mxu3 %v10408_v55 }
  0x98   :  { %6170 = vmatpush.bf16.msra.mxu0 %v10383_v56  ;;  %v10412_v56 = vld [vmem:[#allocation5 + $0x510] sm:$0xff] }
  0x99   :  { %6184 = vmatpush.bf16.msra.mxu1 %v10391_v57  ;;  %v10420_v57 = vld [vmem:[#allocation5 + $0x550] sm:$0xff] }
  0x9a   :  { %6198 = vmatpush.bf16.msra.mxu2 %v10399_v58 }
  0x9b   :  { %6212 = vmatpush.bf16.msra.mxu3 %v10407_v59  ;;  %v10428_v59 = vld [vmem:[#allocation5 + $0x590] sm:$0xff] }
  0x9c   :  { %6171 = vmatpush.bf16.msra.mxu0 %v10382_v60  ;;  %v10436_v60 = vld [vmem:[#allocation5 + $0x5d0] sm:$0xff] }
  0x9d   :  { %6185 = vmatpush.bf16.msra.mxu1 %v10390_v61  ;;  %v10411_v61 = vld [vmem:[#allocation5 + $0x508] sm:$0xff] }
  0x9e   :  { %6199 = vmatpush.bf16.msra.mxu2 %v10398_v62  ;;  %v10419_v62 = vld [vmem:[#allocation5 + $0x548] sm:$0xff] }
  0x9f   :  { %6213 = vmatpush.bf16.msra.mxu3 %v10406_v63  ;;  %v10427_v63 = vld [vmem:[#allocation5 + $0x588] sm:$0xff] }
  0xa0   :  { %6172 = vmatpush.bf16.msra.mxu0 %v10381_v0  ;;  %v10435_v0 = vld [vmem:[#allocation5 + $0x5c8] sm:$0xff] }
  0xa1   :  { %6186 = vmatpush.bf16.msra.mxu1 %v10389_v1  ;;  %v10410_v1 = vld [vmem:[#allocation5 + $0x500] sm:$0xff] }
  0xa2   :  { %6200 = vmatpush.bf16.msra.mxu2 %v10397_v2  ;;  %v10418_v2 = vld [vmem:[#allocation5 + $0x540] sm:$0xff] }
  0xa3   :  { %6214 = vmatpush.bf16.msra.mxu3 %v10405_v3  ;;  %v10426_v3 = vld [vmem:[#allocation5 + $0x580] sm:$0xff] }
  0xa4   :  { %6173 = vmatpush.bf16.msra.mxu0 %v10380_v4  ;;  %v10434_v4 = vld [vmem:[#allocation5 + $0x5c0] sm:$0xff] }
  0xa5   :  { %6187 = vmatpush.bf16.msra.mxu1 %v10388_v5  ;;  %v10449_v5 = vld [vmem:[#allocation5 + $0x638] sm:$0xff] }
  0xa6   :  { %6201 = vmatpush.bf16.msra.mxu2 %v10396_v6  ;;  %v10457_v6 = vld [vmem:[#allocation5 + $0x678] sm:$0xff] }
  0xa7   :  { %6215 = vmatpush.bf16.msra.mxu3 %v10404_v7  ;;  %v7224_v7 = vld [vmem:[#allocation2 + $0x50] sm:$0xf] }
  0xa8   :  { %6174 = vmatpush.bf16.msra.mxu0 %v10379_v8  ;;  %v10218_v8 = vld [vmem:[#allocation2 + $0x19c] sm:$0xf0] }
  0xa9   :  { %6188 = vmatpush.bf16.msra.mxu1 %v10387_v9  ;;  %v7232_v9 = vld [vmem:[#allocation2 + $0x58] sm:$0xf]  ;;  %v7225_v18 = vor.u32 %v10218_v8, %v7224_v7  ;;  %v7250_v7 = vld [vmem:[#allocation2 + $0x1b8] sm:$0xf0] }
  0xaa   :  { %6202 = vmatpush.bf16.msra.mxu2 %v10395_v10  ;;  %v10219_v10 = vld [vmem:[#allocation2 + $0x1a4] sm:$0xf0]  ;;  %v10497_v8 = vld [vmem:[#allocation5 + $0x7b8] sm:$0xff] }
  0xab   :  { %6216 = vmatpush.bf16.msra.mxu3 %v10403_v11  ;;  %v10176_v11 = vld [vmem:[#allocation2 + $0x54] sm:$0xf]  ;;  %v7233_v19 = vor.u32 %v10219_v10, %v7232_v9  ;;  %v10505_v9 = vld [vmem:[#allocation5 + $0x7f8] sm:$0xff] }
  0xac   :  { %6175 = vmatpush.bf16.msra.mxu0 %v10378_v12  ;;  %v5953_v41 = vpop.f32.mrf.mxu0  ;;  %v7226_v12 = vld [vmem:[#allocation2 + $0x1a0] sm:$0xf0] }
  0xad   :  { %6189 = vmatpush.bf16.msra.mxu1 %v10386_v13  ;;  %v5954_v44 = vadd.f32 %v11074_v38, %v5953_v41  ;;  %v5967_v47 = vpop.f32.mrf.mxu1  ;;  %v10177_v13 = vld [vmem:[#allocation2 + $0x5c] sm:$0xf]  ;;  %v7229_v20 = vor.u32 %v10176_v11, %v7226_v12 }
  0xae   :  { %6203 = vmatpush.bf16.msra.mxu2 %v10394_v14  ;;  %v7234_v14 = vld [vmem:[#allocation2 + $0x1a8] sm:$0xf0] }
  0xaf   :  { %6217 = vmatpush.bf16.msra.mxu3 %v10402_v15  ;;  %6176 = vmatmul.bf16.vlgmr.msra.gmra.mxu0 %v7209_v28  ;;  %v5968_v48 = vadd.f32 %v5967_v47, %v5954_v44  ;;  %v10465_v15 = vld [vmem:[#allocation5 + $0x6b8] sm:$0xff]  ;;  %v7237_v21 = vor.u32 %v10177_v13, %v7234_v14  ;;  %v10447_v28 = vld [vmem:[#allocation5 + $0x628] sm:$0xff] }
  0xb0   :  { %6224 = vmatpush.bf16.msrb.mxu0 %v10417_v16  ;;  %6190 = vmatmul.bf16.vlgmr.msra.gmra.mxu1 %v7213_v30  ;;  %v10473_v16 = vld [vmem:[#allocation5 + $0x6f8] sm:$0xff]  ;;  %v10463_v30 = vld [vmem:[#allocation5 + $0x6a8] sm:$0xff] }
  0xb1   :  { %6238 = vmatpush.bf16.msrb.mxu1 %v10425_v17  ;;  %6204 = vmatmul.bf16.vlgmr.msra.gmra.mxu2 %v7217_v29  ;;  %v10455_v29 = vld [vmem:[#allocation5 + $0x668] sm:$0xff]  ;;  %v10461_v44 = vld [vmem:[#allocation5 + $0x698] sm:$0xff] }
  0xb2   :  { %6252 = vmatpush.bf16.msrb.mxu2 %v10433_v26  ;;  %6218 = vmatmul.bf16.vlgmr.msra.gmra.mxu3 %v7221_v31  ;;  %v10472_v26 = vld [vmem:[#allocation5 + $0x6f0] sm:$0xff]  ;;  %v10471_v31 = vld [vmem:[#allocation5 + $0x6e8] sm:$0xff] }
  0xb3   :  { %6266 = vmatpush.bf16.msrb.mxu3 %v10441_v27 }
  0xb4   :  { %6225 = vmatpush.bf16.msrb.mxu0 %v10416_v32  ;;  %v5981_v53 = vpop.f32.mrf.mxu2  ;;  %v11079_v17 = vpop.f32.mrf.mxu0 }
  0xb5   :  { %6239 = vmatpush.bf16.msrb.mxu1 %v10424_v33  ;;  %v5982_v54 = vadd.f32 %v5981_v53, %v5968_v48  ;;  %v5995_v55 = vpop.f32.mrf.mxu3  ;;  %v11081_v22 = vpop.f32.mrf.mxu1  ;;  %v10468_v53 = vld [vmem:[#allocation5 + $0x6d0] sm:$0xff] }
  0xb6   :  { %6253 = vmatpush.bf16.msrb.mxu2 %v10432_v34 }
  0xb7   :  { %6267 = vmatpush.bf16.msrb.mxu3 %v10440_v35  ;;  %v11077_v58 = vadd.f32 %v5995_v55, %v5982_v54  ;;  %v10446_v35 = vld [vmem:[#allocation5 + $0x620] sm:$0xff]  ;;  %v10443_v54 = vld [vmem:[#allocation5 + $0x608] sm:$0xff] }
  0xb8   :  { %6226 = vmatpush.bf16.msrb.mxu0 %v10415_v36  ;;  %v10454_v36 = vld [vmem:[#allocation5 + $0x660] sm:$0xff]  ;;  %v10451_v55 = vld [vmem:[#allocation5 + $0x648] sm:$0xff] }
  0xb9   :  { %6240 = vmatpush.bf16.msrb.mxu1 %v10423_v37  ;;  %v10462_v37 = vld [vmem:[#allocation5 + $0x6a0] sm:$0xff] }
  0xba   :  { %6254 = vmatpush.bf16.msrb.mxu2 %v10431_v39  ;;  %v10470_v39 = vld [vmem:[#allocation5 + $0x6e0] sm:$0xff] }
  0xbb   :  { %6268 = vmatpush.bf16.msrb.mxu3 %v10439_v40 }
  0xbc   :  { %6227 = vmatpush.bf16.msrb.mxu0 %v10414_v42  ;;  %v11083_v27 = vpop.f32.mrf.mxu2  ;;  %v10445_v42 = vld [vmem:[#allocation5 + $0x618] sm:$0xff] }
  0xbd   :  { %6241 = vmatpush.bf16.msrb.mxu1 %v10422_v43  ;;  %v11085_v32 = vpop.f32.mrf.mxu3  ;;  %v10453_v43 = vld [vmem:[#allocation5 + $0x658] sm:$0xff] }
  0xbe   :  { %6255 = vmatpush.bf16.msrb.mxu2 %v10430_v45  ;;  %v10469_v45 = vld [vmem:[#allocation5 + $0x6d8] sm:$0xff] }
  0xbf   :  { %6269 = vmatpush.bf16.msrb.mxu3 %v10438_v46 }
  0xc0   :  { %6228 = vmatpush.bf16.msrb.mxu0 %v10413_v49 }
  0xc1   :  { %6242 = vmatpush.bf16.msrb.mxu1 %v10421_v50  ;;  %v10444_v50 = vld [vmem:[#allocation5 + $0x610] sm:$0xff] }
  0xc2   :  { %6256 = vmatpush.bf16.msrb.mxu2 %v10429_v51  ;;  %v10452_v51 = vld [vmem:[#allocation5 + $0x650] sm:$0xff] }
  0xc3   :  { %6270 = vmatpush.bf16.msrb.mxu3 %v10437_v52  ;;  %v10460_v52 = vld [vmem:[#allocation5 + $0x690] sm:$0xff] }
  0xc4   :  { %6229 = vmatpush.bf16.msrb.mxu0 %v10412_v56  ;;  %v10459_v56 = vld [vmem:[#allocation5 + $0x688] sm:$0xff] }
  0xc5   :  { %6243 = vmatpush.bf16.msrb.mxu1 %v10420_v57  ;;  %v10467_v57 = vld [vmem:[#allocation5 + $0x6c8] sm:$0xff] }
  0xc6   :  { %6257 = vmatpush.bf16.msrb.mxu2 %v10428_v59  ;;  %v10450_v59 = vld [vmem:[#allocation5 + $0x640] sm:$0xff] }
  0xc7   :  { %6271 = vmatpush.bf16.msrb.mxu3 %v10436_v60  ;;  %v10458_v60 = vld [vmem:[#allocation5 + $0x680] sm:$0xff] }
  0xc8   :  { %6230 = vmatpush.bf16.msrb.mxu0 %v10411_v61  ;;  %v10466_v61 = vld [vmem:[#allocation5 + $0x6c0] sm:$0xff] }
  0xc9   :  { %6244 = vmatpush.bf16.msrb.mxu1 %v10419_v62  ;;  %v10481_v62 = vld [vmem:[#allocation5 + $0x738] sm:$0xff] }
  0xca   :  { %6258 = vmatpush.bf16.msrb.mxu2 %v10427_v63  ;;  %v10489_v63 = vld [vmem:[#allocation5 + $0x778] sm:$0xff] }
  0xcb   :  { %6272 = vmatpush.bf16.msrb.mxu3 %v10435_v0  ;;  %v7240_v0 = vld [vmem:[#allocation2 + $0x60] sm:$0xf] }
  0xcc   :  { %6231 = vmatpush.bf16.msrb.mxu0 %v10410_v1  ;;  %v6009_v33 = vpop.f32.mrf.mxu0  ;;  %v10220_v1 = vld [vmem:[#allocation2 + $0x1ac] sm:$0xf0] }
  0xcd   :  { %6245 = vmatpush.bf16.msrb.mxu1 %v10418_v2  ;;  %v6010_v34 = vadd.f32 %v6009_v33, %v11077_v58  ;;  %v6023_v40 = vpop.f32.mrf.mxu1  ;;  %v10442_v58 = vld [vmem:[#allocation5 + $0x600] sm:$0xff]  ;;  %v7248_v2 = vld [vmem:[#allocation2 + $0x68] sm:$0xf]  ;;  %v7241_v10 = vor.u32 %v10220_v1, %v7240_v0  ;;  %v10180_v1 = vld [vmem:[#allocation2 + $0x74] sm:$0xf] }
  0xce   :  { %6259 = vmatpush.bf16.msrb.mxu2 %v10426_v3  ;;  %v10221_v3 = vld [vmem:[#allocation2 + $0x1b4] sm:$0xf0]  ;;  %v10486_v33 = vld [vmem:[#allocation5 + $0x760] sm:$0xff]  ;;  %v10223_v0 = vld [vmem:[#allocation2 + $0x1c4] sm:$0xf0] }
  0xcf   :  { %6273 = vmatpush.bf16.msrb.mxu3 %v10434_v4  ;;  %6232 = vmatmul.bf16.vlgmr.msrb.gmra.mxu0 %v7225_v18  ;;  %v6024_v41 = vadd.f32 %v6023_v40, %v6010_v34  ;;  %v10178_v4 = vld [vmem:[#allocation2 + $0x64] sm:$0xf]  ;;  %v7249_v11 = vor.u32 %v10221_v3, %v7248_v2  ;;  %v10488_v18 = vld [vmem:[#allocation5 + $0x770] sm:$0xff]  ;;  %v10485_v40 = vld [vmem:[#allocation5 + $0x758] sm:$0xff] }
  0xd0   :  { %6280 = vmatpush.bf16.msra.mxu0 %v10449_v5  ;;  %6246 = vmatmul.bf16.vlgmr.msrb.gmra.mxu1 %v7229_v20  ;;  %v7242_v5 = vld [vmem:[#allocation2 + $0x1b0] sm:$0xf0]  ;;  %v7258_v2 = vld [vmem:[#allocation2 + $0x1c0] sm:$0xf0]  ;;  %v10181_v3 = vld [vmem:[#allocation2 + $0x7c] sm:$0xf] }
  0xd1   :  { %6294 = vmatpush.bf16.msra.mxu1 %v10457_v6  ;;  %6260 = vmatmul.bf16.vlgmr.msrb.gmra.mxu2 %v7233_v19  ;;  %v10179_v6 = vld [vmem:[#allocation2 + $0x6c] sm:$0xf]  ;;  %v7245_v13 = vor.u32 %v10178_v4, %v7242_v5  ;;  %v10496_v19 = vld [vmem:[#allocation5 + $0x7b0] sm:$0xff]  ;;  %v10529_v5 = vld [vmem:[#allocation5 + $0x8b8] sm:$0xff] }
  0xd2   :  { %6308 = vmatpush.bf16.msra.mxu2 %v10465_v15  ;;  %6274 = vmatmul.bf16.vlgmr.msrb.gmra.mxu3 %v7237_v21  ;;  %v7253_v14 = vor.u32 %v10179_v6, %v7250_v7  ;;  %v10504_v20 = vld [vmem:[#allocation5 + $0x7f0] sm:$0xff]  ;;  %v10479_v21 = vld [vmem:[#allocation5 + $0x728] sm:$0xff]  ;;  %v10537_v6 = vld [vmem:[#allocation5 + $0x8f8] sm:$0xff] }
  0xd3   :  { %6322 = vmatpush.bf16.msra.mxu3 %v10473_v16  ;;  %v10480_v16 = vld [vmem:[#allocation5 + $0x730] sm:$0xff]  ;;  %v7266_v4 = vld [vmem:[#allocation2 + $0x1c8] sm:$0xf0] }
  0xd4   :  { %6281 = vmatpush.bf16.msra.mxu0 %v10448_v23  ;;  %v6037_v46 = vpop.f32.mrf.mxu2  ;;  %v11090_v12 = vpop.f32.mrf.mxu0  ;;  %v10487_v23 = vld [vmem:[#allocation5 + $0x768] sm:$0xff] }
  0xd5   :  { %6295 = vmatpush.bf16.msra.mxu1 %v10456_v24  ;;  %v6038_v47 = vadd.f32 %v6037_v46, %v6024_v41  ;;  %v6051_v48 = vpop.f32.mrf.mxu3  ;;  %v11092_v15 = vpop.f32.mrf.mxu1  ;;  %v10493_v41 = vld [vmem:[#allocation5 + $0x798] sm:$0xff] }
  0xd6   :  { %6309 = vmatpush.bf16.msra.mxu2 %v10464_v25  ;;  %v10495_v25 = vld [vmem:[#allocation5 + $0x7a8] sm:$0xff] }
  0xd7   :  { %6323 = vmatpush.bf16.msra.mxu3 %v10472_v26  ;;  %v11088_v49 = vadd.f32 %v6051_v48, %v6038_v47  ;;  %v10503_v26 = vld [vmem:[#allocation5 + $0x7e8] sm:$0xff]  ;;  %v10476_v47 = vld [vmem:[#allocation5 + $0x710] sm:$0xff] }
  0xd8   :  { %6282 = vmatpush.bf16.msra.mxu0 %v10447_v28  ;;  %v10484_v48 = vld [vmem:[#allocation5 + $0x750] sm:$0xff] }
  0xd9   :  { %6296 = vmatpush.bf16.msra.mxu1 %v10455_v29 }
  0xda   :  { %6310 = vmatpush.bf16.msra.mxu2 %v10463_v30 }
  0xdb   :  { %6324 = vmatpush.bf16.msra.mxu3 %v10471_v31  ;;  %v10478_v31 = vld [vmem:[#allocation5 + $0x720] sm:$0xff] }
  0xdc   :  { %6283 = vmatpush.bf16.msra.mxu0 %v10446_v35  ;;  %v11094_v24 = vpop.f32.mrf.mxu2  ;;  %v10494_v35 = vld [vmem:[#allocation5 + $0x7a0] sm:$0xff] }
  0xdd   :  { %6297 = vmatpush.bf16.msra.mxu1 %v10454_v36  ;;  %v11096_v28 = vpop.f32.mrf.mxu3  ;;  %v10502_v36 = vld [vmem:[#allocation5 + $0x7e0] sm:$0xff] }
  0xde   :  { %6311 = vmatpush.bf16.msra.mxu2 %v10462_v37 }
  0xdf   :  { %6325 = vmatpush.bf16.msra.mxu3 %v10470_v39  ;;  %v10477_v39 = vld [vmem:[#allocation5 + $0x718] sm:$0xff] }
  0xe0   :  { %6284 = vmatpush.bf16.msra.mxu0 %v10445_v42  ;;  %v10501_v42 = vld [vmem:[#allocation5 + $0x7d8] sm:$0xff] }
  0xe1   :  { %6298 = vmatpush.bf16.msra.mxu1 %v10453_v43 }
  0xe2   :  { %6312 = vmatpush.bf16.msra.mxu2 %v10461_v44 }
  0xe3   :  { %6326 = vmatpush.bf16.msra.mxu3 %v10469_v45 }
  0xe4   :  { %6285 = vmatpush.bf16.msra.mxu0 %v10444_v50  ;;  %v10500_v50 = vld [vmem:[#allocation5 + $0x7d0] sm:$0xff] }
  0xe5   :  { %6299 = vmatpush.bf16.msra.mxu1 %v10452_v51  ;;  %v10475_v51 = vld [vmem:[#allocation5 + $0x708] sm:$0xff] }
  0xe6   :  { %6313 = vmatpush.bf16.msra.mxu2 %v10460_v52  ;;  %v10483_v52 = vld [vmem:[#allocation5 + $0x748] sm:$0xff] }
  0xe7   :  { %6327 = vmatpush.bf16.msra.mxu3 %v10468_v53  ;;  %v10491_v53 = vld [vmem:[#allocation5 + $0x788] sm:$0xff] }
  0xe8   :  { %6286 = vmatpush.bf16.msra.mxu0 %v10443_v54  ;;  %v10499_v54 = vld [vmem:[#allocation5 + $0x7c8] sm:$0xff] }
  0xe9   :  { %6300 = vmatpush.bf16.msra.mxu1 %v10451_v55  ;;  %v10474_v55 = vld [vmem:[#allocation5 + $0x700] sm:$0xff] }
  0xea   :  { %6314 = vmatpush.bf16.msra.mxu2 %v10459_v56  ;;  %v10482_v56 = vld [vmem:[#allocation5 + $0x740] sm:$0xff] }
  0xeb   :  { %6328 = vmatpush.bf16.msra.mxu3 %v10467_v57  ;;  %v10490_v57 = vld [vmem:[#allocation5 + $0x780] sm:$0xff] }
  0xec   :  { %6287 = vmatpush.bf16.msra.mxu0 %v10442_v58  ;;  %v6065_v29 = vpop.f32.mrf.mxu0  ;;  %v10498_v58 = vld [vmem:[#allocation5 + $0x7c0] sm:$0xff] }
  0xed   :  { %6301 = vmatpush.bf16.msra.mxu1 %v10450_v59  ;;  %v6066_v30 = vadd.f32 %v6065_v29, %v11088_v49  ;;  %v6079_v34 = vpop.f32.mrf.mxu1  ;;  %v10492_v49 = vld [vmem:[#allocation5 + $0x790] sm:$0xff]  ;;  %v10513_v59 = vld [vmem:[#allocation5 + $0x838] sm:$0xff] }
  0xee   :  { %6315 = vmatpush.bf16.msra.mxu2 %v10458_v60  ;;  %v10521_v60 = vld [vmem:[#allocation5 + $0x878] sm:$0xff] }
  0xef   :  { %6329 = vmatpush.bf16.msra.mxu3 %v10466_v61  ;;  %6288 = vmatmul.bf16.vlgmr.msra.gmra.mxu0 %v7241_v10  ;;  %v6080_v37 = vadd.f32 %v6079_v34, %v6066_v30  ;;  %v7256_v61 = vld [vmem:[#allocation2 + $0x70] sm:$0xf]  ;;  %v7261_v10 = vor.u32 %v10180_v1, %v7258_v2  ;;  %v10518_v34 = vld [vmem:[#allocation5 + $0x860] sm:$0xff]  ;;  %v10225_v1 = vld [vmem:[#allocation2 + $0x1d4] sm:$0xf0] }
  0xf0   :  { %6336 = vmatpush.bf16.msrb.mxu0 %v10481_v62  ;;  %6302 = vmatmul.bf16.vlgmr.msra.gmra.mxu1 %v7245_v13  ;;  %v10222_v62 = vld [vmem:[#allocation2 + $0x1bc] sm:$0xf0]  ;;  %v10182_v2 = vld [vmem:[#allocation2 + $0x84] sm:$0xf] }
  0xf1   :  { %6350 = vmatpush.bf16.msrb.mxu1 %v10489_v63  ;;  %6316 = vmatmul.bf16.vlgmr.msra.gmra.mxu2 %v7249_v11  ;;  %v7264_v63 = vld [vmem:[#allocation2 + $0x78] sm:$0xf]  ;;  %v7257_v7 = vor.u32 %v10222_v62, %v7256_v61  ;;  %v7269_v11 = vor.u32 %v10181_v3, %v7266_v4  ;;  %v7272_v62 = vld [vmem:[#allocation2 + $0x80] sm:$0xf]  ;;  %v7274_v3 = vld [vmem:[#allocation2 + $0x1d0] sm:$0xf0] }
  0xf2   :  { %6364 = vmatpush.bf16.msrb.mxu2 %v10497_v8  ;;  %6330 = vmatmul.bf16.vlgmr.msra.gmra.mxu3 %v7253_v14  ;;  %v7265_v8 = vor.u32 %v10223_v0, %v7264_v63  ;;  %v10512_v14 = vld [vmem:[#allocation5 + $0x830] sm:$0xff]  ;;  %v10553_v61 = vld [vmem:[#allocation5 + $0x978] sm:$0xff]  ;;  %v7280_v0 = vld [vmem:[#allocation2 + $0x88] sm:$0xf] }
  0xf3   :  { %6378 = vmatpush.bf16.msrb.mxu3 %v10505_v9  ;;  %v10224_v63 = vld [vmem:[#allocation2 + $0x1cc] sm:$0xf0]  ;;  %v10183_v4 = vld [vmem:[#allocation2 + $0x8c] sm:$0xf] }
  0xf4   :  { %6337 = vmatpush.bf16.msrb.mxu0 %v10480_v16  ;;  %v6093_v43 = vpop.f32.mrf.mxu2  ;;  %v11101_v9 = vpop.f32.mrf.mxu0  ;;  %v10520_v16 = vld [vmem:[#allocation5 + $0x870] sm:$0xff] }
  0xf5   :  { %6351 = vmatpush.bf16.msrb.mxu1 %v10488_v18  ;;  %v6094_v44 = vadd.f32 %v6093_v43, %v6080_v37  ;;  %v6107_v45 = vpop.f32.mrf.mxu3  ;;  %v11103_v13 = vpop.f32.mrf.mxu1  ;;  %v10528_v18 = vld [vmem:[#allocation5 + $0x8b0] sm:$0xff]  ;;  %v10534_v37 = vld [vmem:[#allocation5 + $0x8e0] sm:$0xff]  ;;  %v10533_v43 = vld [vmem:[#allocation5 + $0x8d8] sm:$0xff] }
  0xf6   :  { %6365 = vmatpush.bf16.msrb.mxu2 %v10496_v19  ;;  %v10536_v19 = vld [vmem:[#allocation5 + $0x8f0] sm:$0xff] }
  0xf7   :  { %6379 = vmatpush.bf16.msrb.mxu3 %v10504_v20  ;;  %v11099_v46 = vadd.f32 %v6107_v45, %v6094_v44  ;;  %v10511_v20 = vld [vmem:[#allocation5 + $0x828] sm:$0xff] }
  0xf8   :  { %6338 = vmatpush.bf16.msrb.mxu0 %v10479_v21  ;;  %v10519_v21 = vld [vmem:[#allocation5 + $0x868] sm:$0xff] }
  0xf9   :  { %6352 = vmatpush.bf16.msrb.mxu1 %v10487_v23 }
  0xfa   :  { %6366 = vmatpush.bf16.msrb.mxu2 %v10495_v25  ;;  %v10527_v25 = vld [vmem:[#allocation5 + $0x8a8] sm:$0xff] }
  0xfb   :  { %6380 = vmatpush.bf16.msrb.mxu3 %v10503_v26  ;;  %v10535_v26 = vld [vmem:[#allocation5 + $0x8e8] sm:$0xff] }
  0xfc   :  { %6339 = vmatpush.bf16.msrb.mxu0 %v10478_v31  ;;  %v11105_v23 = vpop.f32.mrf.mxu2 }
  0xfd   :  { %6353 = vmatpush.bf16.msrb.mxu1 %v10486_v33  ;;  %v11107_v29 = vpop.f32.mrf.mxu3  ;;  %v10510_v33 = vld [vmem:[#allocation5 + $0x820] sm:$0xff] }
  0xfe   :  { %6367 = vmatpush.bf16.msrb.mxu2 %v10494_v35 }
  0xff   :  { %6381 = vmatpush.bf16.msrb.mxu3 %v10502_v36  ;;  %v10526_v36 = vld [vmem:[#allocation5 + $0x8a0] sm:$0xff] }
 0x100   :  { %6340 = vmatpush.bf16.msrb.mxu0 %v10477_v39 }
 0x101   :  { %6354 = vmatpush.bf16.msrb.mxu1 %v10485_v40  ;;  %v10509_v40 = vld [vmem:[#allocation5 + $0x818] sm:$0xff] }
 0x102   :  { %6368 = vmatpush.bf16.msrb.mxu2 %v10493_v41  ;;  %v10517_v41 = vld [vmem:[#allocation5 + $0x858] sm:$0xff] }
 0x103   :  { %6382 = vmatpush.bf16.msrb.mxu3 %v10501_v42  ;;  %v10525_v42 = vld [vmem:[#allocation5 + $0x898] sm:$0xff] }
 0x104   :  { %6341 = vmatpush.bf16.msrb.mxu0 %v10476_v47 }
 0x105   :  { %6355 = vmatpush.bf16.msrb.mxu1 %v10484_v48  ;;  %v10508_v48 = vld [vmem:[#allocation5 + $0x810] sm:$0xff] }
 0x106   :  { %6369 = vmatpush.bf16.msrb.mxu2 %v10492_v49  ;;  %v10516_v49 = vld [vmem:[#allocation5 + $0x850] sm:$0xff] }
 0x107   :  { %6383 = vmatpush.bf16.msrb.mxu3 %v10500_v50  ;;  %v10524_v50 = vld [vmem:[#allocation5 + $0x890] sm:$0xff] }
 0x108   :  { %6342 = vmatpush.bf16.msrb.mxu0 %v10475_v51  ;;  %v10532_v51 = vld [vmem:[#allocation5 + $0x8d0] sm:$0xff] }
 0x109   :  { %6356 = vmatpush.bf16.msrb.mxu1 %v10483_v52  ;;  %v10507_v52 = vld [vmem:[#allocation5 + $0x808] sm:$0xff] }
 0x10a   :  { %6370 = vmatpush.bf16.msrb.mxu2 %v10491_v53  ;;  %v10515_v53 = vld [vmem:[#allocation5 + $0x848] sm:$0xff] }
 0x10b   :  { %6384 = vmatpush.bf16.msrb.mxu3 %v10499_v54  ;;  %v10523_v54 = vld [vmem:[#allocation5 + $0x888] sm:$0xff] }
 0x10c   :  { %6343 = vmatpush.bf16.msrb.mxu0 %v10474_v55  ;;  %v6121_v30 = vpop.f32.mrf.mxu0  ;;  %v10531_v55 = vld [vmem:[#allocation5 + $0x8c8] sm:$0xff] }
 0x10d   :  { %6357 = vmatpush.bf16.msrb.mxu1 %v10482_v56  ;;  %v6122_v31 = vadd.f32 %v6121_v30, %v11099_v46  ;;  %v6135_v35 = vpop.f32.mrf.mxu1  ;;  %v10506_v56 = vld [vmem:[#allocation5 + $0x800] sm:$0xff]  ;;  %v10551_v30 = vld [vmem:[#allocation5 + $0x968] sm:$0xff] }
 0x10e   :  { %6371 = vmatpush.bf16.msrb.mxu2 %v10490_v57  ;;  %v10514_v57 = vld [vmem:[#allocation5 + $0x840] sm:$0xff] }
 0x10f   :  { %6385 = vmatpush.bf16.msrb.mxu3 %v10498_v58  ;;  %6344 = vmatmul.bf16.vlgmr.msrb.gmra.mxu0 %v7257_v7  ;;  %v6136_v39 = vadd.f32 %v6135_v35, %v6122_v31  ;;  %v10522_v58 = vld [vmem:[#allocation5 + $0x880] sm:$0xff]  ;;  %v10569_v7 = vld [vmem:[#allocation5 + $0x9f8] sm:$0xff] }
 0x110   :  { %6392 = vmatpush.bf16.msra.mxu0 %v10513_v59  ;;  %6358 = vmatmul.bf16.vlgmr.msrb.gmra.mxu1 %v7261_v10  ;;  %v10530_v59 = vld [vmem:[#allocation5 + $0x8c0] sm:$0xff]  ;;  %v7281_v10 = vor.u32 %v10225_v1, %v7280_v0  ;;  %v10577_v1 = vld [vmem:[#allocation5 + $0xa38] sm:$0xff] }
 0x111   :  { %6406 = vmatpush.bf16.msra.mxu1 %v10521_v60  ;;  %6372 = vmatmul.bf16.vlgmr.msrb.gmra.mxu2 %v7265_v8  ;;  %v10545_v60 = vld [vmem:[#allocation5 + $0x938] sm:$0xff]  ;;  %v7273_v8 = vor.u32 %v10224_v63, %v7272_v62  ;;  %v10546_v62 = vld [vmem:[#allocation5 + $0x940] sm:$0xff] }
 0x112   :  { %6420 = vmatpush.bf16.msra.mxu2 %v10529_v5  ;;  %6386 = vmatmul.bf16.vlgmr.msrb.gmra.mxu3 %v7269_v11  ;;  %v7282_v5 = vld [vmem:[#allocation2 + $0x1d8] sm:$0xf0]  ;;  %v10554_v63 = vld [vmem:[#allocation5 + $0x980] sm:$0xff] }
 0x113   :  { %6434 = vmatpush.bf16.msra.mxu3 %v10537_v6  ;;  %v10561_v6 = vld [vmem:[#allocation5 + $0x9b8] sm:$0xff]  ;;  %v10562_v0 = vld [vmem:[#allocation5 + $0x9c0] sm:$0xff] }
 0x114   :  { %6393 = vmatpush.bf16.msra.mxu0 %v10512_v14  ;;  %v6149_v44 = vpop.f32.mrf.mxu2  ;;  %v11112_v11 = vpop.f32.mrf.mxu0  ;;  %v7277_v14 = vor.u32 %v10182_v2, %v7274_v3  ;;  %v10585_v2 = vld [vmem:[#allocation5 + $0xa78] sm:$0xff]  ;;  %v7288_v3 = vld [vmem:[#allocation2 + $0x90] sm:$0xf] }
 0x115   :  { %6407 = vmatpush.bf16.msra.mxu1 %v10520_v16  ;;  %v6150_v45 = vadd.f32 %v6149_v44, %v6136_v39  ;;  %v6163_v47 = vpop.f32.mrf.mxu3  ;;  %v7285_v16 = vor.u32 %v10183_v4, %v7282_v5  ;;  %v10542_v39 = vld [vmem:[#allocation5 + $0x920] sm:$0xff]  ;;  %v7296_v5 = vld [vmem:[#allocation2 + $0x98] sm:$0xf] }
 0x116   :  { %6421 = vmatpush.bf16.msra.mxu2 %v10528_v18  ;;  %v11114_v18 = vpop.f32.mrf.mxu1  ;;  %v10226_v4 = vld [vmem:[#allocation2 + $0x1dc] sm:$0xf0] }
 0x117   :  { %6435 = vmatpush.bf16.msra.mxu3 %v10536_v19  ;;  %v11110_v46 = vadd.f32 %v6163_v47, %v6150_v45  ;;  %v10544_v19 = vld [vmem:[#allocation5 + $0x930] sm:$0xff]  ;;  %v10541_v45 = vld [vmem:[#allocation5 + $0x918] sm:$0xff] }
 0x118   :  { %6394 = vmatpush.bf16.msra.mxu0 %v10511_v20  ;;  %v10552_v20 = vld [vmem:[#allocation5 + $0x970] sm:$0xff]  ;;  %v10549_v47 = vld [vmem:[#allocation5 + $0x958] sm:$0xff] }
 0x119   :  { %6408 = vmatpush.bf16.msra.mxu1 %v10519_v21  ;;  %v10560_v21 = vld [vmem:[#allocation5 + $0x9b0] sm:$0xff] }
 0x11a   :  { %6422 = vmatpush.bf16.msra.mxu2 %v10527_v25  ;;  %v10568_v25 = vld [vmem:[#allocation5 + $0x9f0] sm:$0xff] }
 0x11b   :  { %6436 = vmatpush.bf16.msra.mxu3 %v10535_v26  ;;  %v10543_v26 = vld [vmem:[#allocation5 + $0x928] sm:$0xff] }
 0x11c   :  { %6395 = vmatpush.bf16.msra.mxu0 %v10510_v33  ;;  %v11116_v31 = vpop.f32.mrf.mxu2  ;;  %v10559_v33 = vld [vmem:[#allocation5 + $0x9a8] sm:$0xff] }
 0x11d   :  { %6409 = vmatpush.bf16.msra.mxu1 %v10518_v34  ;;  %v10567_v34 = vld [vmem:[#allocation5 + $0x9e8] sm:$0xff]  ;;  %v11118_v35 = vpop.f32.mrf.mxu3 }
 0x11e   :  { %6423 = vmatpush.bf16.msra.mxu2 %v10526_v36 }
 0x11f   :  { %6437 = vmatpush.bf16.msra.mxu3 %v10534_v37 }
 0x120   :  { %6396 = vmatpush.bf16.msra.mxu0 %v10509_v40  ;;  %v10550_v40 = vld [vmem:[#allocation5 + $0x960] sm:$0xff] }
 0x121   :  { %6410 = vmatpush.bf16.msra.mxu1 %v10517_v41 }
 0x122   :  { %6424 = vmatpush.bf16.msra.mxu2 %v10525_v42  ;;  %v10558_v42 = vld [vmem:[#allocation5 + $0x9a0] sm:$0xff] }
 0x123   :  { %6438 = vmatpush.bf16.msra.mxu3 %v10533_v43  ;;  %v10566_v43 = vld [vmem:[#allocation5 + $0x9e0] sm:$0xff] }
 0x124   :  { %6397 = vmatpush.bf16.msra.mxu0 %v10508_v48  ;;  %v10557_v48 = vld [vmem:[#allocation5 + $0x998] sm:$0xff] }
 0x125   :  { %6411 = vmatpush.bf16.msra.mxu1 %v10516_v49  ;;  %v10565_v49 = vld [vmem:[#allocation5 + $0x9d8] sm:$0xff] }
 0x126   :  { %6425 = vmatpush.bf16.msra.mxu2 %v10524_v50 }
 0x127   :  { %6439 = vmatpush.bf16.msra.mxu3 %v10532_v51 }
 0x128   :  { %6398 = vmatpush.bf16.msra.mxu0 %v10507_v52 }
 0x129   :  { %6412 = vmatpush.bf16.msra.mxu1 %v10515_v53  ;;  %v10540_v53 = vld [vmem:[#allocation5 + $0x910] sm:$0xff] }
 0x12a   :  { %6426 = vmatpush.bf16.msra.mxu2 %v10523_v54  ;;  %v10548_v54 = vld [vmem:[#allocation5 + $0x950] sm:$0xff] }
 0x12b   :  { %6440 = vmatpush.bf16.msra.mxu3 %v10531_v55  ;;  %v10556_v55 = vld [vmem:[#allocation5 + $0x990] sm:$0xff] }
 0x12c   :  { %6399 = vmatpush.bf16.msra.mxu0 %v10506_v56  ;;  %v6177_v36 = vpop.f32.mrf.mxu0  ;;  %v10564_v56 = vld [vmem:[#allocation5 + $0x9d0] sm:$0xff] }
 0x12d   :  { %6413 = vmatpush.bf16.msra.mxu1 %v10514_v57  ;;  %v6178_v37 = vadd.f32 %v6177_v36, %v11110_v46  ;;  %v6191_v41 = vpop.f32.mrf.mxu1  ;;  %v10539_v57 = vld [vmem:[#allocation5 + $0x908] sm:$0xff]  ;;  %v10584_v36 = vld [vmem:[#allocation5 + $0xa70] sm:$0xff] }
 0x12e   :  { %6427 = vmatpush.bf16.msra.mxu2 %v10522_v58  ;;  %v10547_v58 = vld [vmem:[#allocation5 + $0x948] sm:$0xff] }
 0x12f   :  { %6441 = vmatpush.bf16.msra.mxu3 %v10530_v59  ;;  %6400 = vmatmul.bf16.vlgmr.msra.gmra.mxu0 %v7273_v8  ;;  %v6192_v44 = vadd.f32 %v6191_v41, %v6178_v37  ;;  %v10555_v59 = vld [vmem:[#allocation5 + $0x988] sm:$0xff]  ;;  %v7290_v8 = vld [vmem:[#allocation2 + $0x1e0] sm:$0xf0]  ;;  %v10592_v37 = vld [vmem:[#allocation5 + $0xab0] sm:$0xff] }
 0x130   :  { %6448 = vmatpush.bf16.msrb.mxu0 %v10545_v60  ;;  %6414 = vmatmul.bf16.vlgmr.msra.gmra.mxu1 %v7277_v14  ;;  %v10563_v60 = vld [vmem:[#allocation5 + $0x9c8] sm:$0xff] }
 0x131   :  { %6462 = vmatpush.bf16.msrb.mxu1 %v10553_v61  ;;  %6428 = vmatmul.bf16.vlgmr.msra.gmra.mxu2 %v7281_v10  ;;  %v10538_v61 = vld [vmem:[#allocation5 + $0x900] sm:$0xff]  ;;  %v10185_v10 = vld [vmem:[#allocation2 + $0x9c] sm:$0xf]  ;;  %v7298_v14 = vld [vmem:[#allocation2 + $0x1e8] sm:$0xf0] }
 0x132   :  { %6476 = vmatpush.bf16.msrb.mxu2 %v10561_v6  ;;  %6442 = vmatmul.bf16.vlgmr.msra.gmra.mxu3 %v7285_v16  ;;  %v10227_v6 = vld [vmem:[#allocation2 + $0x1e4] sm:$0xf0]  ;;  %v10593_v16 = vld [vmem:[#allocation5 + $0xab8] sm:$0xff] }
 0x133   :  { %6490 = vmatpush.bf16.msrb.mxu3 %v10569_v7  ;;  %v10184_v7 = vld [vmem:[#allocation2 + $0x94] sm:$0xf]  ;;  %v10583_v41 = vld [vmem:[#allocation5 + $0xa68] sm:$0xff] }
 0x134   :  { %6449 = vmatpush.bf16.msrb.mxu0 %v10544_v19  ;;  %v6205_v50 = vpop.f32.mrf.mxu2  ;;  %v10601_v19 = vld [vmem:[#allocation5 + $0xaf8] sm:$0xff] }
 0x135   :  { %6463 = vmatpush.bf16.msrb.mxu1 %v10552_v20  ;;  %v6206_v51 = vadd.f32 %v6205_v50, %v6192_v44  ;;  %v6219_v52 = vpop.f32.mrf.mxu3  ;;  %v7289_v20 = vor.u32 %v10226_v4, %v7288_v3  ;;  %v10599_v44 = vld [vmem:[#allocation5 + $0xae8] sm:$0xff]  ;;  %v10582_v50 = vld [vmem:[#allocation5 + $0xa60] sm:$0xff] }
 0x136   :  { %6477 = vmatpush.bf16.msrb.mxu2 %v10560_v21  ;;  %v7297_v21 = vor.u32 %v10227_v6, %v7296_v5  ;;  %v10579_v3 = vld [vmem:[#allocation5 + $0xa48] sm:$0xff]  ;;  %v10570_v6 = vld [vmem:[#allocation5 + $0xa00] sm:$0xff] }
 0x137   :  { %6491 = vmatpush.bf16.msrb.mxu3 %v10568_v25  ;;  %v11121_v46 = vadd.f32 %v6219_v52, %v6206_v51  ;;  %v11123_v25 = vpop.f32.mrf.mxu0  ;;  %v10590_v52 = vld [vmem:[#allocation5 + $0xaa0] sm:$0xff]  ;;  %v10587_v4 = vld [vmem:[#allocation5 + $0xa88] sm:$0xff] }
 0x138   :  { %6450 = vmatpush.bf16.msrb.mxu0 %v10543_v26  ;;  %v7293_v26 = vor.u32 %v10184_v7, %v7290_v8  ;;  %v10595_v5 = vld [vmem:[#allocation5 + $0xac8] sm:$0xff]  ;;  %v10578_v7 = vld [vmem:[#allocation5 + $0xa40] sm:$0xff] }
 0x139   :  { %6464 = vmatpush.bf16.msrb.mxu1 %v10551_v30  ;;  %v7301_v30 = vor.u32 %v10185_v10, %v7298_v14  ;;  %v10586_v8 = vld [vmem:[#allocation5 + $0xa80] sm:$0xff]  ;;  %v5956_v14 = vadd.f32 %v11074_v38, %v11079_v17 }
 0x13a   :  { %6478 = vmatpush.bf16.msrb.mxu2 %v10559_v33  ;;  %v11125_v33 = vpop.f32.mrf.mxu1  ;;  %v10594_v10 = vld [vmem:[#allocation5 + $0xac0] sm:$0xff] }
 0x13b   :  { %6492 = vmatpush.bf16.msrb.mxu3 %v10567_v34  ;;  %v10576_v34 = vld [vmem:[#allocation5 + $0xa30] sm:$0xff] }
 0x13c   :  { %6451 = vmatpush.bf16.msrb.mxu0 %v10542_v39  ;;  %v10600_v39 = vld [vmem:[#allocation5 + $0xaf0] sm:$0xff] }
 0x13d   :  { %6465 = vmatpush.bf16.msrb.mxu1 %v10550_v40  ;;  %v10575_v40 = vld [vmem:[#allocation5 + $0xa28] sm:$0xff] }
 0x13e   :  { %6479 = vmatpush.bf16.msrb.mxu2 %v10558_v42  ;;  %v11127_v42 = vpop.f32.mrf.mxu2 }
 0x13f   :  { %6493 = vmatpush.bf16.msrb.mxu3 %v10566_v43  ;;  %v10591_v43 = vld [vmem:[#allocation5 + $0xaa8] sm:$0xff] }
 0x140   :  { %6452 = vmatpush.bf16.msrb.mxu0 %v10541_v45  ;;  %v11129_v45 = vpop.f32.mrf.mxu3 }
 0x141   :  { %6466 = vmatpush.bf16.msrb.mxu1 %v10549_v47 }
 0x142   :  { %6480 = vmatpush.bf16.msrb.mxu2 %v10557_v48 }
 0x143   :  { %6494 = vmatpush.bf16.msrb.mxu3 %v10565_v49  ;;  %v10574_v49 = vld [vmem:[#allocation5 + $0xa20] sm:$0xff] }
 0x144   :  { %6453 = vmatpush.bf16.msrb.mxu0 %v10540_v53  ;;  %v10598_v53 = vld [vmem:[#allocation5 + $0xae0] sm:$0xff] }
 0x145   :  { %6467 = vmatpush.bf16.msrb.mxu1 %v10548_v54 }
 0x146   :  { %6481 = vmatpush.bf16.msrb.mxu2 %v10556_v55  ;;  %v10573_v55 = vld [vmem:[#allocation5 + $0xa18] sm:$0xff] }
 0x147   :  { %6495 = vmatpush.bf16.msrb.mxu3 %v10564_v56  ;;  %v10581_v56 = vld [vmem:[#allocation5 + $0xa58] sm:$0xff] }
 0x148   :  { %6454 = vmatpush.bf16.msrb.mxu0 %v10539_v57  ;;  %v10589_v57 = vld [vmem:[#allocation5 + $0xa98] sm:$0xff] }
 0x149   :  { %6468 = vmatpush.bf16.msrb.mxu1 %v10547_v58  ;;  %v10597_v58 = vld [vmem:[#allocation5 + $0xad8] sm:$0xff] }
 0x14a   :  { %6482 = vmatpush.bf16.msrb.mxu2 %v10555_v59 }
 0x14b   :  { %6496 = vmatpush.bf16.msrb.mxu3 %v10563_v60 }
 0x14c   :  { %6455 = vmatpush.bf16.msrb.mxu0 %v10538_v61  ;;  %v6233_v47 = vpop.f32.mrf.mxu0 }
 0x14d   :  { %6469 = vmatpush.bf16.msrb.mxu1 %v10546_v62  ;;  %v6234_v48 = vadd.f32 %v6233_v47, %v11121_v46  ;;  %v6247_v51 = vpop.f32.mrf.mxu1  ;;  %v10572_v62 = vld [vmem:[#allocation5 + $0xa10] sm:$0xff] }
 0x14e   :  { %6483 = vmatpush.bf16.msrb.mxu2 %v10554_v63  ;;  %v10580_v63 = vld [vmem:[#allocation5 + $0xa50] sm:$0xff] }
 0x14f   :  { %6497 = vmatpush.bf16.msrb.mxu3 %v10562_v0  ;;  %6456 = vmatmul.bf16.vlgmr.msrb.gmra.mxu0 %v7289_v20  ;;  %v6248_v54 = vadd.f32 %v6247_v51, %v6234_v48  ;;  %v10588_v0 = vld [vmem:[#allocation5 + $0xa90] sm:$0xff]  ;;  %v7304_v20 = vld [vmem:[#allocation2 + $0xa0] sm:$0xf] }
 0x150   :  { %6504 = vmatpush.bf16.msra.mxu0 %v10577_v1  ;;  %6470 = vmatmul.bf16.vlgmr.msrb.gmra.mxu1 %v7293_v26  ;;  %v10596_v1 = vld [vmem:[#allocation5 + $0xad0] sm:$0xff]  ;;  %v7312_v26 = vld [vmem:[#allocation2 + $0xa8] sm:$0xf] }
 0x151   :  { %6518 = vmatpush.bf16.msra.mxu1 %v10585_v2  ;;  %6484 = vmatmul.bf16.vlgmr.msrb.gmra.mxu2 %v7297_v21  ;;  %v10571_v2 = vld [vmem:[#allocation5 + $0xa08] sm:$0xff]  ;;  %v10228_v21 = vld [vmem:[#allocation2 + $0x1ec] sm:$0xf0] }
 0x152   :  { %6532 = vmatpush.bf16.msra.mxu2 %v10593_v16  ;;  %6498 = vmatmul.bf16.vlgmr.msrb.gmra.mxu3 %v7301_v30  ;;  %v10609_v16 = vld [vmem:[#allocation5 + $0xb38] sm:$0xff]  ;;  %v7305_v38 = vor.u32 %v10228_v21, %v7304_v20  ;;  %v10616_v51 = vld [vmem:[#allocation5 + $0xb70] sm:$0xff] }
 0x153   :  { %6546 = vmatpush.bf16.msra.mxu3 %v10601_v19  ;;  %v10617_v19 = vld [vmem:[#allocation5 + $0xb78] sm:$0xff]  ;;  %v10612_v20 = vld [vmem:[#allocation5 + $0xb50] sm:$0xff] }
 0x154   :  { %6505 = vmatpush.bf16.msra.mxu0 %v10576_v34  ;;  %v6261_v59 = vpop.f32.mrf.mxu2  ;;  %v10229_v30 = vld [vmem:[#allocation2 + $0x1f4] sm:$0xf0]  ;;  %v10186_v34 = vld [vmem:[#allocation2 + $0xa4] sm:$0xf]  ;;  %v10620_v21 = vld [vmem:[#allocation5 + $0xb90] sm:$0xff] }
 0x155   :  { %6519 = vmatpush.bf16.msra.mxu1 %v10584_v36  ;;  %v6262_v60 = vadd.f32 %v6261_v59, %v6248_v54  ;;  %v6275_v61 = vpop.f32.mrf.mxu3  ;;  %v7306_v36 = vld [vmem:[#allocation2 + $0x1f0] sm:$0xf0]  ;;  %v7313_v17 = vor.u32 %v10229_v30, %v7312_v26  ;;  %v10607_v54 = vld [vmem:[#allocation5 + $0xb28] sm:$0xff] }
 0x156   :  { %6533 = vmatpush.bf16.msra.mxu2 %v10592_v37  ;;  %v10187_v37 = vld [vmem:[#allocation2 + $0xac] sm:$0xf]  ;;  %v7309_v47 = vor.u32 %v10186_v34, %v7306_v36  ;;  %v10628_v26 = vld [vmem:[#allocation5 + $0xbd0] sm:$0xff] }
 0x157   :  { %6547 = vmatpush.bf16.msra.mxu3 %v10600_v39  ;;  %v11132_v46 = vadd.f32 %v6275_v61, %v6262_v60  ;;  %v7314_v39 = vld [vmem:[#allocation2 + $0x1f8] sm:$0xf0]  ;;  %v10603_v34 = vld [vmem:[#allocation5 + $0xb08] sm:$0xff] }
 0x158   :  { %6506 = vmatpush.bf16.msra.mxu0 %v10575_v40  ;;  %v10625_v40 = vld [vmem:[#allocation5 + $0xbb8] sm:$0xff]  ;;  %v7317_v48 = vor.u32 %v10187_v37, %v7314_v39  ;;  %v10619_v36 = vld [vmem:[#allocation5 + $0xb88] sm:$0xff]  ;;  %v10602_v39 = vld [vmem:[#allocation5 + $0xb00] sm:$0xff] }
 0x159   :  { %6520 = vmatpush.bf16.msra.mxu1 %v10583_v41  ;;  %v10633_v41 = vld [vmem:[#allocation5 + $0xbf8] sm:$0xff] }
 0x15a   :  { %6534 = vmatpush.bf16.msra.mxu2 %v10591_v43  ;;  %v5970_v43 = vadd.f32 %v11081_v22, %v5956_v14  ;;  %v10632_v22 = vld [vmem:[#allocation5 + $0xbf0] sm:$0xff] }
 0x15b   :  { %6548 = vmatpush.bf16.msra.mxu3 %v10599_v44  ;;  %v11137_v44 = vpop.f32.mrf.mxu0 }
 0x15c   :  { %6507 = vmatpush.bf16.msra.mxu0 %v10574_v49  ;;  %v11139_v49 = vpop.f32.mrf.mxu1 }
 0x15d   :  { %6521 = vmatpush.bf16.msra.mxu1 %v10582_v50  ;;  %v10608_v50 = vld [vmem:[#allocation5 + $0xb30] sm:$0xff]  ;;  %v11145_v60 = vpop.f32.mrf.mxu3 }
 0x15e   :  { %6535 = vmatpush.bf16.msra.mxu2 %v10590_v52  ;;  %v10624_v52 = vld [vmem:[#allocation5 + $0xbb0] sm:$0xff] }
 0x15f   :  { %6549 = vmatpush.bf16.msra.mxu3 %v10598_v53  ;;  %v5984_v53 = vadd.f32 %v11083_v27, %v5970_v43  ;;  %v10626_v43 = vld [vmem:[#allocation5 + $0xbc0] sm:$0xff] }
 0x160   :  { %6508 = vmatpush.bf16.msra.mxu0 %v10573_v55  ;;  %v10615_v55 = vld [vmem:[#allocation5 + $0xb68] sm:$0xff] }
 0x161   :  { %6522 = vmatpush.bf16.msra.mxu1 %v10581_v56  ;;  %v11142_v56 = vpop.f32.mrf.mxu2  ;;  %v5998_v59 = vadd.f32 %v11085_v32, %v5984_v53  ;;  %v10605_v32 = vld [vmem:[#allocation5 + $0xb18] sm:$0xff] }
 0x162   :  { %6536 = vmatpush.bf16.msra.mxu2 %v10589_v57  ;;  %v10623_v57 = vld [vmem:[#allocation5 + $0xba8] sm:$0xff]  ;;  %v10189_v53 = vld [vmem:[#allocation2 + $0xbc] sm:$0xf] }
 0x163   :  { %6550 = vmatpush.bf16.msra.mxu3 %v10597_v58  ;;  %v10631_v58 = vld [vmem:[#allocation5 + $0xbe8] sm:$0xff] }
 0x164   :  { %6509 = vmatpush.bf16.msra.mxu0 %v10572_v62  ;;  %v10606_v62 = vld [vmem:[#allocation5 + $0xb20] sm:$0xff] }
 0x165   :  { %6523 = vmatpush.bf16.msra.mxu1 %v10580_v63  ;;  %v10614_v63 = vld [vmem:[#allocation5 + $0xb60] sm:$0xff] }
 0x166   :  { %6537 = vmatpush.bf16.msra.mxu2 %v10588_v0 }
 0x167   :  { %6551 = vmatpush.bf16.msra.mxu3 %v10596_v1  ;;  %v10622_v1 = vld [vmem:[#allocation5 + $0xba0] sm:$0xff] }
 0x168   :  { %6510 = vmatpush.bf16.msra.mxu0 %v10571_v2  ;;  %v10630_v2 = vld [vmem:[#allocation5 + $0xbe0] sm:$0xff] }
 0x169   :  { %6524 = vmatpush.bf16.msra.mxu1 %v10579_v3  ;;  %v6012_v3 = vadd.f32 %v11090_v12, %v5998_v59  ;;  %v10604_v12 = vld [vmem:[#allocation5 + $0xb10] sm:$0xff] }
 0x16a   :  { %6538 = vmatpush.bf16.msra.mxu2 %v10587_v4 }
 0x16b   :  { %6552 = vmatpush.bf16.msra.mxu3 %v10595_v5  ;;  %v10613_v5 = vld [vmem:[#allocation5 + $0xb58] sm:$0xff] }
 0x16c   :  { %6511 = vmatpush.bf16.msra.mxu0 %v10570_v6  ;;  %v6289_v61 = vpop.f32.mrf.mxu0  ;;  %v10621_v6 = vld [vmem:[#allocation5 + $0xb98] sm:$0xff] }
 0x16d   :  { %6525 = vmatpush.bf16.msra.mxu1 %v10578_v7  ;;  %v6290_v27 = vadd.f32 %v6289_v61, %v11132_v46  ;;  %v6303_v0 = vpop.f32.mrf.mxu1  ;;  %v10629_v7 = vld [vmem:[#allocation5 + $0xbd8] sm:$0xff]  ;;  %v6026_v46 = vadd.f32 %v11092_v15, %v6012_v3  ;;  %v10611_v15 = vld [vmem:[#allocation5 + $0xb48] sm:$0xff] }
 0x16e   :  { %6539 = vmatpush.bf16.msra.mxu2 %v10586_v8 }
 0x16f   :  { %6553 = vmatpush.bf16.msra.mxu3 %v10594_v10  ;;  %6512 = vmatmul.bf16.vlgmr.msra.gmra.mxu0 %v7305_v38  ;;  %v6304_v4 = vadd.f32 %v6303_v0, %v6290_v27  ;;  %v10641_v38 = vld [vmem:[#allocation5 + $0xc38] sm:$0xff]  ;;  %v10648_v0 = vld [vmem:[#allocation5 + $0xc70] sm:$0xff] }
 0x170   :  { %6560 = vmatpush.bf16.msrb.mxu0 %v10609_v16  ;;  %6526 = vmatmul.bf16.vlgmr.msra.gmra.mxu1 %v7309_v47  ;;  %v6040_v16 = vadd.f32 %v11094_v24, %v6026_v46  ;;  %v10627_v24 = vld [vmem:[#allocation5 + $0xbc8] sm:$0xff]  ;;  %v7320_v47 = vld [vmem:[#allocation2 + $0xb0] sm:$0xf] }
 0x171   :  { %6574 = vmatpush.bf16.msrb.mxu1 %v10617_v19  ;;  %6540 = vmatmul.bf16.vlgmr.msra.gmra.mxu2 %v7313_v17  ;;  %v10649_v17 = vld [vmem:[#allocation5 + $0xc78] sm:$0xff] }
 0x172   :  { %6588 = vmatpush.bf16.msrb.mxu2 %v10625_v40  ;;  %6554 = vmatmul.bf16.vlgmr.msra.gmra.mxu3 %v7317_v48  ;;  %v6054_v30 = vadd.f32 %v11096_v28, %v6040_v16  ;;  %v10610_v40 = vld [vmem:[#allocation5 + $0xb40] sm:$0xff]  ;;  %v7328_v48 = vld [vmem:[#allocation2 + $0xb8] sm:$0xf] }
 0x173   :  { %6602 = vmatpush.bf16.msrb.mxu3 %v10633_v41  ;;  %v10618_v41 = vld [vmem:[#allocation5 + $0xb80] sm:$0xff] }
 0x174   :  { %6561 = vmatpush.bf16.msrb.mxu0 %v10608_v50  ;;  %v6317_v8 = vpop.f32.mrf.mxu2  ;;  %v6068_v37 = vadd.f32 %v11101_v9, %v6054_v30  ;;  %v10230_v28 = vld [vmem:[#allocation2 + $0x1fc] sm:$0xf0]  ;;  %v10231_v50 = vld [vmem:[#allocation2 + $0x204] sm:$0xf0]  ;;  %v7330_v9 = vld [vmem:[#allocation2 + $0x208] sm:$0xf0]  ;;  %v11157_v61 = vpop.f32.mrf.mxu0 }
 0x175   :  { %6575 = vmatpush.bf16.msrb.mxu1 %v10616_v51  ;;  %v6318_v10 = vadd.f32 %v6317_v8, %v6304_v4  ;;  %v6331_v14 = vpop.f32.mrf.mxu3  ;;  %v10188_v51 = vld [vmem:[#allocation2 + $0xb4] sm:$0xf]  ;;  %v7329_v59 = vor.u32 %v10231_v50, %v7328_v48  ;;  %v10639_v4 = vld [vmem:[#allocation5 + $0xc28] sm:$0xff]  ;;  %v10637_v30 = vld [vmem:[#allocation5 + $0xc18] sm:$0xff] }
 0x176   :  { %6589 = vmatpush.bf16.msrb.mxu2 %v10624_v52  ;;  %v6082_v52 = vadd.f32 %v11103_v13, %v6068_v37  ;;  %v10640_v13 = vld [vmem:[#allocation5 + $0xc30] sm:$0xff]  ;;  %v10634_v50 = vld [vmem:[#allocation5 + $0xc00] sm:$0xff] }
 0x177   :  { %6603 = vmatpush.bf16.msrb.mxu3 %v10632_v22  ;;  %v11151_v19 = vadd.f32 %v6331_v14, %v6318_v10  ;;  %v7322_v22 = vld [vmem:[#allocation2 + $0x200] sm:$0xf0] }
 0x178   :  { %6562 = vmatpush.bf16.msrb.mxu0 %v10607_v54  ;;  %v10657_v54 = vld [vmem:[#allocation5 + $0xcb8] sm:$0xff]  ;;  %v7325_v27 = vor.u32 %v10188_v51, %v7322_v22  ;;  %v10646_v14 = vld [vmem:[#allocation5 + $0xc60] sm:$0xff] }
 0x179   :  { %6576 = vmatpush.bf16.msrb.mxu1 %v10615_v55  ;;  %v10665_v55 = vld [vmem:[#allocation5 + $0xcf8] sm:$0xff]  ;;  %v10642_v51 = vld [vmem:[#allocation5 + $0xc40] sm:$0xff] }
 0x17a   :  { %6590 = vmatpush.bf16.msrb.mxu2 %v10623_v57  ;;  %v6096_v57 = vadd.f32 %v11105_v23, %v6082_v52  ;;  %v10664_v23 = vld [vmem:[#allocation5 + $0xcf0] sm:$0xff]  ;;  %v10650_v52 = vld [vmem:[#allocation5 + $0xc80] sm:$0xff] }
 0x17b   :  { %6604 = vmatpush.bf16.msrb.mxu3 %v10631_v58  ;;  %v7321_v58 = vor.u32 %v10230_v28, %v7320_v47  ;;  %v10635_v47 = vld [vmem:[#allocation5 + $0xc08] sm:$0xff]  ;;  %v10658_v22 = vld [vmem:[#allocation5 + $0xcc0] sm:$0xff] }
 0x17c   :  { %6563 = vmatpush.bf16.msrb.mxu0 %v10606_v62  ;;  %v7333_v62 = vor.u32 %v10189_v53, %v7330_v9  ;;  %v10651_v28 = vld [vmem:[#allocation5 + $0xc88] sm:$0xff]  ;;  %v10673_v53 = vld [vmem:[#allocation5 + $0xd38] sm:$0xff] }
 0x17d   :  { %6577 = vmatpush.bf16.msrb.mxu1 %v10614_v63  ;;  %v11159_v63 = vpop.f32.mrf.mxu1  ;;  %v11165_v8 = vpop.f32.mrf.mxu3  ;;  %v10681_v9 = vld [vmem:[#allocation5 + $0xd78] sm:$0xff] }
 0x17e   :  { %6591 = vmatpush.bf16.msrb.mxu2 %v10622_v1  ;;  %v10656_v1 = vld [vmem:[#allocation5 + $0xcb0] sm:$0xff] }
 0x17f   :  { %6605 = vmatpush.bf16.msrb.mxu3 %v10630_v2  ;;  %v6110_v2 = vadd.f32 %v11107_v29, %v6096_v57  ;;  %v10233_v57 = vld [vmem:[#allocation2 + $0x214] sm:$0xf0] }
 0x180   :  { %6564 = vmatpush.bf16.msrb.mxu0 %v10605_v32  ;;  %v10647_v32 = vld [vmem:[#allocation5 + $0xc68] sm:$0xff] }
 0x181   :  { %6578 = vmatpush.bf16.msrb.mxu1 %v10613_v5  ;;  %v6124_v3 = vadd.f32 %v11112_v11, %v6110_v2  ;;  %v11163_v5 = vpop.f32.mrf.mxu2  ;;  %v10638_v11 = vld [vmem:[#allocation5 + $0xc20] sm:$0xff] }
 0x182   :  { %6592 = vmatpush.bf16.msrb.mxu2 %v10621_v6  ;;  %v10655_v6 = vld [vmem:[#allocation5 + $0xca8] sm:$0xff] }
 0x183   :  { %6606 = vmatpush.bf16.msrb.mxu3 %v10629_v7  ;;  %v10663_v7 = vld [vmem:[#allocation5 + $0xce8] sm:$0xff]  ;;  %v6138_v29 = vadd.f32 %v11114_v18, %v6124_v3  ;;  %v10653_v18 = vld [vmem:[#allocation5 + $0xc98] sm:$0xff] }
 0x184   :  { %6565 = vmatpush.bf16.msrb.mxu0 %v10604_v12  ;;  %v10654_v12 = vld [vmem:[#allocation5 + $0xca0] sm:$0xff] }
 0x185   :  { %6579 = vmatpush.bf16.msrb.mxu1 %v10612_v20  ;;  %v10662_v20 = vld [vmem:[#allocation5 + $0xce0] sm:$0xff] }
 0x186   :  { %6593 = vmatpush.bf16.msrb.mxu2 %v10620_v21  ;;  %v6152_v21 = vadd.f32 %v11116_v31, %v6138_v29  ;;  %v10636_v31 = vld [vmem:[#allocation5 + $0xc10] sm:$0xff] }
 0x187   :  { %6607 = vmatpush.bf16.msrb.mxu3 %v10628_v26 }
 0x188   :  { %6566 = vmatpush.bf16.msrb.mxu0 %v10603_v34  ;;  %v10645_v34 = vld [vmem:[#allocation5 + $0xc58] sm:$0xff] }
 0x189   :  { %6580 = vmatpush.bf16.msrb.mxu1 %v10611_v15  ;;  %v10661_v15 = vld [vmem:[#allocation5 + $0xcd8] sm:$0xff] }
 0x18a   :  { %6594 = vmatpush.bf16.msrb.mxu2 %v10619_v36 }
 0x18b   :  { %6608 = vmatpush.bf16.msrb.mxu3 %v10627_v24 }
 0x18c   :  { %6567 = vmatpush.bf16.msrb.mxu0 %v10602_v39  ;;  %v6345_v46 = vpop.f32.mrf.mxu0 }
 0x18d   :  { %6581 = vmatpush.bf16.msrb.mxu1 %v10610_v40  ;;  %v6346_v10 = vadd.f32 %v6345_v46, %v11151_v19  ;;  %v6359_v16 = vpop.f32.mrf.mxu1  ;;  %v6166_v19 = vadd.f32 %v11118_v35, %v6152_v21  ;;  %v10643_v35 = vld [vmem:[#allocation5 + $0xc48] sm:$0xff]  ;;  %v10688_v46 = vld [vmem:[#allocation5 + $0xdb0] sm:$0xff] }
 0x18e   :  { %6595 = vmatpush.bf16.msrb.mxu2 %v10618_v41  ;;  %v10644_v41 = vld [vmem:[#allocation5 + $0xc50] sm:$0xff] }
 0x18f   :  { %6609 = vmatpush.bf16.msrb.mxu3 %v10626_v43  ;;  %6568 = vmatmul.bf16.vlgmr.msrb.gmra.mxu0 %v7321_v58  ;;  %v6360_v26 = vadd.f32 %v6359_v16, %v6346_v10  ;;  %v6180_v39 = vadd.f32 %v11123_v25, %v6166_v19  ;;  %v10652_v43 = vld [vmem:[#allocation5 + $0xc90] sm:$0xff]  ;;  %v10659_v25 = vld [vmem:[#allocation5 + $0xcc8] sm:$0xff]  ;;  %v10190_v58 = vld [vmem:[#allocation2 + $0xc4] sm:$0xf] }
 0x190   :  { %6616 = vmatpush.bf16.msra.mxu0 %v10641_v38  ;;  %6582 = vmatmul.bf16.vlgmr.msrb.gmra.mxu1 %v7325_v27  ;;  %v10660_v38 = vld [vmem:[#allocation5 + $0xcd0] sm:$0xff] }
 0x191   :  { %6630 = vmatpush.bf16.msra.mxu1 %v10649_v17  ;;  %6596 = vmatmul.bf16.vlgmr.msrb.gmra.mxu2 %v7329_v59  ;;  %v6194_v17 = vadd.f32 %v11125_v33, %v6180_v39  ;;  %v10232_v33 = vld [vmem:[#allocation2 + $0x20c] sm:$0xf0]  ;;  %v7338_v27 = vld [vmem:[#allocation2 + $0x210] sm:$0xf0]  ;;  %v10677_v39 = vld [vmem:[#allocation5 + $0xd58] sm:$0xff] }
 0x192   :  { %6644 = vmatpush.bf16.msra.mxu2 %v10657_v54  ;;  %6610 = vmatmul.bf16.vlgmr.msrb.gmra.mxu3 %v7333_v62  ;;  %v7336_v54 = vld [vmem:[#allocation2 + $0xc0] sm:$0xf]  ;;  %v10191_v62 = vld [vmem:[#allocation2 + $0xcc] sm:$0xf] }
 0x193   :  { %6658 = vmatpush.bf16.msra.mxu3 %v10665_v55  ;;  %v6208_v48 = vadd.f32 %v11127_v42, %v6194_v17  ;;  %v7344_v55 = vld [vmem:[#allocation2 + $0xc8] sm:$0xf]  ;;  %v7346_v42 = vld [vmem:[#allocation2 + $0x218] sm:$0xf0] }
 0x194   :  { %6617 = vmatpush.bf16.msra.mxu0 %v10640_v13  ;;  %v6373_v36 = vpop.f32.mrf.mxu2  ;;  %v10689_v13 = vld [vmem:[#allocation5 + $0xdb8] sm:$0xff]  ;;  %v7345_v2 = vor.u32 %v10233_v57, %v7344_v55  ;;  %v11178_v3 = vpop.f32.mrf.mxu0  ;;  %v7352_v57 = vld [vmem:[#allocation2 + $0xd0] sm:$0xf] }
 0x195   :  { %6631 = vmatpush.bf16.msra.mxu1 %v10648_v0  ;;  %v6374_v24 = vadd.f32 %v6373_v36, %v6360_v26  ;;  %v6387_v37 = vpop.f32.mrf.mxu3  ;;  %v6222_v59 = vadd.f32 %v11129_v45, %v6208_v48  ;;  %v10697_v0 = vld [vmem:[#allocation5 + $0xdf8] sm:$0xff]  ;;  %v10672_v45 = vld [vmem:[#allocation5 + $0xd30] sm:$0xff]  ;;  %v10694_v36 = vld [vmem:[#allocation5 + $0xde0] sm:$0xff] }
 0x196   :  { %6645 = vmatpush.bf16.msra.mxu2 %v10656_v1  ;;  %v10713_v55 = vld [vmem:[#allocation5 + $0xe78] sm:$0xff] }
 0x197   :  { %6659 = vmatpush.bf16.msra.mxu3 %v10664_v23  ;;  %v11172_v40 = vadd.f32 %v6387_v37, %v6374_v24  ;;  %v6236_v1 = vadd.f32 %v11137_v44, %v6222_v59  ;;  %v7337_v23 = vor.u32 %v10232_v33, %v7336_v54  ;;  %v10696_v44 = vld [vmem:[#allocation5 + $0xdf0] sm:$0xff]  ;;  %v10669_v37 = vld [vmem:[#allocation5 + $0xd18] sm:$0xff]  ;;  %v10690_v54 = vld [vmem:[#allocation5 + $0xdc0] sm:$0xff] }
 0x198   :  { %6618 = vmatpush.bf16.msra.mxu0 %v10639_v4  ;;  %v7341_v4 = vor.u32 %v10190_v58, %v7338_v27  ;;  %v10705_v33 = vld [vmem:[#allocation5 + $0xe38] sm:$0xff]  ;;  %v10235_v59 = vld [vmem:[#allocation2 + $0x224] sm:$0xf0]  ;;  %v10192_v27 = vld [vmem:[#allocation2 + $0xd4] sm:$0xf] }
 0x199   :  { %6632 = vmatpush.bf16.msra.mxu1 %v10647_v32  ;;  %v7349_v32 = vor.u32 %v10191_v62, %v7346_v42  ;;  %v6250_v29 = vadd.f32 %v11139_v49, %v6236_v1  ;;  %v7360_v58 = vld [vmem:[#allocation2 + $0xd8] sm:$0xf]  ;;  %v7354_v42 = vld [vmem:[#allocation2 + $0x220] sm:$0xf0] }
 0x19a   :  { %6646 = vmatpush.bf16.msra.mxu2 %v10655_v6  ;;  %v11180_v6 = vpop.f32.mrf.mxu1  ;;  %v10721_v1 = vld [vmem:[#allocation5 + $0xeb8] sm:$0xff] }
 0x19b   :  { %6660 = vmatpush.bf16.msra.mxu3 %v10663_v7  ;;  %v10680_v7 = vld [vmem:[#allocation5 + $0xd70] sm:$0xff]  ;;  %v6264_v10 = vadd.f32 %v11142_v56, %v6250_v29  ;;  %v10670_v56 = vld [vmem:[#allocation5 + $0xd20] sm:$0xff] }
 0x19c   :  { %6619 = vmatpush.bf16.msra.mxu0 %v10638_v11  ;;  %v10671_v11 = vld [vmem:[#allocation5 + $0xd28] sm:$0xff]  ;;  %v11184_v16 = vpop.f32.mrf.mxu2  ;;  %v10720_v29 = vld [vmem:[#allocation5 + $0xeb0] sm:$0xff] }
 0x19d   :  { %6633 = vmatpush.bf16.msra.mxu1 %v10646_v14  ;;  %v10679_v14 = vld [vmem:[#allocation5 + $0xd68] sm:$0xff]  ;;  %v11186_v21 = vpop.f32.mrf.mxu3  ;;  %v6278_v49 = vadd.f32 %v11145_v60, %v6264_v10  ;;  %v10685_v60 = vld [vmem:[#allocation5 + $0xd98] sm:$0xff]  ;;  %v10728_v10 = vld [vmem:[#allocation5 + $0xef0] sm:$0xff] }
 0x19e   :  { %6647 = vmatpush.bf16.msra.mxu2 %v10654_v12  ;;  %v10687_v12 = vld [vmem:[#allocation5 + $0xda8] sm:$0xff] }
 0x19f   :  { %6661 = vmatpush.bf16.msra.mxu3 %v10662_v20  ;;  %v10695_v20 = vld [vmem:[#allocation5 + $0xde8] sm:$0xff]  ;;  %v6292_v19 = vadd.f32 %v11157_v61, %v6278_v49  ;;  %v10668_v61 = vld [vmem:[#allocation5 + $0xd10] sm:$0xff] }
 0x1a0   :  { %6620 = vmatpush.bf16.msra.mxu0 %v10637_v30  ;;  %v10727_v49 = vld [vmem:[#allocation5 + $0xee8] sm:$0xff] }
 0x1a1   :  { %6634 = vmatpush.bf16.msra.mxu1 %v10645_v34  ;;  %v10678_v34 = vld [vmem:[#allocation5 + $0xd60] sm:$0xff] }
 0x1a2   :  { %6648 = vmatpush.bf16.msra.mxu2 %v10653_v18 }
 0x1a3   :  { %6662 = vmatpush.bf16.msra.mxu3 %v10661_v15  ;;  %v10686_v15 = vld [vmem:[#allocation5 + $0xda0] sm:$0xff] }
 0x1a4   :  { %6621 = vmatpush.bf16.msra.mxu0 %v10636_v31  ;;  %v10693_v31 = vld [vmem:[#allocation5 + $0xdd8] sm:$0xff] }
 0x1a5   :  { %6635 = vmatpush.bf16.msra.mxu1 %v10644_v41 }
 0x1a6   :  { %6649 = vmatpush.bf16.msra.mxu2 %v10652_v43 }
 0x1a7   :  { %6663 = vmatpush.bf16.msra.mxu3 %v10660_v38 }
 0x1a8   :  { %6622 = vmatpush.bf16.msra.mxu0 %v10635_v47 }
 0x1a9   :  { %6636 = vmatpush.bf16.msra.mxu1 %v10643_v35  ;;  %v10676_v35 = vld [vmem:[#allocation5 + $0xd50] sm:$0xff] }
 0x1aa   :  { %6650 = vmatpush.bf16.msra.mxu2 %v10651_v28  ;;  %v10684_v28 = vld [vmem:[#allocation5 + $0xd90] sm:$0xff] }
 0x1ab   :  { %6664 = vmatpush.bf16.msra.mxu3 %v10659_v25  ;;  %v10692_v25 = vld [vmem:[#allocation5 + $0xdd0] sm:$0xff] }
 0x1ac   :  { %6623 = vmatpush.bf16.msra.mxu0 %v10634_v50  ;;  %v6401_v26 = vpop.f32.mrf.mxu0  ;;  %v10667_v50 = vld [vmem:[#allocation5 + $0xd08] sm:$0xff] }
 0x1ad   :  { %6637 = vmatpush.bf16.msra.mxu1 %v10642_v51  ;;  %v6402_v30 = vadd.f32 %v6401_v26, %v11172_v40  ;;  %v6415_v18 = vpop.f32.mrf.mxu1  ;;  %v6306_v40 = vadd.f32 %v11159_v63, %v6292_v19  ;;  %v10675_v63 = vld [vmem:[#allocation5 + $0xd48] sm:$0xff]  ;;  %v10718_v19 = vld [vmem:[#allocation5 + $0xea0] sm:$0xff] }
 0x1ae   :  { %6651 = vmatpush.bf16.msra.mxu2 %v10650_v52  ;;  %v10683_v51 = vld [vmem:[#allocation5 + $0xd88] sm:$0xff] }
 0x1af   :  { %6665 = vmatpush.bf16.msra.mxu3 %v10658_v22  ;;  %6624 = vmatmul.bf16.vlgmr.msra.gmra.mxu0 %v7337_v23  ;;  %v6416_v24 = vadd.f32 %v6415_v18, %v6402_v30  ;;  %v6320_v17 = vadd.f32 %v11163_v5, %v6306_v40  ;;  %v10691_v5 = vld [vmem:[#allocation5 + $0xdc8] sm:$0xff]  ;;  %v10666_v22 = vld [vmem:[#allocation5 + $0xd00] sm:$0xff]  ;;  %v10729_v23 = vld [vmem:[#allocation5 + $0xef8] sm:$0xff] }
 0x1b0   :  { %6672 = vmatpush.bf16.msrb.mxu0 %v10673_v53  ;;  %6638 = vmatmul.bf16.vlgmr.msra.gmra.mxu1 %v7341_v4  ;;  %v10674_v53 = vld [vmem:[#allocation5 + $0xd40] sm:$0xff]  ;;  %v7361_v4 = vor.u32 %v10235_v59, %v7360_v58  ;;  %v10719_v26 = vld [vmem:[#allocation5 + $0xea8] sm:$0xff]  ;;  %v10725_v40 = vld [vmem:[#allocation5 + $0xed8] sm:$0xff] }
 0x1b1   :  { %6686 = vmatpush.bf16.msrb.mxu1 %v10681_v9  ;;  %6652 = vmatmul.bf16.vlgmr.msra.gmra.mxu2 %v7345_v2  ;;  %v6334_v48 = vadd.f32 %v11165_v8, %v6320_v17  ;;  %v10682_v9 = vld [vmem:[#allocation5 + $0xd80] sm:$0xff] }
 0x1b2   :  { %6700 = vmatpush.bf16.msrb.mxu2 %v10689_v13  ;;  %6666 = vmatmul.bf16.vlgmr.msra.gmra.mxu3 %v7349_v32  ;;  %v10234_v8 = vld [vmem:[#allocation2 + $0x21c] sm:$0xf0]  ;;  %v10193_v13 = vld [vmem:[#allocation2 + $0xdc] sm:$0xf] }
 0x1b3   :  { %6714 = vmatpush.bf16.msrb.mxu3 %v10697_v0  ;;  %v6348_v52 = vadd.f32 %v11178_v3, %v6334_v48  ;;  %v7362_v0 = vld [vmem:[#allocation2 + $0x228] sm:$0xf0]  ;;  %v7353_v3 = vor.u32 %v10234_v8, %v7352_v57  ;;  %v10702_v18 = vld [vmem:[#allocation5 + $0xe20] sm:$0xff]  ;;  %v10708_v48 = vld [vmem:[#allocation5 + $0xe50] sm:$0xff] }
 0x1b4   :  { %6673 = vmatpush.bf16.msrb.mxu0 %v10672_v45  ;;  %v6429_v41 = vpop.f32.mrf.mxu2  ;;  %v6403_v32 = vpop.f32.mrf.mxu0  ;;  %v7357_v45 = vor.u32 %v10192_v27, %v7354_v42  ;;  %v10698_v57 = vld [vmem:[#allocation5 + $0xe00] sm:$0xff]  ;;  %v10745_v42 = vld [vmem:[#allocation5 + $0xf78] sm:$0xff] }
 0x1b5   :  { %6687 = vmatpush.bf16.msrb.mxu1 %v10680_v7  ;;  %v6430_v43 = vadd.f32 %v6429_v41, %v6416_v24  ;;  %v6443_v38 = vpop.f32.mrf.mxu3  ;;  %v6362_v62 = vadd.f32 %v11180_v6, %v6348_v52  ;;  %v7365_v7 = vor.u32 %v10193_v13, %v7362_v0  ;;  %v10704_v6 = vld [vmem:[#allocation5 + $0xe30] sm:$0xff]  ;;  %v10726_v24 = vld [vmem:[#allocation5 + $0xee0] sm:$0xff]  ;;  %v10717_v41 = vld [vmem:[#allocation5 + $0xe98] sm:$0xff] }
 0x1b6   :  { %6701 = vmatpush.bf16.msrb.mxu2 %v10688_v46  ;;  %v6417_v46 = vpop.f32.mrf.mxu1  ;;  %v10699_v52 = vld [vmem:[#allocation5 + $0xe08] sm:$0xff]  ;;  %v10706_v8 = vld [vmem:[#allocation5 + $0xe40] sm:$0xff]  ;;  %v10236_v0 = vld [vmem:[#allocation2 + $0x22c] sm:$0xf0] }
 0x1b7   :  { %6715 = vmatpush.bf16.msrb.mxu3 %v10696_v44  ;;  %v11193_v47 = vadd.f32 %v6443_v38, %v6430_v43  ;;  %v6376_v2 = vadd.f32 %v11184_v16, %v6362_v62  ;;  %v10712_v44 = vld [vmem:[#allocation5 + $0xe70] sm:$0xff]  ;;  %v10703_v16 = vld [vmem:[#allocation5 + $0xe28] sm:$0xff]  ;;  %v10714_v58 = vld [vmem:[#allocation5 + $0xe80] sm:$0xff] }
 0x1b8   :  { %6674 = vmatpush.bf16.msrb.mxu0 %v10671_v11  ;;  %v10722_v59 = vld [vmem:[#allocation5 + $0xec0] sm:$0xff]  ;;  %v10737_v62 = vld [vmem:[#allocation5 + $0xf38] sm:$0xff] }
 0x1b9   :  { %6688 = vmatpush.bf16.msrb.mxu1 %v10679_v14  ;;  %v6390_v11 = vadd.f32 %v11186_v21, %v6376_v2  ;;  %v7368_v13 = vld [vmem:[#allocation2 + $0xe0] sm:$0xf]  ;;  %v10194_v2 = vld [vmem:[#allocation2 + $0xe4] sm:$0xf] }
 0x1ba   :  { %6702 = vmatpush.bf16.msrb.mxu2 %v10687_v12  ;;  %v10711_v12 = vld [vmem:[#allocation5 + $0xe68] sm:$0xff] }
 0x1bb   :  { %6716 = vmatpush.bf16.msrb.mxu3 %v10695_v20  ;;  %v6404_v14 = vadd.f32 %v6403_v32, %v6390_v11  ;;  %v7378_v32 = vld [vmem:[#allocation2 + $0x238] sm:$0xf0]  ;;  %v10744_v11 = vld [vmem:[#allocation5 + $0xf70] sm:$0xff] }
 0x1bc   :  { %6675 = vmatpush.bf16.msrb.mxu0 %v10670_v56  ;;  %v6431_v20 = vpop.f32.mrf.mxu2 }
 0x1bd   :  { %6689 = vmatpush.bf16.msrb.mxu1 %v10678_v34  ;;  %v6445_v30 = vpop.f32.mrf.mxu3  ;;  %v6418_v34 = vadd.f32 %v6417_v46, %v6404_v14  ;;  %v7369_v46 = vor.u32 %v10236_v0, %v7368_v13  ;;  %v10752_v14 = vld [vmem:[#allocation5 + $0xfb0] sm:$0xff]  ;;  %v7386_v0 = vld [vmem:[#allocation2 + $0x240] sm:$0xf0] }
 0x1be   :  { %6703 = vmatpush.bf16.msrb.mxu2 %v10686_v15  ;;  %v10710_v15 = vld [vmem:[#allocation5 + $0xe60] sm:$0xff]  ;;  %v10196_v13 = vld [vmem:[#allocation2 + $0xf4] sm:$0xf] }
 0x1bf   :  { %6717 = vmatpush.bf16.msrb.mxu3 %v10694_v36 }
 0x1c0   :  { %6676 = vmatpush.bf16.msrb.mxu0 %v10669_v37  ;;  %v6432_v37 = vadd.f32 %v6431_v20, %v6418_v34  ;;  %v10743_v20 = vld [vmem:[#allocation5 + $0xf68] sm:$0xff]  ;;  %v10734_v34 = vld [vmem:[#allocation5 + $0xf20] sm:$0xff] }
 0x1c1   :  { %6690 = vmatpush.bf16.msrb.mxu1 %v10677_v39 }
 0x1c2   :  { %6704 = vmatpush.bf16.msrb.mxu2 %v10685_v60  ;;  %v10701_v60 = vld [vmem:[#allocation5 + $0xe18] sm:$0xff]  ;;  %v6446_v38 = vadd.f32 %v6445_v30, %v6432_v37 }
 0x1c3   :  { %6718 = vmatpush.bf16.msrb.mxu3 %v10693_v31  ;;  %v10709_v31 = vld [vmem:[#allocation5 + $0xe58] sm:$0xff] }
 0x1c4   :  { %6677 = vmatpush.bf16.msrb.mxu0 %v10668_v61  ;;  %v10741_v37 = vld [vmem:[#allocation5 + $0xf58] sm:$0xff] }
 0x1c5   :  { %6691 = vmatpush.bf16.msrb.mxu1 %v10676_v35 }
 0x1c6   :  { %6705 = vmatpush.bf16.msrb.mxu2 %v10684_v28 }
 0x1c7   :  { %6719 = vmatpush.bf16.msrb.mxu3 %v10692_v25  ;;  %v10700_v25 = vld [vmem:[#allocation5 + $0xe10] sm:$0xff] }
 0x1c8   :  { %6678 = vmatpush.bf16.msrb.mxu0 %v10667_v50 }
 0x1c9   :  { %6692 = vmatpush.bf16.msrb.mxu1 %v10675_v63  ;;  %v10716_v63 = vld [vmem:[#allocation5 + $0xe90] sm:$0xff] }
 0x1ca   :  { %6706 = vmatpush.bf16.msrb.mxu2 %v10683_v51  ;;  %v10724_v51 = vld [vmem:[#allocation5 + $0xed0] sm:$0xff] }
 0x1cb   :  { %6720 = vmatpush.bf16.msrb.mxu3 %v10691_v5 }
 0x1cc   :  { %6679 = vmatpush.bf16.msrb.mxu0 %v10666_v22  ;;  %v6457_v56 = vpop.f32.mrf.mxu0  ;;  %v10707_v22 = vld [vmem:[#allocation5 + $0xe48] sm:$0xff] }
 0x1cd   :  { %6693 = vmatpush.bf16.msrb.mxu1 %v10674_v53  ;;  %v6458_v21 = vadd.f32 %v6457_v56, %v11193_v47  ;;  %v6471_v36 = vpop.f32.mrf.mxu1  ;;  %v10715_v53 = vld [vmem:[#allocation5 + $0xe88] sm:$0xff] }
 0x1ce   :  { %6707 = vmatpush.bf16.msrb.mxu2 %v10682_v9  ;;  %v10723_v9 = vld [vmem:[#allocation5 + $0xec8] sm:$0xff] }
 0x1cf   :  { %6721 = vmatpush.bf16.msrb.mxu3 %v10690_v54  ;;  %6680 = vmatmul.bf16.vlgmr.msrb.gmra.mxu0 %v7353_v3  ;;  %v6472_v39 = vadd.f32 %v6471_v36, %v6458_v21  ;;  %v7370_v3 = vld [vmem:[#allocation2 + $0x230] sm:$0xf0]  ;;  %v10742_v21 = vld [vmem:[#allocation5 + $0xf60] sm:$0xff] }
 0x1d0   :  { %6728 = vmatpush.bf16.msra.mxu0 %v10705_v33  ;;  %6694 = vmatmul.bf16.vlgmr.msrb.gmra.mxu1 %v7357_v45  ;;  %v10753_v45 = vld [vmem:[#allocation5 + $0xfb8] sm:$0xff]  ;;  %v10758_v36 = vld [vmem:[#allocation5 + $0xfe0] sm:$0xff] }
 0x1d1   :  { %6742 = vmatpush.bf16.msra.mxu1 %v10713_v55  ;;  %6708 = vmatmul.bf16.vlgmr.msrb.gmra.mxu2 %v7361_v4  ;;  %v10195_v4 = vld [vmem:[#allocation2 + $0xec] sm:$0xf] }
 0x1d2   :  { %6756 = vmatpush.bf16.msra.mxu2 %v10721_v1  ;;  %6722 = vmatmul.bf16.vlgmr.msrb.gmra.mxu3 %v7365_v7  ;;  %v7376_v1 = vld [vmem:[#allocation2 + $0xe8] sm:$0xf]  ;;  %v10761_v7 = vld [vmem:[#allocation5 + $0xff8] sm:$0xff] }
 0x1d3   :  { %6770 = vmatpush.bf16.msra.mxu3 %v10729_v23  ;;  %v10237_v23 = vld [vmem:[#allocation2 + $0x234] sm:$0xf0] }
 0x1d4   :  { %6729 = vmatpush.bf16.msra.mxu0 %v10704_v6  ;;  %v6485_v43 = vpop.f32.mrf.mxu2  ;;  %v6459_v61 = vpop.f32.mrf.mxu0  ;;  %v7377_v6 = vor.u32 %v10237_v23, %v7376_v1  ;;  %v10197_v1 = vld [vmem:[#allocation2 + $0xfc] sm:$0xf]  ;;  %v7394_v23 = vld [vmem:[#allocation2 + $0x248] sm:$0xf0] }
 0x1d5   :  { %6743 = vmatpush.bf16.msra.mxu1 %v10712_v44  ;;  %v6486_v17 = vadd.f32 %v6485_v43, %v6472_v39  ;;  %v6499_v47 = vpop.f32.mrf.mxu3  ;;  %v6460_v35 = vadd.f32 %v6459_v61, %v6446_v38  ;;  %v6473_v50 = vpop.f32.mrf.mxu1  ;;  %v7373_v44 = vor.u32 %v10194_v2, %v7370_v3  ;;  %v10749_v39 = vld [vmem:[#allocation5 + $0xf98] sm:$0xff]  ;;  %v10740_v61 = vld [vmem:[#allocation5 + $0xf50] sm:$0xff] }
 0x1d6   :  { %6757 = vmatpush.bf16.msra.mxu2 %v10720_v29  ;;  %v7381_v29 = vor.u32 %v10195_v4, %v7378_v32  ;;  %v10785_v2 = vld [vmem:[#allocation5 + $0x10b8] sm:$0xff] }
 0x1d7   :  { %6771 = vmatpush.bf16.msra.mxu3 %v10728_v10  ;;  %v11201_v28 = vadd.f32 %v6499_v47, %v6486_v17  ;;  %v6474_v5 = vadd.f32 %v6473_v50, %v6460_v35  ;;  %v10736_v10 = vld [vmem:[#allocation5 + $0xf30] sm:$0xff]  ;;  %v10731_v50 = vld [vmem:[#allocation5 + $0xf08] sm:$0xff]  ;;  %v10793_v3 = vld [vmem:[#allocation5 + $0x10f8] sm:$0xff] }
 0x1d8   :  { %6730 = vmatpush.bf16.msra.mxu0 %v10703_v16  ;;  %v10760_v16 = vld [vmem:[#allocation5 + $0xff0] sm:$0xff] }
 0x1d9   :  { %6744 = vmatpush.bf16.msra.mxu1 %v10711_v12  ;;  %v10735_v12 = vld [vmem:[#allocation5 + $0xf28] sm:$0xff]  ;;  %v10732_v47 = vld [vmem:[#allocation5 + $0xf10] sm:$0xff] }
 0x1da   :  { %6758 = vmatpush.bf16.msra.mxu2 %v10719_v26  ;;  %v10751_v26 = vld [vmem:[#allocation5 + $0xfa8] sm:$0xff] }
 0x1db   :  { %6772 = vmatpush.bf16.msra.mxu3 %v10727_v49  ;;  %v10759_v49 = vld [vmem:[#allocation5 + $0xfe8] sm:$0xff] }
 0x1dc   :  { %6731 = vmatpush.bf16.msra.mxu0 %v10702_v18  ;;  %v6487_v54 = vpop.f32.mrf.mxu2 }
 0x1dd   :  { %6745 = vmatpush.bf16.msra.mxu1 %v10710_v15  ;;  %v6488_v33 = vadd.f32 %v6487_v54, %v6474_v5  ;;  %v6501_v55 = vpop.f32.mrf.mxu3  ;;  %v10750_v15 = vld [vmem:[#allocation5 + $0xfa0] sm:$0xff]  ;;  %v10755_v5 = vld [vmem:[#allocation5 + $0xfc8] sm:$0xff] }
 0x1de   :  { %6759 = vmatpush.bf16.msra.mxu2 %v10718_v19  ;;  %v10738_v54 = vld [vmem:[#allocation5 + $0xf40] sm:$0xff] }
 0x1df   :  { %6773 = vmatpush.bf16.msra.mxu3 %v10726_v24  ;;  %v11203_v27 = vadd.f32 %v6501_v55, %v6488_v33  ;;  %v10733_v24 = vld [vmem:[#allocation5 + $0xf18] sm:$0xff]  ;;  %v10746_v33 = vld [vmem:[#allocation5 + $0xf80] sm:$0xff] }
 0x1e0   :  { %6732 = vmatpush.bf16.msra.mxu0 %v10701_v60  ;;  %v10757_v60 = vld [vmem:[#allocation5 + $0xfd8] sm:$0xff]  ;;  %v10754_v55 = vld [vmem:[#allocation5 + $0xfc0] sm:$0xff] }
 0x1e1   :  { %6746 = vmatpush.bf16.msra.mxu1 %v10709_v31 }
 0x1e2   :  { %6760 = vmatpush.bf16.msra.mxu2 %v10717_v41 }
 0x1e3   :  { %6774 = vmatpush.bf16.msra.mxu3 %v10725_v40 }
 0x1e4   :  { %6733 = vmatpush.bf16.msra.mxu0 %v10700_v25  ;;  %v10756_v25 = vld [vmem:[#allocation5 + $0xfd0] sm:$0xff] }
 0x1e5   :  { %6747 = vmatpush.bf16.msra.mxu1 %v10708_v48 }
 0x1e6   :  { %6761 = vmatpush.bf16.msra.mxu2 %v10716_v63  ;;  %v10739_v63 = vld [vmem:[#allocation5 + $0xf48] sm:$0xff] }
 0x1e7   :  { %6775 = vmatpush.bf16.msra.mxu3 %v10724_v51  ;;  %v10747_v51 = vld [vmem:[#allocation5 + $0xf88] sm:$0xff] }
 0x1e8   :  { %6734 = vmatpush.bf16.msra.mxu0 %v10699_v52 }
 0x1e9   :  { %6748 = vmatpush.bf16.msra.mxu1 %v10707_v22 }
 0x1ea   :  { %6762 = vmatpush.bf16.msra.mxu2 %v10715_v53 }
 0x1eb   :  { %6776 = vmatpush.bf16.msra.mxu3 %v10723_v9  ;;  %v10730_v9 = vld [vmem:[#allocation5 + $0xf00] sm:$0xff] }
 0x1ec   :  { %6735 = vmatpush.bf16.msra.mxu0 %v10698_v57  ;;  %v6513_v30 = vpop.f32.mrf.mxu0 }
 0x1ed   :  { %6749 = vmatpush.bf16.msra.mxu1 %v10706_v8  ;;  %v6514_v56 = vadd.f32 %v6513_v30, %v11201_v28  ;;  %v6527_v18 = vpop.f32.mrf.mxu1  ;;  %v10748_v28 = vld [vmem:[#allocation5 + $0xf90] sm:$0xff]  ;;  %v10769_v8 = vld [vmem:[#allocation5 + $0x1038] sm:$0xff] }
 0x1ee   :  { %6763 = vmatpush.bf16.msra.mxu2 %v10714_v58  ;;  %v10777_v58 = vld [vmem:[#allocation5 + $0x1078] sm:$0xff] }
 0x1ef   :  { %6777 = vmatpush.bf16.msra.mxu3 %v10722_v59  ;;  %6736 = vmatmul.bf16.vlgmr.msra.gmra.mxu0 %v7369_v46  ;;  %v6528_v19 = vadd.f32 %v6527_v18, %v6514_v56  ;;  %v7384_v59 = vld [vmem:[#allocation2 + $0xf0] sm:$0xf]  ;;  %v10782_v56 = vld [vmem:[#allocation5 + $0x10a0] sm:$0xff]  ;;  %v10765_v18 = vld [vmem:[#allocation5 + $0x1018] sm:$0xff] }
 0x1f0   :  { %6784 = vmatpush.bf16.msrb.mxu0 %v10737_v62  ;;  %6750 = vmatmul.bf16.vlgmr.msra.gmra.mxu1 %v7373_v44  ;;  %v7392_v62 = vld [vmem:[#allocation2 + $0xf8] sm:$0xf]  ;;  %v10768_v46 = vld [vmem:[#allocation5 + $0x1030] sm:$0xff] }
 0x1f1   :  { %6798 = vmatpush.bf16.msrb.mxu1 %v10745_v42  ;;  %6764 = vmatmul.bf16.vlgmr.msra.gmra.mxu2 %v7377_v6  ;;  %v10239_v42 = vld [vmem:[#allocation2 + $0x244] sm:$0xf0]  ;;  %v10776_v6 = vld [vmem:[#allocation5 + $0x1070] sm:$0xff] }
 0x1f2   :  { %6812 = vmatpush.bf16.msrb.mxu2 %v10753_v45  ;;  %6778 = vmatmul.bf16.vlgmr.msra.gmra.mxu3 %v7381_v29  ;;  %v7393_v32 = vor.u32 %v10239_v42, %v7392_v62  ;;  %v7389_v45 = vor.u32 %v10196_v13, %v7386_v0  ;;  %v10784_v44 = vld [vmem:[#allocation5 + $0x10b0] sm:$0xff]  ;;  %v10199_v62 = vld [vmem:[#allocation2 + $0x10c] sm:$0xf]  ;;  %v7410_v42 = vld [vmem:[#allocation2 + $0x258] sm:$0xf0] }
 0x1f3   :  { %6826 = vmatpush.bf16.msrb.mxu3 %v10761_v7  ;;  %v7397_v7 = vor.u32 %v10197_v1, %v7394_v23  ;;  %v10792_v29 = vld [vmem:[#allocation5 + $0x10f0] sm:$0xff]  ;;  %v10817_v13 = vld [vmem:[#allocation5 + $0x11b8] sm:$0xff] }
 0x1f4   :  { %6785 = vmatpush.bf16.msrb.mxu0 %v10736_v10  ;;  %v6541_v31 = vpop.f32.mrf.mxu2  ;;  %v6515_v43 = vpop.f32.mrf.mxu0  ;;  %v10767_v10 = vld [vmem:[#allocation5 + $0x1028] sm:$0xff]  ;;  %v10825_v0 = vld [vmem:[#allocation5 + $0x11f8] sm:$0xff] }
 0x1f5   :  { %6799 = vmatpush.bf16.msrb.mxu1 %v10744_v11  ;;  %v6542_v41 = vadd.f32 %v6541_v31, %v6528_v19  ;;  %v6555_v40 = vpop.f32.mrf.mxu3  ;;  %v6516_v38 = vadd.f32 %v6515_v43, %v11203_v27  ;;  %v6529_v35 = vpop.f32.mrf.mxu1  ;;  %v10238_v27 = vld [vmem:[#allocation2 + $0x23c] sm:$0xf0]  ;;  %v10775_v11 = vld [vmem:[#allocation5 + $0x1068] sm:$0xff]  ;;  %v10789_v19 = vld [vmem:[#allocation5 + $0x10d8] sm:$0xff] }
 0x1f6   :  { %6813 = vmatpush.bf16.msrb.mxu2 %v10752_v14  ;;  %v7385_v4 = vor.u32 %v10238_v27, %v7384_v59  ;;  %v10783_v14 = vld [vmem:[#allocation5 + $0x10a8] sm:$0xff]  ;;  %v10772_v43 = vld [vmem:[#allocation5 + $0x1050] sm:$0xff]  ;;  %v10198_v59 = vld [vmem:[#allocation2 + $0x104] sm:$0xf] }
 0x1f7   :  { %6827 = vmatpush.bf16.msrb.mxu3 %v10760_v16  ;;  %v11207_v17 = vadd.f32 %v6555_v40, %v6542_v41  ;;  %v6530_v48 = vadd.f32 %v6529_v35, %v6516_v38  ;;  %v10791_v16 = vld [vmem:[#allocation5 + $0x10e8] sm:$0xff]  ;;  %v10764_v40 = vld [vmem:[#allocation5 + $0x1010] sm:$0xff] }
 0x1f8   :  { %6786 = vmatpush.bf16.msrb.mxu0 %v10735_v12  ;;  %v10763_v35 = vld [vmem:[#allocation5 + $0x1008] sm:$0xff]  ;;  %v7402_v27 = vld [vmem:[#allocation2 + $0x250] sm:$0xf0] }
 0x1f9   :  { %6800 = vmatpush.bf16.msrb.mxu1 %v10743_v20 }
 0x1fa   :  { %6814 = vmatpush.bf16.msrb.mxu2 %v10751_v26  ;;  %v10766_v26 = vld [vmem:[#allocation5 + $0x1020] sm:$0xff] }
 0x1fb   :  { %6828 = vmatpush.bf16.msrb.mxu3 %v10759_v49  ;;  %v10774_v49 = vld [vmem:[#allocation5 + $0x1060] sm:$0xff] }
 0x1fc   :  { %6787 = vmatpush.bf16.msrb.mxu0 %v10734_v34  ;;  %v6543_v52 = vpop.f32.mrf.mxu2  ;;  %v10790_v34 = vld [vmem:[#allocation5 + $0x10e0] sm:$0xff] }
 0x1fd   :  { %6801 = vmatpush.bf16.msrb.mxu1 %v10742_v21  ;;  %v6544_v22 = vadd.f32 %v6543_v52, %v6530_v48  ;;  %v6557_v53 = vpop.f32.mrf.mxu3  ;;  %v10787_v48 = vld [vmem:[#allocation5 + $0x10c8] sm:$0xff]  ;;  %v10770_v52 = vld [vmem:[#allocation5 + $0x1040] sm:$0xff] }
 0x1fe   :  { %6815 = vmatpush.bf16.msrb.mxu2 %v10750_v15  ;;  %v10773_v15 = vld [vmem:[#allocation5 + $0x1058] sm:$0xff] }
 0x1ff   :  { %6829 = vmatpush.bf16.msrb.mxu3 %v10758_v36  ;;  %v11209_v57 = vadd.f32 %v6557_v53, %v6544_v22  ;;  %v10781_v36 = vld [vmem:[#allocation5 + $0x1098] sm:$0xff]  ;;  %v10778_v22 = vld [vmem:[#allocation5 + $0x1080] sm:$0xff] }
 0x200   :  { %6788 = vmatpush.bf16.msrb.mxu0 %v10733_v24  ;;  %v10786_v53 = vld [vmem:[#allocation5 + $0x10c0] sm:$0xff] }
 0x201   :  { %6802 = vmatpush.bf16.msrb.mxu1 %v10741_v37 }
 0x202   :  { %6816 = vmatpush.bf16.msrb.mxu2 %v10749_v39 }
 0x203   :  { %6830 = vmatpush.bf16.msrb.mxu3 %v10757_v60 }
 0x204   :  { %6789 = vmatpush.bf16.msrb.mxu0 %v10732_v47  ;;  %v10788_v47 = vld [vmem:[#allocation5 + $0x10d0] sm:$0xff] }
 0x205   :  { %6803 = vmatpush.bf16.msrb.mxu1 %v10740_v61 }
 0x206   :  { %6817 = vmatpush.bf16.msrb.mxu2 %v10748_v28  ;;  %v10771_v28 = vld [vmem:[#allocation5 + $0x1048] sm:$0xff] }
 0x207   :  { %6831 = vmatpush.bf16.msrb.mxu3 %v10756_v25  ;;  %v10779_v25 = vld [vmem:[#allocation5 + $0x1088] sm:$0xff] }
 0x208   :  { %6790 = vmatpush.bf16.msrb.mxu0 %v10731_v50 }
 0x209   :  { %6804 = vmatpush.bf16.msrb.mxu1 %v10739_v63 }
 0x20a   :  { %6818 = vmatpush.bf16.msrb.mxu2 %v10747_v51 }
 0x20b   :  { %6832 = vmatpush.bf16.msrb.mxu3 %v10755_v5  ;;  %v10762_v5 = vld [vmem:[#allocation5 + $0x1000] sm:$0xff] }
 0x20c   :  { %6791 = vmatpush.bf16.msrb.mxu0 %v10730_v9  ;;  %v6569_v12 = vpop.f32.mrf.mxu0 }
 0x20d   :  { %6805 = vmatpush.bf16.msrb.mxu1 %v10738_v54  ;;  %v6570_v20 = vadd.f32 %v6569_v12, %v11207_v17  ;;  %v6583_v30 = vpop.f32.mrf.mxu1  ;;  %v10780_v17 = vld [vmem:[#allocation5 + $0x1090] sm:$0xff]  ;;  %v10801_v54 = vld [vmem:[#allocation5 + $0x1138] sm:$0xff] }
 0x20e   :  { %6819 = vmatpush.bf16.msrb.mxu2 %v10746_v33  ;;  %v10809_v33 = vld [vmem:[#allocation5 + $0x1178] sm:$0xff] }
 0x20f   :  { %6833 = vmatpush.bf16.msrb.mxu3 %v10754_v55  ;;  %6792 = vmatmul.bf16.vlgmr.msrb.gmra.mxu0 %v7385_v4  ;;  %v6584_v21 = vadd.f32 %v6583_v30, %v6570_v20  ;;  %v7400_v55 = vld [vmem:[#allocation2 + $0x100] sm:$0xf]  ;;  %v10800_v4 = vld [vmem:[#allocation5 + $0x1130] sm:$0xff]  ;;  %v10797_v30 = vld [vmem:[#allocation5 + $0x1118] sm:$0xff] }
 0x210   :  { %6840 = vmatpush.bf16.msra.mxu0 %v10769_v8  ;;  %6806 = vmatmul.bf16.vlgmr.msrb.gmra.mxu1 %v7389_v45  ;;  %v7408_v8 = vld [vmem:[#allocation2 + $0x108] sm:$0xf]  ;;  %v10816_v45 = vld [vmem:[#allocation5 + $0x11b0] sm:$0xff]  ;;  %v10814_v20 = vld [vmem:[#allocation5 + $0x11a0] sm:$0xff] }
 0x211   :  { %6854 = vmatpush.bf16.msra.mxu1 %v10777_v58  ;;  %6820 = vmatmul.bf16.vlgmr.msrb.gmra.mxu2 %v7393_v32  ;;  %v10241_v58 = vld [vmem:[#allocation2 + $0x254] sm:$0xf0]  ;;  %v10808_v32 = vld [vmem:[#allocation5 + $0x1170] sm:$0xff] }
 0x212   :  { %6868 = vmatpush.bf16.msra.mxu2 %v10785_v2  ;;  %6834 = vmatmul.bf16.vlgmr.msrb.gmra.mxu3 %v7397_v7  ;;  %v7409_v23 = vor.u32 %v10241_v58, %v7408_v8  ;;  %v7405_v2 = vor.u32 %v10198_v59, %v7402_v27  ;;  %v10824_v7 = vld [vmem:[#allocation5 + $0x11f0] sm:$0xff]  ;;  %v10201_v8 = vld [vmem:[#allocation2 + $0x11c] sm:$0xf]  ;;  %v7426_v58 = vld [vmem:[#allocation2 + $0x268] sm:$0xf0] }
 0x213   :  { %6882 = vmatpush.bf16.msra.mxu3 %v10793_v3  ;;  %v7413_v3 = vor.u32 %v10199_v62, %v7410_v42  ;;  %v10849_v59 = vld [vmem:[#allocation5 + $0x12b8] sm:$0xff] }
 0x214   :  { %6841 = vmatpush.bf16.msra.mxu0 %v10768_v46  ;;  %v6597_v24 = vpop.f32.mrf.mxu2  ;;  %v6571_v60 = vpop.f32.mrf.mxu0  ;;  %v10799_v46 = vld [vmem:[#allocation5 + $0x1128] sm:$0xff]  ;;  %v10857_v27 = vld [vmem:[#allocation5 + $0x12f8] sm:$0xff] }
 0x215   :  { %6855 = vmatpush.bf16.msra.mxu1 %v10776_v6  ;;  %v6598_v37 = vadd.f32 %v6597_v24, %v6584_v21  ;;  %v6611_v39 = vpop.f32.mrf.mxu3  ;;  %v6572_v31 = vadd.f32 %v6571_v60, %v11209_v57  ;;  %v6585_v38 = vpop.f32.mrf.mxu1  ;;  %v10240_v57 = vld [vmem:[#allocation2 + $0x24c] sm:$0xf0]  ;;  %v10807_v6 = vld [vmem:[#allocation5 + $0x1168] sm:$0xff]  ;;  %v10821_v21 = vld [vmem:[#allocation5 + $0x11d8] sm:$0xff] }
 0x216   :  { %6869 = vmatpush.bf16.msra.mxu2 %v10784_v44  ;;  %v7401_v1 = vor.u32 %v10240_v57, %v7400_v55  ;;  %v10815_v44 = vld [vmem:[#allocation5 + $0x11a8] sm:$0xff]  ;;  %v10804_v60 = vld [vmem:[#allocation5 + $0x1150] sm:$0xff]  ;;  %v7418_v57 = vld [vmem:[#allocation2 + $0x260] sm:$0xf0] }
 0x217   :  { %6883 = vmatpush.bf16.msra.mxu3 %v10792_v29  ;;  %v11213_v41 = vadd.f32 %v6611_v39, %v6598_v37  ;;  %v6586_v61 = vadd.f32 %v6585_v38, %v6572_v31  ;;  %v10823_v29 = vld [vmem:[#allocation5 + $0x11e8] sm:$0xff]  ;;  %v10796_v39 = vld [vmem:[#allocation5 + $0x1110] sm:$0xff] }
 0x218   :  { %6842 = vmatpush.bf16.msra.mxu0 %v10767_v10  ;;  %v10795_v38 = vld [vmem:[#allocation5 + $0x1108] sm:$0xff]  ;;  %v10200_v55 = vld [vmem:[#allocation2 + $0x114] sm:$0xf] }
 0x219   :  { %6856 = vmatpush.bf16.msra.mxu1 %v10775_v11 }
 0x21a   :  { %6870 = vmatpush.bf16.msra.mxu2 %v10783_v14  ;;  %v10798_v14 = vld [vmem:[#allocation5 + $0x1120] sm:$0xff] }
 0x21b   :  { %6884 = vmatpush.bf16.msra.mxu3 %v10791_v16  ;;  %v10806_v16 = vld [vmem:[#allocation5 + $0x1160] sm:$0xff] }
 0x21c   :  { %6843 = vmatpush.bf16.msra.mxu0 %v10766_v26  ;;  %v6599_v50 = vpop.f32.mrf.mxu2  ;;  %v10822_v26 = vld [vmem:[#allocation5 + $0x11e0] sm:$0xff] }
 0x21d   :  { %6857 = vmatpush.bf16.msra.mxu1 %v10774_v49  ;;  %v6600_v63 = vadd.f32 %v6599_v50, %v6586_v61  ;;  %v6613_v51 = vpop.f32.mrf.mxu3  ;;  %v10819_v61 = vld [vmem:[#allocation5 + $0x11c8] sm:$0xff]  ;;  %v10802_v50 = vld [vmem:[#allocation5 + $0x1140] sm:$0xff] }
 0x21e   :  { %6871 = vmatpush.bf16.msra.mxu2 %v10782_v56  ;;  %v10805_v56 = vld [vmem:[#allocation5 + $0x1158] sm:$0xff] }
 0x21f   :  { %6885 = vmatpush.bf16.msra.mxu3 %v10790_v34  ;;  %v11215_v9 = vadd.f32 %v6613_v51, %v6600_v63  ;;  %v10813_v34 = vld [vmem:[#allocation5 + $0x1198] sm:$0xff]  ;;  %v10810_v63 = vld [vmem:[#allocation5 + $0x1180] sm:$0xff] }
 0x220   :  { %6844 = vmatpush.bf16.msra.mxu0 %v10765_v18  ;;  %v10818_v51 = vld [vmem:[#allocation5 + $0x11c0] sm:$0xff] }
 0x221   :  { %6858 = vmatpush.bf16.msra.mxu1 %v10773_v15 }
 0x222   :  { %6872 = vmatpush.bf16.msra.mxu2 %v10781_v36 }
 0x223   :  { %6886 = vmatpush.bf16.msra.mxu3 %v10789_v19 }
 0x224   :  { %6845 = vmatpush.bf16.msra.mxu0 %v10764_v40  ;;  %v10820_v40 = vld [vmem:[#allocation5 + $0x11d0] sm:$0xff] }
 0x225   :  { %6859 = vmatpush.bf16.msra.mxu1 %v10772_v43 }
 0x226   :  { %6873 = vmatpush.bf16.msra.mxu2 %v10780_v17  ;;  %v10803_v17 = vld [vmem:[#allocation5 + $0x1148] sm:$0xff] }
 0x227   :  { %6887 = vmatpush.bf16.msra.mxu3 %v10788_v47  ;;  %v10811_v47 = vld [vmem:[#allocation5 + $0x1188] sm:$0xff] }
 0x228   :  { %6846 = vmatpush.bf16.msra.mxu0 %v10763_v35 }
 0x229   :  { %6860 = vmatpush.bf16.msra.mxu1 %v10771_v28 }
 0x22a   :  { %6874 = vmatpush.bf16.msra.mxu2 %v10779_v25 }
 0x22b   :  { %6888 = vmatpush.bf16.msra.mxu3 %v10787_v48  ;;  %v10794_v48 = vld [vmem:[#allocation5 + $0x1100] sm:$0xff] }
 0x22c   :  { %6847 = vmatpush.bf16.msra.mxu0 %v10762_v5  ;;  %v6625_v10 = vpop.f32.mrf.mxu0 }
 0x22d   :  { %6861 = vmatpush.bf16.msra.mxu1 %v10770_v52  ;;  %v6626_v11 = vadd.f32 %v6625_v10, %v11213_v41  ;;  %v6639_v12 = vpop.f32.mrf.mxu1  ;;  %v10812_v41 = vld [vmem:[#allocation5 + $0x1190] sm:$0xff]  ;;  %v10833_v52 = vld [vmem:[#allocation5 + $0x1238] sm:$0xff] }
 0x22e   :  { %6875 = vmatpush.bf16.msra.mxu2 %v10778_v22  ;;  %v10841_v22 = vld [vmem:[#allocation5 + $0x1278] sm:$0xff] }
 0x22f   :  { %6889 = vmatpush.bf16.msra.mxu3 %v10786_v53  ;;  %6848 = vmatmul.bf16.vlgmr.msra.gmra.mxu0 %v7401_v1  ;;  %v6640_v49 = vadd.f32 %v6639_v12, %v6626_v11  ;;  %v7416_v53 = vld [vmem:[#allocation2 + $0x110] sm:$0xf]  ;;  %v10829_v10 = vld [vmem:[#allocation5 + $0x1218] sm:$0xff] }
 0x230   :  { %6896 = vmatpush.bf16.msrb.mxu0 %v10801_v54  ;;  %6862 = vmatmul.bf16.vlgmr.msra.gmra.mxu1 %v7405_v2  ;;  %v7424_v54 = vld [vmem:[#allocation2 + $0x118] sm:$0xf]  ;;  %v10832_v1 = vld [vmem:[#allocation5 + $0x1230] sm:$0xff] }
 0x231   :  { %6910 = vmatpush.bf16.msrb.mxu1 %v10809_v33  ;;  %6876 = vmatmul.bf16.vlgmr.msra.gmra.mxu2 %v7409_v23  ;;  %v10243_v33 = vld [vmem:[#allocation2 + $0x264] sm:$0xf0]  ;;  %v10840_v23 = vld [vmem:[#allocation5 + $0x1270] sm:$0xff]  ;;  %v10837_v11 = vld [vmem:[#allocation5 + $0x1258] sm:$0xff] }
 0x232   :  { %6924 = vmatpush.bf16.msrb.mxu2 %v10817_v13  ;;  %6890 = vmatmul.bf16.vlgmr.msra.gmra.mxu3 %v7413_v3  ;;  %v7425_v42 = vor.u32 %v10243_v33, %v7424_v54  ;;  %v7421_v13 = vor.u32 %v10200_v55, %v7418_v57  ;;  %v10848_v2 = vld [vmem:[#allocation5 + $0x12b0] sm:$0xff]  ;;  %v10879_v54 = vld [vmem:[#allocation5 + $0x13a8] sm:$0xff]  ;;  %v10862_v55 = vld [vmem:[#allocation5 + $0x1320] sm:$0xff] }
 0x233   :  { %6938 = vmatpush.bf16.msrb.mxu3 %v10825_v0  ;;  %v7429_v0 = vor.u32 %v10201_v8, %v7426_v58  ;;  %v10856_v3 = vld [vmem:[#allocation5 + $0x12f0] sm:$0xff]  ;;  %v10887_v33 = vld [vmem:[#allocation5 + $0x13e8] sm:$0xff]  ;;  %v10870_v57 = vld [vmem:[#allocation5 + $0x1360] sm:$0xff] }
 0x234   :  { %6897 = vmatpush.bf16.msrb.mxu0 %v10800_v4  ;;  %v6653_v18 = vpop.f32.mrf.mxu2  ;;  %v6627_v19 = vpop.f32.mrf.mxu0  ;;  %v10831_v4 = vld [vmem:[#allocation5 + $0x1228] sm:$0xff]  ;;  %v10828_v12 = vld [vmem:[#allocation5 + $0x1210] sm:$0xff]  ;;  %v10878_v8 = vld [vmem:[#allocation5 + $0x13a0] sm:$0xff] }
 0x235   :  { %6911 = vmatpush.bf16.msrb.mxu1 %v10808_v32  ;;  %v6654_v15 = vadd.f32 %v6653_v18, %v6640_v49  ;;  %v6667_v36 = vpop.f32.mrf.mxu3  ;;  %v6628_v24 = vadd.f32 %v6627_v19, %v11215_v9  ;;  %v6641_v31 = vpop.f32.mrf.mxu1  ;;  %v10242_v9 = vld [vmem:[#allocation2 + $0x25c] sm:$0xf0]  ;;  %v10839_v32 = vld [vmem:[#allocation5 + $0x1268] sm:$0xff]  ;;  %v10852_v49 = vld [vmem:[#allocation5 + $0x12d0] sm:$0xff] }
 0x236   :  { %6925 = vmatpush.bf16.msrb.mxu2 %v10816_v45  ;;  %v7417_v62 = vor.u32 %v10242_v9, %v7416_v53  ;;  %v10847_v45 = vld [vmem:[#allocation5 + $0x12a8] sm:$0xff]  ;;  %v10826_v18 = vld [vmem:[#allocation5 + $0x1200] sm:$0xff] }
 0x237   :  { %6939 = vmatpush.bf16.msrb.mxu3 %v10824_v7  ;;  %v11219_v37 = vadd.f32 %v6667_v36, %v6654_v15  ;;  %v6642_v43 = vadd.f32 %v6641_v31, %v6628_v24  ;;  %v10855_v7 = vld [vmem:[#allocation5 + $0x12e8] sm:$0xff]  ;;  %v10834_v15 = vld [vmem:[#allocation5 + $0x1240] sm:$0xff]  ;;  %v10865_v24 = vld [vmem:[#allocation5 + $0x1338] sm:$0xff] }
 0x238   :  { %6898 = vmatpush.bf16.msrb.mxu0 %v10799_v46  ;;  %v10830_v46 = vld [vmem:[#allocation5 + $0x1220] sm:$0xff]  ;;  %v10244_v31 = vld [vmem:[#allocation2 + $0x26c] sm:$0xf0]  ;;  %v10863_v53 = vld [vmem:[#allocation5 + $0x1328] sm:$0xff] }
 0x239   :  { %6912 = vmatpush.bf16.msrb.mxu1 %v10807_v6  ;;  %v10838_v6 = vld [vmem:[#allocation5 + $0x1260] sm:$0xff]  ;;  %v10871_v9 = vld [vmem:[#allocation5 + $0x1368] sm:$0xff] }
 0x23a   :  { %6926 = vmatpush.bf16.msrb.mxu2 %v10815_v44  ;;  %v10846_v44 = vld [vmem:[#allocation5 + $0x12a0] sm:$0xff] }
 0x23b   :  { %6940 = vmatpush.bf16.msrb.mxu3 %v10823_v29  ;;  %v10854_v29 = vld [vmem:[#allocation5 + $0x12e0] sm:$0xff] }
 0x23c   :  { %6899 = vmatpush.bf16.msrb.mxu0 %v10798_v14  ;;  %v6655_v35 = vpop.f32.mrf.mxu2  ;;  %v10845_v14 = vld [vmem:[#allocation5 + $0x1298] sm:$0xff]  ;;  %v10842_v36 = vld [vmem:[#allocation5 + $0x1280] sm:$0xff] }
 0x23d   :  { %6913 = vmatpush.bf16.msrb.mxu1 %v10806_v16  ;;  %v6656_v28 = vadd.f32 %v6655_v35, %v6642_v43  ;;  %v6669_v25 = vpop.f32.mrf.mxu3  ;;  %v10853_v16 = vld [vmem:[#allocation5 + $0x12d8] sm:$0xff]  ;;  %v10850_v19 = vld [vmem:[#allocation5 + $0x12c0] sm:$0xff] }
 0x23e   :  { %6927 = vmatpush.bf16.msrb.mxu2 %v10814_v20  ;;  %v10836_v20 = vld [vmem:[#allocation5 + $0x1250] sm:$0xff]  ;;  %v10202_v43 = vld [vmem:[#allocation2 + $0x124] sm:$0xf]  ;;  %v10889_v35 = vld [vmem:[#allocation5 + $0x13f8] sm:$0xff] }
 0x23f   :  { %6941 = vmatpush.bf16.msrb.mxu3 %v10822_v26  ;;  %v11221_v5 = vadd.f32 %v6669_v25, %v6656_v28  ;;  %v10844_v26 = vld [vmem:[#allocation5 + $0x1290] sm:$0xff]  ;;  %v10886_v58 = vld [vmem:[#allocation5 + $0x13e0] sm:$0xff] }
 0x240   :  { %6900 = vmatpush.bf16.msrb.mxu0 %v10797_v30  ;;  %v10827_v30 = vld [vmem:[#allocation5 + $0x1208] sm:$0xff] }
 0x241   :  { %6914 = vmatpush.bf16.msrb.mxu1 %v10805_v56  ;;  %v10835_v56 = vld [vmem:[#allocation5 + $0x1248] sm:$0xff] }
 0x242   :  { %6928 = vmatpush.bf16.msrb.mxu2 %v10813_v34  ;;  %v10843_v34 = vld [vmem:[#allocation5 + $0x1288] sm:$0xff] }
 0x243   :  { %6942 = vmatpush.bf16.msrb.mxu3 %v10821_v21  ;;  %v10851_v21 = vld [vmem:[#allocation5 + $0x12c8] sm:$0xff] }
 0x244   :  { %6901 = vmatpush.bf16.msrb.mxu0 %v10796_v39  ;;  %v10873_v39 = vld [vmem:[#allocation5 + $0x1378] sm:$0xff] }
 0x245   :  { %6915 = vmatpush.bf16.msrb.mxu1 %v10804_v60  ;;  %v7432_v60 = vld [vmem:[#allocation2 + $0x120] sm:$0xf] }
 0x246   :  { %6929 = vmatpush.bf16.msrb.mxu2 %v10812_v41  ;;  %v7440_v41 = vld [vmem:[#allocation2 + $0x128] sm:$0xf]  ;;  %v7433_v28 = vor.u32 %v10244_v31, %v7432_v60 }
 0x247   :  { %6943 = vmatpush.bf16.msrb.mxu3 %v10820_v40  ;;  %v10245_v40 = vld [vmem:[#allocation2 + $0x274] sm:$0xf0]  ;;  %v10895_v60 = vld [vmem:[#allocation5 + $0x1428] sm:$0xff] }
 0x248   :  { %6902 = vmatpush.bf16.msrb.mxu0 %v10795_v38  ;;  %v7434_v38 = vld [vmem:[#allocation2 + $0x270] sm:$0xf0]  ;;  %v7441_v25 = vor.u32 %v10245_v40, %v7440_v41  ;;  %v10903_v31 = vld [vmem:[#allocation5 + $0x1468] sm:$0xff] }
 0x249   :  { %6916 = vmatpush.bf16.msrb.mxu1 %v10803_v17  ;;  %v10203_v17 = vld [vmem:[#allocation2 + $0x12c] sm:$0xf] }
 0x24a   :  { %6930 = vmatpush.bf16.msrb.mxu2 %v10811_v47  ;;  %v7442_v47 = vld [vmem:[#allocation2 + $0x278] sm:$0xf0]  ;;  %v10911_v41 = vld [vmem:[#allocation5 + $0x14a8] sm:$0xff] }
 0x24b   :  { %6944 = vmatpush.bf16.msrb.mxu3 %v10819_v61  ;;  %v10881_v61 = vld [vmem:[#allocation5 + $0x13b8] sm:$0xff]  ;;  %v10919_v40 = vld [vmem:[#allocation5 + $0x14e8] sm:$0xff] }
 0x24c   :  { %6903 = vmatpush.bf16.msrb.mxu0 %v10794_v48  ;;  %v7437_v48 = vor.u32 %v10202_v43, %v7434_v38  ;;  %v10894_v43 = vld [vmem:[#allocation5 + $0x1420] sm:$0xff] }
 0x24d   :  { %6917 = vmatpush.bf16.msrb.mxu1 %v10802_v50  ;;  %v7445_v50 = vor.u32 %v10203_v17, %v7442_v47  ;;  %v10902_v38 = vld [vmem:[#allocation5 + $0x1460] sm:$0xff] }
 0x24e   :  { %6931 = vmatpush.bf16.msrb.mxu2 %v10810_v63  ;;  %v10864_v63 = vld [vmem:[#allocation5 + $0x1330] sm:$0xff]  ;;  %v10910_v17 = vld [vmem:[#allocation5 + $0x14a0] sm:$0xff] }
 0x24f   :  { %6945 = vmatpush.bf16.msrb.mxu3 %v10818_v51  ;;  %6904 = vmatmul.bf16.vlgmr.msrb.gmra.mxu0 %v7417_v62  ;;  %v10872_v51 = vld [vmem:[#allocation5 + $0x1370] sm:$0xff]  ;;  %v10877_v62 = vld [vmem:[#allocation5 + $0x1398] sm:$0xff]  ;;  %v10918_v47 = vld [vmem:[#allocation5 + $0x14e0] sm:$0xff] }
 0x250   :  { %6952 = vmatpush.bf16.msra.mxu0 %v10833_v52  ;;  %6918 = vmatmul.bf16.vlgmr.msrb.gmra.mxu1 %v7421_v13  ;;  %v10880_v52 = vld [vmem:[#allocation5 + $0x13b0] sm:$0xff] }
 0x251   :  { %6966 = vmatpush.bf16.msra.mxu1 %v10841_v22  ;;  %6932 = vmatmul.bf16.vlgmr.msrb.gmra.mxu2 %v7425_v42  ;;  %v10888_v22 = vld [vmem:[#allocation5 + $0x13f0] sm:$0xff]  ;;  %v10885_v42 = vld [vmem:[#allocation5 + $0x13d8] sm:$0xff] }
 0x252   :  { %6980 = vmatpush.bf16.msra.mxu2 %v10849_v59  ;;  %6946 = vmatmul.bf16.vlgmr.msrb.gmra.mxu3 %v7429_v0  ;;  %v10861_v59 = vld [vmem:[#allocation5 + $0x1318] sm:$0xff]  ;;  %v10860_v13 = vld [vmem:[#allocation5 + $0x1310] sm:$0xff] }
 0x253   :  { %6994 = vmatpush.bf16.msra.mxu3 %v10857_v27  ;;  %v10869_v27 = vld [vmem:[#allocation5 + $0x1358] sm:$0xff]  ;;  %v10868_v0 = vld [vmem:[#allocation5 + $0x1350] sm:$0xff] }
 0x254   :  { %6953 = vmatpush.bf16.msra.mxu0 %v10832_v1  ;;  %v10876_v1 = vld [vmem:[#allocation5 + $0x1390] sm:$0xff] }
 0x255   :  { %6967 = vmatpush.bf16.msra.mxu1 %v10840_v23  ;;  %v10884_v23 = vld [vmem:[#allocation5 + $0x13d0] sm:$0xff] }
 0x256   :  { %6981 = vmatpush.bf16.msra.mxu2 %v10848_v2  ;;  %v10859_v2 = vld [vmem:[#allocation5 + $0x1308] sm:$0xff] }
 0x257   :  { %6995 = vmatpush.bf16.msra.mxu3 %v10856_v3  ;;  %v10867_v3 = vld [vmem:[#allocation5 + $0x1348] sm:$0xff] }
 0x258   :  { %6954 = vmatpush.bf16.msra.mxu0 %v10831_v4  ;;  %v10875_v4 = vld [vmem:[#allocation5 + $0x1388] sm:$0xff] }
 0x259   :  { %6968 = vmatpush.bf16.msra.mxu1 %v10839_v32  ;;  %v10883_v32 = vld [vmem:[#allocation5 + $0x13c8] sm:$0xff] }
 0x25a   :  { %6982 = vmatpush.bf16.msra.mxu2 %v10847_v45  ;;  %v10858_v45 = vld [vmem:[#allocation5 + $0x1300] sm:$0xff] }
 0x25b   :  { %6996 = vmatpush.bf16.msra.mxu3 %v10855_v7  ;;  %v10866_v7 = vld [vmem:[#allocation5 + $0x1340] sm:$0xff] }
 0x25c   :  { %6955 = vmatpush.bf16.msra.mxu0 %v10830_v46  ;;  %v10874_v46 = vld [vmem:[#allocation5 + $0x1380] sm:$0xff] }
 0x25d   :  { %6969 = vmatpush.bf16.msra.mxu1 %v10838_v6  ;;  %v10882_v6 = vld [vmem:[#allocation5 + $0x13c0] sm:$0xff] }
 0x25e   :  { %6983 = vmatpush.bf16.msra.mxu2 %v10846_v44  ;;  %v10897_v44 = vld [vmem:[#allocation5 + $0x1438] sm:$0xff] }
 0x25f   :  { %6997 = vmatpush.bf16.msra.mxu3 %v10854_v29  ;;  %v10905_v29 = vld [vmem:[#allocation5 + $0x1478] sm:$0xff] }
 0x260   :  { %6956 = vmatpush.bf16.msra.mxu0 %v10829_v10  ;;  %v7448_v10 = vld [vmem:[#allocation2 + $0x130] sm:$0xf] }
 0x261   :  { %6970 = vmatpush.bf16.msra.mxu1 %v10837_v11  ;;  %v10246_v11 = vld [vmem:[#allocation2 + $0x27c] sm:$0xf0] }
 0x262   :  { %6984 = vmatpush.bf16.msra.mxu2 %v10845_v14  ;;  %v7456_v14 = vld [vmem:[#allocation2 + $0x138] sm:$0xf] }
 0x263   :  { %6998 = vmatpush.bf16.msra.mxu3 %v10853_v16  ;;  %v10247_v16 = vld [vmem:[#allocation2 + $0x284] sm:$0xf0] }
 0x264   :  { %6957 = vmatpush.bf16.msra.mxu0 %v10828_v12  ;;  %v10204_v12 = vld [vmem:[#allocation2 + $0x134] sm:$0xf] }
 0x265   :  { %6971 = vmatpush.bf16.msra.mxu1 %v10836_v20  ;;  %v7450_v20 = vld [vmem:[#allocation2 + $0x280] sm:$0xf0] }
 0x266   :  { %6985 = vmatpush.bf16.msra.mxu2 %v10844_v26  ;;  %v10205_v26 = vld [vmem:[#allocation2 + $0x13c] sm:$0xf] }
 0x267   :  { %6999 = vmatpush.bf16.msra.mxu3 %v10852_v49  ;;  %v7458_v49 = vld [vmem:[#allocation2 + $0x288] sm:$0xf0] }
 0x268   :  { %6958 = vmatpush.bf16.msra.mxu0 %v10827_v30  ;;  %v10913_v30 = vld [vmem:[#allocation5 + $0x14b8] sm:$0xff] }
 0x269   :  { %6972 = vmatpush.bf16.msra.mxu1 %v10835_v56  ;;  %v10921_v56 = vld [vmem:[#allocation5 + $0x14f8] sm:$0xff] }
 0x26a   :  { %6986 = vmatpush.bf16.msra.mxu2 %v10843_v34  ;;  %v7449_v34 = vor.u32 %v10246_v11, %v7448_v10 }
 0x26b   :  { %7000 = vmatpush.bf16.msra.mxu3 %v10851_v21  ;;  %v7457_v21 = vor.u32 %v10247_v16, %v7456_v14 }
 0x26c   :  { %6959 = vmatpush.bf16.msra.mxu0 %v10826_v18  ;;  %v7453_v18 = vor.u32 %v10204_v12, %v7450_v20 }
 0x26d   :  { %6973 = vmatpush.bf16.msra.mxu1 %v10834_v15  ;;  %v7461_v15 = vor.u32 %v10205_v26, %v7458_v49 }
 0x26e   :  { %6987 = vmatpush.bf16.msra.mxu2 %v10842_v36  ;;  %v10896_v36 = vld [vmem:[#allocation5 + $0x1430] sm:$0xff] }
 0x26f   :  { %7001 = vmatpush.bf16.msra.mxu3 %v10850_v19  ;;  %6960 = vmatmul.bf16.vlgmr.msra.gmra.mxu0 %v7433_v28  ;;  %v10904_v19 = vld [vmem:[#allocation5 + $0x1470] sm:$0xff]  ;;  %v10909_v28 = vld [vmem:[#allocation5 + $0x1498] sm:$0xff] }
 0x270   :  { %7008 = vmatpush.bf16.msrb.mxu0 %v10865_v24  ;;  %6974 = vmatmul.bf16.vlgmr.msra.gmra.mxu1 %v7437_v48  ;;  %v10912_v24 = vld [vmem:[#allocation5 + $0x14b0] sm:$0xff] }
 0x271   :  { %7022 = vmatpush.bf16.msrb.mxu1 %v10873_v39  ;;  %6988 = vmatmul.bf16.vlgmr.msra.gmra.mxu2 %v7441_v25  ;;  %v10920_v39 = vld [vmem:[#allocation5 + $0x14f0] sm:$0xff]  ;;  %v10917_v25 = vld [vmem:[#allocation5 + $0x14d8] sm:$0xff] }
 0x272   :  { %7036 = vmatpush.bf16.msrb.mxu2 %v10881_v61  ;;  %7002 = vmatmul.bf16.vlgmr.msra.gmra.mxu3 %v7445_v50  ;;  %v10893_v61 = vld [vmem:[#allocation5 + $0x1418] sm:$0xff]  ;;  %v10892_v48 = vld [vmem:[#allocation5 + $0x1410] sm:$0xff] }
 0x273   :  { %7050 = vmatpush.bf16.msrb.mxu3 %v10889_v35  ;;  %v10901_v35 = vld [vmem:[#allocation5 + $0x1458] sm:$0xff]  ;;  %v10900_v50 = vld [vmem:[#allocation5 + $0x1450] sm:$0xff] }
 0x274   :  { %7009 = vmatpush.bf16.msrb.mxu0 %v10864_v63  ;;  %v10908_v63 = vld [vmem:[#allocation5 + $0x1490] sm:$0xff] }
 0x275   :  { %7023 = vmatpush.bf16.msrb.mxu1 %v10872_v51  ;;  %v10916_v51 = vld [vmem:[#allocation5 + $0x14d0] sm:$0xff] }
 0x276   :  { %7037 = vmatpush.bf16.msrb.mxu2 %v10880_v52  ;;  %v10891_v52 = vld [vmem:[#allocation5 + $0x1408] sm:$0xff] }
 0x277   :  { %7051 = vmatpush.bf16.msrb.mxu3 %v10888_v22  ;;  %v10899_v22 = vld [vmem:[#allocation5 + $0x1448] sm:$0xff] }
 0x278   :  { %7010 = vmatpush.bf16.msrb.mxu0 %v10863_v53  ;;  %v10907_v53 = vld [vmem:[#allocation5 + $0x1488] sm:$0xff] }
 0x279   :  { %7024 = vmatpush.bf16.msrb.mxu1 %v10871_v9  ;;  %v10915_v9 = vld [vmem:[#allocation5 + $0x14c8] sm:$0xff] }
 0x27a   :  { %7038 = vmatpush.bf16.msrb.mxu2 %v10879_v54  ;;  %v10890_v54 = vld [vmem:[#allocation5 + $0x1400] sm:$0xff] }
 0x27b   :  { %7052 = vmatpush.bf16.msrb.mxu3 %v10887_v33  ;;  %v10898_v33 = vld [vmem:[#allocation5 + $0x1440] sm:$0xff] }
 0x27c   :  { %7011 = vmatpush.bf16.msrb.mxu0 %v10862_v55  ;;  %v10906_v55 = vld [vmem:[#allocation5 + $0x1480] sm:$0xff] }
 0x27d   :  { %7025 = vmatpush.bf16.msrb.mxu1 %v10870_v57  ;;  %v10914_v57 = vld [vmem:[#allocation5 + $0x14c0] sm:$0xff] }
 0x27e   :  { %7039 = vmatpush.bf16.msrb.mxu2 %v10878_v8  ;;  %v7464_v8 = vld [vmem:[#allocation2 + $0x140] sm:$0xf] }
 0x27f   :  { %7053 = vmatpush.bf16.msrb.mxu3 %v10886_v58  ;;  %v10248_v58 = vld [vmem:[#allocation2 + $0x28c] sm:$0xf0] }
 0x280   :  { %7012 = vmatpush.bf16.msrb.mxu0 %v10861_v59  ;;  %v10206_v59 = vld [vmem:[#allocation2 + $0x144] sm:$0xf] }
 0x281   :  { %7026 = vmatpush.bf16.msrb.mxu1 %v10869_v27  ;;  %v7466_v27 = vld [vmem:[#allocation2 + $0x290] sm:$0xf0] }
 0x282   :  { %7040 = vmatpush.bf16.msrb.mxu2 %v10877_v62  ;;  %v7472_v62 = vld [vmem:[#allocation2 + $0x148] sm:$0xf] }
 0x283   :  { %7054 = vmatpush.bf16.msrb.mxu3 %v10885_v42  ;;  %v10249_v42 = vld [vmem:[#allocation2 + $0x294] sm:$0xf0] }
 0x284   :  { %7013 = vmatpush.bf16.msrb.mxu0 %v10860_v13  ;;  %v10207_v13 = vld [vmem:[#allocation2 + $0x14c] sm:$0xf] }
 0x285   :  { %7027 = vmatpush.bf16.msrb.mxu1 %v10868_v0  ;;  %v7474_v0 = vld [vmem:[#allocation2 + $0x298] sm:$0xf0] }
 0x286   :  { %7041 = vmatpush.bf16.msrb.mxu2 %v10876_v1  ;;  %v7465_v1 = vor.u32 %v10248_v58, %v7464_v8 }
 0x287   :  { %7055 = vmatpush.bf16.msrb.mxu3 %v10884_v23  ;;  %v7469_v23 = vor.u32 %v10206_v59, %v7466_v27 }
 0x288   :  { %7014 = vmatpush.bf16.msrb.mxu0 %v10859_v2  ;;  %v7473_v2 = vor.u32 %v10249_v42, %v7472_v62 }
 0x289   :  { %7028 = vmatpush.bf16.msrb.mxu1 %v10867_v3  ;;  %v7477_v3 = vor.u32 %v10207_v13, %v7474_v0 }
 0x28a   :  { %7042 = vmatpush.bf16.msrb.mxu2 %v10875_v4  ;;  %v6681_v4 = vpop.f32.mrf.mxu0 }
 0x28b   :  { %7056 = vmatpush.bf16.msrb.mxu3 %v10883_v32  ;;  %v6695_v32 = vpop.f32.mrf.mxu1 }
 0x28c   :  { %7015 = vmatpush.bf16.msrb.mxu0 %v10858_v45  ;;  %v6709_v45 = vpop.f32.mrf.mxu2 }
 0x28d   :  { %7029 = vmatpush.bf16.msrb.mxu1 %v10866_v7  ;;  %v6723_v7 = vpop.f32.mrf.mxu3 }
 0x28e   :  { %7043 = vmatpush.bf16.msrb.mxu2 %v10874_v46 }
 0x28f   :  { %7057 = vmatpush.bf16.msrb.mxu3 %v10882_v6  ;;  %7016 = vmatmul.bf16.vlgmr.msrb.gmra.mxu0 %v7449_v34 }
 0x290   :  { %7064 = vmatpush.bf16.msra.mxu0 %v10897_v44  ;;  %7030 = vmatmul.bf16.vlgmr.msrb.gmra.mxu1 %v7453_v18  ;;  %v6682_v18 = vadd.f32 %v6681_v4, %v11219_v37 }
 0x291   :  { %7078 = vmatpush.bf16.msra.mxu1 %v10905_v29  ;;  %7044 = vmatmul.bf16.vlgmr.msrb.gmra.mxu2 %v7457_v21 }
 0x292   :  { %7092 = vmatpush.bf16.msra.mxu2 %v10913_v30  ;;  %7058 = vmatmul.bf16.vlgmr.msrb.gmra.mxu3 %v7461_v15  ;;  %v6683_v46 = vpop.f32.mrf.mxu0 }
 0x293   :  { %7106 = vmatpush.bf16.msra.mxu3 %v10921_v56  ;;  %v6697_v6 = vpop.f32.mrf.mxu1 }
 0x294   :  { %7065 = vmatpush.bf16.msra.mxu0 %v10896_v36  ;;  %v6711_v44 = vpop.f32.mrf.mxu2  ;;  %v6696_v36 = vadd.f32 %v6695_v32, %v6682_v18 }
 0x295   :  { %7079 = vmatpush.bf16.msra.mxu1 %v10904_v19  ;;  %v6725_v29 = vpop.f32.mrf.mxu3 }
 0x296   :  { %7093 = vmatpush.bf16.msra.mxu2 %v10912_v24  ;;  %v6710_v24 = vadd.f32 %v6709_v45, %v6696_v36 }
 0x297   :  { %7107 = vmatpush.bf16.msra.mxu3 %v10920_v39  ;;  %v6684_v39 = vadd.f32 %v6683_v46, %v11221_v5 }
 0x298   :  { %7066 = vmatpush.bf16.msra.mxu0 %v10895_v60 }
 0x299   :  { %7080 = vmatpush.bf16.msra.mxu1 %v10903_v31 }
 0x29a   :  { %7094 = vmatpush.bf16.msra.mxu2 %v10911_v41  ;;  %v6737_v10 = vpop.f32.mrf.mxu0  ;;  %v6724_v41 = vadd.f32 %v6723_v7, %v6710_v24 }
 0x29b   :  { %7108 = vmatpush.bf16.msra.mxu3 %v10919_v40  ;;  %v6751_v11 = vpop.f32.mrf.mxu1 }
 0x29c   :  { %7067 = vmatpush.bf16.msra.mxu0 %v10894_v43  ;;  %v6765_v14 = vpop.f32.mrf.mxu2  ;;  %v6698_v43 = vadd.f32 %v6697_v6, %v6684_v39 }
 0x29d   :  { %7081 = vmatpush.bf16.msra.mxu1 %v10902_v38  ;;  %v6779_v16 = vpop.f32.mrf.mxu3  ;;  %v6738_v38 = vadd.f32 %v6737_v10, %v6724_v41 }
 0x29e   :  { %7095 = vmatpush.bf16.msra.mxu2 %v10910_v17 }
 0x29f   :  { %7109 = vmatpush.bf16.msra.mxu3 %v10918_v47  ;;  %v6712_v47 = vadd.f32 %v6711_v44, %v6698_v43 }
 0x2a0   :  { %7068 = vmatpush.bf16.msra.mxu0 %v10893_v61  ;;  %v6752_v61 = vadd.f32 %v6751_v11, %v6738_v38 }
 0x2a1   :  { %7082 = vmatpush.bf16.msra.mxu1 %v10901_v35 }
 0x2a2   :  { %7096 = vmatpush.bf16.msra.mxu2 %v10909_v28  ;;  %v6739_v12 = vpop.f32.mrf.mxu0 }
 0x2a3   :  { %7110 = vmatpush.bf16.msra.mxu3 %v10917_v25  ;;  %v6753_v20 = vpop.f32.mrf.mxu1  ;;  %v6726_v25 = vadd.f32 %v6725_v29, %v6712_v47 }
 0x2a4   :  { %7069 = vmatpush.bf16.msra.mxu0 %v10892_v48  ;;  %v6767_v26 = vpop.f32.mrf.mxu2  ;;  %v6766_v48 = vadd.f32 %v6765_v14, %v6752_v61 }
 0x2a5   :  { %7083 = vmatpush.bf16.msra.mxu1 %v10900_v50  ;;  %v6781_v49 = vpop.f32.mrf.mxu3  ;;  %v6740_v37 = vadd.f32 %v6739_v12, %v6726_v25 }
 0x2a6   :  { %7097 = vmatpush.bf16.msra.mxu2 %v10908_v63  ;;  %v6780_v63 = vadd.f32 %v6779_v16, %v6766_v48 }
 0x2a7   :  { %7111 = vmatpush.bf16.msra.mxu3 %v10916_v51 }
 0x2a8   :  { %7070 = vmatpush.bf16.msra.mxu0 %v10891_v52  ;;  %v6754_v52 = vadd.f32 %v6753_v20, %v6740_v37 }
 0x2a9   :  { %7084 = vmatpush.bf16.msra.mxu1 %v10899_v22 }
 0x2aa   :  { %7098 = vmatpush.bf16.msra.mxu2 %v10907_v53  ;;  %v6793_v30 = vpop.f32.mrf.mxu0  ;;  %v6768_v5 = vadd.f32 %v6767_v26, %v6754_v52 }
 0x2ab   :  { %7112 = vmatpush.bf16.msra.mxu3 %v10915_v9  ;;  %v6807_v56 = vpop.f32.mrf.mxu1  ;;  %v6794_v22 = vadd.f32 %v6793_v30, %v6780_v63 }
 0x2ac   :  { %7071 = vmatpush.bf16.msra.mxu0 %v10890_v54  ;;  %v6821_v34 = vpop.f32.mrf.mxu2 }
 0x2ad   :  { %7085 = vmatpush.bf16.msra.mxu1 %v10898_v33  ;;  %v6835_v21 = vpop.f32.mrf.mxu3  ;;  %v6808_v54 = vadd.f32 %v6807_v56, %v6794_v22 }
 0x2ae   :  { %7099 = vmatpush.bf16.msra.mxu2 %v10906_v55  ;;  %v6782_v55 = vadd.f32 %v6781_v49, %v6768_v5 }
 0x2af   :  { %7113 = vmatpush.bf16.msra.mxu3 %v10914_v57  ;;  %7072 = vmatmul.bf16.vlgmr.msra.gmra.mxu0 %v7465_v1  ;;  %v6822_v57 = vadd.f32 %v6821_v34, %v6808_v54 }
 0x2b0   :  { %7086 = vmatmul.bf16.vlgmr.msra.gmra.mxu1 %v7469_v23 }
 0x2b1   :  { %7100 = vmatmul.bf16.vlgmr.msra.gmra.mxu2 %v7473_v2  ;;  %v6836_v59 = vadd.f32 %v6835_v21, %v6822_v57 }
 0x2b2   :  { %7114 = vmatmul.bf16.vlgmr.msra.gmra.mxu3 %v7477_v3  ;;  %v6795_v15 = vpop.f32.mrf.mxu0 }
 0x2b3   :  { %v6809_v19 = vpop.f32.mrf.mxu1  ;;  %v6796_v58 = vadd.f32 %v6795_v15, %v6782_v55 }
 0x2b4   :  { %v6823_v60 = vpop.f32.mrf.mxu2 }
 0x2b5   :  { %v6837_v31 = vpop.f32.mrf.mxu3  ;;  %v6810_v42 = vadd.f32 %v6809_v19, %v6796_v58 }
 0x2b7   :  { %v6824_v0 = vadd.f32 %v6823_v60, %v6810_v42 }
 0x2b9   :  { %v6838_v3 = vadd.f32 %v6837_v31, %v6824_v0 }
 0x2ba   :  { %v6849_v40 = vpop.f32.mrf.mxu0 }
 0x2bb   :  { %v6863_v17 = vpop.f32.mrf.mxu1  ;;  %v6850_v13 = vadd.f32 %v6849_v40, %v6836_v59 }
 0x2bc   :  { %v6877_v35 = vpop.f32.mrf.mxu2 }
 0x2bd   :  { %v6891_v28 = vpop.f32.mrf.mxu3  ;;  %v6864_v23 = vadd.f32 %v6863_v17, %v6850_v13 }
 0x2bf   :  { %v6878_v4 = vadd.f32 %v6877_v35, %v6864_v23 }
 0x2c1   :  { %v6892_v46 = vadd.f32 %v6891_v28, %v6878_v4 }
 0x2c2   :  { %v6851_v50 = vpop.f32.mrf.mxu0 }
 0x2c3   :  { %v6865_v51 = vpop.f32.mrf.mxu1  ;;  %v6852_v32 = vadd.f32 %v6851_v50, %v6838_v3 }
 0x2c4   :  { %v6879_v53 = vpop.f32.mrf.mxu2 }
 0x2c5   :  { %v6893_v9 = vpop.f32.mrf.mxu3  ;;  %v6866_v44 = vadd.f32 %v6865_v51, %v6852_v32 }
 0x2c7   :  { %v6880_v11 = vadd.f32 %v6879_v53, %v6866_v44 }
 0x2c9   :  { %v6894_v20 = vadd.f32 %v6893_v9, %v6880_v11 }
 0x2cc   :  { %v6905_v33 = vpop.f32.mrf.mxu0 }
 0x2cd   :  { %v6919_v8 = vpop.f32.mrf.mxu1  ;;  %v6906_v29 = vadd.f32 %v6905_v33, %v6892_v46 }
 0x2cf   :  { %v6920_v14 = vadd.f32 %v6919_v8, %v6906_v29 }
 0x2d4   :  { %v6933_v27 = vpop.f32.mrf.mxu2  ;;  %v6907_v1 = vpop.f32.mrf.mxu0 }
 0x2d5   :  { %v6947_v62 = vpop.f32.mrf.mxu3  ;;  %v6921_v2 = vpop.f32.mrf.mxu1  ;;  %v6934_v26 = vadd.f32 %v6933_v27, %v6920_v14  ;;  %v6908_v49 = vadd.f32 %v6907_v1, %v6894_v20 }
 0x2d7   :  { %v6948_v56 = vadd.f32 %v6947_v62, %v6934_v26  ;;  %v6922_v21 = vadd.f32 %v6921_v2, %v6908_v49 }
 0x2dc   :  { %v6935_v45 = vpop.f32.mrf.mxu2 }
 0x2dd   :  { %v6949_v7 = vpop.f32.mrf.mxu3  ;;  %v6936_v15 = vadd.f32 %v6935_v45, %v6922_v21 }
 0x2df   :  { %v6950_v60 = vadd.f32 %v6949_v7, %v6936_v15 }
 0x2ec   :  { %v6961_v6 = vpop.f32.mrf.mxu0 }
 0x2ed   :  { %v6975_v10 = vpop.f32.mrf.mxu1  ;;  %v6962_v18 = vadd.f32 %v6961_v6, %v6948_v56 }
 0x2ef   :  { %v6976_v24 = vadd.f32 %v6975_v10, %v6962_v18 }
 0x2f4   :  { %v6989_v16 = vpop.f32.mrf.mxu2  ;;  %v6963_v30 = vpop.f32.mrf.mxu0 }
 0x2f5   :  { %v7003_v12 = vpop.f32.mrf.mxu3  ;;  %v6977_v34 = vpop.f32.mrf.mxu1  ;;  %v6990_v31 = vadd.f32 %v6989_v16, %v6976_v24  ;;  %v6964_v40 = vadd.f32 %v6963_v30, %v6950_v60 }
 0x2f7   :  { %v7004_v43 = vadd.f32 %v7003_v12, %v6990_v31  ;;  %v6978_v47 = vadd.f32 %v6977_v34, %v6964_v40 }
 0x2fc   :  { %v6991_v36 = vpop.f32.mrf.mxu2 }
 0x2fd   :  { %v7005_v19 = vpop.f32.mrf.mxu3  ;;  %v6992_v35 = vadd.f32 %v6991_v36, %v6978_v47 }
 0x2ff   :  { %v7006_v37 = vadd.f32 %v7005_v19, %v6992_v35 }
 0x30c   :  { %v7017_v39 = vpop.f32.mrf.mxu0 }
 0x30d   :  { %v7031_v41 = vpop.f32.mrf.mxu1  ;;  %v7018_v61 = vadd.f32 %v7017_v39, %v7004_v43 }
 0x30f   :  { %v7032_v25 = vadd.f32 %v7031_v41, %v7018_v61 }
 0x314   :  { %v7045_v38 = vpop.f32.mrf.mxu2  ;;  %v7019_v28 = vpop.f32.mrf.mxu0 }
 0x315   :  { %v7059_v17 = vpop.f32.mrf.mxu3  ;;  %v7033_v48 = vpop.f32.mrf.mxu1  ;;  %v7046_v50 = vadd.f32 %v7045_v38, %v7032_v25  ;;  %v7020_v63 = vadd.f32 %v7019_v28, %v7006_v37 }
 0x317   :  { %v7060_v22 = vadd.f32 %v7059_v17, %v7046_v50  ;;  %v7034_v53 = vadd.f32 %v7033_v48, %v7020_v63 }
 0x31c   :  { %v7047_v51 = vpop.f32.mrf.mxu2 }
 0x31d   :  { %v7061_v52 = vpop.f32.mrf.mxu3  ;;  %v7048_v33 = vadd.f32 %v7047_v51, %v7034_v53 }
 0x31f   :  { %v7062_v58 = vadd.f32 %v7061_v52, %v7048_v33 }
 0x32c   :  { %v7073_v5 = vpop.f32.mrf.mxu0 }
 0x32d   :  { %v7074_v9 = vadd.f32 %v7073_v5, %v7060_v22  ;;  %v7087_v54 = vpop.f32.mrf.mxu1 }
 0x32f   :  { %v7088_v55 = vadd.f32 %v7087_v54, %v7074_v9 }
 0x334   :  { %v7101_v57 = vpop.f32.mrf.mxu2  ;;  %v7075_v27 = vpop.f32.mrf.mxu0 }
 0x335   :  { %v7115_v8 = vpop.f32.mrf.mxu3  ;;  %v7102_v59 = vadd.f32 %v7101_v57, %v7088_v55  ;;  %v7076_v42 = vadd.f32 %v7075_v27, %v7062_v58  ;;  %v7089_v13 = vpop.f32.mrf.mxu1 }
 0x337   :  { %v7116_v62 = vadd.f32 %v7115_v8, %v7102_v59  ;;  %v7090_v0 = vadd.f32 %v7089_v13, %v7076_v42 }
 0x339   :  { %7120 = vst [vmem:[#allocation8] sm:$0xff] %v7116_v62 }
 0x33c   :  { %v7103_v1 = vpop.f32.mrf.mxu2 }
 0x33d   :  { %v7104_v23 = vadd.f32 %v7103_v1, %v7090_v0  ;;  %v7117_v2 = vpop.f32.mrf.mxu3 }
 0x33f   :  { %v7118_v3 = vadd.f32 %v7117_v2, %v7104_v23 }
 0x341   :  { %7121 = vst [vmem:[#allocation8 + $0x8] sm:$0xff] %v7118_v3 }
 0x342   :  { %7134 = dma.vmem_to_hbm [thread:$0]  %s7127_s2, 256, %s7129_s5, [#allocation4], %s11043_s6, %s11043_s6, %s11044_s7  }
 0x343   :  { %11033 = dma.done.wait [#allocation4], 256  }
 0x344   :  { %11034 = vsyncadd [#allocation4], 4294967040 }
 0x345   :  { %7139 = vsyncpa [#allocation3], 1 }
 0x346   :  { %7140 = vsyncpa [#allocation6], 1 }
 0x347   :  { %7141 = vsyncpa [#allocation4], 1 }

</bundles_post_ra>
